<compile_context>
chip_gen: v5e
topology: v5e:2x2
jax: 0.10.0
libtpu: 0.0.40
codegen_flags: <defaults>
</compile_context>

<pallas_src>
import jax
import jax.numpy as jnp
from jax.experimental import pallas as pl
from jax.experimental.pallas import tpu as pltpu

EPS = 1e-9  # matches Dice.epsilon in the PyTorch module


def _round_up(x, m):
    return ((x + m - 1) // m) * m


def _dice(x, alpha):
    """Dice activation; statistics over axis 0 (batch), unbiased var like torch.var."""
    n = x.shape[0]
    mean = jnp.sum(x, axis=0, keepdims=True) * (1.0 / n)
    diff = x - mean
    # torch.var(dim=0) is unbiased (1/(n-1)); guard only avoids a trace-time
    # ZeroDivisionError for the degenerate B==1 case (torch returns NaN there).
    var = jnp.sum(diff * diff, axis=0, keepdims=True) * (1.0 / max(n - 1, 1))
    norm = diff * jax.lax.rsqrt(var + EPS)        # rsqrt -> EUP slot
    p = jax.nn.sigmoid(norm)                      # sigmoid -> EUP slot
    # alpha*x*(1-p) + x*p  ==  x * (p + alpha*(1-p))   (one fewer full-tensor mul)
    return x * (p + alpha * (1.0 - p))


def activation_unit_kernel(q_ref, ub_ref,
                           w1_ref, a1_ref,
                           w2_ref, b2_ref, a2_ref,
                           w3_ref, b3_ref,
                           out_ref):
    ub = ub_ref[...]                      # (B, Tt, E) f32
    q = q_ref[...]                        # (B, 1, E)  f32
    B, Tt, E = ub.shape
    H1 = w1_ref.shape[1]
    H2 = w2_ref.shape[1]
    M = B * Tt
    mm_dt = w1_ref.dtype                  # f32 (default) or bf16 (v6e/v7x option)

    # Feature matrix matching the host-folded fc1 weight:
    #   [q, ub, q-ub, q*ub] @ W1 + b1  ==  [q, ub, q*ub, 1] @ w1_aug
    qb = jnp.broadcast_to(q, (B, Tt, E))
    ones = jnp.ones((B, Tt, 1), jnp.float32)
    feats = jnp.concatenate([qb, ub, ub * qb, ones], axis=-1)     # (B, Tt, 3E+1)

    # ---- fc1 : one MXU call; bias and query term are already folded in ----
    h1 = jnp.dot(feats.reshape(M, 3 * E + 1).astype(mm_dt), w1_ref[...],
                 preferred_element_type=jnp.float32)              # (M, H1) f32
    h1 = _dice(h1.reshape(B, Tt, H1), a1_ref[0, 0])               # stats over batch
    # TODO(synk): nn.Dropout is identity here (inference semantics only).

    # ---- fc2 : Linear(H1 -> H2) ----
    h2 = jnp.dot(h1.reshape(M, H1).astype(w2_ref.dtype), w2_ref[...],
                 preferred_element_type=jnp.float32) + b2_ref[...]
    h2 = _dice(h2.reshape(B, Tt, H2), a2_ref[0, 0])

    # ---- fc3 : Linear(H2 -> 1), emitted lane-dense as a (B, Tt) tile ----
    out = jnp.sum(h2 * w3_ref[...][None, :, :], axis=-1) + b3_ref[0, 0]
    out_ref[...] = out.astype(out_ref.dtype)


def activation_unit(query, user_behavior, params, *, t_tile=None,
                    max_t_tile=2048, matmul_dtype=jnp.float32):
    """query: (B,1,E), user_behavior: (B,T,E), params as in the torch module -> (B,T,1)."""
    w1, b1, a1, w2, b2, a2, w3, b3 = params
    B, T, E = user_behavior.shape
    H1 = w1.shape[1]
    H2 = w2.shape[1]

    # Host-side, one-time fc1 weight folding (feature concat + bias + q term).
    w1_q = w1[0 * E:1 * E] + w1[2 * E:3 * E]     # multiplies q
    w1_u = w1[1 * E:2 * E] - w1[2 * E:3 * E]     # multiplies ub
    w1_p = w1[3 * E:4 * E]                       # multiplies q*ub
    w1_aug = jnp.concatenate(
        [w1_q, w1_u, w1_p, b1.reshape(1, H1)], axis=0).astype(matmul_dtype)  # (3E+1, H1)
    w2_mm = w2.astype(matmul_dtype)
    w3_row = w3.reshape(1, H2).astype(jnp.float32)   # used in a VPU multiply: keep f32
    b2_f = b2.reshape(1, H2).astype(jnp.float32)
    a1s = a1.reshape(1, 1).astype(jnp.float32)
    a2s = a2.reshape(1, 1).astype(jnp.float32)
    b3s = b3.reshape(1, 1).astype(jnp.float32)

    # T tiling: few, large, lane-aligned (multiple-of-128) tiles; keep the grid
    # even so v7x's two TensorCores are both busy and balanced.  Per-tile
    # working set at max_t_tile=2048 is a few MiB for small B (budget against
    # v7x's 64 MiB VMEM; lower max_t_tile for very large batch sizes).
    if t_tile is None:
        n_tiles = max(2, pl.cdiv(T, max_t_tile))
        n_tiles += n_tiles % 2                       # even grid for the 2-TC megacore
        t_tile = _round_up(pl.cdiv(T, n_tiles), 128)
    else:
        t_tile = _round_up(t_tile, 128)
        n_tiles = pl.cdiv(T, t_tile)
    T_pad = t_tile * n_tiles

    ub = user_behavior
    if T_pad != T:
        # Zero-pad along T: Dice statistics reduce over batch only, so padded
        # positions cannot affect real outputs; they are sliced off below.
        ub = jnp.pad(ub, ((0, 0), (0, T_pad - T), (0, 0)))

    def full_spec(shape):
        return pl.BlockSpec(shape, lambda i, _s=len(shape): (0,) * _s)

    def smem_scalar():
        return pl.BlockSpec((1, 1), lambda i: (0, 0),
                            memory_space=pltpu.MemorySpace.SMEM)

    out2d = pl.pallas_call(
        activation_unit_kernel,
        out_shape=jax.ShapeDtypeStruct((B, T_pad), jnp.float32),
        grid=(n_tiles,),
        in_specs=[
            pl.BlockSpec((B, 1, E), lambda i: (0, 0, 0)),        # query (grid-invariant)
            pl.BlockSpec((B, t_tile, E), lambda i: (0, i, 0)),   # user_behavior (T-tiled)
            full_spec((3 * E + 1, H1)),                          # w1_aug (concat+bias folded)
            smem_scalar(),                                       # Dice alpha 1
            full_spec((H1, H2)),                                 # w2
            full_spec((1, H2)),                                  # b2
            smem_scalar(),                                       # Dice alpha 2
            full_spec((1, H2)),                                  # w3 (lane-dense row)
            smem_scalar(),                                       # b3
        ],
        out_specs=pl.BlockSpec((B, t_tile), lambda i: (0, i)),
        compiler_params=pltpu.CompilerParams(
            # T tiles are independent (Dice reduces over batch only) -> shard
            # across TensorCores on v7x; harmless no-op on v5e/v6e.
            dimension_semantics=("parallel",),
            vmem_limit_bytes=32 * 1024 * 1024,
        ),
    )(query, ub, w1_aug, a1s, w2_mm, b2_f, a2s, w3_row, b3s)

    return out2d[:, :T, None]    # (B, T, 1) with T padding dropped


def activation_unit_ref(query, user_behavior, params):
    """Pure-JAX reference mirroring the PyTorch forward exactly."""
    w1, b1, a1, w2, b2, a2, w3, b3 = params
    B, T, E = user_behavior.shape
    queries = jnp.broadcast_to(query, (B, T, E))
    feats = jnp.concatenate(
        [queries, user_behavior, queries - user_behavior,
         queries * user_behavior], axis=-1)

    def dice(x, alpha):
        n = x.shape[0]
        mean = x.mean(axis=0, keepdims=True)
        var = ((x - mean) ** 2).sum(axis=0, keepdims=True) / (n - 1)
        norm = (x - mean) / jnp.sqrt(var + EPS)
        p = jax.nn.sigmoid(norm)
        return alpha * x * (1 - p) + x * p

    h = dice(feats @ w1 + b1, a1[0, 0])
    h = dice(h @ w2 + b2, a2[0, 0])
    return h @ w3 + b3


if __name__ == "__main__":
    key = jax.random.PRNGKey(0)
    B, T, E = 4, 256, 8               # batch, behavior seq len, embedding dim
    fc_dims = [32, 16]
    ks = jax.random.split(key, 8)

    query = jax.random.normal(ks[0], (B, 1, E), jnp.float32)
    user_behavior = jax.random.normal(ks[1], (B, T, E), jnp.float32)

    in_dim = 4 * E
    w1 = jax.random.normal(ks[2], (in_dim, fc_dims[0]), jnp.float32) * 0.1
    b1 = jax.random.normal(ks[3], (1, fc_dims[0]), jnp.float32) * 0.1
    # PyTorch inits Dice alpha to zeros; use non-zero values so the alpha
    # branch of the kernel is actually exercised by the check.
    a1 = jnp.full((1, 1), 0.25, jnp.float32)
    w2 = jax.random.normal(ks[4], (fc_dims[0], fc_dims[1]), jnp.float32) * 0.1
    b2 = jax.random.normal(ks[5], (1, fc_dims[1]), jnp.float32) * 0.1
    a2 = jnp.full((1, 1), -0.1, jnp.float32)
    w3 = jax.random.normal(ks[6], (fc_dims[1], 1), jnp.float32) * 0.1
    b3 = jax.random.normal(ks[7], (1, 1), jnp.float32) * 0.1

    params = (w1, b1, a1, w2, b2, a2, w3, b3)

    out = activation_unit(query, user_behavior, params)
    out = jax.block_until_ready(out)

    ref = activation_unit_ref(query, user_behavior, params)
    assert out.shape == (B, T, 1), out.shape
    max_diff = jnp.max(jnp.abs(out - ref))
    assert jnp.allclose(out, ref, atol=1e-4, rtol=1e-4), f"max abs diff {max_diff}"

    print("KERNEL_OK")
</pallas_src>

<mosaic_0001>
module attributes {stable_mosaic.version = 11 : i64} {
  func.func @activation_unit_kernel(%arg0: i32, %arg1: memref<4x1x8xf32, #tpu.memory_space<vmem>>, %arg2: memref<4x128x8xf32, #tpu.memory_space<vmem>>, %arg3: memref<25x32xf32, #tpu.memory_space<vmem>>, %arg4: memref<1x1xf32, #tpu.memory_space<smem>>, %arg5: memref<32x16xf32, #tpu.memory_space<vmem>>, %arg6: memref<1x16xf32, #tpu.memory_space<vmem>>, %arg7: memref<1x1xf32, #tpu.memory_space<smem>>, %arg8: memref<1x16xf32, #tpu.memory_space<vmem>>, %arg9: memref<1x1xf32, #tpu.memory_space<smem>>, %arg10: memref<4x128xf32, #tpu.memory_space<vmem>>) attributes {dimension_semantics = [#tpu.dimension_semantics<parallel>], iteration_bounds = array<i64: 2>, scalar_prefetch = 0 : i64, scratch_operands = 0 : i64, tpu.core_type = #tpu.core_type<tc>, window_params = [{pipeline_mode = #tpu.pipeline_mode<synchronous>, transform_indices = @transform_0, window_bounds = array<i64: 4, 1, 8>}, {transform_indices = @transform_1, window_bounds = array<i64: 4, 128, 8>}, {pipeline_mode = #tpu.pipeline_mode<synchronous>, transform_indices = @transform_2, window_bounds = array<i64: 25, 32>}, {transform_indices = @transform_3, window_bounds = array<i64: 1, 1>}, {pipeline_mode = #tpu.pipeline_mode<synchronous>, transform_indices = @transform_4, window_bounds = array<i64: 32, 16>}, {pipeline_mode = #tpu.pipeline_mode<synchronous>, transform_indices = @transform_5, window_bounds = array<i64: 1, 16>}, {transform_indices = @transform_6, window_bounds = array<i64: 1, 1>}, {pipeline_mode = #tpu.pipeline_mode<synchronous>, transform_indices = @transform_7, window_bounds = array<i64: 1, 16>}, {transform_indices = @transform_8, window_bounds = array<i64: 1, 1>}, {transform_indices = @transform_9, window_bounds = array<i64: 4, 128>}]} {
    %c0 = arith.constant 0 : index
    %c0_0 = arith.constant 0 : index
    %c0_1 = arith.constant 0 : index
    %0 = vector.load %arg2[%c0, %c0_0, %c0_1] : memref<4x128x8xf32, #tpu.memory_space<vmem>>, vector<4x128x8xf32>
    %c0_2 = arith.constant 0 : index
    %c0_3 = arith.constant 0 : index
    %c0_4 = arith.constant 0 : index
    %1 = vector.load %arg1[%c0_2, %c0_3, %c0_4] : memref<4x1x8xf32, #tpu.memory_space<vmem>>, vector<4x1x8xf32>
    %2 = vector.shape_cast %1 : vector<4x1x8xf32> to vector<4x1x8xf32>
    %3 = vector.broadcast %2 : vector<4x1x8xf32> to vector<4x128x8xf32>
    %cst = arith.constant 1.000000e+00 : f32
    %4 = vector.broadcast %cst : f32 to vector<4x128x1xf32>
    %5 = arith.mulf %0, %3 : vector<4x128x8xf32>
    %6 = tpu.concatenate %3, %0, %5, %4 in 2 : vector<4x128x8xf32>, vector<4x128x8xf32>, vector<4x128x8xf32>, vector<4x128x1xf32> -> vector<4x128x25xf32>
    %7 = vector.shape_cast %6 : vector<4x128x25xf32> to vector<512x25xf32>
    %c0_5 = arith.constant 0 : index
    %c0_6 = arith.constant 0 : index
    %8 = vector.load %arg3[%c0_5, %c0_6] : memref<25x32xf32, #tpu.memory_space<vmem>>, vector<25x32xf32>
    %cst_7 = arith.constant dense<0.000000e+00> : vector<512x32xf32>
    %9 = tpu.matmul %7, %8, %cst_7 {dimension_numbers = #tpu.dot_dimension_numbers<[1], [0], [0], [1], [0, 0, 1, 1], [], []>} : vector<512x25xf32>, vector<25x32xf32>, vector<512x32xf32> -> vector<512x32xf32>
    %10 = vector.shape_cast %9 : vector<512x32xf32> to vector<4x128x32xf32>
    %c0_8 = arith.constant 0 : index
    %c0_9 = arith.constant 0 : index
    %11 = memref.load %arg4[%c0_8, %c0_9] : memref<1x1xf32, #tpu.memory_space<smem>>
    %cst_10 = arith.constant dense<0.000000e+00> : vector<128x32xf32>
    %12 = vector.multi_reduction <add>, %10, %cst_10 [0] : vector<4x128x32xf32> to vector<128x32xf32>
    %13 = vector.shape_cast %12 : vector<128x32xf32> to vector<1x128x32xf32>
    %cst_11 = arith.constant 2.500000e-01 : f32
    %14 = vector.broadcast %cst_11 : f32 to vector<1x128x32xf32>
    %15 = arith.mulf %13, %14 : vector<1x128x32xf32>
    %16 = vector.broadcast %15 : vector<1x128x32xf32> to vector<4x128x32xf32>
    %17 = arith.subf %10, %16 : vector<4x128x32xf32>
    %18 = arith.mulf %17, %17 : vector<4x128x32xf32>
    %cst_12 = arith.constant dense<0.000000e+00> : vector<128x32xf32>
    %19 = vector.multi_reduction <add>, %18, %cst_12 [0] : vector<4x128x32xf32> to vector<128x32xf32>
    %20 = vector.shape_cast %19 : vector<128x32xf32> to vector<1x128x32xf32>
    %cst_13 = arith.constant 0.333333343 : f32
    %21 = vector.broadcast %cst_13 : f32 to vector<1x128x32xf32>
    %22 = arith.mulf %20, %21 : vector<1x128x32xf32>
    %cst_14 = arith.constant 9.99999971E-10 : f32
    %23 = vector.broadcast %cst_14 : f32 to vector<1x128x32xf32>
    %24 = arith.addf %22, %23 : vector<1x128x32xf32>
    %25 = math.rsqrt %24 : vector<1x128x32xf32>
    %26 = vector.broadcast %25 : vector<1x128x32xf32> to vector<4x128x32xf32>
    %27 = arith.mulf %17, %26 : vector<4x128x32xf32>
    %28 = arith.negf %27 : vector<4x128x32xf32>
    %29 = math.exp %28 : vector<4x128x32xf32>
    %cst_15 = arith.constant 1.000000e+00 : f32
    %30 = vector.broadcast %cst_15 : f32 to vector<4x128x32xf32>
    %31 = arith.addf %30, %29 : vector<4x128x32xf32>
    %32 = arith.divf %30, %31 : vector<4x128x32xf32>
    %cst_16 = arith.constant 1.000000e+00 : f32
    %33 = vector.broadcast %cst_16 : f32 to vector<4x128x32xf32>
    %34 = arith.subf %33, %32 : vector<4x128x32xf32>
    %35 = vector.broadcast %11 : f32 to vector<4x128x32xf32>
    %36 = arith.mulf %35, %34 : vector<4x128x32xf32>
    %37 = arith.addf %32, %36 : vector<4x128x32xf32>
    %38 = arith.mulf %10, %37 : vector<4x128x32xf32>
    %39 = vector.shape_cast %38 : vector<4x128x32xf32> to vector<512x32xf32>
    %c0_17 = arith.constant 0 : index
    %c0_18 = arith.constant 0 : index
    %40 = vector.load %arg5[%c0_17, %c0_18] : memref<32x16xf32, #tpu.memory_space<vmem>>, vector<32x16xf32>
    %cst_19 = arith.constant dense<0.000000e+00> : vector<512x16xf32>
    %41 = tpu.matmul %39, %40, %cst_19 {dimension_numbers = #tpu.dot_dimension_numbers<[1], [0], [0], [1], [0, 0, 1, 1], [], []>} : vector<512x32xf32>, vector<32x16xf32>, vector<512x16xf32> -> vector<512x16xf32>
    %c0_20 = arith.constant 0 : index
    %c0_21 = arith.constant 0 : index
    %42 = vector.load %arg6[%c0_20, %c0_21] : memref<1x16xf32, #tpu.memory_space<vmem>>, vector<1x16xf32>
    %43 = vector.broadcast %42 : vector<1x16xf32> to vector<512x16xf32>
    %44 = arith.addf %41, %43 : vector<512x16xf32>
    %45 = vector.shape_cast %44 : vector<512x16xf32> to vector<4x128x16xf32>
    %c0_22 = arith.constant 0 : index
    %c0_23 = arith.constant 0 : index
    %46 = memref.load %arg7[%c0_22, %c0_23] : memref<1x1xf32, #tpu.memory_space<smem>>
    %cst_24 = arith.constant dense<0.000000e+00> : vector<128x16xf32>
    %47 = vector.multi_reduction <add>, %45, %cst_24 [0] : vector<4x128x16xf32> to vector<128x16xf32>
    %48 = vector.shape_cast %47 : vector<128x16xf32> to vector<1x128x16xf32>
    %cst_25 = arith.constant 2.500000e-01 : f32
    %49 = vector.broadcast %cst_25 : f32 to vector<1x128x16xf32>
    %50 = arith.mulf %48, %49 : vector<1x128x16xf32>
    %51 = vector.broadcast %50 : vector<1x128x16xf32> to vector<4x128x16xf32>
    %52 = arith.subf %45, %51 : vector<4x128x16xf32>
    %53 = arith.mulf %52, %52 : vector<4x128x16xf32>
    %cst_26 = arith.constant dense<0.000000e+00> : vector<128x16xf32>
    %54 = vector.multi_reduction <add>, %53, %cst_26 [0] : vector<4x128x16xf32> to vector<128x16xf32>
    %55 = vector.shape_cast %54 : vector<128x16xf32> to vector<1x128x16xf32>
    %cst_27 = arith.constant 0.333333343 : f32
    %56 = vector.broadcast %cst_27 : f32 to vector<1x128x16xf32>
    %57 = arith.mulf %55, %56 : vector<1x128x16xf32>
    %cst_28 = arith.constant 9.99999971E-10 : f32
    %58 = vector.broadcast %cst_28 : f32 to vector<1x128x16xf32>
    %59 = arith.addf %57, %58 : vector<1x128x16xf32>
    %60 = math.rsqrt %59 : vector<1x128x16xf32>
    %61 = vector.broadcast %60 : vector<1x128x16xf32> to vector<4x128x16xf32>
    %62 = arith.mulf %52, %61 : vector<4x128x16xf32>
    %63 = arith.negf %62 : vector<4x128x16xf32>
    %64 = math.exp %63 : vector<4x128x16xf32>
    %cst_29 = arith.constant 1.000000e+00 : f32
    %65 = vector.broadcast %cst_29 : f32 to vector<4x128x16xf32>
    %66 = arith.addf %65, %64 : vector<4x128x16xf32>
    %67 = arith.divf %65, %66 : vector<4x128x16xf32>
    %cst_30 = arith.constant 1.000000e+00 : f32
    %68 = vector.broadcast %cst_30 : f32 to vector<4x128x16xf32>
    %69 = arith.subf %68, %67 : vector<4x128x16xf32>
    %70 = vector.broadcast %46 : f32 to vector<4x128x16xf32>
    %71 = arith.mulf %70, %69 : vector<4x128x16xf32>
    %72 = arith.addf %67, %71 : vector<4x128x16xf32>
    %73 = arith.mulf %45, %72 : vector<4x128x16xf32>
    %c0_31 = arith.constant 0 : index
    %c0_32 = arith.constant 0 : index
    %74 = vector.load %arg8[%c0_31, %c0_32] : memref<1x16xf32, #tpu.memory_space<vmem>>, vector<1x16xf32>
    %75 = vector.shape_cast %74 : vector<1x16xf32> to vector<1x1x16xf32>
    %76 = vector.broadcast %75 : vector<1x1x16xf32> to vector<4x128x16xf32>
    %77 = arith.mulf %73, %76 : vector<4x128x16xf32>
    %cst_33 = arith.constant dense<0.000000e+00> : vector<4x128xf32>
    %78 = vector.multi_reduction <add>, %77, %cst_33 [2] : vector<4x128x16xf32> to vector<4x128xf32>
    %c0_34 = arith.constant 0 : index
    %c0_35 = arith.constant 0 : index
    %79 = memref.load %arg9[%c0_34, %c0_35] : memref<1x1xf32, #tpu.memory_space<smem>>
    %80 = vector.broadcast %79 : f32 to vector<4x128xf32>
    %81 = arith.addf %78, %80 : vector<4x128xf32>
    %c0_36 = arith.constant 0 : index
    %c0_37 = arith.constant 0 : index
    %82 = vector.load %arg10[%c0_36, %c0_37] : memref<4x128xf32, #tpu.memory_space<vmem>>, vector<4x128xf32>
    tpu.vector_store %arg10[%c0_36, %c0_37], %81 {strides = array<i32>} : memref<4x128xf32, #tpu.memory_space<vmem>>, vector<4x128xf32>,
    return
  }
  func.func @transform_0(%arg0: i32) -> (i32, i32, i32) {
    %c0_i32 = arith.constant 0 : i32
    %c0_i32_0 = arith.constant 0 : i32
    %c0_i32_1 = arith.constant 0 : i32
    %c0_i32_2 = arith.constant 0 : i32
    return %c0_i32, %c0_i32_0, %c0_i32_1 : i32, i32, i32
  }
  func.func @transform_1(%arg0: i32) -> (i32, i32, i32) {
    %c0_i32 = arith.constant 0 : i32
    %c0_i32_0 = arith.constant 0 : i32
    %c0_i32_1 = arith.constant 0 : i32
    return %c0_i32, %arg0, %c0_i32_0 : i32, i32, i32
  }
  func.func @transform_2(%arg0: i32) -> (i32, i32) {
    %c0_i32 = arith.constant 0 : i32
    %c0_i32_0 = arith.constant 0 : i32
    %c0_i32_1 = arith.constant 0 : i32
    return %c0_i32, %c0_i32_0 : i32, i32
  }
  func.func @transform_3(%arg0: i32) -> (i32, i32) {
    %c0_i32 = arith.constant 0 : i32
    %c0_i32_0 = arith.constant 0 : i32
    %c0_i32_1 = arith.constant 0 : i32
    return %c0_i32, %c0_i32_0 : i32, i32
  }
  func.func @transform_4(%arg0: i32) -> (i32, i32) {
    %c0_i32 = arith.constant 0 : i32
    %c0_i32_0 = arith.constant 0 : i32
    %c0_i32_1 = arith.constant 0 : i32
    return %c0_i32, %c0_i32_0 : i32, i32
  }
  func.func @transform_5(%arg0: i32) -> (i32, i32) {
    %c0_i32 = arith.constant 0 : i32
    %c0_i32_0 = arith.constant 0 : i32
    %c0_i32_1 = arith.constant 0 : i32
    return %c0_i32, %c0_i32_0 : i32, i32
  }
  func.func @transform_6(%arg0: i32) -> (i32, i32) {
    %c0_i32 = arith.constant 0 : i32
    %c0_i32_0 = arith.constant 0 : i32
    %c0_i32_1 = arith.constant 0 : i32
    return %c0_i32, %c0_i32_0 : i32, i32
  }
  func.func @transform_7(%arg0: i32) -> (i32, i32) {
    %c0_i32 = arith.constant 0 : i32
    %c0_i32_0 = arith.constant 0 : i32
    %c0_i32_1 = arith.constant 0 : i32
    return %c0_i32, %c0_i32_0 : i32, i32
  }
  func.func @transform_8(%arg0: i32) -> (i32, i32) {
    %c0_i32 = arith.constant 0 : i32
    %c0_i32_0 = arith.constant 0 : i32
    %c0_i32_1 = arith.constant 0 : i32
    return %c0_i32, %c0_i32_0 : i32, i32
  }
  func.func @transform_9(%arg0: i32) -> (i32, i32) {
    %c0_i32 = arith.constant 0 : i32
    %c0_i32_0 = arith.constant 0 : i32
    return %c0_i32, %arg0 : i32, i32
  }
}

</mosaic_0001>

<bundles_post_ra>
// kernel: tpu_custom_call.1
= control target key start
LH: loop header
LB: loop body
LE: loop exit
PB: predicated region body
PF: predicated region fallthrough
CT: control target
= control target key end

     0   :  { %s14738_s0 = inlined_call_operand.vmem [shape: f32[4,1,8], index: 0, kind: input, shape index: {}]   ;;  %s14739_s1 = inlined_call_operand.vmem [shape: f32[4,256,8], index: 1, kind: input, shape index: {}]   ;;  %s14740_s2 = inlined_call_operand.vmem [shape: f32[25,32], index: 2, kind: input, shape index: {}]   ;;  %s14741_s3 = inlined_call_operand.<no memory space> [shape: f32[1,1], index: 3, kind: input, shape index: {}]   ;;  %s14742_s4 = inlined_call_operand.vmem [shape: f32[32,16], index: 4, kind: input, shape index: {}]   ;;  %s14743_s5 = inlined_call_operand.vmem [shape: f32[1,16], index: 5, kind: input, shape index: {}]   ;;  %s14744_s6 = inlined_call_operand.<no memory space> [shape: f32[1,1], index: 6, kind: input, shape index: {}]   ;;  %s14745_s7 = inlined_call_operand.vmem [shape: f32[1,16], index: 7, kind: input, shape index: {}]   ;;  %s14746_s8 = inlined_call_operand.<no memory space> [shape: f32[1,1], index: 8, kind: input, shape index: {}]   ;;  %s14747_s9 = inlined_call_operand.hbm [shape: f32[4,256], index: 9, kind: output, shape index: {}]  }
   0x1   :  { %14 = sst [smem:[#allocation2]] %s14741_s3 }
   0x2   :  { %15 = sst [smem:[#allocation3]] %s14744_s6 }
   0x3   :  { %16 = sst [smem:[#allocation4]] %s14746_s8 }
   0x4   :  { %17 = vsyncpa [#allocation7], 0 }
   0x5   :  { %19 = vsyncpa [#allocation7 + $0x1], 0  ;;  %s8159_s15 = smov 0   ;;  %s8161_s16 = smov 0  }
   0x6   :  { %s8163_s17 = smov 0   ;;  %s8165_s18 = smov 0  }
   0x7 LB: > { %s7124_s3 = sadd.s32 4294967295, %s8096_s18   ;;  %s7125_s6 = sadd.s32 4294967294, %s8096_s18   ;;  %s8096_s18 = sphi %s8165_s18, %s15683_s18   ;;  %s8092_s17 = sphi %s8163_s17, %s15682_s17   ;;  %s8088_s16 = sphi %s8161_s16, %s15681_s16   ;;  %s8084_s15 = sphi %s8159_s15, %s15680_s15  }
   0x8   : > { %s8182_s8 = sadd.s32 1, %s8096_s18   ;;  %s53_s19 = sadd.s32 1, %s8092_s17 }
   0x9   : > { %s50_s20 = ssub.s32 %s8096_s18, %s8182_s8  ;;  %p60_p0 = scmp.ne.s32.totalorder %s8092_s17, %s8088_s16 }
   0xa   : > { %p51_p1 = scmp.eq.s32.totalorder %s50_s20, 0  ;;  %p61_p2 = scmp.eq.s32.totalorder %s8096_s18, 0 }
   0xb   : > { %p237_p3 = scmp.eq.s32.totalorder %s7124_s3, 1  ;;  %p242_p4 = scmp.ne.s32.totalorder %s8088_s16, %s8084_s15 }
   0xc   : > { %s8195_s21 = scalar_select %p51_p1, %s8092_s17, %s53_s19  }
   0xd   : > { %p62_p5 = por %p61_p2, %p60_p0  ;;  %p8197_p6 = por %p237_p3, %p60_p0 }
   0xe   : > { %p243_p7 = scmp.eq.s32.totalorder %s7125_s6, 1  ;;  %p7127_p9 = scmp.ge.s32.totalorder %s8096_s18, 2 }
  0x10   : > { %p8201_p8 = por %p243_p7, %p242_p4  ;;  %283 = sbr.rel (%p7127_p9) target bundleno = 89 (0x59), region = 48 }
  0x15   : > { %286 = sbr.rel (!%p62_p5) target bundleno = 89 (0x59), region = 52  ;;  %s288_s24 = sand.u32 (%p62_p5), 1, %s8092_s17  }
  0x16   : > { %s7395_s25 = sshll.u32 (%p62_p5), %s8096_s18, 7  ;;  %s7128_s26 = sshll.u32 (%p62_p5), %s288_s24, 9 }
  0x17   : > { %s8213_s29 = scalar_lea.vmem (%p62_p5), %s14739_s1, %s7395_s25  ;;  %s8218_s30 = scalar_lea.vmem (%p62_p5), [#allocation5], %s7128_s26 }
  0x18   : > { %v448_v0 = vld [vmem:[%s8213_s29] sm:$0xff] (%p62_p5)  ;;  %v450_v1 = vld [vmem:[%s8213_s29 + $0x8] sm:$0xff] (%p62_p5)  ;;  %v452_v2 = vld [vmem:[%s8213_s29 + $0x10] sm:$0xff] (%p62_p5) }
  0x19   : > { %449 = vst [vmem:[%s8218_s30] sm:$0xff] (%p62_p5), %v448_v0  ;;  %v454_v3 = vld [vmem:[%s8213_s29 + $0x18] sm:$0xff] (%p62_p5)  ;;  %v456_v4 = vld [vmem:[%s8213_s29 + $0x20] sm:$0xff] (%p62_p5)  ;;  %v458_v5 = vld [vmem:[%s8213_s29 + $0x28] sm:$0xff] (%p62_p5) }
  0x1a   : > { %451 = vst [vmem:[%s8218_s30 + $0x8] sm:$0xff] %v450_v1  ;;  %v460_v6 = vld [vmem:[%s8213_s29 + $0x30] sm:$0xff]  ;;  %v462_v7 = vld [vmem:[%s8213_s29 + $0x38] sm:$0xff]  ;;  %v464_v8 = vld [vmem:[%s8213_s29 + $0x40] sm:$0xff] }
  0x1b   : > { %453 = vst [vmem:[%s8218_s30 + $0x10] sm:$0xff] %v452_v2  ;;  %v466_v9 = vld [vmem:[%s8213_s29 + $0x48] sm:$0xff]  ;;  %v468_v10 = vld [vmem:[%s8213_s29 + $0x50] sm:$0xff]  ;;  %v470_v11 = vld [vmem:[%s8213_s29 + $0x58] sm:$0xff] }
  0x1c   : > { %455 = vst [vmem:[%s8218_s30 + $0x18] sm:$0xff] %v454_v3  ;;  %v472_v12 = vld [vmem:[%s8213_s29 + $0x60] sm:$0xff]  ;;  %v474_v13 = vld [vmem:[%s8213_s29 + $0x68] sm:$0xff]  ;;  %v476_v14 = vld [vmem:[%s8213_s29 + $0x70] sm:$0xff] }
  0x1d   : > { %457 = vst [vmem:[%s8218_s30 + $0x20] sm:$0xff] %v456_v4  ;;  %v478_v15 = vld [vmem:[%s8213_s29 + $0x78] sm:$0xff]  ;;  %v480_v16 = vld [vmem:[%s8213_s29 + $0x100] sm:$0xff]  ;;  %v482_v17 = vld [vmem:[%s8213_s29 + $0x108] sm:$0xff] }
  0x1e   : > { %459 = vst [vmem:[%s8218_s30 + $0x28] sm:$0xff] %v458_v5  ;;  %v484_v18 = vld [vmem:[%s8213_s29 + $0x110] sm:$0xff]  ;;  %v486_v19 = vld [vmem:[%s8213_s29 + $0x118] sm:$0xff]  ;;  %v488_v20 = vld [vmem:[%s8213_s29 + $0x120] sm:$0xff] }
  0x1f   : > { %461 = vst [vmem:[%s8218_s30 + $0x30] sm:$0xff] %v460_v6  ;;  %v490_v21 = vld [vmem:[%s8213_s29 + $0x128] sm:$0xff]  ;;  %v492_v22 = vld [vmem:[%s8213_s29 + $0x130] sm:$0xff]  ;;  %v494_v23 = vld [vmem:[%s8213_s29 + $0x138] sm:$0xff] }
  0x20   : > { %463 = vst [vmem:[%s8218_s30 + $0x38] sm:$0xff] %v462_v7  ;;  %v496_v24 = vld [vmem:[%s8213_s29 + $0x140] sm:$0xff]  ;;  %v498_v25 = vld [vmem:[%s8213_s29 + $0x148] sm:$0xff]  ;;  %v500_v26 = vld [vmem:[%s8213_s29 + $0x150] sm:$0xff] }
  0x21   : > { %465 = vst [vmem:[%s8218_s30 + $0x40] sm:$0xff] %v464_v8  ;;  %v502_v27 = vld [vmem:[%s8213_s29 + $0x158] sm:$0xff]  ;;  %v504_v28 = vld [vmem:[%s8213_s29 + $0x160] sm:$0xff]  ;;  %v506_v29 = vld [vmem:[%s8213_s29 + $0x168] sm:$0xff] }
  0x22   : > { %467 = vst [vmem:[%s8218_s30 + $0x48] sm:$0xff] %v466_v9  ;;  %v508_v30 = vld [vmem:[%s8213_s29 + $0x170] sm:$0xff]  ;;  %v510_v31 = vld [vmem:[%s8213_s29 + $0x178] sm:$0xff]  ;;  %v512_v32 = vld [vmem:[%s8213_s29 + $0x200] sm:$0xff] }
  0x23   : > { %469 = vst [vmem:[%s8218_s30 + $0x50] sm:$0xff] %v468_v10  ;;  %v514_v33 = vld [vmem:[%s8213_s29 + $0x208] sm:$0xff]  ;;  %v516_v34 = vld [vmem:[%s8213_s29 + $0x210] sm:$0xff]  ;;  %v518_v35 = vld [vmem:[%s8213_s29 + $0x218] sm:$0xff] }
  0x24   : > { %471 = vst [vmem:[%s8218_s30 + $0x58] sm:$0xff] %v470_v11  ;;  %v520_v36 = vld [vmem:[%s8213_s29 + $0x220] sm:$0xff]  ;;  %v522_v37 = vld [vmem:[%s8213_s29 + $0x228] sm:$0xff]  ;;  %v524_v38 = vld [vmem:[%s8213_s29 + $0x230] sm:$0xff] }
  0x25   : > { %473 = vst [vmem:[%s8218_s30 + $0x60] sm:$0xff] %v472_v12  ;;  %v526_v39 = vld [vmem:[%s8213_s29 + $0x238] sm:$0xff]  ;;  %v528_v40 = vld [vmem:[%s8213_s29 + $0x240] sm:$0xff]  ;;  %v530_v41 = vld [vmem:[%s8213_s29 + $0x248] sm:$0xff] }
  0x26   : > { %475 = vst [vmem:[%s8218_s30 + $0x68] sm:$0xff] %v474_v13  ;;  %v532_v42 = vld [vmem:[%s8213_s29 + $0x250] sm:$0xff]  ;;  %v534_v43 = vld [vmem:[%s8213_s29 + $0x258] sm:$0xff]  ;;  %v536_v44 = vld [vmem:[%s8213_s29 + $0x260] sm:$0xff] }
  0x27   : > { %477 = vst [vmem:[%s8218_s30 + $0x70] sm:$0xff] %v476_v14  ;;  %v538_v45 = vld [vmem:[%s8213_s29 + $0x268] sm:$0xff]  ;;  %v540_v46 = vld [vmem:[%s8213_s29 + $0x270] sm:$0xff]  ;;  %v542_v47 = vld [vmem:[%s8213_s29 + $0x278] sm:$0xff] }
  0x28   : > { %479 = vst [vmem:[%s8218_s30 + $0x78] sm:$0xff] %v478_v15  ;;  %v544_v48 = vld [vmem:[%s8213_s29 + $0x300] sm:$0xff]  ;;  %v546_v49 = vld [vmem:[%s8213_s29 + $0x308] sm:$0xff]  ;;  %v548_v50 = vld [vmem:[%s8213_s29 + $0x310] sm:$0xff] }
  0x29   : > { %481 = vst [vmem:[%s8218_s30 + $0x80] sm:$0xff] %v480_v16  ;;  %v550_v51 = vld [vmem:[%s8213_s29 + $0x318] sm:$0xff]  ;;  %v552_v52 = vld [vmem:[%s8213_s29 + $0x320] sm:$0xff]  ;;  %v554_v53 = vld [vmem:[%s8213_s29 + $0x328] sm:$0xff] }
  0x2a   : > { %483 = vst [vmem:[%s8218_s30 + $0x88] sm:$0xff] %v482_v17  ;;  %v556_v54 = vld [vmem:[%s8213_s29 + $0x330] sm:$0xff]  ;;  %v558_v55 = vld [vmem:[%s8213_s29 + $0x338] sm:$0xff]  ;;  %v560_v56 = vld [vmem:[%s8213_s29 + $0x340] sm:$0xff] }
  0x2b   : > { %485 = vst [vmem:[%s8218_s30 + $0x90] sm:$0xff] %v484_v18  ;;  %v562_v57 = vld [vmem:[%s8213_s29 + $0x348] sm:$0xff]  ;;  %v564_v58 = vld [vmem:[%s8213_s29 + $0x350] sm:$0xff]  ;;  %v566_v59 = vld [vmem:[%s8213_s29 + $0x358] sm:$0xff] }
  0x2c   : > { %487 = vst [vmem:[%s8218_s30 + $0x98] sm:$0xff] %v486_v19  ;;  %v568_v60 = vld [vmem:[%s8213_s29 + $0x360] sm:$0xff]  ;;  %v570_v61 = vld [vmem:[%s8213_s29 + $0x368] sm:$0xff]  ;;  %v572_v62 = vld [vmem:[%s8213_s29 + $0x370] sm:$0xff] }
  0x2d   : > { %489 = vst [vmem:[%s8218_s30 + $0xa0] sm:$0xff] %v488_v20  ;;  %v574_v63 = vld [vmem:[%s8213_s29 + $0x378] sm:$0xff] }
  0x2e   : > { %491 = vst [vmem:[%s8218_s30 + $0xa8] sm:$0xff] %v490_v21 }
  0x2f   : > { %493 = vst [vmem:[%s8218_s30 + $0xb0] sm:$0xff] %v492_v22 }
  0x30   : > { %495 = vst [vmem:[%s8218_s30 + $0xb8] sm:$0xff] %v494_v23 }
  0x31   : > { %497 = vst [vmem:[%s8218_s30 + $0xc0] sm:$0xff] %v496_v24 }
  0x32   : > { %499 = vst [vmem:[%s8218_s30 + $0xc8] sm:$0xff] %v498_v25 }
  0x33   : > { %501 = vst [vmem:[%s8218_s30 + $0xd0] sm:$0xff] %v500_v26 }
  0x34   : > { %503 = vst [vmem:[%s8218_s30 + $0xd8] sm:$0xff] %v502_v27 }
  0x35   : > { %505 = vst [vmem:[%s8218_s30 + $0xe0] sm:$0xff] %v504_v28 }
  0x36   : > { %507 = vst [vmem:[%s8218_s30 + $0xe8] sm:$0xff] %v506_v29 }
  0x37   : > { %509 = vst [vmem:[%s8218_s30 + $0xf0] sm:$0xff] %v508_v30 }
  0x38   : > { %511 = vst [vmem:[%s8218_s30 + $0xf8] sm:$0xff] %v510_v31 }
  0x39   : > { %513 = vst [vmem:[%s8218_s30 + $0x100] sm:$0xff] %v512_v32 }
  0x3a   : > { %515 = vst [vmem:[%s8218_s30 + $0x108] sm:$0xff] %v514_v33 }
  0x3b   : > { %517 = vst [vmem:[%s8218_s30 + $0x110] sm:$0xff] %v516_v34 }
  0x3c   : > { %519 = vst [vmem:[%s8218_s30 + $0x118] sm:$0xff] %v518_v35 }
  0x3d   : > { %521 = vst [vmem:[%s8218_s30 + $0x120] sm:$0xff] %v520_v36 }
  0x3e   : > { %523 = vst [vmem:[%s8218_s30 + $0x128] sm:$0xff] %v522_v37 }
  0x3f   : > { %525 = vst [vmem:[%s8218_s30 + $0x130] sm:$0xff] %v524_v38 }
  0x40   : > { %527 = vst [vmem:[%s8218_s30 + $0x138] sm:$0xff] %v526_v39 }
  0x41   : > { %529 = vst [vmem:[%s8218_s30 + $0x140] sm:$0xff] %v528_v40 }
  0x42   : > { %531 = vst [vmem:[%s8218_s30 + $0x148] sm:$0xff] %v530_v41 }
  0x43   : > { %533 = vst [vmem:[%s8218_s30 + $0x150] sm:$0xff] %v532_v42 }
  0x44   : > { %535 = vst [vmem:[%s8218_s30 + $0x158] sm:$0xff] %v534_v43 }
  0x45   : > { %537 = vst [vmem:[%s8218_s30 + $0x160] sm:$0xff] %v536_v44 }
  0x46   : > { %539 = vst [vmem:[%s8218_s30 + $0x168] sm:$0xff] %v538_v45 }
  0x47   : > { %541 = vst [vmem:[%s8218_s30 + $0x170] sm:$0xff] %v540_v46 }
  0x48   : > { %543 = vst [vmem:[%s8218_s30 + $0x178] sm:$0xff] %v542_v47 }
  0x49   : > { %545 = vst [vmem:[%s8218_s30 + $0x180] sm:$0xff] %v544_v48 }
  0x4a   : > { %547 = vst [vmem:[%s8218_s30 + $0x188] sm:$0xff] %v546_v49 }
  0x4b   : > { %549 = vst [vmem:[%s8218_s30 + $0x190] sm:$0xff] %v548_v50 }
  0x4c   : > { %551 = vst [vmem:[%s8218_s30 + $0x198] sm:$0xff] %v550_v51 }
  0x4d   : > { %553 = vst [vmem:[%s8218_s30 + $0x1a0] sm:$0xff] %v552_v52 }
  0x4e   : > { %555 = vst [vmem:[%s8218_s30 + $0x1a8] sm:$0xff] %v554_v53 }
  0x4f   : > { %557 = vst [vmem:[%s8218_s30 + $0x1b0] sm:$0xff] %v556_v54 }
  0x50   : > { %559 = vst [vmem:[%s8218_s30 + $0x1b8] sm:$0xff] %v558_v55 }
  0x51   : > { %561 = vst [vmem:[%s8218_s30 + $0x1c0] sm:$0xff] %v560_v56 }
  0x52   : > { %563 = vst [vmem:[%s8218_s30 + $0x1c8] sm:$0xff] %v562_v57 }
  0x53   : > { %565 = vst [vmem:[%s8218_s30 + $0x1d0] sm:$0xff] %v564_v58 }
  0x54   : > { %567 = vst [vmem:[%s8218_s30 + $0x1d8] sm:$0xff] %v566_v59 }
  0x55   : > { %569 = vst [vmem:[%s8218_s30 + $0x1e0] sm:$0xff] %v568_v60 }
  0x56   : > { %571 = vst [vmem:[%s8218_s30 + $0x1e8] sm:$0xff] %v570_v61 }
  0x57   : > { %573 = vst [vmem:[%s8218_s30 + $0x1f0] sm:$0xff] %v572_v62 }
  0x58   : > { %575 = vst [vmem:[%s8218_s30 + $0x1f8] sm:$0xff] %v574_v63 }
  0x59 PF: > { %p7131_p10 = scmp.ge.s32.totalorder %s8096_s18, 1  ;;  %p580_p11 = scmp.lt.s32.totalorder %s8096_s18, 3 }
  0x5b   : > { %p581_p12 = pnand %p7131_p10, %p580_p11 }
  0x5d   : > { %584 = sbr.rel (%p581_p12) target bundleno = 1795 (0x703), region = 90 }
  0x62   : > { %s8348_s10 = sand.u32 1, %s8088_s16   ;;  %v8357_v1 = vld [vmem:[%s14738_s0 + $0x2] ss:$0 sm:$0xff]  ;;  %s8098_s6 = smov 8   ;;  %v8364_v3 = vld [vmem:[%s14738_s0] ss:$0 sm:$0xff] }
  0x63   : > { %s7132_s11 = sshll.u32 %s8348_s10, 9  ;;  %s8099_s24 = smov 16   ;;  %v1477_v35 = vld [vmem:[%s14740_s2 + $0x18] sm:$0x1]  ;;  %vm1671_vm0 = vcmask 1040384   ;;  %v1476_v36 = vld [vmem:[%s14740_s2 + $0x10] sm:$0xff] }
  0x64   : > { %s8351_s12 = scalar_lea.vmem [#allocation5], %s7132_s11  ;;  %7134 = vmatpush.msk.msra.mxu0 %vm1671_vm0, %v1477_v35  ;;  %7396 = vmatpush.msk.msra.mxu2 %vm1671_vm0, %v1477_v35  ;;  %v1475_v40 = vld [vmem:[%s14740_s2 + $0x8] sm:$0xff]  ;;  %v1474_v43 = vld [vmem:[%s14740_s2] sm:$0xff]  ;;  %vm1279_vm1 = vcmask 64512   ;;  %vm1344_vm2 = vcmask 130048   ;;  %vm1409_vm3 = vcmask 195584  }
  0x65   : > { %v655_v0 = vld [vmem:[%s8351_s12 + $0x100] sm:$0xff]  ;;  %v656_v4 = vld [vmem:[%s8351_s12 + $0x108] sm:$0xff]  ;;  %v657_v10 = vld [vmem:[%s8351_s12 + $0x110] sm:$0xff]  ;;  %vm1478_vm4 = vcmask 203776   ;;  %vm1885_vm5 = vcmask 261120   ;;  %s1884_s20 = sld [smem:[#allocation2]] }
  0x66   : > { %v623_v2 = vld [vmem:[%s8351_s12] sm:$0xff]  ;;  %895 = vrot.lane.b32.xlu0 %v655_v0, %s8098_s6  ;;  %897 = vrot.lane.b32.xlu2 %v656_v4, %s8098_s6  ;;  %v735_v5 = vmul.f32 %v8357_v1, %v655_v0  ;;  %v736_v7 = vmul.f32 %v8357_v1, %v656_v4  ;;  %v624_v8 = vld [vmem:[%s8351_s12 + $0x8] sm:$0xff]  ;;  %v737_v11 = vmul.f32 %v8357_v1, %v657_v10  ;;  %s7045_s11 = scalar_lea.sflag [#allocation7], %s8348_s10  ;;  %s8054_s25 = scalar_lea.hbm %s14747_s9, 8 }
  0x67   : > { %831 = vrot.lane.b32.xlu1 %v623_v2, %s8098_s6  ;;  %v703_v6 = vmul.f32 %v8364_v3, %v623_v2  ;;  %v704_v9 = vmul.f32 %v8364_v3, %v624_v8  ;;  %v625_v12 = vld [vmem:[%s8351_s12 + $0x10] sm:$0xff]  ;;  %v658_v14 = vld [vmem:[%s8351_s12 + $0x118] sm:$0xff]  ;;  %v659_v18 = vld [vmem:[%s8351_s12 + $0x120] sm:$0xff]  ;;  %1688 = vmatpush.msra.mxu0 %v1476_v36 }
  0x68   : > { %v705_v13 = vmul.f32 %v8364_v3, %v625_v12  ;;  %v738_v15 = vmul.f32 %v8357_v1, %v658_v14  ;;  %v626_v16 = vld [vmem:[%s8351_s12 + $0x18] sm:$0xff]  ;;  %v739_v19 = vmul.f32 %v8357_v1, %v659_v18  ;;  %v627_v20 = vld [vmem:[%s8351_s12 + $0x20] sm:$0xff]  ;;  %v660_v22 = vld [vmem:[%s8351_s12 + $0x128] sm:$0xff]  ;;  %7397 = vmatpush.msra.mxu2 %v1476_v36 }
  0x69   : > { %v706_v17 = vmul.f32 %v8364_v3, %v626_v16  ;;  %v707_v21 = vmul.f32 %v8364_v3, %v627_v20  ;;  %v740_v23 = vmul.f32 %v8357_v1, %v660_v22  ;;  %v628_v24 = vld [vmem:[%s8351_s12 + $0x28] sm:$0xff]  ;;  %v661_v26 = vld [vmem:[%s8351_s12 + $0x130] sm:$0xff]  ;;  %v662_v30 = vld [vmem:[%s8351_s12 + $0x138] sm:$0xff]  ;;  %1689 = vmatpush.msra.mxu0 %v1475_v40 }
  0x6a   : > { %v708_v25 = vmul.f32 %v8364_v3, %v628_v24  ;;  %v741_v27 = vmul.f32 %v8357_v1, %v661_v26  ;;  %v629_v28 = vld [vmem:[%s8351_s12 + $0x30] sm:$0xff]  ;;  %v742_v31 = vmul.f32 %v8357_v1, %v662_v30  ;;  %v630_v32 = vld [vmem:[%s8351_s12 + $0x38] sm:$0xff]  ;;  %v663_v34 = vld [vmem:[%s8351_s12 + $0x140] sm:$0xff]  ;;  %7398 = vmatpush.msra.mxu2 %v1475_v40 }
  0x6b   : > { %v709_v29 = vmul.f32 %v8364_v3, %v629_v28  ;;  %v710_v33 = vmul.f32 %v8364_v3, %v630_v32  ;;  %v743_v37 = vmul.f32 %v8357_v1, %v663_v34  ;;  %v631_v38 = vld [vmem:[%s8351_s12 + $0x40] sm:$0xff]  ;;  %v664_v41 = vld [vmem:[%s8351_s12 + $0x148] sm:$0xff]  ;;  %1690 = vmatpush.msra.mxu0 %v1474_v43  ;;  %v665_v48 = vld [vmem:[%s8351_s12 + $0x150] sm:$0xff] }
  0x6c   : > { %v711_v39 = vmul.f32 %v8364_v3, %v631_v38  ;;  %v744_v44 = vmul.f32 %v8357_v1, %v664_v41  ;;  %7399 = vmatpush.msra.mxu2 %v1474_v43  ;;  %v632_v45 = vld [vmem:[%s8351_s12 + $0x48] sm:$0xff]  ;;  %v745_v49 = vmul.f32 %v8357_v1, %v665_v48  ;;  %v633_v50 = vld [vmem:[%s8351_s12 + $0x50] sm:$0xff]  ;;  %v666_v53 = vld [vmem:[%s8351_s12 + $0x158] sm:$0xff] }
  0x6d   : > { %v712_v47 = vmul.f32 %v8364_v3, %v632_v45  ;;  %v713_v52 = vmul.f32 %v8364_v3, %v633_v50  ;;  %v746_v57 = vmul.f32 %v8357_v1, %v666_v53  ;;  %v634_v58 = vld [vmem:[%s8351_s12 + $0x58] sm:$0xff]  ;;  %v667_v60 = vld [vmem:[%s8351_s12 + $0x160] sm:$0xff]  ;;  %v637_v40 = vld [vmem:[%s8351_s12 + $0x70] sm:$0xff] }
  0x6e   : > { %1151 = vrot.lane.b32.xlu0 %v735_v5, %s8099_s24  ;;  %1153 = vrot.lane.b32.xlu2 %v736_v7, %s8099_s24  ;;  %v714_v59 = vmul.f32 %v8364_v3, %v634_v58 }
  0x6f   : > { %1087 = vrot.lane.b32.xlu1 %v703_v6, %s8099_s24 }
  0x76   : > { %833 = vrot.lane.b32.xlu0 %v624_v8, %s8098_s6  ;;  %899 = vrot.lane.b32.xlu2 %v657_v10, %s8098_s6  ;;  %v747_v8 = vmul.f32 %v8357_v1, %v667_v60  ;;  %v635_v10 = vld [vmem:[%s8351_s12 + $0x60] sm:$0xff] }
  0x77   : > { %1089 = vrot.lane.b32.xlu1 %v704_v9, %s8099_s24 }
  0x7e   : > { %1155 = vrot.lane.b32.xlu0 %v737_v11, %s8099_s24  ;;  %1091 = vrot.lane.b32.xlu2 %v705_v13, %s8099_s24 }
  0x7f   : > { %835 = vrot.lane.b32.xlu1 %v625_v12, %s8098_s6 }
  0x86   : > { %901 = vrot.lane.b32.xlu0 %v658_v14, %s8098_s6  ;;  %837 = vrot.lane.b32.xlu2 %v626_v16, %s8098_s6 }
  0x87   : > { %1157 = vrot.lane.b32.xlu1 %v738_v15, %s8099_s24 }
  0x8e   : > { %1093 = vrot.lane.b32.xlu0 %v706_v17, %s8099_s24  ;;  %1159 = vrot.lane.b32.xlu2 %v739_v19, %s8099_s24  ;;  %v668_v19 = vld [vmem:[%s8351_s12 + $0x168] sm:$0xff] }
  0x8f   : > { %903 = vrot.lane.b32.xlu1 %v659_v18, %s8098_s6  ;;  %v715_v18 = vmul.f32 %v8364_v3, %v635_v10 }
  0x96   : > { %839 = vrot.lane.b32.xlu0 %v627_v20, %s8098_s6  ;;  %905 = vrot.lane.b32.xlu2 %v660_v22, %s8098_s6 }
  0x97   : > { %1095 = vrot.lane.b32.xlu1 %v707_v21, %s8099_s24  ;;  %v748_v21 = vmul.f32 %v8357_v1, %v668_v19 }
  0x9e   : > { %1161 = vrot.lane.b32.xlu0 %v740_v23, %s8099_s24  ;;  %1097 = vrot.lane.b32.xlu2 %v708_v25, %s8099_s24  ;;  %v636_v23 = vld [vmem:[%s8351_s12 + $0x68] sm:$0xff] }
  0x9f   : > { %841 = vrot.lane.b32.xlu1 %v628_v24, %s8098_s6 }
  0xa6   : > { %907 = vrot.lane.b32.xlu0 %v661_v26, %s8098_s6  ;;  %843 = vrot.lane.b32.xlu2 %v629_v28, %s8098_s6 }
  0xa7   : > { %1163 = vrot.lane.b32.xlu1 %v741_v27, %s8099_s24 }
  0xae   : > { %1099 = vrot.lane.b32.xlu0 %v709_v29, %s8099_s24  ;;  %1165 = vrot.lane.b32.xlu2 %v742_v31, %s8099_s24  ;;  %v716_v31 = vmul.f32 %v8364_v3, %v636_v23 }
  0xaf   : > { %909 = vrot.lane.b32.xlu1 %v662_v30, %s8098_s6 }
  0xb6   : > { %845 = vrot.lane.b32.xlu0 %v630_v32, %s8098_s6  ;;  %911 = vrot.lane.b32.xlu2 %v663_v34, %s8098_s6 }
  0xb7   : > { %1101 = vrot.lane.b32.xlu1 %v710_v33, %s8099_s24  ;;  %v669_v33 = vld [vmem:[%s8351_s12 + $0x170] sm:$0xff] }
  0xbe   : > { %1167 = vrot.lane.b32.xlu0 %v743_v37, %s8099_s24  ;;  %1103 = vrot.lane.b32.xlu2 %v711_v39, %s8099_s24  ;;  %v749_v39 = vmul.f32 %v8357_v1, %v669_v33 }
  0xbf   : > { %847 = vrot.lane.b32.xlu1 %v631_v38, %s8098_s6 }
  0xc0   : > { %v898_v42 = vpop.permute.xlu2 %897 }
  0xc1   : > { %v1313_v9 = vsel %vm1279_vm1, %v8357_v1, %v898_v42  ;;  %v717_v42 = vmul.f32 %v8364_v3, %v637_v40 }
  0xc6   : > { %913 = vrot.lane.b32.xlu0 %v664_v41, %s8098_s6  ;;  %849 = vrot.lane.b32.xlu2 %v632_v45, %s8098_s6 }
  0xc7   : > { %1169 = vrot.lane.b32.xlu1 %v744_v44, %s8099_s24  ;;  %v670_v44 = vld [vmem:[%s8351_s12 + $0x178] sm:$0xff] }
  0xc8   : > { %v1154_v46 = vpop.permute.xlu2 %1153 }
  0xc9   : > { %v1378_v11 = vsel %vm1344_vm2, %v1313_v9, %v1154_v46 }
  0xca   : > { %v1443_v17 = vsel %vm1409_vm3, %v1378_v11, 1.0 }
  0xce   : > { %1105 = vrot.lane.b32.xlu0 %v712_v47, %s8099_s24  ;;  %1171 = vrot.lane.b32.xlu2 %v745_v49, %s8099_s24 }
  0xcf   : > { %915 = vrot.lane.b32.xlu1 %v665_v48, %s8098_s6 }
  0xd0   : > { %v900_v51 = vpop.permute.xlu2 %899 }
  0xd1   : > { %v1314_v22 = vsel %vm1279_vm1, %v8357_v1, %v900_v51 }
  0xd6   : > { %851 = vrot.lane.b32.xlu0 %v633_v50, %s8098_s6  ;;  %917 = vrot.lane.b32.xlu2 %v666_v53, %s8098_s6 }
  0xd7   : > { %1107 = vrot.lane.b32.xlu1 %v713_v52, %s8099_s24  ;;  %v750_v52 = vmul.f32 %v8357_v1, %v670_v44 }
  0xd8   : > { %v896_v54 = vpop.permute.xlu0 %895  ;;  %v1092_v56 = vpop.permute.xlu2 %1091 }
  0xd9   : > { %v832_v55 = vpop.permute.xlu1 %831  ;;  %v1312_v61 = vsel %vm1279_vm1, %v8357_v1, %v896_v54  ;;  %v638_v54 = vld [vmem:[%s8351_s12 + $0x78] sm:$0xff] }
  0xda   : > { %v1280_v62 = vsel %vm1279_vm1, %v8364_v3, %v832_v55 }
  0xde   : > { %1173 = vrot.lane.b32.xlu0 %v746_v57, %s8099_s24  ;;  %1109 = vrot.lane.b32.xlu2 %v714_v59, %s8099_s24 }
  0xdf   : > { %853 = vrot.lane.b32.xlu1 %v634_v58, %s8098_s6  ;;  %v8551_v58 = vld [vmem:[%s14738_s0 + $0x3] ss:$0 sm:$0xff] }
  0xe0   : > { %v1152_v63 = vpop.permute.xlu0 %1151  ;;  %v838_v5 = vpop.permute.xlu2 %837 }
  0xe1   : > { %v1088_v0 = vpop.permute.xlu1 %1087  ;;  %v1377_v2 = vsel %vm1344_vm2, %v1312_v61, %v1152_v63  ;;  %v1283_v43 = vsel %vm1279_vm1, %v8364_v3, %v838_v5  ;;  %v718_v61 = vmul.f32 %v8364_v3, %v638_v54  ;;  %v639_v5 = vld [vmem:[%s8351_s12 + $0x80] sm:$0xff] }
  0xe2   : > { %v1345_v4 = vsel %vm1344_vm2, %v1280_v62, %v1088_v0  ;;  %v1442_v7 = vsel %vm1409_vm3, %v1377_v2, 1.0  ;;  %v671_v62 = vld [vmem:[%s8351_s12 + $0x180] sm:$0xff] }
  0xe3   : > { %v1410_v6 = vsel %vm1409_vm3, %v1345_v4, 1.0  ;;  %7167 = vmatmul.msk.f32.vlgmr.msra.gmra.mxu2 %vm1478_vm4, %v1442_v7  ;;  %v751_v0 = vmul.f32 %v8551_v58, %v671_v62  ;;  %v8566_v4 = vld [vmem:[%s14738_s0 + $0x1] ss:$0 sm:$0xff] }
  0xe4   : > { %7135 = vmatmul.msk.f32.vlgmr.msra.gmra.mxu0 %vm1478_vm4, %v1410_v6 }
  0xe6   : > { %919 = vrot.lane.b32.xlu0 %v667_v60, %s8098_s6  ;;  %855 = vrot.lane.b32.xlu2 %v635_v10, %s8098_s6 }
  0xe7   : > { %1175 = vrot.lane.b32.xlu1 %v747_v8, %s8099_s24 }
  0xe8   : > { %v834_v12 = vpop.permute.xlu0 %833  ;;  %v1160_v15 = vpop.permute.xlu2 %1159 }
  0xe9   : > { %v1090_v13 = vpop.permute.xlu1 %1089  ;;  %v1281_v14 = vsel %vm1279_vm1, %v8364_v3, %v834_v12 }
  0xea   : > { %v1346_v16 = vsel %vm1344_vm2, %v1281_v14, %v1090_v13  ;;  %v719_v13 = vmul.f32 %v8566_v4, %v639_v5 }
  0xeb   : > { %7168 = vmatmul.msk.f32.gmra.mxu2 %vm1478_vm4, %v1443_v17  ;;  %v1411_v20 = vsel %vm1409_vm3, %v1346_v16, 1.0 }
  0xec   : > { %7136 = vmatmul.msk.f32.gmra.mxu0 %vm1478_vm4, %v1411_v20 }
  0xee   : > { %1111 = vrot.lane.b32.xlu0 %v715_v18, %s8099_s24  ;;  %1177 = vrot.lane.b32.xlu2 %v748_v21, %s8099_s24 }
  0xef   : > { %921 = vrot.lane.b32.xlu1 %v668_v19, %s8098_s6 }
  0xf0   : > { %v1156_v24 = vpop.permute.xlu0 %1155  ;;  %v906_v28 = vpop.permute.xlu2 %905 }
  0xf1   : > { %v836_v25 = vpop.permute.xlu1 %835  ;;  %v1379_v26 = vsel %vm1344_vm2, %v1314_v22, %v1156_v24  ;;  %v1317_v2 = vsel %vm1279_vm1, %v8357_v1, %v906_v28  ;;  %v640_v22 = vld [vmem:[%s8351_s12 + $0x88] sm:$0xff] }
  0xf2   : > { %v1282_v27 = vsel %vm1279_vm1, %v8364_v3, %v836_v25  ;;  %v1444_v30 = vsel %vm1409_vm3, %v1379_v26, 1.0  ;;  %v720_v24 = vmul.f32 %v8566_v4, %v640_v22  ;;  %v673_v26 = vld [vmem:[%s8351_s12 + $0x190] sm:$0xff] }
  0xf3   : > { %v1347_v29 = vsel %vm1344_vm2, %v1282_v27, %v1092_v56  ;;  %7169 = vmatmul.msk.f32.gmra.mxu2 %vm1478_vm4, %v1444_v30 }
  0xf4   : > { %v1412_v32 = vsel %vm1409_vm3, %v1347_v29, 1.0 }
  0xf5   : > { %7137 = vmatmul.msk.f32.gmra.mxu0 %vm1478_vm4, %v1412_v32 }
  0xf6   : > { %857 = vrot.lane.b32.xlu0 %v636_v23, %s8098_s6  ;;  %923 = vrot.lane.b32.xlu2 %v669_v33, %s8098_s6 }
  0xf7   : > { %1113 = vrot.lane.b32.xlu1 %v716_v31, %s8099_s24 }
  0xf8   : > { %v902_v34 = vpop.permute.xlu0 %901  ;;  %v1098_v37 = vpop.permute.xlu2 %1097 }
  0xf9   : > { %v1158_v35 = vpop.permute.xlu1 %1157  ;;  %v1315_v36 = vsel %vm1279_vm1, %v8357_v1, %v902_v34  ;;  %v753_v34 = vmul.f32 %v8551_v58, %v673_v26 }
  0xfa   : > { %v1380_v38 = vsel %vm1344_vm2, %v1315_v36, %v1158_v35  ;;  %v641_v36 = vld [vmem:[%s8351_s12 + $0x90] sm:$0xff] }
  0xfb   : > { %v1445_v41 = vsel %vm1409_vm3, %v1380_v38, 1.0 }
  0xfc   : > { %7170 = vmatmul.msk.f32.gmra.mxu2 %vm1478_vm4, %v1445_v41 }
  0xfe   : > { %1179 = vrot.lane.b32.xlu0 %v749_v39, %s8099_s24  ;;  %1115 = vrot.lane.b32.xlu2 %v717_v42, %s8099_s24  ;;  %v721_v42 = vmul.f32 %v8566_v4, %v641_v36 }
  0xff   : > { %859 = vrot.lane.b32.xlu1 %v637_v40, %s8098_s6 }
 0x100   : > { %v1094_v45 = vpop.permute.xlu0 %1093  ;;  %v844_v49 = vpop.permute.xlu2 %843 }
 0x101   : > { %v904_v46 = vpop.permute.xlu1 %903  ;;  %v1348_v47 = vsel %vm1344_vm2, %v1283_v43, %v1094_v45  ;;  %v1286_v25 = vsel %vm1279_vm1, %v8364_v3, %v844_v49  ;;  %v674_v43 = vld [vmem:[%s8351_s12 + $0x198] sm:$0xff] }
 0x102   : > { %v1316_v48 = vsel %vm1279_vm1, %v8357_v1, %v904_v46  ;;  %v1413_v51 = vsel %vm1409_vm3, %v1348_v47, 1.0  ;;  %v754_v45 = vmul.f32 %v8551_v58, %v674_v43  ;;  %v642_v47 = vld [vmem:[%s8351_s12 + $0x98] sm:$0xff] }
 0x103   : > { %v1381_v50 = vsel %vm1344_vm2, %v1316_v48, %v1160_v15  ;;  %7138 = vmatmul.msk.f32.gmra.mxu0 %vm1478_vm4, %v1413_v51  ;;  %v672_v15 = vld [vmem:[%s8351_s12 + $0x188] sm:$0xff] }
 0x104   : > { %v1446_v53 = vsel %vm1409_vm3, %v1381_v50, 1.0  ;;  %v752_v21 = vmul.f32 %v8551_v58, %v672_v15 }
 0x105   : > { %7171 = vmatmul.msk.f32.gmra.mxu2 %vm1478_vm4, %v1446_v53 }
 0x106   : > { %925 = vrot.lane.b32.xlu0 %v670_v44, %s8098_s6  ;;  %861 = vrot.lane.b32.xlu2 %v638_v54, %s8098_s6 }
 0x107   : > { %1181 = vrot.lane.b32.xlu1 %v750_v52, %s8099_s24 }
 0x108   : > { %v840_v55 = vpop.permute.xlu0 %839  ;;  %v1166_v59 = vpop.permute.xlu2 %1165 }
 0x109   : > { %v1096_v56 = vpop.permute.xlu1 %1095  ;;  %v1284_v57 = vsel %vm1279_vm1, %v8364_v3, %v840_v55  ;;  %v722_v55 = vmul.f32 %v8566_v4, %v642_v47 }
 0x10a   : > { %v1349_v60 = vsel %vm1344_vm2, %v1284_v57, %v1096_v56  ;;  %v675_v57 = vld [vmem:[%s8351_s12 + $0x1a0] sm:$0xff] }
 0x10b   : > { %v1414_v63 = vsel %vm1409_vm3, %v1349_v60, 1.0 }
 0x10c   : > { %7139 = vmatmul.msk.f32.gmra.mxu0 %vm1478_vm4, %v1414_v63 }
 0x10e   : > { %1117 = vrot.lane.b32.xlu0 %v718_v61, %s8099_s24  ;;  %1183 = vrot.lane.b32.xlu2 %v751_v0, %s8099_s24  ;;  %v755_v0 = vmul.f32 %v8551_v58, %v675_v57 }
 0x10f   : > { %927 = vrot.lane.b32.xlu1 %v671_v62, %s8098_s6 }
 0x110   : > { %v1162_v6 = vpop.permute.xlu0 %1161  ;;  %v912_v10 = vpop.permute.xlu2 %911 }
 0x111   : > { %v842_v7 = vpop.permute.xlu1 %841  ;;  %v1382_v8 = vsel %vm1344_vm2, %v1317_v2, %v1162_v6  ;;  %v1320_v46 = vsel %vm1279_vm1, %v8357_v1, %v912_v10  ;;  %v643_v2 = vld [vmem:[%s8351_s12 + $0xa0] sm:$0xff] }
 0x112   : > { %v1285_v9 = vsel %vm1279_vm1, %v8364_v3, %v842_v7  ;;  %v1447_v12 = vsel %vm1409_vm3, %v1382_v8, 1.0  ;;  %v723_v6 = vmul.f32 %v8566_v4, %v643_v2  ;;  %v676_v8 = vld [vmem:[%s8351_s12 + $0x1a8] sm:$0xff] }
 0x113   : > { %v1350_v11 = vsel %vm1344_vm2, %v1285_v9, %v1098_v37  ;;  %7172 = vmatmul.msk.f32.gmra.mxu2 %vm1478_vm4, %v1447_v12 }
 0x114   : > { %v1415_v14 = vsel %vm1409_vm3, %v1350_v11, 1.0 }
 0x115   : > { %7140 = vmatmul.msk.f32.gmra.mxu0 %vm1478_vm4, %v1415_v14 }
 0x116   : > { %863 = vrot.lane.b32.xlu0 %v639_v5, %s8098_s6  ;;  %929 = vrot.lane.b32.xlu2 %v672_v15, %s8098_s6 }
 0x117   : > { %1119 = vrot.lane.b32.xlu1 %v719_v13, %s8099_s24 }
 0x118   : > { %v908_v16 = vpop.permute.xlu0 %907  ;;  %v1104_v19 = vpop.permute.xlu2 %1103 }
 0x119   : > { %v1164_v17 = vpop.permute.xlu1 %1163  ;;  %v1318_v18 = vsel %vm1279_vm1, %v8357_v1, %v908_v16  ;;  %v756_v16 = vmul.f32 %v8551_v58, %v676_v8 }
 0x11a   : > { %v1383_v20 = vsel %vm1344_vm2, %v1318_v18, %v1164_v17  ;;  %v644_v18 = vld [vmem:[%s8351_s12 + $0xa8] sm:$0xff] }
 0x11b   : > { %v1448_v23 = vsel %vm1409_vm3, %v1383_v20, 1.0 }
 0x11c   : > { %7173 = vmatmul.msk.f32.gmra.mxu2 %vm1478_vm4, %v1448_v23 }
 0x11e   : > { %1185 = vrot.lane.b32.xlu0 %v752_v21, %s8099_s24  ;;  %1121 = vrot.lane.b32.xlu2 %v720_v24, %s8099_s24  ;;  %v724_v24 = vmul.f32 %v8566_v4, %v644_v18 }
 0x11f   : > { %865 = vrot.lane.b32.xlu1 %v640_v22, %s8098_s6 }
 0x120   : > { %v1100_v27 = vpop.permute.xlu0 %1099  ;;  %v850_v31 = vpop.permute.xlu2 %849 }
 0x121   : > { %v910_v28 = vpop.permute.xlu1 %909  ;;  %v1351_v29 = vsel %vm1344_vm2, %v1286_v25, %v1100_v27  ;;  %v1289_v7 = vsel %vm1279_vm1, %v8364_v3, %v850_v31  ;;  %v677_v25 = vld [vmem:[%s8351_s12 + $0x1b0] sm:$0xff] }
 0x122   : > { %v1319_v30 = vsel %vm1279_vm1, %v8357_v1, %v910_v28  ;;  %v1416_v33 = vsel %vm1409_vm3, %v1351_v29, 1.0  ;;  %v757_v27 = vmul.f32 %v8551_v58, %v677_v25  ;;  %v645_v29 = vld [vmem:[%s8351_s12 + $0xb0] sm:$0xff] }
 0x123   : > { %v1384_v32 = vsel %vm1344_vm2, %v1319_v30, %v1166_v59  ;;  %7141 = vmatmul.msk.f32.gmra.mxu0 %vm1478_vm4, %v1416_v33 }
 0x124   : > { %v1449_v35 = vsel %vm1409_vm3, %v1384_v32, 1.0 }
 0x125   : > { %7174 = vmatmul.msk.f32.gmra.mxu2 %vm1478_vm4, %v1449_v35 }
 0x126   : > { %931 = vrot.lane.b32.xlu0 %v673_v26, %s8098_s6  ;;  %867 = vrot.lane.b32.xlu2 %v641_v36, %s8098_s6 }
 0x127   : > { %1187 = vrot.lane.b32.xlu1 %v753_v34, %s8099_s24 }
 0x128   : > { %v846_v37 = vpop.permute.xlu0 %845  ;;  %v1172_v40 = vpop.permute.xlu2 %1171 }
 0x129   : > { %v1102_v38 = vpop.permute.xlu1 %1101  ;;  %v1287_v39 = vsel %vm1279_vm1, %v8364_v3, %v846_v37  ;;  %v725_v37 = vmul.f32 %v8566_v4, %v645_v29 }
 0x12a   : > { %v1352_v41 = vsel %vm1344_vm2, %v1287_v39, %v1102_v38  ;;  %v678_v39 = vld [vmem:[%s8351_s12 + $0x1b8] sm:$0xff] }
 0x12b   : > { %v1417_v44 = vsel %vm1409_vm3, %v1352_v41, 1.0 }
 0x12c   : > { %7142 = vmatmul.msk.f32.gmra.mxu0 %vm1478_vm4, %v1417_v44 }
 0x12e   : > { %1123 = vrot.lane.b32.xlu0 %v721_v42, %s8099_s24  ;;  %1189 = vrot.lane.b32.xlu2 %v754_v45, %s8099_s24  ;;  %v758_v45 = vmul.f32 %v8551_v58, %v678_v39 }
 0x12f   : > { %933 = vrot.lane.b32.xlu1 %v674_v43, %s8098_s6 }
 0x130   : > { %v1168_v48 = vpop.permute.xlu0 %1167  ;;  %v918_v52 = vpop.permute.xlu2 %917 }
 0x131   : > { %v848_v49 = vpop.permute.xlu1 %847  ;;  %v1385_v50 = vsel %vm1344_vm2, %v1320_v46, %v1168_v48  ;;  %v1323_v28 = vsel %vm1279_vm1, %v8357_v1, %v918_v52  ;;  %v646_v46 = vld [vmem:[%s8351_s12 + $0xb8] sm:$0xff] }
 0x132   : > { %v1288_v51 = vsel %vm1279_vm1, %v8364_v3, %v848_v49  ;;  %v1450_v54 = vsel %vm1409_vm3, %v1385_v50, 1.0  ;;  %v726_v48 = vmul.f32 %v8566_v4, %v646_v46  ;;  %v679_v50 = vld [vmem:[%s8351_s12 + $0x1c0] sm:$0xff] }
 0x133   : > { %v1353_v53 = vsel %vm1344_vm2, %v1288_v51, %v1104_v19  ;;  %7175 = vmatmul.msk.f32.gmra.mxu2 %vm1478_vm4, %v1450_v54 }
 0x134   : > { %v1418_v56 = vsel %vm1409_vm3, %v1353_v53, 1.0 }
 0x135   : > { %7143 = vmatmul.msk.f32.gmra.mxu0 %vm1478_vm4, %v1418_v56 }
 0x136   : > { %869 = vrot.lane.b32.xlu0 %v642_v47, %s8098_s6  ;;  %935 = vrot.lane.b32.xlu2 %v675_v57, %s8098_s6  ;;  %v759_v57 = vmul.f32 %v8551_v58, %v679_v50 }
 0x137   : > { %1125 = vrot.lane.b32.xlu1 %v722_v55, %s8099_s24 }
 0x138   : > { %v914_v59 = vpop.permute.xlu0 %913  ;;  %v1110_v62 = vpop.permute.xlu2 %1109 }
 0x139   : > { %v1170_v60 = vpop.permute.xlu1 %1169  ;;  %v1321_v61 = vsel %vm1279_vm1, %v8357_v1, %v914_v59 }
 0x13a   : > { %v1386_v63 = vsel %vm1344_vm2, %v1321_v61, %v1170_v60  ;;  %v647_v61 = vld [vmem:[%s8351_s12 + $0xc0] sm:$0xff] }
 0x13b   : > { %v1451_v5 = vsel %vm1409_vm3, %v1386_v63, 1.0 }
 0x13c   : > { %7176 = vmatmul.msk.f32.gmra.mxu2 %vm1478_vm4, %v1451_v5  ;;  %v727_v5 = vmul.f32 %v8566_v4, %v647_v61 }
 0x13e   : > { %1191 = vrot.lane.b32.xlu0 %v755_v0, %s8099_s24  ;;  %1127 = vrot.lane.b32.xlu2 %v723_v6, %s8099_s24  ;;  %v680_v6 = vld [vmem:[%s8351_s12 + $0x1c8] sm:$0xff] }
 0x13f   : > { %871 = vrot.lane.b32.xlu1 %v643_v2, %s8098_s6 }
 0x140   : > { %v1106_v9 = vpop.permute.xlu0 %1105  ;;  %v856_v13 = vpop.permute.xlu2 %855 }
 0x141   : > { %v916_v10 = vpop.permute.xlu1 %915  ;;  %v1354_v11 = vsel %vm1344_vm2, %v1289_v7, %v1106_v9  ;;  %v1292_v49 = vsel %vm1279_vm1, %v8364_v3, %v856_v13  ;;  %v760_v9 = vmul.f32 %v8551_v58, %v680_v6 }
 0x142   : > { %v1322_v12 = vsel %vm1279_vm1, %v8357_v1, %v916_v10  ;;  %v1419_v15 = vsel %vm1409_vm3, %v1354_v11, 1.0  ;;  %v648_v11 = vld [vmem:[%s8351_s12 + $0xc8] sm:$0xff] }
 0x143   : > { %v1387_v14 = vsel %vm1344_vm2, %v1322_v12, %v1172_v40  ;;  %7144 = vmatmul.msk.f32.gmra.mxu0 %vm1478_vm4, %v1419_v15 }
 0x144   : > { %v1452_v17 = vsel %vm1409_vm3, %v1387_v14, 1.0 }
 0x145   : > { %7177 = vmatmul.msk.f32.gmra.mxu2 %vm1478_vm4, %v1452_v17  ;;  %v728_v17 = vmul.f32 %v8566_v4, %v648_v11 }
 0x146   : > { %937 = vrot.lane.b32.xlu0 %v676_v8, %s8098_s6  ;;  %873 = vrot.lane.b32.xlu2 %v644_v18, %s8098_s6 }
 0x147   : > { %1193 = vrot.lane.b32.xlu1 %v756_v16, %s8099_s24 }
 0x148   : > { %v852_v19 = vpop.permute.xlu0 %851  ;;  %v1178_v22 = vpop.permute.xlu2 %1177 }
 0x149   : > { %v1108_v20 = vpop.permute.xlu1 %1107  ;;  %v1290_v21 = vsel %vm1279_vm1, %v8364_v3, %v852_v19 }
 0x14a   : > { %v1355_v23 = vsel %vm1344_vm2, %v1290_v21, %v1108_v20 }
 0x14b   : > { %v1420_v26 = vsel %vm1409_vm3, %v1355_v23, 1.0  ;;  %v681_v23 = vld [vmem:[%s8351_s12 + $0x1d0] sm:$0xff] }
 0x14c   : > { %7145 = vmatmul.msk.f32.gmra.mxu0 %vm1478_vm4, %v1420_v26 }
 0x14e   : > { %1129 = vrot.lane.b32.xlu0 %v724_v24, %s8099_s24  ;;  %1195 = vrot.lane.b32.xlu2 %v757_v27, %s8099_s24 }
 0x14f   : > { %939 = vrot.lane.b32.xlu1 %v677_v25, %s8098_s6 }
 0x150   : > { %v1174_v30 = vpop.permute.xlu0 %1173  ;;  %v924_v34 = vpop.permute.xlu2 %923 }
 0x151   : > { %v854_v31 = vpop.permute.xlu1 %853  ;;  %v1388_v32 = vsel %vm1344_vm2, %v1323_v28, %v1174_v30  ;;  %v1326_v10 = vsel %vm1279_vm1, %v8357_v1, %v924_v34  ;;  %v761_v28 = vmul.f32 %v8551_v58, %v681_v23 }
 0x152   : > { %v1291_v33 = vsel %vm1279_vm1, %v8364_v3, %v854_v31  ;;  %v1453_v36 = vsel %vm1409_vm3, %v1388_v32, 1.0 }
 0x153   : > { %v1356_v35 = vsel %vm1344_vm2, %v1291_v33, %v1110_v62  ;;  %7178 = vmatmul.msk.f32.gmra.mxu2 %vm1478_vm4, %v1453_v36 }
 0x154   : > { %v1421_v38 = vsel %vm1409_vm3, %v1356_v35, 1.0  ;;  %v682_v35 = vld [vmem:[%s8351_s12 + $0x1d8] sm:$0xff] }
 0x155   : > { %7146 = vmatmul.msk.f32.gmra.mxu0 %vm1478_vm4, %v1421_v38 }
 0x156   : > { %875 = vrot.lane.b32.xlu0 %v645_v29, %s8098_s6  ;;  %941 = vrot.lane.b32.xlu2 %v678_v39, %s8098_s6  ;;  %v649_v29 = vld [vmem:[%s8351_s12 + $0xd0] sm:$0xff] }
 0x157   : > { %1131 = vrot.lane.b32.xlu1 %v725_v37, %s8099_s24  ;;  %v729_v32 = vmul.f32 %v8566_v4, %v649_v29 }
 0x158   : > { %v920_v40 = vpop.permute.xlu0 %919  ;;  %v1116_v43 = vpop.permute.xlu2 %1115 }
 0x159   : > { %v1176_v41 = vpop.permute.xlu1 %1175  ;;  %v1324_v42 = vsel %vm1279_vm1, %v8357_v1, %v920_v40 }
 0x15a   : > { %v1389_v44 = vsel %vm1344_vm2, %v1324_v42, %v1176_v41  ;;  %v762_v41 = vmul.f32 %v8551_v58, %v682_v35 }
 0x15b   : > { %v1454_v47 = vsel %vm1409_vm3, %v1389_v44, 1.0  ;;  %v650_v44 = vld [vmem:[%s8351_s12 + $0xd8] sm:$0xff] }
 0x15c   : > { %7179 = vmatmul.msk.f32.gmra.mxu2 %vm1478_vm4, %v1454_v47 }
 0x15e   : > { %1197 = vrot.lane.b32.xlu0 %v758_v45, %s8099_s24  ;;  %1133 = vrot.lane.b32.xlu2 %v726_v48, %s8099_s24 }
 0x15f   : > { %877 = vrot.lane.b32.xlu1 %v646_v46, %s8098_s6 }
 0x160   : > { %v1112_v51 = vpop.permute.xlu0 %1111  ;;  %v862_v54 = vpop.permute.xlu2 %861 }
 0x161   : > { %v1357_v52 = vsel %vm1344_vm2, %v1292_v49, %v1112_v51  ;;  %v922_v53 = vpop.permute.xlu1 %921  ;;  %v8737_v19 = vpop.f32.mrf.mxu0  ;;  %v730_v51 = vmul.f32 %v8566_v4, %v650_v44 }
 0x162   : > { %v1325_v55 = vsel %vm1279_vm1, %v8357_v1, %v922_v53  ;;  %v1422_v56 = vsel %vm1409_vm3, %v1357_v52, 1.0  ;;  %v683_v52 = vld [vmem:[%s8351_s12 + $0x1e0] sm:$0xff] }
 0x163   : > { %v1390_v59 = vsel %vm1344_vm2, %v1325_v55, %v1178_v22  ;;  %7147 = vmatmul.msk.f32.gmra.mxu0 %vm1478_vm4, %v1422_v56  ;;  %v763_v55 = vmul.f32 %v8551_v58, %v683_v52 }
 0x164   : > { %v1455_v60 = vsel %vm1409_vm3, %v1390_v59, 1.0  ;;  %v651_v59 = vld [vmem:[%s8351_s12 + $0xe0] sm:$0xff] }
 0x165   : > { %7180 = vmatmul.msk.f32.gmra.mxu2 %vm1478_vm4, %v1455_v60 }
 0x166   : > { %943 = vrot.lane.b32.xlu0 %v679_v50, %s8098_s6  ;;  %879 = vrot.lane.b32.xlu2 %v647_v61, %s8098_s6  ;;  %v8739_v20 = vpop.f32.mrf.mxu2 }
 0x167   : > { %1199 = vrot.lane.b32.xlu1 %v759_v57, %s8099_s24 }
 0x168   : > { %v858_v62 = vpop.permute.xlu0 %857  ;;  %v1184_v7 = vpop.permute.xlu2 %1183 }
 0x169   : > { %v1293_v63 = vsel %vm1279_vm1, %v8364_v3, %v858_v62  ;;  %v1114_v0 = vpop.permute.xlu1 %1113  ;;  %v8757_v33 = vpop.f32.mrf.mxu0 }
 0x16a   : > { %v1358_v2 = vsel %vm1344_vm2, %v1293_v63, %v1114_v0 }
 0x16b   : > { %v1423_v8 = vsel %vm1409_vm3, %v1358_v2, 1.0 }
 0x16c   : > { %7148 = vmatmul.msk.f32.gmra.mxu0 %vm1478_vm4, %v1423_v8 }
 0x16e   : > { %1135 = vrot.lane.b32.xlu0 %v727_v5, %s8099_s24  ;;  %1201 = vrot.lane.b32.xlu2 %v760_v9, %s8099_s24  ;;  %v8759_v34 = vpop.f32.mrf.mxu2  ;;  %v731_v5 = vmul.f32 %v8566_v4, %v651_v59  ;;  %v684_v9 = vld [vmem:[%s8351_s12 + $0x1e8] sm:$0xff] }
 0x16f   : > { %945 = vrot.lane.b32.xlu1 %v680_v6, %s8098_s6 }
 0x170   : > { %v1180_v12 = vpop.permute.xlu0 %1179  ;;  %v930_v18 = vpop.permute.xlu2 %929 }
 0x171   : > { %v1391_v13 = vsel %vm1344_vm2, %v1326_v10, %v1180_v12  ;;  %v860_v14 = vpop.permute.xlu1 %859  ;;  %v1329_v56 = vsel %vm1279_vm1, %v8551_v58, %v930_v18 }
 0x172   : > { %v1294_v15 = vsel %vm1279_vm1, %v8364_v3, %v860_v14  ;;  %v1456_v16 = vsel %vm1409_vm3, %v1391_v13, 1.0  ;;  %v8779_v45 = vpop.f32.mrf.mxu0 }
 0x173   : > { %v1359_v21 = vsel %vm1344_vm2, %v1294_v15, %v1116_v43  ;;  %7181 = vmatmul.msk.f32.gmra.mxu2 %vm1478_vm4, %v1456_v16  ;;  %v764_v15 = vmul.f32 %v8551_v58, %v684_v9  ;;  %v652_v16 = vld [vmem:[%s8351_s12 + $0xe8] sm:$0xff] }
 0x174   : > { %v1424_v22 = vsel %vm1409_vm3, %v1359_v21, 1.0 }
 0x175   : > { %7149 = vmatmul.msk.f32.gmra.mxu0 %vm1478_vm4, %v1424_v22  ;;  %v732_v22 = vmul.f32 %v8566_v4, %v652_v16 }
 0x176   : > { %881 = vrot.lane.b32.xlu0 %v648_v11, %s8098_s6  ;;  %947 = vrot.lane.b32.xlu2 %v681_v23, %s8098_s6  ;;  %v8781_v46 = vpop.f32.mrf.mxu2 }
 0x177   : > { %1137 = vrot.lane.b32.xlu1 %v728_v17, %s8099_s24 }
 0x178   : > { %v926_v24 = vpop.permute.xlu0 %925  ;;  %v1122_v30 = vpop.permute.xlu2 %1121 }
 0x179   : > { %v1327_v25 = vsel %vm1279_vm1, %v8357_v1, %v926_v24  ;;  %v1182_v26 = vpop.permute.xlu1 %1181  ;;  %v1295_v1 = vsel %vm1279_vm1, %v8364_v3, %v862_v54  ;;  %v685_v24 = vld [vmem:[%s8351_s12 + $0x1f0] sm:$0xff] }
 0x17a   : > { %v1392_v27 = vsel %vm1344_vm2, %v1327_v25, %v1182_v26 }
 0x17b   : > { %v1457_v31 = vsel %vm1409_vm3, %v1392_v27, 1.0 }
 0x17c   : > { %7182 = vmatmul.msk.f32.gmra.mxu2 %vm1478_vm4, %v1457_v31 }
 0x17e   : > { %1203 = vrot.lane.b32.xlu0 %v761_v28, %s8099_s24  ;;  %1139 = vrot.lane.b32.xlu2 %v729_v32, %s8099_s24 }
 0x17f   : > { %883 = vrot.lane.b32.xlu1 %v649_v29, %s8098_s6  ;;  %v8800_v61 = vpop.f32.mrf.mxu2 }
 0x180   : > { %v1118_v36 = vpop.permute.xlu0 %1117  ;;  %v868_v3 = vpop.permute.xlu2 %867  ;;  %14990 = vst [vmem:[#allocation10_spill] sm:$0xff] %v8800_v61 }
 0x181   : > { %v1360_v37 = vsel %vm1344_vm2, %v1295_v1, %v1118_v36  ;;  %v928_v38 = vpop.permute.xlu1 %927  ;;  %v8796_v57 = vpop.f32.mrf.mxu0  ;;  %v1298_v23 = vsel %vm1279_vm1, %v8566_v4, %v868_v3 }
 0x182   : > { %v1328_v39 = vsel %vm1279_vm1, %v8551_v58, %v928_v38  ;;  %v1425_v40 = vsel %vm1409_vm3, %v1360_v37, 1.0  ;;  %14989 = vst [vmem:[#allocation9_spill] sm:$0xff] %v8796_v57  ;;  %v653_v37 = vld [vmem:[%s8351_s12 + $0xf0] sm:$0xff] }
 0x183   : > { %v1393_v42 = vsel %vm1344_vm2, %v1328_v39, %v1184_v7  ;;  %7150 = vmatmul.msk.f32.gmra.mxu0 %vm1478_vm4, %v1425_v40  ;;  %v733_v3 = vmul.f32 %v8566_v4, %v653_v37 }
 0x184   : > { %v1458_v43 = vsel %vm1409_vm3, %v1393_v42, 1.0  ;;  %v686_v42 = vld [vmem:[%s8351_s12 + $0x1f8] sm:$0xff] }
 0x185   : > { %7183 = vmatmul.msk.f32.gmra.mxu2 %vm1478_vm4, %v1458_v43 }
 0x186   : > { %949 = vrot.lane.b32.xlu0 %v682_v35, %s8098_s6  ;;  %885 = vrot.lane.b32.xlu2 %v650_v44, %s8098_s6 }
 0x187   : > { %1205 = vrot.lane.b32.xlu1 %v762_v41, %s8099_s24 }
 0x188   : > { %v864_v47 = vpop.permute.xlu0 %863  ;;  %v1190_v53 = vpop.permute.xlu2 %1189 }
 0x189   : > { %v1296_v48 = vsel %vm1279_vm1, %v8566_v4, %v864_v47  ;;  %v1120_v49 = vpop.permute.xlu1 %1119  ;;  %v8815_v11 = vpop.f32.mrf.mxu0 }
 0x18a   : > { %v1361_v50 = vsel %vm1344_vm2, %v1296_v48, %v1120_v49  ;;  %14991 = vst [vmem:[#allocation11_spill] sm:$0xff] %v8815_v11  ;;  %v8822_v18 = vpop.f32.mrf.mxu2  ;;  %v766_v48 = vmul.f32 %v8551_v58, %v686_v42 }
 0x18b   : > { %v1426_v54 = vsel %vm1409_vm3, %v1361_v50, 1.0  ;;  %14992 = vst [vmem:[#allocation12_spill] sm:$0xff] %v8822_v18 }
 0x18c   : > { %7151 = vmatmul.msk.f32.gmra.mxu0 %vm1478_vm4, %v1426_v54 }
 0x18e   : > { %1141 = vrot.lane.b32.xlu0 %v730_v51, %s8099_s24  ;;  %1207 = vrot.lane.b32.xlu2 %v763_v55, %s8099_s24  ;;  %v654_v51 = vld [vmem:[%s8351_s12 + $0xf8] sm:$0xff] }
 0x18f   : > { %951 = vrot.lane.b32.xlu1 %v683_v52, %s8098_s6 }
 0x190   : > { %v1186_v60 = vpop.permute.xlu0 %1185  ;;  %v936_v6 = vpop.permute.xlu2 %935 }
 0x191   : > { %v1394_v62 = vsel %vm1344_vm2, %v1329_v56, %v1186_v60  ;;  %v866_v63 = vpop.permute.xlu1 %865  ;;  %v1332_v50 = vsel %vm1279_vm1, %v8551_v58, %v936_v6 }
 0x192   : > { %v1297_v0 = vsel %vm1279_vm1, %v8566_v4, %v866_v63  ;;  %v1459_v2 = vsel %vm1409_vm3, %v1394_v62, 1.0  ;;  %v8838_v32 = vpop.f32.mrf.mxu0 }
 0x193   : > { %v1362_v7 = vsel %vm1344_vm2, %v1297_v0, %v1122_v30  ;;  %7184 = vmatmul.msk.f32.gmra.mxu2 %vm1478_vm4, %v1459_v2  ;;  %v765_v30 = vmul.f32 %v8551_v58, %v685_v24  ;;  %14993 = vst [vmem:[#allocation13_spill] sm:$0xff] %v8838_v32 }
 0x194   : > { %v1427_v8 = vsel %vm1409_vm3, %v1362_v7, 1.0 }
 0x195   : > { %7152 = vmatmul.msk.f32.gmra.mxu0 %vm1478_vm4, %v1427_v8 }
 0x196   : > { %887 = vrot.lane.b32.xlu0 %v651_v59, %s8098_s6  ;;  %953 = vrot.lane.b32.xlu2 %v684_v9, %s8098_s6  ;;  %v8840_v1 = vpop.f32.mrf.mxu2  ;;  %v734_v59 = vmul.f32 %v8566_v4, %v654_v51 }
 0x197   : > { %1143 = vrot.lane.b32.xlu1 %v731_v5, %s8099_s24  ;;  %14994 = vst [vmem:[#allocation14_spill] sm:$0xff] %v8840_v1 }
 0x198   : > { %v932_v10 = vpop.permute.xlu0 %931  ;;  %v1128_v17 = vpop.permute.xlu2 %1127 }
 0x199   : > { %v1330_v12 = vsel %vm1279_vm1, %v8551_v58, %v932_v10  ;;  %v1188_v13 = vpop.permute.xlu1 %1187 }
 0x19a   : > { %v1395_v14 = vsel %vm1344_vm2, %v1330_v12, %v1188_v13 }
 0x19b   : > { %v1460_v21 = vsel %vm1409_vm3, %v1395_v14, 1.0 }
 0x19c   : > { %7185 = vmatmul.msk.f32.gmra.mxu2 %vm1478_vm4, %v1460_v21 }
 0x19e   : > { %1209 = vrot.lane.b32.xlu0 %v764_v15, %s8099_s24  ;;  %1145 = vrot.lane.b32.xlu2 %v732_v22, %s8099_s24 }
 0x19f   : > { %889 = vrot.lane.b32.xlu1 %v652_v16, %s8098_s6  ;;  %v8860_v49 = vpop.f32.mrf.mxu2 }
 0x1a0   : > { %v1124_v25 = vpop.permute.xlu0 %1123  ;;  %v874_v31 = vpop.permute.xlu2 %873  ;;  %14995 = vst [vmem:[#allocation15_spill] sm:$0xff] %v8860_v49 }
 0x1a1   : > { %v1363_v26 = vsel %vm1344_vm2, %v1298_v23, %v1124_v25  ;;  %v934_v27 = vpop.permute.xlu1 %933  ;;  %v8855_v44 = vpop.f32.mrf.mxu0  ;;  %v1301_v10 = vsel %vm1279_vm1, %v8566_v4, %v874_v31 }
 0x1a2   : > { %v1331_v28 = vsel %vm1279_vm1, %v8551_v58, %v934_v27  ;;  %v1428_v29 = vsel %vm1409_vm3, %v1363_v26, 1.0 }
 0x1a3   : > { %v1396_v35 = vsel %vm1344_vm2, %v1331_v28, %v1190_v53  ;;  %7153 = vmatmul.msk.f32.gmra.mxu0 %vm1478_vm4, %v1428_v29 }
 0x1a4   : > { %v1461_v36 = vsel %vm1409_vm3, %v1396_v35, 1.0 }
 0x1a5   : > { %7186 = vmatmul.msk.f32.gmra.mxu2 %vm1478_vm4, %v1461_v36 }
 0x1a6   : > { %955 = vrot.lane.b32.xlu0 %v685_v24, %s8098_s6  ;;  %891 = vrot.lane.b32.xlu2 %v653_v37, %s8098_s6 }
 0x1a7   : > { %1211 = vrot.lane.b32.xlu1 %v765_v30, %s8099_s24 }
 0x1a8   : > { %v870_v38 = vpop.permute.xlu0 %869  ;;  %v1196_v43 = vpop.permute.xlu2 %1195 }
 0x1a9   : > { %v1299_v39 = vsel %vm1279_vm1, %v8566_v4, %v870_v38  ;;  %v1126_v40 = vpop.permute.xlu1 %1125  ;;  %v8876_v0 = vpop.f32.mrf.mxu0 }
 0x1aa   : > { %v1364_v41 = vsel %vm1344_vm2, %v1299_v39, %v1126_v40  ;;  %14996 = vst [vmem:[#allocation16_spill] sm:$0xff] %v8876_v0  ;;  %v8881_v2 = vpop.f32.mrf.mxu2 }
 0x1ab   : > { %v1429_v47 = vsel %vm1409_vm3, %v1364_v41, 1.0  ;;  %14997 = vst [vmem:[#allocation17_spill] sm:$0xff] %v8881_v2 }
 0x1ac   : > { %7154 = vmatmul.msk.f32.gmra.mxu0 %vm1478_vm4, %v1429_v47 }
 0x1ae   : > { %1147 = vrot.lane.b32.xlu0 %v733_v3, %s8099_s24  ;;  %1213 = vrot.lane.b32.xlu2 %v766_v48, %s8099_s24 }
 0x1af   : > { %957 = vrot.lane.b32.xlu1 %v686_v42, %s8098_s6 }
 0x1b0   : > { %v1192_v52 = vpop.permute.xlu0 %1191  ;;  %v942_v63 = vpop.permute.xlu2 %941 }
 0x1b1   : > { %v1397_v53 = vsel %vm1344_vm2, %v1332_v50, %v1192_v52  ;;  %v872_v54 = vpop.permute.xlu1 %871  ;;  %v1335_v36 = vsel %vm1279_vm1, %v8551_v58, %v942_v63 }
 0x1b2   : > { %v1300_v55 = vsel %vm1279_vm1, %v8566_v4, %v872_v54  ;;  %v1462_v56 = vsel %vm1409_vm3, %v1397_v53, 1.0  ;;  %v8890_v13 = vpop.f32.mrf.mxu0 }
 0x1b3   : > { %v1365_v60 = vsel %vm1344_vm2, %v1300_v55, %v1128_v17  ;;  %7187 = vmatmul.msk.f32.gmra.mxu2 %vm1478_vm4, %v1462_v56  ;;  %14998 = vst [vmem:[#allocation18_spill] sm:$0xff] %v8890_v13 }
 0x1b4   : > { %v1430_v62 = vsel %vm1409_vm3, %v1365_v60, 1.0 }
 0x1b5   : > { %7155 = vmatmul.msk.f32.gmra.mxu0 %vm1478_vm4, %v1430_v62 }
 0x1b6   : > { %893 = vrot.lane.b32.xlu0 %v654_v51, %s8098_s6  ;;  %v8892_v14 = vpop.f32.mrf.mxu2  ;;  %s12233_s6 = sld [smem:[#allocation3]] }
 0x1b7   : > { %1149 = vrot.lane.b32.xlu1 %v734_v59, %s8099_s24  ;;  %14999 = vst [vmem:[#allocation19_spill] sm:$0xff] %v8892_v14  ;;  %s7392_s24 = sshll.u32 %s7124_s3, 2 }
 0x1b8   : > { %v938_v5 = vpop.permute.xlu0 %937  ;;  %v1134_v12 = vpop.permute.xlu2 %1133  ;;  %s7055_s27 = scalar_lea.hbm %s14747_s9, %s7392_s24 }
 0x1b9   : > { %v1333_v6 = vsel %vm1279_vm1, %v8551_v58, %v938_v5  ;;  %v1194_v7 = vpop.permute.xlu1 %1193  ;;  %s7059_s30 = sshll.u32 %s7055_s27, 4  ;;  %s7060_s30 = int_to_ptr.hbm [resolvable:$true] %s7059_s30 }
 0x1ba   : > { %v1398_v8 = vsel %vm1344_vm2, %v1333_v6, %v1194_v7  ;;  %s8048_s13 = sshra.s32 %s7060_s30, 4  ;;  %s8049_s13 = int_to_ptr.hbm [resolvable:$true] %s8048_s13 }
 0x1bb   : > { %v1463_v9 = vsel %vm1409_vm3, %v1398_v8, 1.0  ;;  %s8050_s14 = scalar_lea.hbm %s8049_s13, 4  ;;  %p8055_p2 = scmp.lt.s32.totalorder %s8049_s13, %s14747_s9 }
 0x1bc   : > { %7188 = vmatmul.msk.f32.gmra.mxu2 %vm1478_vm4, %v1463_v9  ;;  %p8051_p13 = scmp.ne.s32.totalorder %s8049_s13, %s8050_s14  ;;  %p8056_p3 = scmp.lt.s32.totalorder %s8054_s25, %s8050_s14 }
 0x1be   : > { %p8052_p0 = pnand %p8051_p13, %p8197_p6  ;;  %p8057_p4 = por %p8056_p3, %p8055_p2 }
 0x1bf   : > { %v8904_v28 = vpop.f32.mrf.mxu2 }
 0x1c0   : > { %v1130_v15 = vpop.permute.xlu0 %1129  ;;  %v8902_v25 = vpop.f32.mrf.mxu0  ;;  %15001 = vst [vmem:[#allocation21_spill] sm:$0xff] %v8904_v28  ;;  %p8053_p1 = pneg %p8052_p0 }
 0x1c1   : > { %v1366_v16 = vsel %vm1344_vm2, %v1301_v10, %v1130_v15  ;;  %v940_v17 = vpop.permute.xlu1 %939  ;;  %15000 = vst [vmem:[#allocation20_spill] sm:$0xff] %v8902_v25  ;;  %v880_v27 = vpop.permute.xlu2 %879 }
 0x1c2   : > { %v1334_v21 = vsel %vm1279_vm1, %v8551_v58, %v940_v17  ;;  %v1431_v22 = vsel %vm1409_vm3, %v1366_v16, 1.0  ;;  %v1304_v60 = vsel %vm1279_vm1, %v8566_v4, %v880_v27  ;;  %p8058_p5 = pnand %p8057_p4, %p8053_p1 }
 0x1c3   : > { %v1399_v23 = vsel %vm1344_vm2, %v1334_v21, %v1196_v43  ;;  %7156 = vmatmul.msk.f32.gmra.mxu0 %vm1478_vm4, %v1431_v22 }
 0x1c4   : > { %v1464_v24 = vsel %vm1409_vm3, %v1399_v23, 1.0 }
 0x1c5   : > { %7189 = vmatmul.msk.f32.gmra.mxu2 %vm1478_vm4, %v1464_v24 }
 0x1c8   : > { %v876_v26 = vpop.permute.xlu0 %875  ;;  %v8919_v43 = vpop.f32.mrf.mxu2 }
 0x1c9   : > { %v1302_v29 = vsel %vm1279_vm1, %v8566_v4, %v876_v26  ;;  %v1132_v30 = vpop.permute.xlu1 %1131  ;;  %v8914_v40 = vpop.f32.mrf.mxu0  ;;  %15003 = vst [vmem:[#allocation23_spill] sm:$0xff] %v8919_v43 }
 0x1ca   : > { %v1367_v31 = vsel %vm1344_vm2, %v1302_v29, %v1132_v30  ;;  %15002 = vst [vmem:[#allocation22_spill] sm:$0xff] %v8914_v40  ;;  %v1202_v42 = vpop.permute.xlu2 %1201 }
 0x1cb   : > { %v1432_v35 = vsel %vm1409_vm3, %v1367_v31, 1.0 }
 0x1cc   : > { %7157 = vmatmul.msk.f32.gmra.mxu0 %vm1478_vm4, %v1432_v35 }
 0x1d0   : > { %v1198_v37 = vpop.permute.xlu0 %1197 }
 0x1d1   : > { %v1400_v38 = vsel %vm1344_vm2, %v1335_v36, %v1198_v37  ;;  %v878_v39 = vpop.permute.xlu1 %877 }
 0x1d2   : > { %v1303_v41 = vsel %vm1279_vm1, %v8566_v4, %v878_v39  ;;  %v1465_v3 = vsel %vm1409_vm3, %v1400_v38, 1.0  ;;  %v8931_v56 = vpop.f32.mrf.mxu0  ;;  %v948_v59 = vpop.permute.xlu2 %947 }
 0x1d3   : > { %v1368_v47 = vsel %vm1344_vm2, %v1303_v41, %v1134_v12  ;;  %7190 = vmatmul.msk.f32.gmra.mxu2 %vm1478_vm4, %v1465_v3  ;;  %15005 = vst [vmem:[#allocation25_spill] sm:$0xff] %v8931_v56  ;;  %v1338_v24 = vsel %vm1279_vm1, %v8551_v58, %v948_v59 }
 0x1d4   : > { %v1433_v48 = vsel %vm1409_vm3, %v1368_v47, 1.0 }
 0x1d5   : > { %7158 = vmatmul.msk.f32.gmra.mxu0 %vm1478_vm4, %v1433_v48 }
 0x1d6   : > { %v8928_v54 = vpop.f32.mrf.mxu2 }
 0x1d7   : > { %15004 = vst [vmem:[#allocation24_spill] sm:$0xff] %v8928_v54 }
 0x1d8   : > { %v944_v50 = vpop.permute.xlu0 %943 }
 0x1d9   : > { %v1336_v51 = vsel %vm1279_vm1, %v8551_v58, %v944_v50  ;;  %v1200_v52 = vpop.permute.xlu1 %1199 }
 0x1da   : > { %v1401_v53 = vsel %vm1344_vm2, %v1336_v51, %v1200_v52  ;;  %v1140_v15 = vpop.permute.xlu2 %1139 }
 0x1db   : > { %v1466_v55 = vsel %vm1409_vm3, %v1401_v53, 1.0 }
 0x1dc   : > { %7191 = vmatmul.msk.f32.gmra.mxu2 %vm1478_vm4, %v1466_v55 }
 0x1df   : > { %v8945_v12 = vpop.f32.mrf.mxu2 }
 0x1e0   : > { %v1136_v62 = vpop.permute.xlu0 %1135  ;;  %v8942_v9 = vpop.f32.mrf.mxu0 }
 0x1e1   : > { %v1369_v63 = vsel %vm1344_vm2, %v1304_v60, %v1136_v62  ;;  %v946_v5 = vpop.permute.xlu1 %945  ;;  %15006 = vst [vmem:[#allocation26_spill] sm:$0xff] %v8942_v9 }
 0x1e2   : > { %v1434_v6 = vsel %vm1409_vm3, %v1369_v63, 1.0  ;;  %v1337_v7 = vsel %vm1279_vm1, %v8551_v58, %v946_v5  ;;  %v886_v30 = vpop.permute.xlu2 %885 }
 0x1e3   : > { %v1402_v8 = vsel %vm1344_vm2, %v1337_v7, %v1202_v42  ;;  %7159 = vmatmul.msk.f32.gmra.mxu0 %vm1478_vm4, %v1434_v6  ;;  %v1307_v53 = vsel %vm1279_vm1, %v8566_v4, %v886_v30 }
 0x1e4   : > { %v1467_v10 = vsel %vm1409_vm3, %v1402_v8, 1.0 }
 0x1e5   : > { %7192 = vmatmul.msk.f32.gmra.mxu2 %vm1478_vm4, %v1467_v10 }
 0x1e8   : > { %v882_v16 = vpop.permute.xlu0 %881  ;;  %v8957_v27 = vpop.f32.mrf.mxu2 }
 0x1e9   : > { %v1305_v17 = vsel %vm1279_vm1, %v8566_v4, %v882_v16  ;;  %v1138_v21 = vpop.permute.xlu1 %1137  ;;  %v8955_v26 = vpop.f32.mrf.mxu0  ;;  %15008 = vst [vmem:[#allocation28_spill] sm:$0xff] %v8957_v27 }
 0x1ea   : > { %v1370_v22 = vsel %vm1344_vm2, %v1305_v17, %v1138_v21  ;;  %15007 = vst [vmem:[#allocation27_spill] sm:$0xff] %v8955_v26  ;;  %v1208_v51 = vpop.permute.xlu2 %1207 }
 0x1eb   : > { %v1435_v23 = vsel %vm1409_vm3, %v1370_v22, 1.0 }
 0x1ec   : > { %7160 = vmatmul.msk.f32.gmra.mxu0 %vm1478_vm4, %v1435_v23  ;;  %v1886_v23 = vsel %vm1885_vm5, %v8737_v19, 0.0 }
 0x1f0   : > { %v1204_v29 = vpop.permute.xlu0 %1203 }
 0x1f1   : > { %v1403_v31 = vsel %vm1344_vm2, %v1338_v24, %v1204_v29  ;;  %v884_v35 = vpop.permute.xlu1 %883 }
 0x1f2   : > { %v1468_v36 = vsel %vm1409_vm3, %v1403_v31, 1.0  ;;  %v1306_v37 = vsel %vm1279_vm1, %v8566_v4, %v884_v35  ;;  %v8969_v3 = vpop.f32.mrf.mxu0  ;;  %v954_v10 = vpop.permute.xlu2 %953  ;;  %v1889_v35 = vsel %vm1885_vm5, %v8739_v20, 0.0 }
 0x1f3   : > { %v1371_v38 = vsel %vm1344_vm2, %v1306_v37, %v1140_v15  ;;  %7193 = vmatmul.msk.f32.gmra.mxu2 %vm1478_vm4, %v1468_v36  ;;  %15010 = vst [vmem:[#allocation30_spill] sm:$0xff] %v8969_v3 }
 0x1f4   : > { %v1436_v39 = vsel %vm1409_vm3, %v1371_v38, 1.0  ;;  %v1341_v38 = vsel %vm1279_vm1, %v8551_v58, %v954_v10 }
 0x1f5   : > { %7161 = vmatmul.msk.f32.gmra.mxu0 %vm1478_vm4, %v1436_v39 }
 0x1f6   : > { %v8967_v41 = vpop.f32.mrf.mxu2 }
 0x1f7   : > { %15009 = vst [vmem:[#allocation29_spill] sm:$0xff] %v8967_v41 }
 0x1f8   : > { %v950_v42 = vpop.permute.xlu0 %949 }
 0x1f9   : > { %v1339_v47 = vsel %vm1279_vm1, %v8551_v58, %v950_v42  ;;  %v1206_v48 = vpop.permute.xlu1 %1205 }
 0x1fa   : > { %v1404_v50 = vsel %vm1344_vm2, %v1339_v47, %v1206_v48  ;;  %v1146_v39 = vpop.permute.xlu2 %1145 }
 0x1fb   : > { %v1469_v52 = vsel %vm1409_vm3, %v1404_v50, 1.0 }
 0x1fc   : > { %7194 = vmatmul.msk.f32.gmra.mxu2 %vm1478_vm4, %v1469_v52 }
 0x1ff   : > { %v8980_v60 = vpop.f32.mrf.mxu2 }
 0x200   : > { %v1142_v55 = vpop.permute.xlu0 %1141  ;;  %v8978_v59 = vpop.f32.mrf.mxu0  ;;  %15012 = vst [vmem:[#allocation32_spill] sm:$0xff] %v8980_v60 }
 0x201   : > { %15011 = vst [vmem:[#allocation31_spill] sm:$0xff] %v8978_v59  ;;  %v1372_v62 = vsel %vm1344_vm2, %v1307_v53, %v1142_v55  ;;  %v952_v63 = vpop.permute.xlu1 %951 }
 0x202   : > { %v1437_v5 = vsel %vm1409_vm3, %v1372_v62, 1.0  ;;  %v1340_v6 = vsel %vm1279_vm1, %v8551_v58, %v952_v63 }
 0x203   : > { %v1405_v7 = vsel %vm1344_vm2, %v1340_v6, %v1208_v51  ;;  %7162 = vmatmul.msk.f32.gmra.mxu0 %vm1478_vm4, %v1437_v5 }
 0x204   : > { %v1470_v8 = vsel %vm1409_vm3, %v1405_v7, 1.0 }
 0x205   : > { %7195 = vmatmul.msk.f32.gmra.mxu2 %vm1478_vm4, %v1470_v8 }
 0x208   : > { %v888_v15 = vpop.permute.xlu0 %887  ;;  %v8999_v29 = vpop.f32.mrf.mxu2 }
 0x209   : > { %v1308_v16 = vsel %vm1279_vm1, %v8566_v4, %v888_v15  ;;  %v1144_v17 = vpop.permute.xlu1 %1143  ;;  %v8992_v21 = vpop.f32.mrf.mxu0  ;;  %15014 = vst [vmem:[#allocation34_spill] sm:$0xff] %v8999_v29  ;;  %v1891_v37 = vsel %vm1885_vm5, %v8999_v29, 0.0 }
 0x20a   : > { %15013 = vst [vmem:[#allocation33_spill] sm:$0xff] %v8992_v21  ;;  %v1373_v22 = vsel %vm1344_vm2, %v1308_v16, %v1144_v17  ;;  %v1887_v24 = vsel %vm1885_vm5, %v8992_v21, 0.0  ;;  %v1893_v17 = vsel %vm1885_vm5, %v8757_v33, 0.0 }
 0x20b   : > { %v1438_v30 = vsel %vm1409_vm3, %v1373_v22, 1.0  ;;  %v1888_v31 = vadd.f32 %v1887_v24, %v1886_v23 }
 0x20c   : > { %7163 = vmatmul.msk.f32.gmra.mxu0 %vm1478_vm4, %v1438_v30  ;;  %v1896_v30 = vsel %vm1885_vm5, %v8759_v34, 0.0 }
 0x20d   : > { %v1890_v36 = vadd.f32 %v1889_v35, %v1888_v31 }
 0x20f   : > { %v1892_v42 = vadd.f32 %v1891_v37, %v1890_v36 }
 0x210   : > { %v1210_v47 = vpop.permute.xlu0 %1209 }
 0x211   : > { %v1998_v48 = vmul.f32 0.25, %v1892_v42  ;;  %v1406_v50 = vsel %vm1344_vm2, %v1341_v38, %v1210_v47  ;;  %v890_v51 = vpop.permute.xlu1 %889  ;;  %v892_v47 = vpop.permute.xlu2 %891 }
 0x212   : > { %v1471_v52 = vsel %vm1409_vm3, %v1406_v50, 1.0  ;;  %v1309_v53 = vsel %vm1279_vm1, %v8566_v4, %v890_v51  ;;  %v9013_v55 = vpop.f32.mrf.mxu0 }
 0x213   : > { %15015 = vst [vmem:[#allocation35_spill] sm:$0xff] %v9013_v55  ;;  %v9016_v62 = vsub.f32 %v8737_v19, %v1998_v48  ;;  %v9019_v63 = vsub.f32 %v8992_v21, %v1998_v48  ;;  %v9022_v5 = vsub.f32 %v8739_v20, %v1998_v48  ;;  %v9025_v6 = vsub.f32 %v8999_v29, %v1998_v48 }
 0x214   : > { %7196 = vmatmul.msk.f32.gmra.mxu2 %vm1478_vm4, %v1471_v52  ;;  %v1374_v7 = vsel %vm1344_vm2, %v1309_v53, %v1146_v39  ;;  %v1894_v8 = vsel %vm1885_vm5, %v9013_v55, 0.0 }
 0x215   : > { %v2078_v10 = vmul.f32 %v9016_v62, %v9016_v62  ;;  %v2094_v15 = vmul.f32 %v9019_v63, %v9019_v63  ;;  %v2110_v16 = vmul.f32 %v9022_v5, %v9022_v5  ;;  %v1439_v22 = vsel %vm1409_vm3, %v1374_v7, 1.0 }
 0x216   : > { %v1895_v23 = vadd.f32 %v1894_v8, %v1893_v17  ;;  %v9040_v24 = vpop.f32.mrf.mxu2  ;;  %v2126_v31 = vmul.f32 %v9025_v6, %v9025_v6  ;;  %7164 = vmatmul.msk.f32.gmra.mxu0 %vm1478_vm4, %v1439_v22  ;;  %v1310_v22 = vsel %vm1279_vm1, %v8566_v4, %v892_v47 }
 0x217   : > { %15016 = vst [vmem:[#allocation36_spill] sm:$0xff] %v9040_v24  ;;  %v2142_v35 = vsel %vm1885_vm5, %v2078_v10, 0.0  ;;  %v2143_v36 = vsel %vm1885_vm5, %v2094_v15, 0.0  ;;  %v1898_v39 = vsel %vm1885_vm5, %v9040_v24, 0.0  ;;  %v2145_v48 = vsel %vm1885_vm5, %v2110_v16, 0.0 }
 0x218   : > { %v2144_v37 = vadd.f32 %v2143_v36, %v2142_v35  ;;  %v1897_v38 = vadd.f32 %v1896_v30, %v1895_v23  ;;  %v956_v42 = vpop.permute.xlu0 %955  ;;  %v2147_v8 = vsel %vm1885_vm5, %v2126_v31, 0.0 }
 0x219   : > { %v1342_v50 = vsel %vm1279_vm1, %v8551_v58, %v956_v42  ;;  %v1212_v51 = vpop.permute.xlu1 %1211 }
 0x21a   : > { %v2146_v52 = vadd.f32 %v2145_v48, %v2144_v37  ;;  %v1899_v53 = vadd.f32 %v1898_v39, %v1897_v38  ;;  %v1407_v7 = vsel %vm1344_vm2, %v1342_v50, %v1212_v51 }
 0x21b   : > { %v1472_v10 = vsel %vm1409_vm3, %v1407_v7, 1.0  ;;  %v1214_v7 = vpop.permute.xlu2 %1213 }
 0x21c   : > { %v2148_v15 = vadd.f32 %v2147_v8, %v2146_v52  ;;  %v1999_v17 = vmul.f32 0.25, %v1899_v53  ;;  %7197 = vmatmul.msk.f32.gmra.mxu2 %vm1478_vm4, %v1472_v10 }
 0x21e   : > { %v2254_v16 = vmul.f32 0.33333334, %v2148_v15  ;;  %v9061_v23 = vsub.f32 %v8757_v33, %v1999_v17  ;;  %v9064_v58 = vsub.f32 %v9013_v55, %v1999_v17  ;;  %v9067_v30 = vsub.f32 %v8759_v34, %v1999_v17 }
 0x21f   : > { %v9070_v31 = vsub.f32 %v9040_v24, %v1999_v17  ;;  %v9082_v42 = vpop.f32.mrf.mxu2  ;;  %v1900_v15 = vsel %vm1885_vm5, %v8779_v45, 0.0  ;;  %v1910_v55 = vsel %vm1885_vm5, %v8800_v61, 0.0 }
 0x220   : > { %v9072_v35 = vadd.f32 1e-09, %v2254_v16  ;;  %v2079_v36 = vmul.f32 %v9061_v23, %v9061_v23  ;;  %v2095_v4 = vmul.f32 %v9064_v58, %v9064_v58  ;;  %v2111_v37 = vmul.f32 %v9067_v30, %v9067_v30  ;;  %v1148_v38 = vpop.permute.xlu0 %1147  ;;  %v9080_v39 = vpop.f32.mrf.mxu0  ;;  %15018 = vst [vmem:[#allocation38_spill] sm:$0xff] %v9082_v42  ;;  %v8027_v16 = vld [vmem:[%s14738_s0 + $0x3] ss:$0 sm:$0xff] }
 0x221   : > { %15017 = vst [vmem:[#allocation37_spill] sm:$0xff] %v9080_v39  ;;  %v1375_v47 = vsel %vm1344_vm2, %v1310_v22, %v1148_v38  ;;  %v1901_v48 = vsel %vm1885_vm5, %v9080_v39, 0.0  ;;  %v958_v50 = vpop.permute.xlu1 %957  ;;  %v2127_v51 = vmul.f32 %v9070_v31, %v9070_v31 }
 0x222   : > { %7451 = vrsqrt.f32 %v9072_v35  ;;  %v2149_v52 = vsel %vm1885_vm5, %v2079_v36, 0.0  ;;  %v2150_v53 = vsel %vm1885_vm5, %v2095_v4, 0.0  ;;  %v1440_v10 = vsel %vm1409_vm3, %v1375_v47, 1.0 }
 0x223   : > { %v2151_v8 = vadd.f32 %v2150_v53, %v2149_v52  ;;  %v2152_v17 = vsel %vm1885_vm5, %v2111_v37, 0.0  ;;  %v1902_v22 = vadd.f32 %v1901_v48, %v1900_v15  ;;  %v1343_v38 = vsel %vm1279_vm1, %v8027_v16, %v958_v50  ;;  %7165 = vmatmul.msk.f32.gmra.mxu0 %vm1478_vm4, %v1440_v10 }
 0x224   : > { %v1903_v36 = vsel %vm1885_vm5, %v8781_v46, 0.0  ;;  %v1408_v47 = vsel %vm1344_vm2, %v1343_v38, %v1214_v7  ;;  %v2154_v52 = vsel %vm1885_vm5, %v2127_v51, 0.0  ;;  %v1905_v15 = vsel %vm1885_vm5, %v9082_v42, 0.0  ;;  %v8028_v51 = vld [vmem:[%s14738_s0 + $0x1] ss:$0 sm:$0xff] }
 0x225   : > { %v2153_v4 = vadd.f32 %v2152_v17, %v2151_v8  ;;  %v1904_v53 = vadd.f32 %v1903_v36, %v1902_v22  ;;  %v1473_v37 = vsel %vm1409_vm3, %v1408_v47, 1.0  ;;  %vm2292_vm7 = vweird.f32 %v9072_v35 }
 0x226   : > { %7198 = vmatmul.msk.f32.gmra.mxu2 %vm1478_vm4, %v1473_v37 }
 0x227   : > { %v2155_v48 = vadd.f32 %v2154_v52, %v2153_v4  ;;  %v1906_v16 = vadd.f32 %v1905_v15, %v1904_v53  ;;  %v1907_v4 = vsel %vm1885_vm5, %v8796_v57, 0.0 }
 0x228   : > { %v7452_v50 = vpop.eup %7451  ;;  %v894_v10 = vpop.permute.xlu0 %893 }
 0x229   : > { %v2287_v8 = vmul.f32 %v7452_v50, %v9072_v35  ;;  %v2255_v7 = vmul.f32 0.33333334, %v2155_v48  ;;  %v1311_v17 = vsel %vm1279_vm1, %v8028_v51, %v894_v10  ;;  %v9116_v22 = vpop.f32.mrf.mxu0  ;;  %v1150_v38 = vpop.permute.xlu1 %1149  ;;  %v2000_v36 = vmul.f32 0.25, %v1906_v16 }
 0x22a   : > { %15019 = vst [vmem:[#allocation39_spill] sm:$0xff] %v9116_v22  ;;  %v1908_v47 = vsel %vm1885_vm5, %v9116_v22, 0.0  ;;  %v1376_v52 = vsel %vm1344_vm2, %v1311_v17, %v1150_v38  ;;  %v9123_v48 = vpop.f32.mrf.mxu2  ;;  %vm2293_vm6 = vweird.f32 %v7452_v50 }
 0x22b   : > { %v2288_v53 = vmul.f32 %v7452_v50, %v2287_v8  ;;  %v2271_v37 = vadd.f32 1e-09, %v2255_v7  ;;  %15020 = vst [vmem:[#allocation40_spill] sm:$0xff] %v9123_v48  ;;  %v1909_v15 = vadd.f32 %v1908_v47, %v1907_v4  ;;  %v1441_v29 = vsel %vm1409_vm3, %v1376_v52, 1.0  ;;  %vm2294_vm8 = vmor %vm2292_vm7, %vm2293_vm6 }
 0x22c   : > { %v9127_v10 = vsub.f32 %v8779_v45, %v2000_v36  ;;  %v9130_v16 = vsub.f32 %v9080_v39, %v2000_v36  ;;  %v9133_v51 = vsub.f32 %v8781_v46, %v2000_v36  ;;  %v9136_v24 = vsub.f32 %v9082_v42, %v2000_v36  ;;  %7166 = vmatmul.msk.f32.gmra.mxu0 %vm1478_vm4, %v1441_v29 }
 0x22d   : > { %v2289_v8 = vmul.f32 0.5, %v2288_v53  ;;  %7453 = vrsqrt.f32 %v2271_v37  ;;  %v1911_v7 = vadd.f32 %v1910_v55, %v1909_v15  ;;  %v1912_v47 = vsel %vm1885_vm5, %v9123_v48, 0.0 }
 0x22e   : > { %v2080_v17 = vmul.f32 %v9127_v10, %v9127_v10  ;;  %v2096_v38 = vmul.f32 %v9130_v16, %v9130_v16  ;;  %v2112_v4 = vmul.f32 %v9133_v51, %v9133_v51  ;;  %v2128_v29 = vmul.f32 %v9136_v24, %v9136_v24 }
 0x22f   : > { %v2290_v52 = vsub.f32 1.5, %v2289_v8  ;;  %v1913_v36 = vadd.f32 %v1912_v47, %v1911_v7  ;;  %vm2302_vm10 = vweird.f32 %v2271_v37 }
 0x230   : > { %v2156_v55 = vsel %vm1885_vm5, %v2080_v17, 0.0  ;;  %v2157_v53 = vsel %vm1885_vm5, %v2096_v38, 0.0  ;;  %v2159_v21 = vsel %vm1885_vm5, %v2112_v4, 0.0  ;;  %v2161_v38 = vsel %vm1885_vm5, %v2128_v29, 0.0 }
 0x231   : > { %v2291_v15 = vmul.f32 %v7452_v50, %v2290_v52  ;;  %v2158_v42 = vadd.f32 %v2157_v53, %v2156_v55  ;;  %v2001_v39 = vmul.f32 0.25, %v1913_v36 }
 0x233   : > { %v7454_v59 = vpop.eup %7453  ;;  %v9153_v60 = vsel %vm2294_vm8, %v7452_v50, %v2291_v15  ;;  %v2160_v8 = vadd.f32 %v2159_v21, %v2158_v42  ;;  %v9165_v35 = vsub.f32 %v8796_v57, %v2001_v39  ;;  %v9168_v4 = vsub.f32 %v9116_v22, %v2001_v39  ;;  %v9182_v15 = vpop.f32.mrf.mxu0 }
 0x234   : > { %v9157_v7 = vmul.f32 %v9153_v60, %v9019_v63  ;;  %v9161_v17 = vmul.f32 %v9153_v60, %v9025_v6  ;;  %v2297_v47 = vmul.f32 %v7454_v59, %v2271_v37  ;;  %v9171_v21 = vsub.f32 %v8800_v61, %v2001_v39  ;;  %15022 = vst [vmem:[#allocation42_spill] sm:$0xff] %v9182_v15 }
 0x235   : > { %v2162_v52 = vadd.f32 %v2161_v38, %v2160_v8  ;;  %v9174_v50 = vsub.f32 %v9123_v48, %v2001_v39  ;;  %v2081_v6 = vmul.f32 %v9165_v35, %v9165_v35  ;;  %v2097_v36 = vmul.f32 %v9168_v4, %v9168_v4 }
 0x236   : > { %15021 = vst [vmem:[#allocation41_spill] sm:$0xff] %v9161_v17  ;;  %v2298_v42 = vmul.f32 %v7454_v59, %v2297_v47  ;;  %v2113_v29 = vmul.f32 %v9171_v21, %v9171_v21  ;;  %vm2303_vm9 = vweird.f32 %v7454_v59  ;;  %v1915_v22 = vsel %vm1885_vm5, %v9182_v15, 0.0 }
 0x237   : > { %v2256_v63 = vmul.f32 0.33333334, %v2162_v52  ;;  %v2129_v8 = vmul.f32 %v9174_v50, %v9174_v50  ;;  %v2163_v38 = vsel %vm1885_vm5, %v2081_v6, 0.0  ;;  %v2164_v39 = vsel %vm1885_vm5, %v2097_v36, 0.0  ;;  %vm2304_vm11 = vmor %vm2302_vm10, %vm2303_vm9 }
 0x238   : > { %v2299_v55 = vmul.f32 0.5, %v2298_v42  ;;  %v2165_v52 = vadd.f32 %v2164_v39, %v2163_v38  ;;  %v2166_v48 = vsel %vm1885_vm5, %v2113_v29, 0.0  ;;  %v1914_v61 = vsel %vm1885_vm5, %v8815_v11, 0.0  ;;  %v9200_v29 = vpop.f32.mrf.mxu2 }
 0x239   : > { %v2272_v53 = vadd.f32 1e-09, %v2256_v63  ;;  %v2168_v6 = vsel %vm1885_vm5, %v2129_v8, 0.0  ;;  %v1916_v41 = vadd.f32 %v1915_v22, %v1914_v61  ;;  %15024 = vst [vmem:[#allocation44_spill] sm:$0xff] %v9200_v29  ;;  %v1917_v37 = vsel %vm1885_vm5, %v8822_v18, 0.0 }
 0x23a   : > { %v2300_v47 = vsub.f32 1.5, %v2299_v55  ;;  %v2167_v63 = vadd.f32 %v2166_v48, %v2165_v52  ;;  %v1919_v61 = vsel %vm1885_vm5, %v9200_v29, 0.0  ;;  %v2478_v17 = vmul.f32 %v9153_v60, %v9022_v5 }
 0x23b   : > { %7455 = vrsqrt.f32 %v2272_v53  ;;  %vm2312_vm13 = vweird.f32 %v2272_v53 }
 0x23c   : > { %v2301_v42 = vmul.f32 %v7454_v59, %v2300_v47  ;;  %v2169_v55 = vadd.f32 %v2168_v6, %v2167_v63  ;;  %v1918_v47 = vadd.f32 %v1917_v37, %v1916_v41 }
 0x23e   : > { %v9194_v36 = vsel %vm2304_vm11, %v7454_v59, %v2301_v42  ;;  %v2257_v8 = vmul.f32 0.33333334, %v2169_v55  ;;  %v1920_v22 = vadd.f32 %v1919_v61, %v1918_v47  ;;  %v1921_v61 = vsel %vm1885_vm5, %v8838_v32, 0.0 }
 0x23f   : > { %v9198_v38 = vmul.f32 %v9194_v36, %v9064_v58  ;;  %v9206_v48 = vmul.f32 %v9194_v36, %v9070_v31 }
 0x240   : > { %v2273_v58 = vadd.f32 1e-09, %v2257_v8  ;;  %v2002_v42 = vmul.f32 0.25, %v1920_v22  ;;  %v9210_v6 = vpop.f32.mrf.mxu0 }
 0x241   : > { %15023 = vst [vmem:[#allocation43_spill] sm:$0xff] %v9198_v38  ;;  %v7456_v39 = vpop.eup %7455  ;;  %v1922_v41 = vsel %vm1885_vm5, %v9210_v6, 0.0 }
 0x242   : > { %v2307_v59 = vmul.f32 %v7456_v39, %v2272_v53  ;;  %15025 = vst [vmem:[#allocation45_spill] sm:$0xff] %v9210_v6  ;;  %v9213_v38 = vsub.f32 %v8815_v11, %v2002_v42  ;;  %v9216_v31 = vsub.f32 %v9182_v15, %v2002_v42  ;;  %vm2313_vm12 = vweird.f32 %v7456_v39 }
 0x243   : > { %7457 = vrsqrt.f32 %v2273_v58  ;;  %vm2314_vm14 = vmor %vm2312_vm13, %vm2313_vm12  ;;  %v9221_v37 = vsub.f32 %v8822_v18, %v2002_v42  ;;  %v1923_v22 = vadd.f32 %v1922_v41, %v1921_v61  ;;  %v9236_v53 = vsub.f32 %v9200_v29, %v2002_v42 }
 0x244   : > { %v2308_v52 = vmul.f32 %v7456_v39, %v2307_v59  ;;  %v2082_v47 = vmul.f32 %v9213_v38, %v9213_v38  ;;  %v2098_v8 = vmul.f32 %v9216_v31, %v9216_v31  ;;  %vm2322_vm0 = vweird.f32 %v2273_v58 }
 0x245   : > { %v2130_v29 = vmul.f32 %v9236_v53, %v9236_v53 }
 0x246   : > { %v2309_v63 = vmul.f32 0.5, %v2308_v52  ;;  %v2170_v41 = vsel %vm1885_vm5, %v2082_v47, 0.0  ;;  %v3986_v47 = vld [vmem:[%s14742_s4 + $0x18] sm:$0xff] }
 0x247   : > { %4195 = vmatpush.msra.mxu1 %v3986_v47  ;;  %7400 = vmatpush.msra.mxu3 %v3986_v47 }
 0x248   : > { %v2310_v3 = vsub.f32 1.5, %v2309_v63  ;;  %v1924_v63 = vsel %vm1885_vm5, %v8840_v1, 0.0 }
 0x249   : > { %v7458_v52 = vpop.eup %7457  ;;  %v1925_v61 = vadd.f32 %v1924_v63, %v1923_v22  ;;  %v2175_v22 = vsel %vm1885_vm5, %v2130_v29, 0.0  ;;  %v9259_v27 = vpop.f32.mrf.mxu0 }
 0x24a   : > { %v2311_v55 = vmul.f32 %v7456_v39, %v2310_v3  ;;  %v2317_v42 = vmul.f32 %v7458_v52, %v2273_v58  ;;  %15029 = vst [vmem:[#allocation49_spill] sm:$0xff] %v9259_v27  ;;  %vm2323_vm15 = vweird.f32 %v7458_v52 }
 0x24b   : > { %vm2324_vm1 = vmor %vm2322_vm0, %vm2323_vm15 }
 0x24c   : > { %v9229_v59 = vsel %vm2314_vm14, %v7456_v39, %v2311_v55  ;;  %v2114_v39 = vmul.f32 %v9221_v37, %v9221_v37  ;;  %v2171_v55 = vsel %vm1885_vm5, %v2098_v8, 0.0  ;;  %v2318_v11 = vmul.f32 %v7458_v52, %v2317_v42 }
 0x24d   : > { %v9233_v3 = vmul.f32 %v9229_v59, %v9130_v16  ;;  %v9242_v15 = vmul.f32 %v9229_v59, %v9136_v24  ;;  %v9248_v16 = vpop.f32.mrf.mxu2  ;;  %v2172_v18 = vadd.f32 %v2171_v55, %v2170_v41 }
 0x24e   : > { %15028 = vst [vmem:[#allocation48_spill] sm:$0xff] %v9248_v16  ;;  %v1926_v24 = vsel %vm1885_vm5, %v9248_v16, 0.0  ;;  %v2319_v8 = vmul.f32 0.5, %v2318_v11  ;;  %v2446_v11 = vmul.f32 %v9153_v60, %v9016_v62  ;;  %v1929_v62 = vsel %vm1885_vm5, %v9259_v27, 0.0 }
 0x24f   : > { %15026 = vst [vmem:[#allocation46_spill] sm:$0xff] %v9233_v3  ;;  %v2173_v3 = vsel %vm1885_vm5, %v2114_v39, 0.0  ;;  %v1927_v26 = vadd.f32 %v1926_v24, %v1925_v61  ;;  %v3985_v39 = vld [vmem:[%s14742_s4 + $0x10] sm:$0xff] }
 0x250   : > { %15027 = vst [vmem:[#allocation47_spill] sm:$0xff] %v9242_v15  ;;  %v2174_v15 = vadd.f32 %v2173_v3, %v2172_v18  ;;  %v2320_v41 = vsub.f32 1.5, %v2319_v8  ;;  %4196 = vmatpush.msra.mxu1 %v3985_v39  ;;  %7401 = vmatpush.msra.mxu3 %v3985_v39  ;;  %v7199_v58 = vmul.f32 -1.442695, %v2446_v11 }
 0x251   : > { %v2003_v3 = vmul.f32 0.25, %v1927_v26 }
 0x252   : > { %v2176_v63 = vadd.f32 %v2175_v22, %v2174_v15  ;;  %v2321_v55 = vmul.f32 %v7458_v52, %v2320_v41  ;;  %v9302_v39 = vpop.f32.mrf.mxu0 }
 0x253   : > { %v9271_v61 = vsub.f32 %v8838_v32, %v2003_v3  ;;  %v9278_v24 = vsub.f32 %v9210_v6, %v2003_v3  ;;  %v9281_v26 = vsub.f32 %v8840_v1, %v2003_v3  ;;  %v9296_v8 = vsub.f32 %v9248_v16, %v2003_v3  ;;  %15034 = vst [vmem:[#allocation54_spill] sm:$0xff] %v9302_v39 }
 0x254   : > { %v2258_v18 = vmul.f32 0.33333334, %v2176_v63  ;;  %v9266_v29 = vsel %vm2324_vm1, %v7458_v52, %v2321_v55  ;;  %v1928_v63 = vsel %vm1885_vm5, %v8855_v44, 0.0  ;;  %v1936_v11 = vsel %vm1885_vm5, %v9302_v39, 0.0 }
 0x255   : > { %v9275_v42 = vmul.f32 %v9266_v29, %v9168_v4  ;;  %15031 = vst [vmem:[#allocation51_spill] sm:$0xff] %v9281_v26  ;;  %v9287_v52 = vmul.f32 %v9266_v29, %v9174_v50  ;;  %v9289_v47 = vpop.f32.mrf.mxu2  ;;  %v3984_v4 = vld [vmem:[%s14742_s4 + $0x8] sm:$0xff]  ;;  %v2083_v22 = vmul.f32 %v9271_v61, %v9271_v61  ;;  %v2099_v50 = vmul.f32 %v9278_v24, %v9278_v24 }
 0x256   : > { %v9268_v15 = vadd.f32 1e-09, %v2258_v18  ;;  %15033 = vst [vmem:[#allocation53_spill] sm:$0xff] %v9289_v47  ;;  %4197 = vmatpush.msra.mxu1 %v3984_v4  ;;  %7402 = vmatpush.msra.mxu3 %v3984_v4  ;;  %v1930_v41 = vadd.f32 %v1929_v62, %v1928_v63  ;;  %v3983_v18 = vld [vmem:[%s14742_s4] sm:$0xff]  ;;  %v2115_v3 = vmul.f32 %v9281_v26, %v9281_v26  ;;  %v1931_v4 = vsel %vm1885_vm5, %v8860_v49, 0.0 }
 0x257   : > { %15030 = vst [vmem:[#allocation50_spill] sm:$0xff] %v9275_v42  ;;  %v2177_v55 = vsel %vm1885_vm5, %v2083_v22, 0.0  ;;  %v2131_v62 = vmul.f32 %v9296_v8, %v9296_v8  ;;  %v2178_v63 = vsel %vm1885_vm5, %v2099_v50, 0.0  ;;  %v1935_v1 = vsel %vm1885_vm5, %v8876_v0, 0.0 }
 0x258   : > { %15032 = vst [vmem:[#allocation52_spill] sm:$0xff] %v9287_v52  ;;  %7459 = vrsqrt.f32 %v9268_v15  ;;  %4198 = vmatpush.msra.mxu1 %v3983_v18  ;;  %7403 = vmatpush.msra.mxu3 %v3983_v18  ;;  %v2179_v16 = vadd.f32 %v2178_v63, %v2177_v55  ;;  %v1932_v6 = vadd.f32 %v1931_v4, %v1930_v41  ;;  %v1933_v22 = vsel %vm1885_vm5, %v9289_v47, 0.0 }
 0x259   : > { %7461 = vpow2.f32 %v7199_v58  ;;  %v2180_v58 = vsel %vm1885_vm5, %v2115_v3, 0.0  ;;  %v1937_v52 = vadd.f32 %v1936_v11, %v1935_v1  ;;  %v1938_v50 = vsel %vm1885_vm5, %v8881_v2, 0.0 }
 0x25a   : > { %v2181_v42 = vadd.f32 %v2180_v58, %v2179_v16  ;;  %v1934_v26 = vadd.f32 %v1933_v22, %v1932_v6  ;;  %v2182_v41 = vsel %vm1885_vm5, %v2131_v62, 0.0  ;;  %v7231_v62 = vmul.f32 -1.442695, %v2478_v17 }
 0x25b   : > { %v1939_v3 = vadd.f32 %v1938_v50, %v1937_v52  ;;  %vm2332_vm4 = vweird.f32 %v9268_v15 }
 0x25c   : > { %v2183_v63 = vadd.f32 %v2182_v41, %v2181_v42  ;;  %v2004_v57 = vmul.f32 0.25, %v1934_v26 }
 0x25d   : > { %v9325_v9 = vpop.f32.mrf.mxu2 }
 0x25e   : > { %v7460_v18 = vpop.eup %7459  ;;  %15035 = vst [vmem:[#allocation55_spill] sm:$0xff] %v9325_v9  ;;  %v1940_v1 = vsel %vm1885_vm5, %v9325_v9, 0.0  ;;  %v2259_v11 = vmul.f32 0.33333334, %v2183_v63  ;;  %v9337_v58 = vsub.f32 %v8855_v44, %v2004_v57  ;;  %v9343_v60 = vsub.f32 %v8860_v49, %v2004_v57 }
 0x25f   : > { %v2327_v32 = vmul.f32 %v7460_v18, %v9268_v15  ;;  %v7462_v55 = vpop.eup %7461  ;;  %v1941_v22 = vadd.f32 %v1940_v1, %v1939_v3  ;;  %vm2333_vm3 = vweird.f32 %v7460_v18  ;;  %v9347_v5 = vsub.f32 %v9289_v47, %v2004_v57 }
 0x260   : > { %v9334_v16 = vadd.f32 1.0, %v7462_v55  ;;  %v2275_v26 = vadd.f32 1e-09, %v2259_v11  ;;  %v2084_v52 = vmul.f32 %v9337_v58, %v9337_v58  ;;  %vm2334_vm6 = vmor %vm2332_vm4, %vm2333_vm3  ;;  %v2116_v55 = vmul.f32 %v9343_v60, %v9343_v60 }
 0x261   : > { %v2328_v4 = vmul.f32 %v7460_v18, %v2327_v32  ;;  %v9340_v32 = vsub.f32 %v9259_v27, %v2004_v57  ;;  %v2005_v41 = vmul.f32 0.25, %v1941_v22  ;;  %v2132_v15 = vmul.f32 %v9347_v5, %v9347_v5 }
 0x262   : > { %7463 = vrcp.f32 %v9334_v16  ;;  %v2184_v57 = vsel %vm1885_vm5, %v2084_v52, 0.0  ;;  %v2187_v22 = vsel %vm1885_vm5, %v2116_v55, 0.0  ;;  %vm2342_vm8 = vweird.f32 %v2275_v26 }
 0x263   : > { %v2329_v6 = vmul.f32 0.5, %v2328_v4  ;;  %v2100_v17 = vmul.f32 %v9340_v32, %v9340_v32  ;;  %7465 = vrsqrt.f32 %v2275_v26  ;;  %v9371_v11 = vsub.f32 %v8876_v0, %v2005_v41 }
 0x264   : > { %7467 = vpow2.f32 %v7231_v62  ;;  %v9385_v27 = vsub.f32 %v8881_v2, %v2005_v41  ;;  %v9396_v2 = vsub.f32 %v9325_v9, %v2005_v41  ;;  %vm2771_vm11 = vweird.f32 %v9334_v16 }
 0x265   : > { %v2330_v42 = vsub.f32 1.5, %v2329_v6  ;;  %v2185_v63 = vsel %vm1885_vm5, %v2100_v17, 0.0  ;;  %v2189_v17 = vsel %vm1885_vm5, %v2132_v15, 0.0 }
 0x266   : > { %v2186_v6 = vadd.f32 %v2185_v63, %v2184_v57 }
 0x267   : > { %v2331_v50 = vmul.f32 %v7460_v18, %v2330_v42 }
 0x268   : > { %v2188_v42 = vadd.f32 %v2187_v22, %v2186_v6 }
 0x269   : > { %v9356_v4 = vsel %vm2334_vm6, %v7460_v18, %v2331_v50  ;;  %v9373_v18 = vpop.eup %7463 }
 0x26a   : > { %v9362_v3 = vmul.f32 %v9356_v4, %v9216_v31  ;;  %v9368_v1 = vmul.f32 %v9356_v4, %v9236_v53  ;;  %v7466_v62 = vpop.eup %7465  ;;  %v9377_v31 = vsub.f32 %v9302_v39, %v2005_v41  ;;  %v2190_v47 = vadd.f32 %v2189_v17, %v2188_v42 }
 0x26b   : > { %v2337_v52 = vmul.f32 %v7466_v62, %v2275_v26  ;;  %v7468_v50 = vpop.eup %7467  ;;  %v2085_v53 = vmul.f32 %v9371_v11, %v9371_v11  ;;  %v2767_v57 = vmul.f32 %v9373_v18, %v9334_v16  ;;  %v2447_v42 = vmul.f32 %v9194_v36, %v9061_v23 }
 0x26c   : > { %15036 = vst [vmem:[#allocation56_spill] sm:$0xff] %v9362_v3  ;;  %v2101_v55 = vmul.f32 %v9377_v31, %v9377_v31  ;;  %v2260_v6 = vmul.f32 0.33333334, %v2190_v47  ;;  %v9389_v22 = vadd.f32 1.0, %v7468_v50  ;;  %vm2343_vm7 = vweird.f32 %v7466_v62 }
 0x26d   : > { %v2338_v63 = vmul.f32 %v7466_v62, %v2337_v52  ;;  %v2191_v15 = vsel %vm1885_vm5, %v2085_v53, 0.0  ;;  %v2768_v49 = vsub.f32 1.0, %v2767_v57  ;;  %v2117_v47 = vmul.f32 %v9385_v27, %v9385_v27  ;;  %vm2344_vm9 = vmor %vm2342_vm8, %vm2343_vm7 }
 0x26e   : > { %v2276_v17 = vadd.f32 1e-09, %v2260_v6  ;;  %v2192_v0 = vsel %vm1885_vm5, %v2101_v55, 0.0  ;;  %vm2772_vm10 = vweird.f32 %v9373_v18  ;;  %vm3251_vm3 = vweird.f32 %v9389_v22 }
 0x26f   : > { %v2339_v39 = vmul.f32 0.5, %v2338_v63  ;;  %v2193_v50 = vadd.f32 %v2192_v0, %v2191_v15  ;;  %v7200_v63 = vmul.f32 -1.442695, %v2447_v42  ;;  %v2769_v23 = vmul.f32 %v9373_v18, %v2768_v49  ;;  %vm2773_vm12 = vmor %vm2771_vm11, %vm2772_vm10 }
 0x270   : > { %7469 = vrsqrt.f32 %v2276_v17  ;;  %v2194_v41 = vsel %vm1885_vm5, %v2117_v47, 0.0  ;;  %vm2352_vm15 = vweird.f32 %v2276_v17 }
 0x271   : > { %v2340_v52 = vsub.f32 1.5, %v2339_v39  ;;  %7471 = vrcp.f32 %v9389_v22  ;;  %v2133_v39 = vmul.f32 %v9396_v2, %v9396_v2  ;;  %v2195_v0 = vadd.f32 %v2194_v41, %v2193_v50 }
 0x272   : > { %7473 = vpow2.f32 %v7200_v63  ;;  %v2770_v49 = vadd.f32 %v9373_v18, %v2769_v23  ;;  %v2777_v50 = vand.u32 2147483648, %v9334_v16 }
 0x273   : > { %v2341_v53 = vmul.f32 %v7466_v62, %v2340_v52  ;;  %v2196_v42 = vsel %vm1885_vm5, %v2133_v39, 0.0 }
 0x274   : > { %v2197_v52 = vadd.f32 %v2196_v42, %v2195_v0  ;;  %v2774_v63 = vsel %vm2773_vm12, %v9373_v18, %v2770_v49  ;;  %v2778_v39 = vor.u32 1.1754944e-38, %v2777_v50 }
 0x275   : > { %v9402_v55 = vsel %vm2344_vm9, %v7466_v62, %v2341_v53 }
 0x276   : > { %v9409_v57 = vmul.f32 %v9402_v55, %v9278_v24  ;;  %v7470_v6 = vpop.eup %7469  ;;  %v9413_v26 = vmul.f32 %v9402_v55, %v9296_v8  ;;  %v2775_v24 = vand.u32 2147483647, %v9334_v16  ;;  %v2479_v8 = vmul.f32 %v9194_v36, %v9067_v30 }
 0x277   : > { %v7472_v62 = vpop.eup %7471  ;;  %v2347_v15 = vmul.f32 %v7470_v6, %v2276_v17  ;;  %v2261_v53 = vmul.f32 0.33333334, %v2197_v52  ;;  %vm2353_vm14 = vweird.f32 %v7470_v6  ;;  %v9427_v36 = vstv %s1884_s20  ;;  %s13939_s20 = sld [smem:[#allocation4]] }
 0x278   : > { %15037 = vst [vmem:[#allocation57_spill] sm:$0xff] %v9409_v57  ;;  %v3247_v23 = vmul.f32 %v7472_v62, %v9389_v22  ;;  %v7474_v9 = vpop.eup %7473  ;;  %vm2776_vm13 = vcmp.eq.f32.partialorder %v2775_v24, 8.507059e+37  ;;  %v7232_v57 = vmul.f32 -1.442695, %v2479_v8  ;;  %vm2354_vm0 = vmor %vm2352_vm15, %vm2353_vm14  ;;  %vm3252_vm1 = vweird.f32 %v7472_v62 }
 0x279   : > { %15038 = vst [vmem:[#allocation58_spill] sm:$0xff] %v9413_v26  ;;  %v2348_v47 = vmul.f32 %v7470_v6, %v2347_v15  ;;  %v2277_v0 = vadd.f32 1e-09, %v2261_v53  ;;  %v2779_v15 = vsel %vm2776_vm13, %v2778_v39, %v2774_v63  ;;  %v9425_v16 = vadd.f32 1.0, %v7474_v9  ;;  %vm3253_vm4 = vmor %vm3251_vm3, %vm3252_vm1 }
 0x27a   : > { %v3248_v42 = vsub.f32 1.0, %v3247_v23  ;;  %v3726_v30 = vsub.f32 1.0, %v2779_v15  ;;  %v3257_v17 = vand.u32 2147483648, %v9389_v22  ;;  %v2448_v23 = vmul.f32 %v9229_v59, %v9127_v10 }
 0x27b   : > { %v2349_v41 = vmul.f32 0.5, %v2348_v47  ;;  %7475 = vrsqrt.f32 %v2277_v0  ;;  %vm2362_vm8 = vweird.f32 %v2277_v0  ;;  %vm2786_vm11 = vweird.f32 %v9425_v16 }
 0x27c   : > { %v3249_v18 = vmul.f32 %v7472_v62, %v3248_v42  ;;  %7477 = vpow2.f32 %v7232_v57  ;;  %v3791_v52 = vmul.f32 %v9427_v36, %v3726_v30 }
 0x27d   : > { %v2350_v26 = vsub.f32 1.5, %v2349_v41  ;;  %7479 = vrcp.f32 %v9425_v16 }
 0x27e   : > { %v3250_v9 = vadd.f32 %v7472_v62, %v3249_v18 }
 0x27f   : > { %v2351_v3 = vmul.f32 %v7470_v6, %v2350_v26 }
 0x280   : > { %v3254_v53 = vsel %vm3253_vm4, %v7472_v62, %v3250_v9 }
 0x281   : > { %v9429_v49 = vsel %vm2354_vm0, %v7470_v6, %v2351_v3  ;;  %v7476_v24 = vpop.eup %7475  ;;  %v3255_v3 = vand.u32 2147483647, %v9389_v22  ;;  %v3855_v6 = vadd.f32 %v3791_v52, %v2779_v15  ;;  %v7201_v52 = vmul.f32 -1.442695, %v2448_v23 }
 0x282   : > { %v9435_v47 = vmul.f32 %v9429_v49, %v9340_v32  ;;  %v9440_v26 = vmul.f32 %v9429_v49, %v9347_v5  ;;  %v2357_v57 = vmul.f32 %v7476_v24, %v2277_v0  ;;  %v7478_v50 = vpop.eup %7477  ;;  %v3258_v32 = vor.u32 1.1754944e-38, %v3257_v17  ;;  %v9447_v5 = vpop.f32.mrf.mxu0 }
 0x283   : > { %v7480_v63 = vpop.eup %7479  ;;  %v3919_v41 = vmul.f32 %v3855_v6, %v8737_v19  ;;  %vm3256_vm6 = vcmp.eq.f32.partialorder %v3255_v3, 8.507059e+37  ;;  %15041 = vst [vmem:[#allocation61_spill] sm:$0xff] %v9447_v5  ;;  %v9449_v30 = vadd.f32 1.0, %v7478_v50  ;;  %v1943_v62 = vsel %vm1885_vm5, %v9447_v5, 0.0 }
 0x284   : > { %15039 = vst [vmem:[#allocation59_spill] sm:$0xff] %v9435_v47  ;;  %v2358_v8 = vmul.f32 %v7476_v24, %v2357_v57  ;;  %v3259_v42 = vsel %vm3256_vm6, %v3258_v32, %v3254_v53  ;;  %v2782_v18 = vmul.f32 %v7480_v63, %v9425_v16  ;;  %vm2363_vm7 = vweird.f32 %v7476_v24  ;;  %v9465_v53 = vpop.f32.mrf.mxu2 }
 0x285   : > { %15040 = vst [vmem:[#allocation60_spill] sm:$0xff] %v9440_v26  ;;  %7263 = vmatmul.msk.f32.vlgmr.msra.gmra.mxu1 %vm1885_vm5, %v3919_v41  ;;  %v3758_v22 = vsub.f32 1.0, %v3259_v42  ;;  %v1942_v19 = vsel %vm1885_vm5, %v8890_v13, 0.0  ;;  %7481 = vrcp.f32 %v9449_v30  ;;  %vm2364_vm9 = vmor %vm2362_vm8, %vm2363_vm7  ;;  %v2480_v57 = vmul.f32 %v9229_v59, %v9133_v51 }
 0x286   : > { %v2359_v39 = vmul.f32 0.5, %v2358_v8  ;;  %v1944_v17 = vadd.f32 %v1943_v62, %v1942_v19  ;;  %v2783_v3 = vsub.f32 1.0, %v2782_v18  ;;  %7483 = vpow2.f32 %v7201_v52  ;;  %15042 = vst [vmem:[#allocation62_spill] sm:$0xff] %v9465_v53 }
 0x287   : > { %v3823_v9 = vmul.f32 %v9427_v36, %v3758_v22  ;;  %v1945_v50 = vsel %vm1885_vm5, %v8892_v14, 0.0  ;;  %v7233_v59 = vmul.f32 -1.442695, %v2480_v57  ;;  %vm2787_vm10 = vweird.f32 %v7480_v63 }
 0x288   : > { %v2360_v15 = vsub.f32 1.5, %v2359_v39  ;;  %v1946_v32 = vadd.f32 %v1945_v50, %v1944_v17  ;;  %v2784_v23 = vmul.f32 %v7480_v63, %v2783_v3  ;;  %v1947_v39 = vsel %vm1885_vm5, %v9465_v53, 0.0  ;;  %vm2788_vm12 = vmor %vm2786_vm11, %vm2787_vm10 }
 0x289   : > { %v3887_v8 = vadd.f32 %v3823_v9, %v3259_v42  ;;  %v2790_v62 = vand.u32 2147483647, %v9425_v16  ;;  %7485 = vpow2.f32 %v7233_v59  ;;  %v2449_v19 = vmul.f32 %v9266_v29, %v9165_v35 }
 0x28a   : > { %v2361_v10 = vmul.f32 %v7476_v24, %v2360_v15  ;;  %v1948_v22 = vadd.f32 %v1947_v39, %v1946_v32  ;;  %v2785_v15 = vadd.f32 %v7480_v63, %v2784_v23  ;;  %vm3266_vm15 = vweird.f32 %v9449_v30 }
 0x28b   : > { %v9475_v51 = vpop.eup %7481  ;;  %vm2791_vm13 = vcmp.eq.f32.partialorder %v2790_v62, 8.507059e+37  ;;  %v7202_v32 = vmul.f32 -1.442695, %v2449_v19 }
 0x28c   : > { %v9461_v6 = vsel %vm2364_vm9, %v7476_v24, %v2361_v10  ;;  %v3951_v24 = vmul.f32 %v3887_v8, %v8739_v20  ;;  %v7484_v42 = vpop.eup %7483  ;;  %v2006_v18 = vmul.f32 0.25, %v1948_v22  ;;  %v2789_v52 = vsel %vm2788_vm12, %v7480_v63, %v2785_v15 }
 0x28d   : > { %v9469_v0 = vmul.f32 %v9461_v6, %v9377_v31  ;;  %v9473_v41 = vmul.f32 %v9461_v6, %v9396_v2  ;;  %v2792_v2 = vand.u32 2147483648, %v9425_v16  ;;  %v3262_v31 = vmul.f32 %v9475_v51, %v9449_v30 }
 0x28e   : > { %7295 = vmatmul.msk.f32.vlgmr.msra.gmra.mxu3 %vm1885_vm5, %v3951_v24  ;;  %v9486_v20 = vadd.f32 1.0, %v7484_v42  ;;  %v9491_v9 = vsub.f32 %v8890_v13, %v2006_v18  ;;  %v9494_v17 = vsub.f32 %v9447_v5, %v2006_v18  ;;  %v9497_v16 = vsub.f32 %v8892_v14, %v2006_v18 }
 0x28f   : > { %15043 = vst [vmem:[#allocation63_spill] sm:$0xff] %v9469_v0  ;;  %v2793_v10 = vor.u32 1.1754944e-38, %v2792_v2  ;;  %v3263_v3 = vsub.f32 1.0, %v3262_v31  ;;  %v9500_v57 = vsub.f32 %v9465_v53, %v2006_v18  ;;  %v7486_v8 = vpop.eup %7485  ;;  %v2481_v22 = vmul.f32 %v9266_v29, %v9171_v21  ;;  %v9524_v29 = vpop.f32.mrf.mxu0 }
 0x290   : > { %15044 = vst [vmem:[#allocation64_spill] sm:$0xff] %v9473_v41  ;;  %7487 = vrcp.f32 %v9486_v20  ;;  %v2086_v35 = vmul.f32 %v9491_v9, %v9491_v9  ;;  %v2102_v63 = vmul.f32 %v9494_v17, %v9494_v17  ;;  %v2118_v23 = vmul.f32 %v9497_v16, %v9497_v16 }
 0x291   : > { %v2794_v50 = vsel %vm2791_vm13, %v2793_v10, %v2789_v52  ;;  %v3264_v42 = vmul.f32 %v9475_v51, %v3263_v3  ;;  %v2134_v15 = vmul.f32 %v9500_v57, %v9500_v57  ;;  %v9516_v2 = vadd.f32 1.0, %v7486_v8  ;;  %15045 = vst [vmem:[#allocation65_spill] sm:$0xff] %v9524_v29 }
 0x292   : > { %v2198_v59 = vsel %vm1885_vm5, %v2086_v35, 0.0  ;;  %v2199_v24 = vsel %vm1885_vm5, %v2102_v63, 0.0  ;;  %v3727_v39 = vsub.f32 1.0, %v2794_v50  ;;  %vm3267_vm14 = vweird.f32 %v9475_v51 }
 0x293   : > { %v2200_v62 = vadd.f32 %v2199_v24, %v2198_v59  ;;  %7489 = vpow2.f32 %v7202_v32  ;;  %v2201_v31 = vsel %vm1885_vm5, %v2118_v23, 0.0  ;;  %v3265_v10 = vadd.f32 %v9475_v51, %v3264_v42  ;;  %vm9527_vm0 = vmor %vm3266_vm15, %vm3267_vm14 }
 0x294   : > { %v3792_v19 = vmul.f32 %v9427_v36, %v3727_v39  ;;  %v3270_v21 = vand.u32 2147483647, %v9449_v30  ;;  %v7234_v3 = vmul.f32 -1.442695, %v2481_v22  ;;  %v2203_v35 = vsel %vm1885_vm5, %v2134_v15, 0.0 }
 0x295   : > { %v2202_v52 = vadd.f32 %v2201_v31, %v2200_v62  ;;  %v3272_v8 = vand.u32 2147483648, %v9449_v30  ;;  %7491 = vrcp.f32 %v9516_v2  ;;  %v3269_v59 = vsel %vm9527_vm0, %v9475_v51, %v3265_v10 }
 0x296   : > { %v7488_v18 = vpop.eup %7487  ;;  %v3856_v23 = vadd.f32 %v3792_v19, %v2794_v50  ;;  %v1949_v24 = vsel %vm1885_vm5, %v8902_v25, 0.0  ;;  %v1950_v42 = vsel %vm1885_vm5, %v9524_v29, 0.0  ;;  %vm3271_vm1 = vcmp.eq.f32.partialorder %v3270_v21, 8.507059e+37 }
 0x297   : > { %v2204_v32 = vadd.f32 %v2203_v35, %v2202_v52  ;;  %v3273_v39 = vor.u32 1.1754944e-38, %v3272_v8  ;;  %v2797_v22 = vmul.f32 %v7488_v18, %v9486_v20  ;;  %v1951_v62 = vadd.f32 %v1950_v42, %v1949_v24  ;;  %v9544_v52 = vpop.f32.mrf.mxu2 }
 0x298   : > { %v3920_v30 = vmul.f32 %v3856_v23, %v8757_v33  ;;  %v1952_v50 = vsel %vm1885_vm5, %v8904_v28, 0.0  ;;  %7493 = vpow2.f32 %v7234_v3  ;;  %15048 = vst [vmem:[#allocation66_spill] sm:$0xff] %v9544_v52  ;;  %v7215_v10 = vmul.f32 -1.442695, %v9157_v7 }
 0x299   : > { %v2262_v15 = vmul.f32 0.33333334, %v2204_v32  ;;  %v7490_v31 = vpop.eup %7489  ;;  %v3274_v51 = vsel %vm3271_vm1, %v3273_v39, %v3269_v59  ;;  %v2798_v19 = vsub.f32 1.0, %v2797_v22  ;;  %vm2802_vm3 = vweird.f32 %v7488_v18 }
 0x29a   : > { %7264 = vmatmul.msk.f32.gmra.mxu1 %vm1885_vm5, %v3920_v30  ;;  %v3759_v63 = vsub.f32 1.0, %v3274_v51  ;;  %v1953_v33 = vadd.f32 %v1952_v50, %v1951_v62  ;;  %v2805_v8 = vand.u32 2147483647, %v9486_v20  ;;  %v2807_v32 = vand.u32 2147483648, %v9486_v20 }
 0x29b   : > { %v9547_v35 = vadd.f32 1e-09, %v2262_v15  ;;  %v2799_v21 = vmul.f32 %v7488_v18, %v2798_v19  ;;  %v9552_v23 = vpop.eup %7491  ;;  %v9554_v3 = vadd.f32 1.0, %v7490_v31  ;;  %v1954_v59 = vsel %vm1885_vm5, %v9544_v52, 0.0  ;;  %v9563_v15 = vpop.f32.mrf.mxu0 }
 0x29c   : > { %v3824_v7 = vmul.f32 %v9427_v36, %v3759_v63  ;;  %v1955_v24 = vadd.f32 %v1954_v59, %v1953_v33  ;;  %vm2801_vm4 = vweird.f32 %v9486_v20  ;;  %v1959_v42 = vsel %vm1885_vm5, %v8919_v43, 0.0  ;;  %15049 = vst [vmem:[#allocation67_spill] sm:$0xff] %v9563_v15 }
 0x29d   : > { %7495 = vrsqrt.f32 %v9547_v35  ;;  %v2800_v39 = vadd.f32 %v7488_v18, %v2799_v21  ;;  %vm2803_vm6 = vmor %vm2801_vm4, %vm2802_vm3  ;;  %v2808_v30 = vor.u32 1.1754944e-38, %v2807_v32  ;;  %vm2806_vm7 = vcmp.eq.f32.partialorder %v2805_v8, 8.507059e+37 }
 0x29e   : > { %7497 = vpow2.f32 %v7215_v10  ;;  %v3888_v22 = vadd.f32 %v3824_v7, %v3274_v51  ;;  %v7494_v62 = vpop.eup %7493  ;;  %v2007_v31 = vmul.f32 0.25, %v1955_v24  ;;  %v3277_v19 = vmul.f32 %v9552_v23, %v9516_v2 }
 0x29f   : > { %v2804_v50 = vsel %vm2803_vm6, %v7488_v18, %v2800_v39  ;;  %v1956_v20 = vsel %vm1885_vm5, %v8914_v40, 0.0  ;;  %7499 = vrcp.f32 %v9554_v3  ;;  %v1957_v21 = vsel %vm1885_vm5, %v9563_v15, 0.0  ;;  %v9611_v41 = vpop.f32.mrf.mxu2 }
 0x2a0   : > { %v3952_v10 = vmul.f32 %v3888_v22, %v8759_v34  ;;  %v2809_v51 = vsel %vm2806_vm7, %v2808_v30, %v2804_v50  ;;  %v9573_v63 = vsub.f32 %v8902_v25, %v2007_v31  ;;  %v9576_v33 = vsub.f32 %v9524_v29, %v2007_v31  ;;  %15050 = vst [vmem:[#allocation68_spill] sm:$0xff] %v9611_v41 }
 0x2a1   : > { %v9579_v18 = vsub.f32 %v8904_v28, %v2007_v31  ;;  %v9583_v32 = vadd.f32 1.0, %v7494_v62  ;;  %v9587_v34 = vsub.f32 %v9544_v52, %v2007_v31  ;;  %v3728_v7 = vsub.f32 1.0, %v2809_v51 }
 0x2a2   : > { %7296 = vmatmul.msk.f32.gmra.mxu3 %vm1885_vm5, %v3952_v10  ;;  %v3278_v59 = vsub.f32 1.0, %v3277_v19  ;;  %v2450_v24 = vmul.f32 %v9356_v4, %v9213_v38  ;;  %vm2372_vm8 = vweird.f32 %v9547_v35  ;;  %v2087_v22 = vmul.f32 %v9573_v63, %v9573_v63 }
 0x2a3   : > { %v7496_v8 = vpop.eup %7495  ;;  %v2103_v62 = vmul.f32 %v9576_v33, %v9576_v33  ;;  %v2119_v31 = vmul.f32 %v9579_v18, %v9579_v18  ;;  %v1958_v50 = vadd.f32 %v1957_v21, %v1956_v20  ;;  %vm3282_vm9 = vweird.f32 %v9552_v23 }
 0x2a4   : > { %v2367_v39 = vmul.f32 %v7496_v8, %v9547_v35  ;;  %v7498_v30 = vpop.eup %7497  ;;  %v2205_v38 = vsel %vm1885_vm5, %v2087_v22, 0.0  ;;  %v3793_v10 = vmul.f32 %v9427_v36, %v3728_v7  ;;  %v3279_v52 = vmul.f32 %v9552_v23, %v3278_v59 }
 0x2a5   : > { %v9603_v53 = vpop.eup %7499  ;;  %v2135_v29 = vmul.f32 %v9587_v34, %v9587_v34  ;;  %v2206_v5 = vsel %vm1885_vm5, %v2103_v62, 0.0  ;;  %vm3281_vm10 = vweird.f32 %v9516_v2  ;;  %v3285_v20 = vand.u32 2147483647, %v9516_v2 }
 0x2a6   : > { %v2368_v19 = vmul.f32 %v7496_v8, %v2367_v39  ;;  %v2207_v0 = vadd.f32 %v2206_v5, %v2205_v38  ;;  %v3857_v39 = vadd.f32 %v3793_v10, %v2809_v51  ;;  %v3280_v22 = vadd.f32 %v9552_v23, %v3279_v52  ;;  %vm9616_vm12 = vmor %vm3281_vm10, %vm3282_vm9 }
 0x2a7   : > { %vm2373_vm11 = vweird.f32 %v7496_v8  ;;  %v2208_v7 = vsel %vm1885_vm5, %v2119_v31, 0.0  ;;  %v3287_v62 = vand.u32 2147483648, %v9516_v2  ;;  %v1960_v28 = vadd.f32 %v1959_v42, %v1958_v50 }
 0x2a8   : > { %v2369_v21 = vmul.f32 0.5, %v2368_v19  ;;  %v2209_v19 = vadd.f32 %v2208_v7, %v2207_v0  ;;  %v3921_v5 = vmul.f32 %v3857_v39, %v8779_v45  ;;  %v3284_v52 = vsel %vm9616_vm12, %v9552_v23, %v3280_v22  ;;  %vm2374_vm14 = vmor %vm2372_vm8, %vm2373_vm11 }
 0x2a9   : > { %v2210_v51 = vsel %vm1885_vm5, %v2135_v29, 0.0  ;;  %v3288_v31 = vor.u32 1.1754944e-38, %v3287_v62  ;;  %v1961_v38 = vsel %vm1885_vm5, %v9611_v41, 0.0  ;;  %v2812_v10 = vmul.f32 %v9603_v53, %v9554_v3 }
 0x2aa   : > { %v2370_v25 = vsub.f32 1.5, %v2369_v21  ;;  %v2211_v2 = vadd.f32 %v2210_v51, %v2209_v19  ;;  %7265 = vmatmul.msk.f32.gmra.mxu1 %vm1885_vm5, %v3921_v5  ;;  %vm3286_vm13 = vcmp.eq.f32.partialorder %v3285_v20, 8.507059e+37  ;;  %v1962_v0 = vadd.f32 %v1961_v38, %v1960_v28 }
 0x2ab   : > { %7501 = vrcp.f32 %v9583_v32  ;;  %v7203_v45 = vmul.f32 -1.442695, %v2450_v24  ;;  %v3289_v29 = vsel %vm3286_vm13, %v3288_v31, %v3284_v52  ;;  %v2813_v20 = vsub.f32 1.0, %v2812_v10 }
 0x2ac   : > { %v2371_v26 = vmul.f32 %v7496_v8, %v2370_v25  ;;  %v2263_v42 = vmul.f32 0.33333334, %v2211_v2  ;;  %v3760_v50 = vsub.f32 1.0, %v3289_v29  ;;  %v2008_v21 = vmul.f32 0.25, %v1962_v0 }
 0x2ad   : > { %7503 = vpow2.f32 %v7203_v45  ;;  %v2814_v5 = vmul.f32 %v9603_v53, %v2813_v20  ;;  %vm2817_vm15 = vweird.f32 %v9603_v53  ;;  %vm2816_vm0 = vweird.f32 %v9554_v3 }
 0x2ae   : > { %v9635_v23 = vsel %vm2374_vm14, %v7496_v8, %v2371_v26  ;;  %v9645_v24 = vadd.f32 1e-09, %v2263_v42  ;;  %v3825_v35 = vmul.f32 %v9427_v36, %v3760_v50  ;;  %v9649_v39 = vsub.f32 %v8914_v40, %v2008_v21  ;;  %vm9684_vm1 = vmor %vm2816_vm0, %vm2817_vm15 }
 0x2af   : > { %v9639_v25 = vmul.f32 %v9635_v23, %v9494_v17  ;;  %v9643_v28 = vmul.f32 %v9635_v23, %v9500_v57  ;;  %v9652_v26 = vsub.f32 %v9563_v15, %v2008_v21  ;;  %v9654_v8 = vadd.f32 1.0, %v7498_v30 }
 0x2b0   : > { %15055 = vst [vmem:[#allocation71_spill] sm:$0xff] %v9649_v39  ;;  %v9657_v17 = vsub.f32 %v8919_v43, %v2008_v21  ;;  %7505 = vrsqrt.f32 %v9645_v24  ;;  %v3889_v57 = vadd.f32 %v3825_v35, %v3289_v29  ;;  %v9663_v7 = vsub.f32 %v9611_v41, %v2008_v21 }
 0x2b1   : > { %15053 = vst [vmem:[#allocation69_spill] sm:$0xff] %v9639_v25  ;;  %v9660_v22 = vpop.eup %7501  ;;  %v2088_v59 = vmul.f32 %v9649_v39, %v9649_v39  ;;  %v2104_v62 = vmul.f32 %v9652_v26, %v9652_v26  ;;  %7507 = vrcp.f32 %v9654_v8  ;;  %v2820_v10 = vand.u32 2147483647, %v9554_v3  ;;  %v15071_v25 = vld [vmem:[#allocation51_spill] sm:$0xff] }
 0x2b2   : > { %15054 = vst [vmem:[#allocation70_spill] sm:$0xff] %v9643_v28  ;;  %v3953_v30 = vmul.f32 %v3889_v57, %v8781_v46  ;;  %v2120_v19 = vmul.f32 %v9657_v17, %v9657_v17  ;;  %v2136_v52 = vmul.f32 %v9663_v7, %v9663_v7  ;;  %v2815_v46 = vadd.f32 %v9603_v53, %v2814_v5 }
 0x2b3   : > { %15056 = vst [vmem:[#allocation72_spill] sm:$0xff] %v9657_v17  ;;  %v2212_v51 = vsel %vm1885_vm5, %v2088_v59, 0.0  ;;  %v2213_v31 = vsel %vm1885_vm5, %v2104_v62, 0.0  ;;  %v7504_v2 = vpop.eup %7503  ;;  %v2822_v29 = vand.u32 2147483648, %v9554_v3  ;;  %v3292_v42 = vmul.f32 %v9660_v22, %v9583_v32 }
 0x2b4   : > { %7297 = vmatmul.msk.f32.gmra.mxu3 %vm1885_vm5, %v3953_v30  ;;  %v2214_v38 = vadd.f32 %v2213_v31, %v2212_v51  ;;  %v2215_v0 = vsel %vm1885_vm5, %v2120_v19, 0.0  ;;  %v7248_v21 = vmul.f32 -1.442695, %v9206_v48  ;;  %v2482_v20 = vmul.f32 %v9356_v4, %v9221_v37 }
 0x2b5   : > { %v2819_v57 = vsel %vm9684_vm1, %v9603_v53, %v2815_v46  ;;  %v2217_v62 = vsel %vm1885_vm5, %v2136_v52, 0.0  ;;  %v2823_v30 = vor.u32 1.1754944e-38, %v2822_v29  ;;  %v3293_v3 = vsub.f32 1.0, %v3292_v42 }
 0x2b6   : > { %v7506_v50 = vpop.eup %7505  ;;  %v2216_v35 = vadd.f32 %v2215_v0, %v2214_v38  ;;  %v1963_v19 = vsel %vm1885_vm5, %v8931_v56, 0.0  ;;  %vm2821_vm3 = vcmp.eq.f32.partialorder %v2820_v10, 8.507059e+37  ;;  %v9703_v51 = vadd.f32 1.0, %v7504_v2 }
 0x2b7   : > { %v2377_v59 = vmul.f32 %v7506_v50, %v9645_v24  ;;  %v9701_v48 = vpop.eup %7507  ;;  %v2824_v4 = vsel %vm2821_vm3, %v2823_v30, %v2819_v57  ;;  %v3294_v31 = vmul.f32 %v9660_v22, %v3293_v3  ;;  %v1966_v53 = vsel %vm1885_vm5, %v8928_v54, 0.0 }
 0x2b8   : > { %v2218_v5 = vadd.f32 %v2217_v62, %v2216_v35  ;;  %v9710_v52 = vsel %vm1885_vm5, %v8945_v12, 0.0  ;;  %v3729_v46 = vsub.f32 1.0, %v2824_v4  ;;  %7509 = vpow2.f32 %v7248_v21  ;;  %v9723_v21 = vpop.f32.mrf.mxu0 }
 0x2b9   : > { %v2378_v37 = vmul.f32 %v7506_v50, %v2377_v59  ;;  %v7235_v0 = vmul.f32 -1.442695, %v2482_v20  ;;  %vm3297_vm4 = vweird.f32 %v9660_v22  ;;  %v3302_v10 = vand.u32 2147483648, %v9583_v32  ;;  %15059 = vst [vmem:[#allocation73_spill] sm:$0xff] %v9723_v21 }
 0x2ba   : > { %v2264_v38 = vmul.f32 0.33333334, %v2218_v5  ;;  %v3007_v2 = vmul.f32 %v9701_v48, %v9654_v8  ;;  %v3300_v42 = vand.u32 2147483647, %v9583_v32  ;;  %7511 = vrcp.f32 %v9703_v51 }
 0x2bb   : > { %v2379_v45 = vmul.f32 0.5, %v2378_v37  ;;  %v3794_v35 = vmul.f32 %v9427_v36, %v3729_v46  ;;  %v3295_v57 = vadd.f32 %v9660_v22, %v3294_v31  ;;  %vm3296_vm6 = vweird.f32 %v9583_v32  ;;  %v15060_v37 = vld [vmem:[#allocation41_spill] sm:$0xff] }
 0x2bc   : > { %v9716_v29 = vadd.f32 1e-09, %v2264_v38  ;;  %v2451_v20 = vmul.f32 %v9402_v55, %v9271_v61  ;;  %vm2383_vm7 = vweird.f32 %v7506_v50  ;;  %vm3298_vm8 = vmor %vm3296_vm6, %vm3297_vm4  ;;  %v3303_v3 = vor.u32 1.1754944e-38, %v3302_v10  ;;  %v15061_v38 = vld [vmem:[#allocation9_spill] sm:$0xff] }
 0x2bd   : > { %v2380_v59 = vsub.f32 1.5, %v2379_v45  ;;  %v3858_v62 = vadd.f32 %v3794_v35, %v2824_v4  ;;  %v3299_v30 = vsel %vm3298_vm8, %v9660_v22, %v3295_v57  ;;  %vm2382_vm9 = vweird.f32 %v9645_v24  ;;  %v15063_v35 = vld [vmem:[#allocation28_spill] sm:$0xff] }
 0x2be   : > { %7513 = vrsqrt.f32 %v9716_v29  ;;  %vm3301_vm10 = vcmp.eq.f32.partialorder %v3300_v42, 8.507059e+37  ;;  %v1964_v32 = vsel %vm1885_vm5, %v9723_v21, 0.0  ;;  %v7510_v61 = vpop.eup %7509  ;;  %v7247_v31 = vmul.f32 -1.442695, %v15060_v37  ;;  %vm2384_vm11 = vmor %vm2382_vm9, %vm2383_vm7 }
 0x2bf   : > { %7515 = vpow2.f32 %v7235_v0  ;;  %v2381_v5 = vmul.f32 %v7506_v50, %v2380_v59  ;;  %v3922_v46 = vmul.f32 %v3858_v62, %v15061_v38  ;;  %v3304_v45 = vsel %vm3301_vm10, %v3303_v3, %v3299_v30  ;;  %v15062_v0 = vld [vmem:[#allocation26_spill] sm:$0xff]  ;;  %v15067_v30 = vld [vmem:[#allocation27_spill] sm:$0xff] }
 0x2c0   : > { %v1965_v15 = vadd.f32 %v1964_v32, %v1963_v19  ;;  %v9738_v4 = vsel %vm1885_vm5, %v15062_v0, 0.0  ;;  %v7204_v22 = vmul.f32 -1.442695, %v2451_v20  ;;  %v3761_v24 = vsub.f32 1.0, %v3304_v45  ;;  %v9742_v42 = vpop.eup %7511  ;;  %v15069_v38 = vld [vmem:[#allocation30_spill] sm:$0xff] }
 0x2c1   : > { %v9740_v10 = vsel %vm2384_vm11, %v7506_v50, %v2381_v5  ;;  %v9746_v57 = vsel %vm1885_vm5, %v15063_v35, 0.0  ;;  %v3008_v59 = vsub.f32 1.0, %v3007_v2  ;;  %7266 = vmatmul.msk.f32.gmra.mxu1 %vm1885_vm5, %v3922_v46  ;;  %v9757_v50 = vpop.f32.mrf.mxu2  ;;  %v9761_v3 = vsel %vm1885_vm5, %v15067_v30, 0.0  ;;  %v15068_v5 = vld [vmem:[#allocation46_spill] sm:$0xff] }
 0x2c2   : > { %v9750_v62 = vmul.f32 %v9740_v10, %v9576_v33  ;;  %v9754_v19 = vmul.f32 %v9740_v10, %v9587_v34  ;;  %15066 = vst [vmem:[#allocation26_spill] sm:$0xff] %v9757_v50  ;;  %v7217_v32 = vmul.f32 -1.442695, %v15068_v5  ;;  %v3826_v2 = vmul.f32 %v9427_v36, %v3761_v24  ;;  %v15070_v24 = vld [vmem:[#allocation29_spill] sm:$0xff] }
 0x2c3   : > { %v1967_v37 = vadd.f32 %v1966_v53, %v1965_v15  ;;  %v9767_v41 = vsel %vm1885_vm5, %v15069_v38, 0.0  ;;  %7517 = vpow2.f32 %v7247_v31  ;;  %v9769_v34 = vadd.f32 1.0, %v7510_v61 }
 0x2c4   : > { %15064 = vst [vmem:[#allocation41_spill] sm:$0xff] %v9750_v62  ;;  %v7514_v20 = vpop.eup %7513  ;;  %7519 = vpow2.f32 %v7204_v22  ;;  %v1968_v28 = vsel %vm1885_vm5, %v9757_v50, 0.0  ;;  %v2827_v5 = vmul.f32 %v9742_v42, %v9703_v51  ;;  %v9778_v15 = vsel %vm1885_vm5, %v15070_v24, 0.0  ;;  %v15072_v22 = vld [vmem:[#allocation10_spill] sm:$0xff] }
 0x2c5   : > { %15065 = vst [vmem:[#allocation9_spill] sm:$0xff] %v9754_v19  ;;  %v7516_v33 = vpop.eup %7515  ;;  %v2387_v46 = vmul.f32 %v7514_v20, %v9716_v29  ;;  %v3890_v19 = vadd.f32 %v3826_v2, %v3304_v45  ;;  %v3009_v53 = vmul.f32 %v9701_v48, %v3008_v59  ;;  %v1969_v31 = vadd.f32 %v1968_v28, %v1967_v37 }
 0x2c6   : > { %7521 = vpow2.f32 %v7217_v32  ;;  %v9781_v61 = vadd.f32 1.0, %v7516_v33  ;;  %v2483_v45 = vmul.f32 %v9402_v55, %v15071_v25  ;;  %v3015_v43 = vand.u32 2147483647, %v9654_v8 }
 0x2c7   : > { %v2388_v62 = vmul.f32 %v7514_v20, %v2387_v46  ;;  %v3954_v2 = vmul.f32 %v3890_v19, %v15072_v22  ;;  %7523 = vrcp.f32 %v9769_v34  ;;  %v2009_v14 = vmul.f32 0.25, %v1969_v31  ;;  %v15073_v46 = vld [vmem:[#allocation43_spill] sm:$0xff] }
 0x2c8   : > { %vm3012_vm12 = vweird.f32 %v9701_v48  ;;  %v3017_v59 = vand.u32 2147483648, %v9654_v8  ;;  %v7216_v28 = vmul.f32 -1.442695, %v15073_v46  ;;  %v2828_v32 = vsub.f32 1.0, %v2827_v5 }
 0x2c9   : > { %v2389_v40 = vmul.f32 0.5, %v2388_v62  ;;  %7298 = vmatmul.msk.f32.gmra.mxu3 %vm1885_vm5, %v3954_v2  ;;  %v7518_v37 = vpop.eup %7517  ;;  %vm2393_vm13 = vweird.f32 %v7514_v20  ;;  %v9793_v55 = vsub.f32 %v8931_v56, %v2009_v14  ;;  %v9796_v25 = vsub.f32 %v9723_v21, %v2009_v14  ;;  %v15076_v21 = vld [vmem:[#allocation32_spill] sm:$0xff] }
 0x2ca   : > { %v7520_v62 = vpop.eup %7519  ;;  %v3010_v19 = vadd.f32 %v9701_v48, %v3009_v53  ;;  %7525 = vrcp.f32 %v9781_v61  ;;  %v7236_v31 = vmul.f32 -1.442695, %v2483_v45  ;;  %vm2392_vm14 = vweird.f32 %v9716_v29 }
 0x2cb   : > { %v2390_v33 = vsub.f32 1.5, %v2389_v40  ;;  %15074 = vst [vmem:[#allocation28_spill] sm:$0xff] %v9793_v55  ;;  %v9802_v5 = vsub.f32 %v8928_v54, %v2009_v14  ;;  %v2089_v40 = vmul.f32 %v9793_v55, %v9793_v55  ;;  %v2105_v2 = vmul.f32 %v9796_v25, %v9796_v25  ;;  %vm2394_vm0 = vmor %vm2392_vm14, %vm2393_vm13 }
 0x2cc   : > { %v7522_v46 = vpop.eup %7521  ;;  %v9810_v56 = vsel %vm1885_vm5, %v15076_v21, 0.0  ;;  %v9812_v53 = vadd.f32 1.0, %v7518_v37  ;;  %vm3011_vm15 = vweird.f32 %v9654_v8  ;;  %v2829_v29 = vmul.f32 %v9742_v42, %v2828_v32  ;;  %v9893_v21 = vpop.f32.mrf.mxu0 }
 0x2cd   : > { %v2391_v22 = vmul.f32 %v7514_v20, %v2390_v33  ;;  %15075 = vst [vmem:[#allocation27_spill] sm:$0xff] %v9802_v5  ;;  %v9817_v45 = vpop.eup %7523  ;;  %vm9821_vm1 = vmor %vm3011_vm15, %vm3012_vm12  ;;  %7527 = vpow2.f32 %v7216_v28  ;;  %v9825_v54 = vadd.f32 1.0, %v7520_v62  ;;  %v9830_v37 = vsub.f32 %v9757_v50, %v2009_v14 }
 0x2ce   : > { %15077 = vst [vmem:[#allocation46_spill] sm:$0xff] %v9810_v56  ;;  %v3014_v8 = vsel %vm9821_vm1, %v9701_v48, %v3010_v19  ;;  %vm9835_vm3 = vcmp.eq.f32.partialorder %v3015_v43, 8.507059e+37  ;;  %v3018_v13 = vor.u32 1.1754944e-38, %v3017_v59  ;;  %7529 = vpow2.f32 %v7236_v31 }
 0x2cf   : > { %v9827_v47 = vsel %vm2394_vm0, %v7514_v20, %v2391_v22  ;;  %v9839_v55 = vadd.f32 1.0, %v7522_v46  ;;  %v2121_v28 = vmul.f32 %v9802_v5, %v9802_v5  ;;  %v2219_v20 = vsel %vm1885_vm5, %v2089_v40, 0.0  ;;  %15089 = vst [vmem:[#allocation10_spill] sm:$0xff] %v9893_v21 }
 0x2d0   : > { %15080 = vst [vmem:[#allocation30_spill] sm:$0xff] %v9827_v47  ;;  %v2220_v14 = vsel %vm1885_vm5, %v2105_v2, 0.0  ;;  %v9845_v62 = vpop.eup %7525  ;;  %v3502_v48 = vmul.f32 %v9817_v45, %v9769_v34  ;;  %v9851_v43 = vmul.f32 %v9827_v47, %v9652_v26  ;;  %v2830_v59 = vadd.f32 %v9742_v42, %v2829_v29 }
 0x2d1   : > { %vm2832_vm4 = vweird.f32 %v9742_v42  ;;  %7531 = vrcp.f32 %v9825_v54  ;;  %v9858_v19 = vmul.f32 %v9827_v47, %v9663_v7  ;;  %v2137_v31 = vmul.f32 %v9830_v37, %v9830_v37  ;;  %v15085_v7 = vld [vmem:[#allocation50_spill] sm:$0xff] }
 0x2d2   : > { %15083 = vst [vmem:[#allocation29_spill] sm:$0xff] %v9851_v43  ;;  %v2837_v22 = vand.u32 2147483648, %v9703_v51  ;;  %v3510_v40 = vand.u32 2147483647, %v9769_v34  ;;  %v2221_v2 = vadd.f32 %v2220_v14, %v2219_v20  ;;  %vm2831_vm6 = vweird.f32 %v9703_v51 }
 0x2d3   : > { %15084 = vst [vmem:[#allocation51_spill] sm:$0xff] %v9858_v19  ;;  %v2835_v26 = vand.u32 2147483647, %v9703_v51  ;;  %v7528_v46 = vpop.eup %7527  ;;  %v9868_v29 = vsel %vm9835_vm3, %v3018_v13, %v3014_v8  ;;  %7533 = vrcp.f32 %v9839_v55  ;;  %v7218_v33 = vmul.f32 -1.442695, %v15085_v7  ;;  %vm9873_vm7 = vmor %vm2831_vm6, %vm2832_vm4 }
 0x2d4   : > { %v2222_v50 = vsel %vm1885_vm5, %v2121_v28, 0.0  ;;  %v7530_v20 = vpop.eup %7529  ;;  %v3503_v14 = vsub.f32 1.0, %v3502_v48  ;;  %v2834_v51 = vsel %vm9873_vm7, %v9742_v42, %v2830_v59  ;;  %v3307_v13 = vmul.f32 %v9845_v62, %v9781_v61 }
 0x2d5   : > { %v2223_v19 = vadd.f32 %v2222_v50, %v2221_v2  ;;  %v3512_v8 = vand.u32 2147483648, %v9769_v34  ;;  %v2452_v32 = vmul.f32 %v9429_v49, %v9337_v58  ;;  %v2224_v28 = vsel %vm1885_vm5, %v2137_v31, 0.0  ;;  %v15088_v50 = vld [vmem:[#allocation47_spill] sm:$0xff] }
 0x2d6   : > { %v2838_v7 = vor.u32 1.1754944e-38, %v2837_v22  ;;  %v3742_v5 = vsub.f32 1.0, %v9868_v29  ;;  %vm3506_vm8 = vweird.f32 %v9769_v34  ;;  %v7249_v48 = vmul.f32 -1.442695, %v15088_v50  ;;  %v9941_v34 = vpop.f32.mrf.mxu2 }
 0x2d7   : > { %v2225_v2 = vadd.f32 %v2224_v28, %v2223_v19  ;;  %vm2836_vm9 = vcmp.eq.f32.partialorder %v2835_v26, 8.507059e+37  ;;  %v9889_v42 = vpop.eup %7531  ;;  %7535 = vpow2.f32 %v7218_v33  ;;  %v9891_v43 = vadd.f32 1.0, %v7530_v20  ;;  %15096 = vst [vmem:[#allocation50_spill] sm:$0xff] %v9941_v34 }
 0x2d8   : > { %v2839_v59 = vsel %vm2836_vm9, %v2838_v7, %v2834_v51  ;;  %v3308_v17 = vsub.f32 1.0, %v3307_v13  ;;  %v3504_v58 = vmul.f32 %v9817_v45, %v3503_v14  ;;  %v3317_v47 = vand.u32 2147483648, %v9781_v61 }
 0x2d9   : > { %v2265_v31 = vmul.f32 0.33333334, %v2225_v2  ;;  %v3730_v22 = vsub.f32 1.0, %v2839_v59  ;;  %v9897_v39 = vpop.eup %7533  ;;  %v7205_v50 = vmul.f32 -1.442695, %v2452_v32  ;;  %vm3312_vm10 = vweird.f32 %v9845_v62 }
 0x2da   : > { %v3309_v19 = vmul.f32 %v9845_v62, %v3308_v17  ;;  %v3315_v26 = vand.u32 2147483647, %v9781_v61  ;;  %v1971_v14 = vsel %vm1885_vm5, %v9893_v21, 0.0  ;;  %v2842_v51 = vmul.f32 %v9889_v42, %v9825_v54 }
 0x2db   : > { %v9902_v33 = vadd.f32 1e-09, %v2265_v31  ;;  %v3795_v20 = vmul.f32 %v9427_v36, %v3730_v22  ;;  %vm3507_vm11 = vweird.f32 %v9817_v45  ;;  %7537 = vrcp.f32 %v9891_v43 }
 0x2dc   : > { %v3310_v17 = vadd.f32 %v9845_v62, %v3309_v19  ;;  %vm3311_vm12 = vweird.f32 %v9781_v61  ;;  %v3505_v13 = vadd.f32 %v9817_v45, %v3504_v58  ;;  %v3037_v32 = vmul.f32 %v9897_v39, %v9839_v55  ;;  %vm9927_vm15 = vmor %vm3506_vm8, %vm3507_vm11 }
 0x2dd   : > { %7539 = vrsqrt.f32 %v9902_v33  ;;  %vm3313_vm13 = vmor %vm3311_vm12, %vm3312_vm10  ;;  %v3318_v28 = vor.u32 1.1754944e-38, %v3317_v47  ;;  %v7536_v7 = vpop.eup %7535  ;;  %v3859_v2 = vadd.f32 %v3795_v20, %v2839_v59  ;;  %vm3316_vm14 = vcmp.eq.f32.partialorder %v3315_v26, 8.507059e+37 }
 0x2de   : > { %v3314_v31 = vsel %vm3313_vm13, %v9845_v62, %v3310_v17  ;;  %v1972_v22 = vadd.f32 %v1971_v14, %v9738_v4  ;;  %v2484_v19 = vmul.f32 %v9429_v49, %v9343_v60  ;;  %7541 = vpow2.f32 %v7205_v50  ;;  %v15095_v4 = vld [vmem:[#allocation11_spill] sm:$0xff] }
 0x2df   : > { %v3319_v61 = vsel %vm3316_vm14, %v3318_v28, %v3314_v31  ;;  %v2843_v58 = vsub.f32 1.0, %v2842_v51  ;;  %v9921_v56 = vadd.f32 1.0, %v7528_v46  ;;  %vm9931_vm0 = vcmp.eq.f32.partialorder %v3510_v40, 8.507059e+37 }
 0x2e0   : > { %v3923_v59 = vmul.f32 %v3859_v2, %v15095_v4  ;;  %v3762_v60 = vsub.f32 1.0, %v3319_v61  ;;  %v3509_v49 = vsel %vm9927_vm15, %v9817_v45, %v3505_v13  ;;  %v3513_v46 = vor.u32 1.1754944e-38, %v3512_v8 }
 0x2e1   : > { %15090 = vst [vmem:[#allocation43_spill] sm:$0xff] %v9921_v56  ;;  %v3038_v50 = vsub.f32 1.0, %v3037_v32  ;;  %v9939_v26 = vadd.f32 1.0, %v7536_v7  ;;  %v9943_v20 = vpop.eup %7537  ;;  %v9946_v40 = vmul.f32 %v9427_v36, %v3742_v5  ;;  %7543 = vpow2.f32 %v7249_v48 }
 0x2e2   : > { %7267 = vmatmul.msk.f32.gmra.mxu1 %vm1885_vm5, %v3923_v59  ;;  %v3827_v14 = vmul.f32 %v9427_v36, %v3762_v60  ;;  %v1974_v51 = vadd.f32 %v9710_v52, %v1972_v22  ;;  %v3045_v45 = vand.u32 2147483647, %v9839_v55  ;;  %v3047_v8 = vand.u32 2147483648, %v9839_v55 }
 0x2e3   : > { %v7540_v17 = vpop.eup %7539  ;;  %v7237_v13 = vmul.f32 -1.442695, %v2484_v19  ;;  %v2844_v32 = vmul.f32 %v9889_v42, %v2843_v58  ;;  %v9956_v28 = vsel %vm9931_vm0, %v3513_v46, %v3509_v49  ;;  %v1975_v7 = vsel %vm1885_vm5, %v9941_v34, 0.0  ;;  %v15097_v58 = vld [vmem:[#allocation12_spill] sm:$0xff] }
 0x2e4   : > { %v2397_v5 = vmul.f32 %v7540_v17, %v9902_v33  ;;  %v3891_v48 = vadd.f32 %v3827_v14, %v3319_v61  ;;  %v7542_v2 = vpop.eup %7541  ;;  %v3039_v52 = vmul.f32 %v9897_v39, %v3038_v50  ;;  %7545 = vrcp.f32 %v9939_v26 }
 0x2e5   : > { %v1976_v31 = vadd.f32 %v1975_v7, %v1974_v51  ;;  %v2845_v22 = vadd.f32 %v9889_v42, %v2844_v32  ;;  %vm2846_vm1 = vweird.f32 %v9825_v54  ;;  %vm2847_vm3 = vweird.f32 %v9889_v42 }
 0x2e6   : > { %v2398_v19 = vmul.f32 %v7540_v17, %v2397_v5  ;;  %v3955_v47 = vmul.f32 %v3891_v48, %v15097_v58  ;;  %7547 = vpow2.f32 %v7237_v13  ;;  %vm9967_vm4 = vmor %vm2846_vm1, %vm2847_vm3  ;;  %v2850_v4 = vand.u32 2147483647, %v9825_v54 }
 0x2e7   : > { %v2010_v61 = vmul.f32 0.25, %v1976_v31  ;;  %v2852_v59 = vand.u32 2147483648, %v9825_v54  ;;  %v9973_v60 = vpop.eup %7543  ;;  %v9975_v49 = vadd.f32 1.0, %v7542_v2  ;;  %v2849_v50 = vsel %vm9967_vm4, %v9889_v42, %v2845_v22 }
 0x2e8   : > { %v2399_v46 = vmul.f32 0.5, %v2398_v19  ;;  %7299 = vmatmul.msk.f32.gmra.mxu3 %vm1885_vm5, %v3955_v47  ;;  %v3322_v14 = vmul.f32 %v9943_v20, %v9891_v43  ;;  %v2453_v5 = vmul.f32 %v9461_v6, %v9371_v11  ;;  %vm2403_vm6 = vweird.f32 %v7540_v17  ;;  %v10007_v11 = vpop.f32.mrf.mxu0 }
 0x2e9   : > { %v9984_v51 = vsub.f32 %v15062_v0, %v2010_v61  ;;  %v9987_v13 = vsub.f32 %v9893_v21, %v2010_v61  ;;  %v9990_v54 = vsub.f32 %v8945_v12, %v2010_v61  ;;  %v9993_v32 = vsub.f32 %v9941_v34, %v2010_v61  ;;  %15100 = vst [vmem:[#allocation47_spill] sm:$0xff] %v10007_v11 }
 0x2ea   : > { %v2400_v48 = vsub.f32 1.5, %v2399_v46  ;;  %v2853_v42 = vor.u32 1.1754944e-38, %v2852_v59  ;;  %v9997_v7 = vpop.eup %7545  ;;  %vm3041_vm7 = vweird.f32 %v9839_v55  ;;  %vm2851_vm8 = vcmp.eq.f32.partialorder %v2850_v4, 8.507059e+37 }
 0x2eb   : > { %v2090_v2 = vmul.f32 %v9984_v51, %v9984_v51  ;;  %v2106_v31 = vmul.f32 %v9987_v13, %v9987_v13  ;;  %v2122_v22 = vmul.f32 %v9990_v54, %v9990_v54  ;;  %vm2402_vm9 = vweird.f32 %v9902_v33 }
 0x2ec   : > { %v2401_v19 = vmul.f32 %v7540_v17, %v2400_v48  ;;  %v2854_v58 = vsel %vm2851_vm8, %v2853_v42, %v2849_v50  ;;  %v3323_v47 = vsub.f32 1.0, %v3322_v14  ;;  %v7548_v61 = vpop.eup %7547  ;;  %v2485_v62 = vmul.f32 %v9461_v6, %v9385_v27  ;;  %vm2404_vm10 = vmor %vm2402_vm9, %vm2403_vm6 }
 0x2ed   : > { %v2138_v59 = vmul.f32 %v9993_v32, %v9993_v32  ;;  %v2226_v46 = vsel %vm1885_vm5, %v2090_v2, 0.0  ;;  %v2227_v4 = vsel %vm1885_vm5, %v2106_v31, 0.0  ;;  %7549 = vrcp.f32 %v9975_v49 }
 0x2ee   : > { %v10017_v33 = vsel %vm2404_vm10, %v7540_v17, %v2401_v19  ;;  %v2228_v48 = vadd.f32 %v2227_v4, %v2226_v46  ;;  %v3731_v50 = vsub.f32 1.0, %v2854_v58  ;;  %v2229_v6 = vsel %vm1885_vm5, %v2122_v22, 0.0 }
 0x2ef   : > { %v10021_v14 = vmul.f32 %v10017_v33, %v9796_v25  ;;  %v10025_v27 = vmul.f32 %v10017_v33, %v9830_v37  ;;  %v1978_v42 = vsel %vm1885_vm5, %v10007_v11, 0.0  ;;  %vm10030_vm11 = vcmp.eq.f32.partialorder %v3045_v45, 8.507059e+37 }
 0x2f0   : > { %v7206_v17 = vmul.f32 -1.442695, %v2453_v5  ;;  %v2230_v31 = vadd.f32 %v2229_v6, %v2228_v48  ;;  %v3796_v19 = vmul.f32 %v9427_v36, %v3731_v50  ;;  %v3324_v25 = vmul.f32 %v9943_v20, %v3323_v47 }
 0x2f1   : > { %15101 = vst [vmem:[#allocation11_spill] sm:$0xff] %v10021_v14  ;;  %vm3042_vm12 = vweird.f32 %v9897_v39  ;;  %v3048_v37 = vor.u32 1.1754944e-38, %v3047_v8  ;;  %v7238_v46 = vmul.f32 -1.442695, %v2485_v62  ;;  %v2231_v22 = vsel %vm1885_vm5, %v2138_v59, 0.0  ;;  %v15109_v62 = vld [vmem:[#allocation52_spill] sm:$0xff] }
 0x2f2   : > { %15102 = vst [vmem:[#allocation12_spill] sm:$0xff] %v10025_v27  ;;  %v3040_v4 = vadd.f32 %v9897_v39, %v3039_v52  ;;  %v2232_v45 = vadd.f32 %v2231_v22, %v2230_v31  ;;  %v1979_v34 = vadd.f32 %v1978_v42, %v9761_v3  ;;  %v3860_v21 = vadd.f32 %v3796_v19, %v2854_v58  ;;  %vm10052_vm14 = vmor %vm3041_vm7, %vm3042_vm12  ;;  %v15107_v52 = vld [vmem:[#allocation13_spill] sm:$0xff] }
 0x2f3   : > { %v3052_v5 = vmul.f32 %v9997_v7, %v9939_v26  ;;  %v10044_v48 = vadd.f32 1.0, %v7548_v61  ;;  %v3325_v47 = vadd.f32 %v9943_v20, %v3324_v25  ;;  %vm3327_vm13 = vweird.f32 %v9943_v20  ;;  %v10048_v50 = vpop.eup %7549  ;;  %v10058_v61 = vpop.f32.mrf.mxu2 }
 0x2f4   : > { %7551 = vpow2.f32 %v7206_v17  ;;  %v2266_v3 = vmul.f32 0.33333334, %v2232_v45  ;;  %v3924_v58 = vmul.f32 %v3860_v21, %v15107_v52  ;;  %vm3326_vm15 = vweird.f32 %v9891_v43  ;;  %15108 = vst [vmem:[#allocation13_spill] sm:$0xff] %v10058_v61  ;;  %v15112_v45 = vld [vmem:[#allocation31_spill] sm:$0xff] }
 0x2f5   : > { %v7250_v59 = vmul.f32 -1.442695, %v15109_v62  ;;  %7553 = vpow2.f32 %v7238_v46  ;;  %vm10061_vm0 = vmor %vm3326_vm15, %vm3327_vm13  ;;  %v3330_v55 = vand.u32 2147483647, %v9891_v43  ;;  %v3332_v42 = vand.u32 2147483648, %v9891_v43 }
 0x2f6   : > { %v3044_v17 = vsel %vm10052_vm14, %v9897_v39, %v3040_v4  ;;  %v10070_v21 = vadd.f32 1e-09, %v2266_v3  ;;  %7268 = vmatmul.msk.f32.gmra.mxu1 %vm1885_vm5, %v3924_v58  ;;  %v3329_v31 = vsel %vm10061_vm0, %v9943_v20, %v3325_v47  ;;  %v1981_v19 = vadd.f32 %v9746_v57, %v1979_v34 }
 0x2f7   : > { %7555 = vrcp.f32 %v10044_v48  ;;  %v3333_v25 = vor.u32 1.1754944e-38, %v3332_v42  ;;  %v1982_v43 = vsel %vm1885_vm5, %v10058_v61, 0.0  ;;  %v2857_v46 = vmul.f32 %v10048_v50, %v9975_v49 }
 0x2f8   : > { %v3053_v39 = vsub.f32 1.0, %v3052_v5  ;;  %7557 = vrsqrt.f32 %v10070_v21  ;;  %vm3331_vm1 = vcmp.eq.f32.partialorder %v3330_v55, 8.507059e+37  ;;  %v1983_v22 = vadd.f32 %v1982_v43, %v1981_v19 }
 0x2f9   : > { %7559 = vrcp.f32 %v9812_v53  ;;  %v10086_v20 = vsel %vm10030_vm11, %v3048_v37, %v3044_v17  ;;  %v3334_v57 = vsel %vm3331_vm1, %v3333_v25, %v3329_v31  ;;  %v2858_v34 = vsub.f32 1.0, %v2857_v46 }
 0x2fa   : > { %v7552_v4 = vpop.eup %7551  ;;  %v10090_v47 = vsel %vm1885_vm5, %v15112_v45, 0.0  ;;  %7561 = vrcp.f32 %v9921_v56  ;;  %v3763_v5 = vsub.f32 1.0, %v3334_v57  ;;  %v2011_v8 = vmul.f32 0.25, %v1983_v22 }
 0x2fb   : > { %v7554_v3 = vpop.eup %7553  ;;  %v10095_v52 = vadd.f32 %v9946_v40, %v9868_v29  ;;  %v10099_v37 = vadd.f32 1.0, %v9973_v60  ;;  %7563 = vpow2.f32 %v7250_v59  ;;  %v3054_v62 = vmul.f32 %v9997_v7, %v3053_v39 }
 0x2fc   : > { %v3828_v55 = vmul.f32 %v9427_v36, %v3763_v5  ;;  %v7251_v17 = vmul.f32 -1.442695, %v9368_v1  ;;  %v10108_v29 = vadd.f32 1.0, %v7552_v4  ;;  %v10111_v40 = vsub.f32 %v15067_v30, %v2011_v8 }
 0x2fd   : > { %v10105_v42 = vpop.eup %7555  ;;  %v2859_v60 = vmul.f32 %v10048_v50, %v2858_v34  ;;  %v10114_v31 = vadd.f32 1.0, %v7554_v3  ;;  %v10117_v25 = vsub.f32 %v10007_v11, %v2011_v8  ;;  %v2867_v43 = vand.u32 2147483648, %v9975_v49  ;;  %v15115_v34 = vld [vmem:[#allocation14_spill] sm:$0xff] }
 0x2fe   : > { %v7558_v59 = vpop.eup %7557  ;;  %v3892_v19 = vadd.f32 %v3828_v55, %v3334_v57  ;;  %vm2861_vm3 = vweird.f32 %v9975_v49  ;;  %vm2862_vm4 = vweird.f32 %v10048_v50  ;;  %v2865_v39 = vand.u32 2147483647, %v9975_v49 }
 0x2ff   : > { %v10120_v46 = vpop.eup %7559  ;;  %v2407_v1 = vmul.f32 %v7558_v59, %v10070_v21  ;;  %v10130_v57 = vsub.f32 %v15063_v35, %v2011_v8  ;;  %v10133_v5 = vsub.f32 %v10058_v61, %v2011_v8  ;;  %v3337_v3 = vmul.f32 %v10105_v42, %v10044_v48  ;;  %vm2863_vm6 = vmor %vm2861_vm3, %vm2862_vm4 }
 0x300   : > { %15113 = vst [vmem:[#allocation52_spill] sm:$0xff] %v10120_v46  ;;  %v10126_v22 = vpop.eup %7561  ;;  %v3956_v4 = vmul.f32 %v3892_v19, %v15115_v34  ;;  %v2091_v58 = vmul.f32 %v10111_v40, %v10111_v40  ;;  %v2107_v2 = vmul.f32 %v10117_v25, %v10117_v25  ;;  %v2860_v19 = vadd.f32 %v10048_v50, %v2859_v60 }
 0x301   : > { %15114 = vst [vmem:[#allocation31_spill] sm:$0xff] %v10126_v22  ;;  %v10137_v55 = vpop.eup %7563  ;;  %v2408_v6 = vmul.f32 %v7558_v59, %v2407_v1  ;;  %7565 = vrcp.f32 %v10108_v29  ;;  %v2123_v8 = vmul.f32 %v10130_v57, %v10130_v57  ;;  %v2139_v34 = vmul.f32 %v10133_v5, %v10133_v5 }
 0x302   : > { %7300 = vmatmul.msk.f32.gmra.mxu3 %vm1885_vm5, %v3956_v4  ;;  %v2868_v1 = vor.u32 1.1754944e-38, %v2867_v43  ;;  %v2233_v11 = vsel %vm1885_vm5, %v2091_v58, 0.0  ;;  %v2234_v60 = vsel %vm1885_vm5, %v2107_v2, 0.0  ;;  %v2864_v27 = vsel %vm2863_vm6, %v10048_v50, %v2860_v19 }
 0x303   : > { %v2409_v61 = vmul.f32 0.5, %v2408_v6  ;;  %v2454_v4 = vmul.f32 %v9635_v23, %v9491_v9  ;;  %vm2413_vm7 = vweird.f32 %v7558_v59  ;;  %v2235_v14 = vadd.f32 %v2234_v60, %v2233_v11 }
 0x304   : > { %vm2866_vm8 = vcmp.eq.f32.partialorder %v2865_v39, 8.507059e+37  ;;  %v2236_v56 = vsel %vm1885_vm5, %v2123_v8, 0.0  ;;  %v3338_v49 = vsub.f32 1.0, %v3337_v3  ;;  %v3055_v43 = vadd.f32 %v9997_v7, %v3054_v62  ;;  %v15118_v8 = vld [vmem:[#allocation33_spill] sm:$0xff] }
 0x305   : > { %v2410_v22 = vsub.f32 1.5, %v2409_v61  ;;  %v2869_v46 = vsel %vm2866_vm8, %v2868_v1, %v2864_v27  ;;  %vm3057_vm9 = vweird.f32 %v9997_v7  ;;  %v2237_v58 = vadd.f32 %v2236_v56, %v2235_v14 }
 0x306   : > { %v3732_v6 = vsub.f32 1.0, %v2869_v46  ;;  %vm2412_vm10 = vweird.f32 %v10070_v21  ;;  %v2238_v50 = vsel %vm1885_vm5, %v2139_v34, 0.0  ;;  %v3339_v9 = vmul.f32 %v10105_v42, %v3338_v49 }
 0x307   : > { %v2411_v2 = vmul.f32 %v7558_v59, %v2410_v22  ;;  %v10165_v11 = vpop.eup %7565  ;;  %7567 = vpow2.f32 %v7251_v17  ;;  %v7207_v61 = vmul.f32 -1.442695, %v2454_v4  ;;  %vm2414_vm11 = vmor %vm2412_vm10, %vm2413_vm7  ;;  %v2239_v27 = vadd.f32 %v2238_v50, %v2237_v58 }
 0x308   : > { %v3797_v62 = vmul.f32 %v9427_v36, %v3732_v6  ;;  %7569 = vrcp.f32 %v10114_v31  ;;  %v3340_v14 = vadd.f32 %v10105_v42, %v3339_v9  ;;  %vm3342_vm12 = vweird.f32 %v10105_v42 }
 0x309   : > { %v10170_v56 = vsel %vm2414_vm11, %v7558_v59, %v2411_v2  ;;  %vm3341_vm13 = vweird.f32 %v10044_v48  ;;  %v3345_v17 = vand.u32 2147483647, %v10044_v48  ;;  %v3347_v39 = vand.u32 2147483648, %v10044_v48 }
 0x30a   : > { %v10176_v21 = vmul.f32 %v10170_v56, %v9987_v13  ;;  %v10183_v22 = vmul.f32 %v10170_v56, %v9993_v32  ;;  %v2267_v59 = vmul.f32 0.33333334, %v2239_v27  ;;  %v3861_v3 = vadd.f32 %v3797_v62, %v2869_v46  ;;  %vm10193_vm15 = vmor %vm3341_vm13, %vm3342_vm12  ;;  %v10197_v32 = vpop.f32.mrf.mxu0 }
 0x30b   : > { %v2872_v19 = vmul.f32 %v10165_v11, %v10108_v29  ;;  %v10189_v34 = vmul.f32 %v10095_v52, %v15118_v8  ;;  %vm3056_vm14 = vweird.f32 %v9939_v26  ;;  %v3060_v13 = vand.u32 2147483647, %v9939_v26  ;;  %15122 = vst [vmem:[#allocation75_spill] sm:$0xff] %v10197_v32 }
 0x30c   : > { %15116 = vst [vmem:[#allocation14_spill] sm:$0xff] %v10176_v21  ;;  %7571 = vpow2.f32 %v7207_v61  ;;  %v15123_v46 = vsub.f32 1.0, %v9956_v28  ;;  %vm10205_vm0 = vmor %vm3056_vm14, %vm3057_vm9  ;;  %v3925_v60 = vmul.f32 %v3861_v3, %v8855_v44  ;;  %v3344_v4 = vsel %vm10193_vm15, %v10105_v42, %v3340_v14 }
 0x30d   : > { %15117 = vst [vmem:[#allocation74_spill] sm:$0xff] %v10183_v22  ;;  %7573 = vrcp.f32 %v10099_v37  ;;  %v7568_v49 = vpop.eup %7567  ;;  %v15126_v58 = vsub.f32 1.0, %v10086_v20  ;;  %v3059_v2 = vsel %vm10205_vm0, %v9997_v7, %v3055_v43  ;;  %v10219_v50 = vadd.f32 1e-09, %v2267_v59  ;;  %v10230_v43 = vpop.f32.mrf.mxu2 }
 0x30e   : > { %15119 = vst [vmem:[#allocation33_spill] sm:$0xff] %v10189_v34  ;;  %v3840_v1 = vmul.f32 %v9427_v36, %v15123_v46  ;;  %v3348_v9 = vor.u32 1.1754944e-38, %v3347_v39  ;;  %v10221_v61 = vpop.eup %7569  ;;  %v15127_v44 = vand.u32 2147483648, %v9939_v26  ;;  %7269 = vmatmul.msk.f32.gmra.mxu1 %vm1885_vm5, %v3925_v60  ;;  %vm3346_vm1 = vcmp.eq.f32.partialorder %v3345_v17, 8.507059e+37 }
 0x30f   : > { %v3809_v6 = vmul.f32 %v9427_v36, %v15126_v58  ;;  %v1985_v42 = vsel %vm1885_vm5, %v10197_v32, 0.0  ;;  %v2873_v62 = vsub.f32 1.0, %v2872_v19  ;;  %vm3061_vm3 = vcmp.eq.f32.partialorder %v3060_v13, 8.507059e+37  ;;  %15128 = vst [vmem:[#allocation76_spill] sm:$0xff] %v10230_v43  ;;  %v15129_v13 = vld [vmem:[#allocation56_spill] sm:$0xff] }
 0x310   : > { %v3063_v27 = vor.u32 1.1754944e-38, %v15127_v44  ;;  %v2486_v14 = vmul.f32 %v9635_v23, %v9497_v16  ;;  %v3349_v7 = vsel %vm3346_vm1, %v3348_v9, %v3344_v4  ;;  %v1986_v39 = vadd.f32 %v1985_v42, %v9767_v41  ;;  %v15130_v9 = vld [vmem:[#allocation15_spill] sm:$0xff] }
 0x311   : > { %v10234_v59 = vadd.f32 %v3840_v1, %v9956_v28  ;;  %v3764_v3 = vsub.f32 1.0, %v3349_v7  ;;  %v2874_v17 = vmul.f32 %v10165_v11, %v2873_v62  ;;  %v10240_v19 = vadd.f32 1.0, %v10137_v55 }
 0x312   : > { %v10236_v26 = vsel %vm3061_vm3, %v3063_v27, %v3059_v2  ;;  %v7572_v8 = vpop.eup %7571  ;;  %v7219_v48 = vmul.f32 -1.442695, %v15129_v13  ;;  %7575 = vrsqrt.f32 %v10219_v50  ;;  %v1988_v16 = vadd.f32 %v9778_v15, %v1986_v39 }
 0x313   : > { %v10245_v23 = vpop.eup %7573  ;;  %v10248_v41 = vadd.f32 %v3809_v6, %v10086_v20  ;;  %v10250_v28 = vadd.f32 1.0, %v7568_v49  ;;  %v3829_v46 = vmul.f32 %v9427_v36, %v3764_v3  ;;  %v1989_v1 = vsel %vm1885_vm5, %v10230_v43, 0.0 }
 0x314   : > { %v3745_v55 = vsub.f32 1.0, %v10236_v26  ;;  %v7239_v52 = vmul.f32 -1.442695, %v2486_v14  ;;  %v1990_v60 = vadd.f32 %v1989_v1, %v1988_v16  ;;  %v3352_v4 = vmul.f32 %v10221_v61, %v10114_v31  ;;  %v15131_v14 = vld [vmem:[#allocation57_spill] sm:$0xff] }
 0x315   : > { %v10258_v15 = vadd.f32 1.0, %v7572_v8  ;;  %v3893_v58 = vadd.f32 %v3829_v46, %v3349_v7  ;;  %v2875_v20 = vadd.f32 %v10165_v11, %v2874_v17  ;;  %vm2877_vm4 = vweird.f32 %v10165_v11 }
 0x316   : > { %7577 = vpow2.f32 %v7219_v48  ;;  %v2455_v49 = vmul.f32 %v9740_v10, %v9573_v63  ;;  %v2012_v6 = vmul.f32 0.25, %v1990_v60  ;;  %v2882_v2 = vand.u32 2147483648, %v10108_v29 }
 0x317   : > { %7579 = vrcp.f32 %v10250_v28  ;;  %v3957_v44 = vmul.f32 %v3893_v58, %v15130_v9  ;;  %vm2876_vm6 = vweird.f32 %v10108_v29  ;;  %v2880_v27 = vand.u32 2147483647, %v10108_v29 }
 0x318   : > { %v7576_v42 = vpop.eup %7575  ;;  %v10270_v62 = vmul.f32 %v9427_v36, %v3745_v55  ;;  %v7220_v7 = vmul.f32 -1.442695, %v15131_v14  ;;  %7581 = vpow2.f32 %v7239_v52  ;;  %vm10273_vm7 = vmor %vm2876_vm6, %vm2877_vm4  ;;  %v3353_v39 = vsub.f32 1.0, %v3352_v4 }
 0x319   : > { %7583 = vrcp.f32 %v10258_v15  ;;  %v2487_v3 = vmul.f32 %v9740_v10, %v9579_v18  ;;  %v2417_v17 = vmul.f32 %v7576_v42, %v10219_v50  ;;  %7301 = vmatmul.msk.f32.gmra.mxu3 %vm1885_vm5, %v3957_v44  ;;  %v2879_v29 = vsel %vm10273_vm7, %v10165_v11, %v2875_v20 }
 0x31a   : > { %v7208_v8 = vmul.f32 -1.442695, %v2455_v49  ;;  %v10286_v13 = vsub.f32 %v15069_v38, %v2012_v6  ;;  %v10289_v48 = vsub.f32 %v10197_v32, %v2012_v6  ;;  %v2883_v16 = vor.u32 1.1754944e-38, %v2882_v2 }
 0x31b   : > { %v2418_v46 = vmul.f32 %v7576_v42, %v2417_v17  ;;  %v10292_v1 = vsub.f32 %v15070_v24, %v2012_v6  ;;  %v10295_v18 = vsub.f32 %v10230_v43, %v2012_v6  ;;  %vm2881_vm8 = vcmp.eq.f32.partialorder %v2880_v27, 8.507059e+37 }
 0x31c   : > { %v7578_v10 = vpop.eup %7577  ;;  %v2092_v11 = vmul.f32 %v10286_v13, %v10286_v13  ;;  %v2108_v55 = vmul.f32 %v10289_v48, %v10289_v48  ;;  %v2884_v52 = vsel %vm2881_vm8, %v2883_v16, %v2879_v29  ;;  %v3354_v60 = vmul.f32 %v10221_v61, %v3353_v39 }
 0x31d   : > { %v10302_v4 = vpop.eup %7579  ;;  %7585 = vpow2.f32 %v7220_v7  ;;  %v2419_v58 = vmul.f32 0.5, %v2418_v46  ;;  %v2124_v20 = vmul.f32 %v10292_v1, %v10292_v1  ;;  %v3733_v49 = vsub.f32 1.0, %v2884_v52 }
 0x31e   : > { %v7582_v6 = vpop.eup %7581  ;;  %v7240_v2 = vmul.f32 -1.442695, %v2487_v3  ;;  %v2140_v9 = vmul.f32 %v10295_v18, %v10295_v18  ;;  %v2240_v44 = vsel %vm1885_vm5, %v2092_v11, 0.0  ;;  %v2241_v27 = vsel %vm1885_vm5, %v2108_v55, 0.0 }
 0x31f   : > { %v10310_v14 = vpop.eup %7583  ;;  %7587 = vpow2.f32 %v7208_v8  ;;  %v2420_v63 = vsub.f32 1.5, %v2419_v58  ;;  %vm2423_vm9 = vweird.f32 %v7576_v42  ;;  %v2242_v7 = vadd.f32 %v2241_v27, %v2240_v44  ;;  %v10321_v58 = vpop.f32.mrf.mxu0 }
 0x320   : > { %v2243_v39 = vsel %vm1885_vm5, %v2124_v20, 0.0  ;;  %v3798_v17 = vmul.f32 %v9427_v36, %v3733_v49  ;;  %v3355_v29 = vadd.f32 %v10221_v61, %v3354_v60  ;;  %vm3357_vm10 = vweird.f32 %v10221_v61  ;;  %15134 = vst [vmem:[#allocation56_spill] sm:$0xff] %v10321_v58 }
 0x321   : > { %v2421_v3 = vmul.f32 %v7576_v42, %v2420_v63  ;;  %vm2422_vm11 = vweird.f32 %v10219_v50  ;;  %v2244_v16 = vadd.f32 %v2243_v39, %v2242_v7  ;;  %vm3356_vm12 = vweird.f32 %v10114_v31  ;;  %v15139_v39 = vld [vmem:[#allocation16_spill] sm:$0xff] }
 0x322   : > { %vm2424_vm13 = vmor %vm2422_vm11, %vm2423_vm9  ;;  %v2245_v8 = vsel %vm1885_vm5, %v2140_v9, 0.0  ;;  %v3862_v46 = vadd.f32 %v3798_v17, %v2884_v52  ;;  %v3360_v11 = vand.u32 2147483647, %v10114_v31  ;;  %v3362_v55 = vand.u32 2147483648, %v10114_v31 }
 0x323   : > { %v7586_v20 = vpop.eup %7585  ;;  %v3547_v60 = vmul.f32 %v10302_v4, %v10250_v28  ;;  %v10325_v49 = vsel %vm2424_vm13, %v7576_v42, %v2421_v3  ;;  %v2246_v50 = vadd.f32 %v2245_v8, %v2244_v16  ;;  %vm10329_vm14 = vmor %vm3356_vm12, %vm3357_vm10  ;;  %v1992_v52 = vsel %vm1885_vm5, %v10321_v58, 0.0  ;;  %v10353_v16 = vpop.f32.mrf.mxu2  ;;  %v15141_v8 = vld [vmem:[#allocation36_spill] sm:$0xff] }
 0x324   : > { %v10335_v9 = vadd.f32 1.0, %v7582_v6  ;;  %v10339_v31 = vmul.f32 %v10325_v49, %v10117_v25  ;;  %v10343_v42 = vmul.f32 %v10325_v49, %v10133_v5  ;;  %v3359_v27 = vsel %vm10329_vm14, %v10221_v61, %v3355_v29  ;;  %15140 = vst [vmem:[#allocation16_spill] sm:$0xff] %v10353_v16 }
 0x325   : > { %v7588_v63 = vpop.eup %7587  ;;  %v2268_v7 = vmul.f32 0.33333334, %v2246_v50  ;;  %v3926_v17 = vmul.f32 %v3862_v46, %v15139_v39  ;;  %v3363_v3 = vor.u32 1.1754944e-38, %v3362_v55  ;;  %v2887_v6 = vmul.f32 %v10310_v14, %v10258_v15  ;;  %v15144_v55 = vld [vmem:[#allocation58_spill] sm:$0xff]  ;;  %v15148_v39 = vld [vmem:[#allocation39_spill] sm:$0xff] }
 0x326   : > { %15137 = vst [vmem:[#allocation15_spill] sm:$0xff] %v10339_v31  ;;  %v3874_v25 = vadd.f32 %v10270_v62, %v10236_v26  ;;  %7589 = vpow2.f32 %v7240_v2  ;;  %vm3361_vm15 = vcmp.eq.f32.partialorder %v3360_v11, 8.507059e+37  ;;  %v1993_v5 = vadd.f32 %v1992_v52, %v10090_v47  ;;  %v15145_v2 = vld [vmem:[#allocation46_spill] sm:$0xff]  ;;  %v15146_v52 = vld [vmem:[#allocation37_spill] sm:$0xff] }
 0x327   : > { %15138 = vst [vmem:[#allocation57_spill] sm:$0xff] %v10343_v42  ;;  %v10358_v61 = vmul.f32 %v10234_v59, %v15141_v8  ;;  %7591 = vrcp.f32 %v10240_v19  ;;  %v10361_v29 = vadd.f32 1.0, %v7578_v10  ;;  %7270 = vmatmul.msk.f32.gmra.mxu1 %vm1885_vm5, %v3926_v17  ;;  %v3364_v46 = vsel %vm3361_vm15, %v3363_v3, %v3359_v27 }
 0x328   : > { %v7252_v50 = vmul.f32 -1.442695, %v15144_v55  ;;  %v10365_v26 = vadd.f32 1e-09, %v2268_v7  ;;  %v3765_v62 = vsub.f32 1.0, %v3364_v46  ;;  %v1995_v11 = vadd.f32 %v15145_v2, %v1993_v5 }
 0x329   : > { %15142 = vst [vmem:[#allocation36_spill] sm:$0xff] %v10358_v61  ;;  %v3548_v44 = vsub.f32 1.0, %v3547_v60  ;;  %7593 = vrcp.f32 %v10335_v9  ;;  %v1996_v47 = vsel %vm1885_vm5, %v10353_v16, 0.0  ;;  %v2888_v59 = vsub.f32 1.0, %v2887_v6  ;;  %v15158_v61 = vld [vmem:[#allocation28_spill] sm:$0xff] }
 0x32a   : > { %15143 = vst [vmem:[#allocation77_spill] sm:$0xff] %v10361_v29  ;;  %v10373_v10 = vmul.f32 %v10248_v41, %v15146_v52  ;;  %v10376_v27 = vmul.f32 %v3874_v25, %v15148_v39  ;;  %v3830_v7 = vmul.f32 %v9427_v36, %v3765_v62  ;;  %v1997_v17 = vadd.f32 %v1996_v47, %v1995_v11  ;;  %v15150_v11 = vld [vmem:[#allocation71_spill] sm:$0xff]  ;;  %v15151_v47 = vld [vmem:[#allocation30_spill] sm:$0xff]  ;;  %v15152_v39 = vld [vmem:[#allocation17_spill] sm:$0xff] }
 0x32b   : > { %7595 = vrcp.f32 %v10361_v29  ;;  %v3555_v60 = vand.u32 2147483647, %v10250_v28  ;;  %v10382_v5 = vadd.f32 1.0, %v7588_v63  ;;  %v2889_v55 = vmul.f32 %v10310_v14, %v2888_v59 }
 0x32c   : > { %15147 = vst [vmem:[#allocation58_spill] sm:$0xff] %v10373_v10  ;;  %v7590_v8 = vpop.eup %7589  ;;  %7597 = vrsqrt.f32 %v10365_v26  ;;  %v3894_v6 = vadd.f32 %v3830_v7, %v3364_v46  ;;  %v2013_v41 = vmul.f32 0.25, %v1997_v17  ;;  %v3549_v62 = vmul.f32 %v10302_v4, %v3548_v44  ;;  %v15153_v7 = vld [vmem:[#allocation32_spill] sm:$0xff] }
 0x32d   : > { %15149 = vst [vmem:[#allocation46_spill] sm:$0xff] %v10376_v27  ;;  %v10386_v25 = vpop.eup %7591  ;;  %7599 = vpow2.f32 %v7252_v50  ;;  %v10389_v2 = vadd.f32 1.0, %v7586_v20  ;;  %v2456_v52 = vmul.f32 %v15151_v47, %v15150_v11  ;;  %vm3552_vm0 = vweird.f32 %v10302_v4  ;;  %v15154_v50 = vld [vmem:[#allocation72_spill] sm:$0xff] }
 0x32e   : > { %v3958_v63 = vmul.f32 %v3894_v6, %v15152_v39  ;;  %v10395_v3 = vsub.f32 %v15112_v45, %v2013_v41  ;;  %v10398_v46 = vsub.f32 %v10321_v58, %v2013_v41  ;;  %v10401_v59 = vsub.f32 %v15153_v7, %v2013_v41 }
 0x32f   : > { %v10403_v17 = vpop.eup %7593  ;;  %v10406_v20 = vadd.f32 1.0, %v7590_v8  ;;  %7601 = vrcp.f32 %v10382_v5  ;;  %v2488_v44 = vmul.f32 %v15151_v47, %v15154_v50  ;;  %v10412_v6 = vsub.f32 %v10353_v16, %v2013_v41 }
 0x330   : > { %7302 = vmatmul.msk.f32.gmra.mxu3 %vm1885_vm5, %v3958_v63  ;;  %v2093_v11 = vmul.f32 %v10395_v3, %v10395_v3  ;;  %v2109_v39 = vmul.f32 %v10398_v46, %v10398_v46  ;;  %v2890_v58 = vadd.f32 %v10310_v14, %v2889_v55  ;;  %vm2892_vm1 = vweird.f32 %v10310_v14 }
 0x331   : > { %v10421_v8 = vpop.eup %7595  ;;  %vm3551_vm3 = vweird.f32 %v10250_v28  ;;  %v7209_v47 = vmul.f32 -1.442695, %v2456_v52  ;;  %v2125_v41 = vmul.f32 %v10401_v59, %v10401_v59  ;;  %vm2891_vm4 = vweird.f32 %v10258_v15 }
 0x332   : > { %15155 = vst [vmem:[#allocation37_spill] sm:$0xff] %v10421_v8  ;;  %v2897_v63 = vand.u32 2147483648, %v10258_v15  ;;  %v7598_v50 = vpop.eup %7597  ;;  %v2247_v16 = vsel %vm1885_vm5, %v2093_v11, 0.0  ;;  %v2248_v43 = vsel %vm1885_vm5, %v2109_v39, 0.0  ;;  %v2895_v55 = vand.u32 2147483647, %v10258_v15  ;;  %vm10439_vm6 = vmor %vm2891_vm4, %vm2892_vm1 }
 0x333   : > { %v3367_v32 = vmul.f32 %v10403_v17, %v10335_v9  ;;  %v7600_v31 = vpop.eup %7599  ;;  %7603 = vrcp.f32 %v10389_v2  ;;  %v2427_v52 = vmul.f32 %v7598_v50, %v10365_v26  ;;  %v2141_v22 = vmul.f32 %v10412_v6, %v10412_v6  ;;  %vm10472_vm11 = vmor %vm3551_vm3, %vm3552_vm0 }
 0x334   : > { %v2249_v42 = vadd.f32 %v2248_v43, %v2247_v16  ;;  %v3550_v15 = vadd.f32 %v10302_v4, %v3549_v62  ;;  %7605 = vrcp.f32 %v10406_v20  ;;  %v7241_v39 = vmul.f32 -1.442695, %v2488_v44 }
 0x335   : > { %v2894_v21 = vsel %vm10439_vm6, %v10310_v14, %v2890_v58  ;;  %v10448_v27 = vpop.eup %7601  ;;  %7607 = vpow2.f32 %v7209_v47  ;;  %v2428_v10 = vmul.f32 %v7598_v50, %v2427_v52  ;;  %v2250_v43 = vsel %vm1885_vm5, %v2125_v41, 0.0 }
 0x336   : > { %v2898_v16 = vor.u32 1.1754944e-38, %v2897_v63  ;;  %v2457_v8 = vmul.f32 %v10017_v33, %v15158_v61  ;;  %v2251_v29 = vadd.f32 %v2250_v43, %v2249_v42  ;;  %vm2896_vm7 = vcmp.eq.f32.partialorder %v2895_v55, 8.507059e+37 }
 0x337   : > { %v3368_v62 = vsub.f32 1.0, %v3367_v32  ;;  %vm10453_vm8 = vcmp.eq.f32.partialorder %v3555_v60, 8.507059e+37  ;;  %v2429_v44 = vmul.f32 0.5, %v2428_v10  ;;  %vm2433_vm9 = vweird.f32 %v7598_v50 }
 0x338   : > { %v2252_v14 = vsel %vm1885_vm5, %v2141_v22, 0.0  ;;  %v2899_v58 = vsel %vm2896_vm7, %v2898_v16, %v2894_v21  ;;  %vm3372_vm10 = vweird.f32 %v10403_v17  ;;  %v3375_v32 = vand.u32 2147483647, %v10335_v9 }
 0x339   : > { %v2253_v47 = vadd.f32 %v2252_v14, %v2251_v29  ;;  %v3734_v52 = vsub.f32 1.0, %v2899_v58  ;;  %v3369_v41 = vmul.f32 %v10403_v17, %v3368_v62  ;;  %v10460_v63 = vpop.eup %7603  ;;  %v2430_v42 = vsub.f32 1.5, %v2429_v44 }
 0x33a   : > { %v3377_v61 = vand.u32 2147483648, %v10335_v9  ;;  %v2902_v10 = vmul.f32 %v10448_v27, %v10382_v5  ;;  %v10466_v60 = vpop.eup %7605  ;;  %vm3371_vm12 = vweird.f32 %v10335_v9  ;;  %7609 = vpow2.f32 %v7241_v39 }
 0x33b   : > { %v2269_v22 = vmul.f32 0.33333334, %v2253_v47  ;;  %v3799_v29 = vmul.f32 %v9427_v36, %v3734_v52  ;;  %v3370_v55 = vadd.f32 %v10403_v17, %v3369_v41  ;;  %v7608_v11 = vpop.eup %7607  ;;  %v2431_v43 = vmul.f32 %v7598_v50, %v2430_v42  ;;  %vm3373_vm14 = vmor %vm3371_vm12, %vm3372_vm10 }
 0x33c   : > { %vm2432_vm13 = vweird.f32 %v10365_v26  ;;  %v3378_v16 = vor.u32 1.1754944e-38, %v3377_v61  ;;  %v2903_v47 = vsub.f32 1.0, %v2902_v10  ;;  %v3554_v9 = vsel %vm10472_vm11, %v10302_v4, %v3550_v15 }
 0x33d   : > { %vm2434_vm15 = vmor %vm2432_vm13, %vm2433_vm9  ;;  %v10483_v62 = vadd.f32 1e-09, %v2269_v22  ;;  %v3863_v44 = vadd.f32 %v3799_v29, %v2899_v58  ;;  %v3374_v14 = vsel %vm3373_vm14, %v10403_v17, %v3370_v55  ;;  %v7210_v39 = vmul.f32 -1.442695, %v2457_v8  ;;  %v15164_v8 = vld [vmem:[#allocation18_spill] sm:$0xff] }
 0x33e   : > { %v10489_v52 = vsel %vm2434_vm15, %v7598_v50, %v2431_v43  ;;  %vm3376_vm0 = vcmp.eq.f32.partialorder %v3375_v32, 8.507059e+37  ;;  %v15163_v26 = vand.u32 2147483648, %v10250_v28  ;;  %v10501_v61 = vadd.f32 1.0, %v7600_v31  ;;  %v15165_v32 = vld [vmem:[#allocation27_spill] sm:$0xff] }
 0x33f   : > { %v10495_v42 = vmul.f32 %v10489_v52, %v10289_v48  ;;  %v10499_v58 = vmul.f32 %v10489_v52, %v10295_v18  ;;  %v3379_v17 = vsel %vm3376_vm0, %v3378_v16, %v3374_v14  ;;  %v3090_v4 = vand.u32 2147483647, %v10389_v2 }
 0x340   : > { %v3558_v41 = vor.u32 1.1754944e-38, %v15163_v26  ;;  %7611 = vrsqrt.f32 %v10483_v62  ;;  %v3927_v50 = vmul.f32 %v3863_v44, %v15164_v8  ;;  %v10510_v15 = vadd.f32 1.0, %v7608_v11  ;;  %v7610_v18 = vpop.eup %7609 }
 0x341   : > { %v2904_v48 = vmul.f32 %v10448_v27, %v2903_v47  ;;  %vm2907_vm1 = vweird.f32 %v10448_v27  ;;  %v2489_v31 = vmul.f32 %v10017_v33, %v15165_v32  ;;  %7613 = vpow2.f32 %v7210_v39  ;;  %v15166_v39 = vld [vmem:[#allocation59_spill] sm:$0xff] }
 0x342   : > { %v10508_v28 = vsel %vm10453_vm8, %v3558_v41, %v3554_v9  ;;  %7271 = vmatmul.msk.f32.gmra.mxu1 %vm1885_vm5, %v3927_v50  ;;  %v3766_v10 = vsub.f32 1.0, %v3379_v17  ;;  %v2910_v21 = vand.u32 2147483647, %v10382_v5  ;;  %vm2906_vm3 = vweird.f32 %v10382_v5 }
 0x343   : > { %v2905_v34 = vadd.f32 %v10448_v27, %v2904_v48  ;;  %v2912_v22 = vand.u32 2147483648, %v10382_v5  ;;  %v3382_v29 = vmul.f32 %v10466_v60, %v10406_v20  ;;  %v3778_v55 = vsub.f32 1.0, %v10508_v28  ;;  %vm2908_vm4 = vmor %vm2906_vm3, %vm2907_vm1 }
 0x344   : > { %v3092_v11 = vand.u32 2147483648, %v10389_v2  ;;  %7615 = vrcp.f32 %v10501_v61  ;;  %v3831_v33 = vmul.f32 %v9427_v36, %v3766_v10  ;;  %v3082_v43 = vmul.f32 %v10460_v63, %v10389_v2 }
 0x345   : > { %v10531_v16 = vadd.f32 1.0, %v7610_v18  ;;  %v2909_v5 = vsel %vm2908_vm4, %v10448_v27, %v2905_v34  ;;  %v2913_v44 = vor.u32 1.1754944e-38, %v2912_v22  ;;  %7617 = vrcp.f32 %v10510_v15  ;;  %v15167_v27 = vld [vmem:[#allocation19_spill] sm:$0xff] }
 0x346   : > { %v10534_v14 = vpop.eup %7611  ;;  %v3895_v47 = vadd.f32 %v3831_v33, %v3379_v17  ;;  %vm2911_vm6 = vcmp.eq.f32.partialorder %v2910_v21, 8.507059e+37  ;;  %v3383_v9 = vsub.f32 1.0, %v3382_v29  ;;  %v7221_v26 = vmul.f32 -1.442695, %v15166_v39  ;;  %v15168_v21 = vld [vmem:[#allocation60_spill] sm:$0xff] }
 0x347   : > { %v7242_v41 = vmul.f32 -1.442695, %v2489_v31  ;;  %v2437_v8 = vmul.f32 %v10534_v14, %v10483_v62  ;;  %v2914_v50 = vsel %vm2911_vm6, %v2913_v44, %v2909_v5  ;;  %v7614_v48 = vpop.eup %7613  ;;  %v2458_v18 = vmul.f32 %v10170_v56, %v9984_v51 }
 0x348   : > { %v3959_v32 = vmul.f32 %v3895_v47, %v15167_v27  ;;  %v3735_v10 = vsub.f32 1.0, %v2914_v50  ;;  %v3384_v34 = vmul.f32 %v10466_v60, %v3383_v9  ;;  %v3843_v17 = vmul.f32 %v9427_v36, %v3778_v55 }
 0x349   : > { %v7253_v22 = vmul.f32 -1.442695, %v15168_v21  ;;  %v2490_v31 = vmul.f32 %v10170_v56, %v9990_v54  ;;  %v2438_v29 = vmul.f32 %v10534_v14, %v2437_v8  ;;  %v3083_v5 = vsub.f32 1.0, %v3082_v43 }
 0x34a   : > { %v10549_v33 = vpop.eup %7615  ;;  %7619 = vrcp.f32 %v10531_v16  ;;  %7303 = vmatmul.msk.f32.gmra.mxu3 %vm1885_vm5, %v3959_v32  ;;  %v3800_v51 = vmul.f32 %v9427_v36, %v3735_v10  ;;  %v3392_v44 = vand.u32 2147483648, %v10406_v20  ;;  %v3385_v55 = vadd.f32 %v10466_v60, %v3384_v34  ;;  %v15169_v34 = vld [vmem:[#allocation20_spill] sm:$0xff] }
 0x34b   : > { %v2439_v47 = vmul.f32 0.5, %v2438_v29  ;;  %vm3387_vm7 = vweird.f32 %v10466_v60  ;;  %v3390_v54 = vand.u32 2147483647, %v10406_v20  ;;  %v10558_v56 = vpop.eup %7617  ;;  %7621 = vpow2.f32 %v7242_v41 }
 0x34c   : > { %v10560_v9 = vadd.f32 1.0, %v7614_v48  ;;  %v7211_v43 = vmul.f32 -1.442695, %v2458_v18  ;;  %v3864_v39 = vadd.f32 %v3800_v51, %v2914_v50  ;;  %v7243_v8 = vmul.f32 -1.442695, %v2490_v31 }
 0x34d   : > { %v2459_v27 = vmul.f32 %v10325_v49, %v10111_v40  ;;  %v2491_v32 = vmul.f32 %v10325_v49, %v10130_v57  ;;  %vm3386_vm8 = vweird.f32 %v10406_v20  ;;  %v2440_v10 = vsub.f32 1.5, %v2439_v47 }
 0x34e   : > { %vm2443_vm9 = vweird.f32 %v10534_v14  ;;  %v3928_v21 = vmul.f32 %v3864_v39, %v15169_v34  ;;  %vm3388_vm10 = vmor %vm3386_vm8, %vm3387_vm7  ;;  %v3393_v41 = vor.u32 1.1754944e-38, %v3392_v44  ;;  %7623 = vpow2.f32 %v7221_v26 }
 0x34f   : > { %v3389_v48 = vsel %vm3388_vm10, %v10466_v60, %v3385_v55  ;;  %vm3391_vm11 = vcmp.eq.f32.partialorder %v3390_v54, 8.507059e+37  ;;  %v2917_v50 = vmul.f32 %v10558_v56, %v10510_v15  ;;  %vm3086_vm12 = vweird.f32 %v10389_v2 }
 0x350   : > { %v10572_v40 = vpop.eup %7619  ;;  %7625 = vrcp.f32 %v10560_v9  ;;  %v2441_v57 = vmul.f32 %v10534_v14, %v2440_v10  ;;  %vm2442_vm13 = vweird.f32 %v10483_v62  ;;  %7272 = vmatmul.msk.f32.gmra.mxu1 %vm1885_vm5, %v3928_v21  ;;  %v3394_v49 = vsel %vm3391_vm11, %v3393_v41, %v3389_v48 }
 0x351   : > { %v3084_v20 = vmul.f32 %v10460_v63, %v3083_v5  ;;  %7627 = vpow2.f32 %v7211_v43  ;;  %vm2444_vm14 = vmor %vm2442_vm13, %vm2443_vm9  ;;  %v3767_v60 = vsub.f32 1.0, %v3394_v49  ;;  %v2918_v26 = vsub.f32 1.0, %v2917_v50  ;;  %v7622_v18 = vpop.eup %7621  ;;  %v15177_v50 = vld [vmem:[#allocation22_spill] sm:$0xff] }
 0x352   : > { %7629 = vpow2.f32 %v7243_v8  ;;  %v7212_v31 = vmul.f32 -1.442695, %v2459_v27  ;;  %v7244_v29 = vmul.f32 -1.442695, %v2491_v32  ;;  %v10583_v51 = vsel %vm2444_vm14, %v10534_v14, %v2441_v57 }
 0x353   : > { %v10587_v62 = vmul.f32 %v10583_v51, %v10398_v46  ;;  %v10591_v5 = vmul.f32 %v10583_v51, %v10412_v6  ;;  %v2927_v44 = vand.u32 2147483648, %v10510_v15  ;;  %v3397_v47 = vmul.f32 %v10572_v40, %v10531_v16 }
 0x354   : > { %v3832_v55 = vmul.f32 %v9427_v36, %v3767_v60  ;;  %v2919_v54 = vmul.f32 %v10558_v56, %v2918_v26  ;;  %vm2922_vm15 = vweird.f32 %v10558_v56  ;;  %v2925_v14 = vand.u32 2147483647, %v10510_v15  ;;  %v7624_v43 = vpop.eup %7623 }
 0x355   : > { %v3907_v46 = vadd.f32 %v3843_v17, %v10508_v28  ;;  %v3085_v39 = vadd.f32 %v10460_v63, %v3084_v20  ;;  %vm3087_vm0 = vweird.f32 %v10460_v63  ;;  %7631 = vpow2.f32 %v7253_v22 }
 0x356   : > { %v10603_v6 = vpop.eup %7625  ;;  %7633 = vpow2.f32 %v7212_v31  ;;  %v3896_v8 = vadd.f32 %v3832_v55, %v3394_v49  ;;  %v2920_v27 = vadd.f32 %v10558_v56, %v2919_v54  ;;  %vm2921_vm1 = vweird.f32 %v10510_v15  ;;  %v15172_v15 = vld [vmem:[#allocation21_spill] sm:$0xff]  ;;  %vm10625_vm7 = vmor %vm3086_vm12, %vm3087_vm0 }
 0x357   : > { %v7628_v32 = vpop.eup %7627  ;;  %v10607_v10 = vadd.f32 1.0, %v7622_v18  ;;  %7635 = vpow2.f32 %v7244_v29  ;;  %vm2923_vm3 = vmor %vm2921_vm1, %vm2922_vm15  ;;  %v2928_v28 = vor.u32 1.1754944e-38, %v2927_v44  ;;  %v3398_v17 = vsub.f32 1.0, %v3397_v47  ;;  %v15175_v44 = vld [vmem:[#allocation64_spill] sm:$0xff] }
 0x358   : > { %v7630_v34 = vpop.eup %7629  ;;  %vm10613_vm4 = vcmp.eq.f32.partialorder %v3090_v4, 8.507059e+37  ;;  %v2460_v21 = vmul.f32 %v10489_v52, %v10286_v13  ;;  %v3960_v41 = vmul.f32 %v3896_v8, %v15172_v15  ;;  %v2924_v48 = vsel %vm2923_vm3, %v10558_v56, %v2920_v27 }
 0x359   : > { %vm2926_vm6 = vcmp.eq.f32.partialorder %v2925_v14, 8.507059e+37  ;;  %v3399_v57 = vmul.f32 %v10572_v40, %v3398_v17  ;;  %vm3402_vm8 = vweird.f32 %v10572_v40  ;;  %v3405_v13 = vand.u32 2147483647, %v10531_v16  ;;  %v15176_v17 = vld [vmem:[#allocation44_spill] sm:$0xff] }
 0x35a   : > { %v2929_v4 = vsel %vm2926_vm6, %v2928_v28, %v2924_v48  ;;  %v3089_v56 = vsel %vm10625_vm7, %v10460_v63, %v3085_v39  ;;  %v10635_v49 = vadd.f32 1.0, %v7628_v32  ;;  %7304 = vmatmul.msk.f32.gmra.mxu3 %vm1885_vm5, %v3960_v41  ;;  %v3407_v60 = vand.u32 2147483648, %v10531_v16 }
 0x35b   : > { %v3736_v20 = vsub.f32 1.0, %v2929_v4  ;;  %v7632_v26 = vpop.eup %7631  ;;  %7637 = vrcp.f32 %v10607_v10  ;;  %v3400_v18 = vadd.f32 %v10572_v40, %v3399_v57  ;;  %vm3401_vm9 = vweird.f32 %v10531_v16 }
 0x35c   : > { %v2932_v31 = vmul.f32 %v10603_v6, %v10560_v9  ;;  %v7634_v29 = vpop.eup %7633  ;;  %v7254_v63 = vmul.f32 -1.442695, %v15175_v44  ;;  %v7213_v47 = vmul.f32 -1.442695, %v2460_v21  ;;  %vm3403_vm10 = vmor %vm3401_vm9, %vm3402_vm8  ;;  %v3408_v54 = vor.u32 1.1754944e-38, %v3407_v60  ;;  %v15178_v44 = vld [vmem:[#allocation23_spill] sm:$0xff] }
 0x35d   : > { %v3801_v55 = vmul.f32 %v9427_v36, %v3736_v20  ;;  %v7636_v14 = vpop.eup %7635  ;;  %v10648_v39 = vadd.f32 1.0, %v7630_v34  ;;  %v3404_v8 = vsel %vm3403_vm10, %v10572_v40, %v3400_v18  ;;  %vm3406_vm11 = vcmp.eq.f32.partialorder %v3405_v13, 8.507059e+37 }
 0x35e   : > { %v2933_v16 = vsub.f32 1.0, %v2932_v31  ;;  %7639 = vrcp.f32 %v10635_v49  ;;  %v2492_v27 = vmul.f32 %v10489_v52, %v10292_v1  ;;  %v3409_v28 = vsel %vm3406_vm11, %v3408_v54, %v3404_v8 }
 0x35f   : > { %v3865_v32 = vadd.f32 %v3801_v55, %v2929_v4  ;;  %v10655_v21 = vmul.f32 %v3907_v46, %v15176_v17  ;;  %v3093_v15 = vor.u32 1.1754944e-38, %v3092_v11  ;;  %v3768_v41 = vsub.f32 1.0, %v3409_v28 }
 0x360   : > { %v2934_v34 = vmul.f32 %v10603_v6, %v2933_v16  ;;  %v10660_v48 = vadd.f32 1.0, %v7624_v43  ;;  %v10662_v40 = vadd.f32 1.0, %v7634_v29  ;;  %7641 = vpow2.f32 %v7213_v47 }
 0x361   : > { %v3929_v57 = vmul.f32 %v3865_v32, %v15177_v50  ;;  %v10665_v13 = vpop.eup %7637  ;;  %v10669_v1 = vsel %vm10613_vm4, %v3093_v15, %v3089_v56  ;;  %7643 = vpow2.f32 %v7254_v63  ;;  %v10671_v52 = vadd.f32 1.0, %v7636_v14 }
 0x362   : > { %vm2937_vm12 = vweird.f32 %v10603_v6  ;;  %7645 = vrcp.f32 %v10648_v39  ;;  %v7245_v2 = vmul.f32 -1.442695, %v2492_v27  ;;  %v3833_v11 = vmul.f32 %v9427_v36, %v3768_v41 }
 0x363   : > { %7273 = vmatmul.msk.f32.gmra.mxu1 %vm1885_vm5, %v3929_v57  ;;  %v2940_v43 = vand.u32 2147483647, %v10560_v9  ;;  %v2461_v46 = vmul.f32 %v10583_v51, %v10395_v3  ;;  %v2935_v22 = vadd.f32 %v10603_v6, %v2934_v34  ;;  %vm2936_vm13 = vweird.f32 %v10560_v9 }
 0x364   : > { %v2942_v4 = vand.u32 2147483648, %v10560_v9  ;;  %v10683_v56 = vpop.eup %7639  ;;  %v10685_v20 = vadd.f32 1.0, %v7632_v26  ;;  %7647 = vrcp.f32 %v10662_v40  ;;  %v3897_v60 = vadd.f32 %v3833_v11, %v3409_v28  ;;  %vm2938_vm14 = vmor %vm2936_vm13, %vm2937_vm12 }
 0x365   : > { %v3412_v18 = vmul.f32 %v10665_v13, %v10607_v10  ;;  %7649 = vrcp.f32 %v10671_v52  ;;  %v2493_v3 = vmul.f32 %v10583_v51, %v10401_v59  ;;  %v2939_v31 = vsel %vm2938_vm14, %v10603_v6, %v2935_v22 }
 0x366   : > { %v2943_v29 = vor.u32 1.1754944e-38, %v2942_v4  ;;  %v7642_v9 = vpop.eup %7641  ;;  %v3961_v63 = vmul.f32 %v3897_v60, %v15178_v44  ;;  %vm2941_vm15 = vcmp.eq.f32.partialorder %v2940_v43, 8.507059e+37  ;;  %v3422_v47 = vand.u32 2147483648, %v10607_v10 }
 0x367   : > { %v3413_v26 = vsub.f32 1.0, %v3412_v18  ;;  %v7644_v55 = vpop.eup %7643  ;;  %7651 = vpow2.f32 %v7245_v2  ;;  %v7214_v54 = vmul.f32 -1.442695, %v2461_v46  ;;  %v2947_v8 = vmul.f32 %v10683_v56, %v10635_v49  ;;  %v15179_v18 = vld [vmem:[#allocation25_spill] sm:$0xff] }
 0x368   : > { %v2944_v14 = vsel %vm2941_vm15, %v2943_v29, %v2939_v31  ;;  %v10698_v16 = vpop.eup %7645  ;;  %7305 = vmatmul.msk.f32.gmra.mxu3 %vm1885_vm5, %v3961_v63  ;;  %vm3417_vm0 = vweird.f32 %v10665_v13  ;;  %v3420_v6 = vand.u32 2147483647, %v10607_v10  ;;  %v10704_v27 = vadd.f32 1.0, %v7642_v9 }
 0x369   : > { %v3737_v59 = vsub.f32 1.0, %v2944_v14  ;;  %v3414_v51 = vmul.f32 %v10665_v13, %v3413_v26  ;;  %v7246_v32 = vmul.f32 -1.442695, %v2493_v3  ;;  %vm3416_vm1 = vweird.f32 %v10607_v10 }
 0x36a   : > { %v2948_v28 = vsub.f32 1.0, %v2947_v8  ;;  %v10707_v17 = vpop.eup %7647  ;;  %v3423_v34 = vor.u32 1.1754944e-38, %v3422_v47  ;;  %vm2952_vm3 = vweird.f32 %v10683_v56  ;;  %vm3418_vm4 = vmor %vm3416_vm1, %vm3417_vm0  ;;  %v2955_v2 = vand.u32 2147483647, %v10635_v49 }
 0x36b   : > { %v3802_v15 = vmul.f32 %v9427_v36, %v3737_v59  ;;  %v3415_v41 = vadd.f32 %v10665_v13, %v3414_v51  ;;  %v10712_v50 = vpop.eup %7649  ;;  %v2957_v11 = vand.u32 2147483648, %v10635_v49  ;;  %v3427_v10 = vmul.f32 %v10698_v16, %v10648_v39 }
 0x36c   : > { %v2949_v57 = vmul.f32 %v10683_v56, %v2948_v28  ;;  %7653 = vpow2.f32 %v7214_v54  ;;  %vm3421_vm6 = vcmp.eq.f32.partialorder %v3420_v6, 8.507059e+37  ;;  %vm2951_vm7 = vweird.f32 %v10635_v49 }
 0x36d   : > { %v3866_v43 = vadd.f32 %v3802_v15, %v2944_v14  ;;  %v3419_v46 = vsel %vm3418_vm4, %v10665_v13, %v3415_v41  ;;  %v7652_v22 = vpop.eup %7651  ;;  %7655 = vpow2.f32 %v7246_v32  ;;  %vm2953_vm8 = vmor %vm2951_vm7, %vm2952_vm3  ;;  %v2958_v29 = vor.u32 1.1754944e-38, %v2957_v11 }
 0x36e   : > { %v3424_v4 = vsel %vm3421_vm6, %v3423_v34, %v3419_v46  ;;  %v2950_v60 = vadd.f32 %v10683_v56, %v2949_v57  ;;  %v3428_v9 = vsub.f32 1.0, %v3427_v10  ;;  %vm2956_vm9 = vcmp.eq.f32.partialorder %v2955_v2, 8.507059e+37  ;;  %v15180_v34 = vld [vmem:[#allocation24_spill] sm:$0xff] }
 0x36f   : > { %v3930_v3 = vmul.f32 %v3866_v43, %v15179_v18  ;;  %v3769_v31 = vsub.f32 1.0, %v3424_v4  ;;  %vm3432_vm10 = vweird.f32 %v10698_v16  ;;  %v3437_v13 = vand.u32 2147483648, %v10648_v39 }
 0x370   : > { %v2954_v44 = vsel %vm2953_vm8, %v10683_v56, %v2950_v60  ;;  %v3429_v26 = vmul.f32 %v10698_v16, %v3428_v9  ;;  %v3435_v47 = vand.u32 2147483647, %v10648_v39  ;;  %7657 = vrcp.f32 %v10660_v48 }
 0x371   : > { %7274 = vmatmul.msk.f32.gmra.mxu1 %vm1885_vm5, %v3930_v3  ;;  %v3834_v63 = vmul.f32 %v9427_v36, %v3769_v31  ;;  %v2959_v49 = vsel %vm2956_vm9, %v2958_v29, %v2954_v44  ;;  %v10733_v54 = vadd.f32 1.0, %v7644_v55  ;;  %v10735_v14 = vadd.f32 1.0, %v7652_v22  ;;  %v15181_v31 = vld [vmem:[#allocation69_spill] sm:$0xff] }
 0x372   : > { %v3738_v56 = vsub.f32 1.0, %v2959_v49  ;;  %v7654_v8 = vpop.eup %7653  ;;  %7659 = vrcp.f32 %v10704_v27  ;;  %v3430_v51 = vadd.f32 %v10698_v16, %v3429_v26  ;;  %vm3431_vm11 = vweird.f32 %v10648_v39 }
 0x373   : > { %v3898_v59 = vadd.f32 %v3834_v63, %v3424_v4  ;;  %v7656_v6 = vpop.eup %7655  ;;  %v3747_v32 = vsub.f32 1.0, %v10669_v1  ;;  %vm3433_vm12 = vmor %vm3431_vm11, %vm3432_vm10  ;;  %v3438_v55 = vor.u32 1.1754944e-38, %v3437_v13  ;;  %v2962_v15 = vmul.f32 %v10707_v17, %v10662_v40 }
 0x374   : > { %v3803_v28 = vmul.f32 %v9427_v36, %v3738_v56  ;;  %v3105_v41 = vand.u32 2147483647, %v10660_v48  ;;  %v3434_v2 = vsel %vm3433_vm12, %v10698_v16, %v3430_v51  ;;  %vm3436_vm13 = vcmp.eq.f32.partialorder %v3435_v47, 8.507059e+37 }
 0x375   : > { %v3962_v57 = vmul.f32 %v3898_v59, %v15180_v34  ;;  %7661 = vrcp.f32 %v10733_v54  ;;  %v3439_v11 = vsel %vm3436_vm13, %v3438_v55, %v3434_v2  ;;  %v2963_v10 = vsub.f32 1.0, %v2962_v15 }
 0x376   : > { %v3867_v39 = vadd.f32 %v3803_v28, %v2959_v49  ;;  %7663 = vrcp.f32 %v10735_v14  ;;  %v3770_v43 = vsub.f32 1.0, %v3439_v11  ;;  %vm2967_vm14 = vweird.f32 %v10707_v17  ;;  %v10754_v22 = vpop.eup %7657 }
 0x377   : > { %7306 = vmatmul.msk.f32.gmra.mxu3 %vm1885_vm5, %v3962_v57  ;;  %v2970_v46 = vand.u32 2147483647, %v10662_v40  ;;  %v2964_v16 = vmul.f32 %v10707_v17, %v2963_v10  ;;  %v2972_v60 = vand.u32 2147483648, %v10662_v40  ;;  %v3442_v18 = vmul.f32 %v10712_v50, %v10671_v52 }
 0x378   : > { %v3931_v4 = vmul.f32 %v3867_v39, %v15062_v0  ;;  %v10761_v3 = vpop.eup %7659  ;;  %v7223_v29 = vmul.f32 -1.442695, %v15181_v31  ;;  %v10764_v9 = vadd.f32 1.0, %v7654_v8  ;;  %v10766_v44 = vadd.f32 1.0, %v7656_v6 }
 0x379   : > { %v3835_v13 = vmul.f32 %v9427_v36, %v3770_v43  ;;  %v2965_v0 = vadd.f32 %v10707_v17, %v2964_v16  ;;  %vm2966_vm15 = vweird.f32 %v10662_v40  ;;  %vm10772_vm0 = vcmp.eq.f32.partialorder %v2970_v46, 8.507059e+37 }
 0x37a   : > { %7275 = vmatmul.msk.f32.gmra.mxu1 %vm1885_vm5, %v3931_v4  ;;  %v3443_v49 = vsub.f32 1.0, %v3442_v18  ;;  %vm2968_vm1 = vmor %vm2966_vm15, %vm2967_vm14  ;;  %v2973_v47 = vor.u32 1.1754944e-38, %v2972_v60  ;;  %v3450_v56 = vand.u32 2147483647, %v10671_v52  ;;  %v3452_v8 = vand.u32 2147483648, %v10671_v52 }
 0x37b   : > { %v3899_v26 = vadd.f32 %v3835_v13, %v3439_v11  ;;  %v10780_v59 = vpop.eup %7661  ;;  %v2969_v51 = vsel %vm2968_vm1, %v10707_v17, %v2965_v0  ;;  %vm3447_vm3 = vweird.f32 %v10712_v50  ;;  %v2977_v6 = vmul.f32 %v10761_v3, %v10704_v27 }
 0x37c   : > { %v3444_v40 = vmul.f32 %v10712_v50, %v3443_v49  ;;  %v7664_v28 = vpop.eup %7663  ;;  %v3107_v55 = vand.u32 2147483648, %v10660_v48  ;;  %7665 = vpow2.f32 %v7223_v29  ;;  %v2974_v34 = vsel %vm10772_vm0, %v2973_v47, %v2969_v51 }
 0x37d   : > { %v3963_v15 = vmul.f32 %v3899_v26, %v8945_v12  ;;  %7667 = vrcp.f32 %v10764_v9  ;;  %v3739_v57 = vsub.f32 1.0, %v2974_v34  ;;  %vm3446_vm4 = vweird.f32 %v10671_v52 }
 0x37e   : > { %v3445_v17 = vadd.f32 %v10712_v50, %v3444_v40  ;;  %7669 = vrcp.f32 %v10766_v44  ;;  %vm3448_vm6 = vmor %vm3446_vm4, %vm3447_vm3  ;;  %vm3451_vm7 = vcmp.eq.f32.partialorder %v3450_v56, 8.507059e+37  ;;  %v3453_v2 = vor.u32 1.1754944e-38, %v3452_v8 }
 0x37f   : > { %7307 = vmatmul.msk.f32.gmra.mxu3 %vm1885_vm5, %v3963_v15  ;;  %v2978_v39 = vsub.f32 1.0, %v2977_v6  ;;  %v3804_v12 = vmul.f32 %v9427_v36, %v3739_v57  ;;  %v2987_v10 = vand.u32 2147483648, %v10704_v27  ;;  %v3457_v43 = vmul.f32 %v7664_v28, %v10735_v14 }
 0x380   : > { %v3449_v11 = vsel %vm3448_vm6, %v10712_v50, %v3445_v17  ;;  %vm2982_vm8 = vweird.f32 %v10761_v3  ;;  %v2985_v52 = vand.u32 2147483647, %v10704_v27  ;;  %vm2981_vm9 = vweird.f32 %v10704_v27 }
 0x381   : > { %v3454_v46 = vsel %vm3451_vm7, %v3453_v2, %v3449_v11  ;;  %v2979_v4 = vmul.f32 %v10761_v3, %v2978_v39  ;;  %v3868_v16 = vadd.f32 %v3804_v12, %v2974_v34  ;;  %v3458_v18 = vsub.f32 1.0, %v3457_v43  ;;  %vm2983_vm11 = vmor %vm2981_vm9, %vm2982_vm8 }
 0x382   : > { %v3771_v60 = vsub.f32 1.0, %v3454_v46  ;;  %v7666_v31 = vpop.eup %7665  ;;  %v2988_v50 = vor.u32 1.1754944e-38, %v2987_v10  ;;  %vm3462_vm10 = vweird.f32 %v7664_v28  ;;  %v3467_v13 = vand.u32 2147483648, %v10735_v14 }
 0x383   : > { %v2980_v29 = vadd.f32 %v10761_v3, %v2979_v4  ;;  %v7668_v0 = vpop.eup %7667  ;;  %v3932_v63 = vmul.f32 %v3868_v16, %v15067_v30  ;;  %v3459_v26 = vmul.f32 %v7664_v28, %v3458_v18  ;;  %v3465_v47 = vand.u32 2147483647, %v10735_v14 }
 0x384   : > { %v3836_v49 = vmul.f32 %v9427_v36, %v3771_v60  ;;  %v10809_v56 = vpop.eup %7669  ;;  %v10813_v27 = vmul.f32 %v10754_v22, %v10660_v48  ;;  %7671 = vrcp.f32 %v10685_v20  ;;  %vm2986_vm12 = vcmp.eq.f32.partialorder %v2985_v52, 8.507059e+37 }
 0x385   : > { %v2984_v8 = vsel %vm2983_vm11, %v10761_v3, %v2980_v29  ;;  %7276 = vmatmul.msk.f32.gmra.mxu1 %vm1885_vm5, %v3932_v63  ;;  %v3460_v40 = vadd.f32 %v7664_v28, %v3459_v26  ;;  %vm3461_vm13 = vweird.f32 %v10735_v14  ;;  %v10822_v6 = vmul.f32 %v9427_v36, %v3747_v32  ;;  %v15184_v26 = vld [vmem:[#allocation41_spill] sm:$0xff] }
 0x386   : > { %v3900_v30 = vadd.f32 %v3836_v49, %v3454_v46  ;;  %v2989_v51 = vsel %vm2986_vm12, %v2988_v50, %v2984_v8  ;;  %vm3463_vm14 = vmor %vm3461_vm13, %vm3462_vm10  ;;  %v3468_v34 = vor.u32 1.1754944e-38, %v3467_v13  ;;  %v2992_v57 = vmul.f32 %v7668_v0, %v10764_v9 }
 0x387   : > { %v3740_v15 = vsub.f32 1.0, %v2989_v51  ;;  %v10826_v3 = vadd.f32 1.0, %v7666_v31  ;;  %v3464_v2 = vsel %vm3463_vm14, %v7664_v28, %v3460_v40  ;;  %vm3466_vm15 = vcmp.eq.f32.partialorder %v3465_v47, 8.507059e+37 }
 0x388   : > { %v3964_v17 = vmul.f32 %v3900_v30, %v15063_v35  ;;  %v3098_v39 = vsub.f32 1.0, %v10813_v27  ;;  %v3469_v12 = vsel %vm3466_vm15, %v3468_v34, %v3464_v2  ;;  %v2993_v11 = vsub.f32 1.0, %v2992_v57  ;;  %v15186_v2 = vld [vmem:[#allocation43_spill] sm:$0xff] }
 0x389   : > { %v3805_v14 = vmul.f32 %v9427_v36, %v3740_v15  ;;  %v10833_v32 = vmul.f32 %v10780_v59, %v10733_v54  ;;  %v3772_v10 = vsub.f32 1.0, %v3469_v12  ;;  %v3002_v43 = vand.u32 2147483648, %v10764_v9 }
 0x38a   : > { %7308 = vmatmul.msk.f32.gmra.mxu3 %vm1885_vm5, %v3964_v17  ;;  %v3472_v35 = vmul.f32 %v10809_v56, %v10766_v44  ;;  %v10839_v28 = vpop.eup %7671  ;;  %v2994_v4 = vmul.f32 %v7668_v0, %v2993_v11  ;;  %vm2997_vm0 = vweird.f32 %v7668_v0  ;;  %v3000_v52 = vand.u32 2147483647, %v10764_v9 }
 0x38b   : > { %v3869_v46 = vadd.f32 %v3805_v14, %v2989_v51  ;;  %7673 = vrcp.f32 %v10826_v3  ;;  %v3837_v16 = vmul.f32 %v9427_v36, %v3772_v10  ;;  %vm2996_vm1 = vweird.f32 %v10764_v9  ;;  %v15187_v14 = vld [vmem:[#allocation31_spill] sm:$0xff] }
 0x38c   : > { %v3473_v60 = vsub.f32 1.0, %v3472_v35  ;;  %v2995_v31 = vadd.f32 %v7668_v0, %v2994_v4  ;;  %v3480_v29 = vand.u32 2147483647, %v10766_v44  ;;  %v3482_v50 = vand.u32 2147483648, %v10766_v44  ;;  %vm2998_vm3 = vmor %vm2996_vm1, %vm2997_vm0 }
 0x38d   : > { %v3933_v18 = vmul.f32 %v3869_v46, %v15069_v38  ;;  %v3901_v13 = vadd.f32 %v3837_v16, %v3469_v12  ;;  %v3003_v63 = vor.u32 1.1754944e-38, %v3002_v43  ;;  %vm3477_vm4 = vweird.f32 %v10809_v56  ;;  %v15185_v38 = vld [vmem:[#allocation52_spill] sm:$0xff] }
 0x38e   : > { %v3474_v49 = vmul.f32 %v10809_v56, %v3473_v60  ;;  %v7224_v47 = vmul.f32 -1.442695, %v15184_v26  ;;  %v2999_v9 = vsel %vm2998_vm3, %v7668_v0, %v2995_v31  ;;  %vm3001_vm6 = vcmp.eq.f32.partialorder %v3000_v52, 8.507059e+37  ;;  %v15188_v26 = vld [vmem:[#allocation63_spill] sm:$0xff] }
 0x38f   : > { %7277 = vmatmul.msk.f32.gmra.mxu1 %vm1885_vm5, %v3933_v18  ;;  %v3487_v8 = vmul.f32 %v15185_v38, %v9812_v53  ;;  %v3965_v30 = vmul.f32 %v3901_v13, %v15070_v24  ;;  %v3004_v51 = vsel %vm3001_vm6, %v3003_v63, %v2999_v9  ;;  %vm3476_vm7 = vweird.f32 %v10766_v44 }
 0x390   : > { %v3475_v40 = vadd.f32 %v10809_v56, %v3474_v49  ;;  %v3741_v15 = vsub.f32 1.0, %v3004_v51  ;;  %vm3478_vm8 = vmor %vm3476_vm7, %vm3477_vm4  ;;  %vm3481_vm9 = vcmp.eq.f32.partialorder %v3480_v29, 8.507059e+37  ;;  %v3483_v34 = vor.u32 1.1754944e-38, %v3482_v50 }
 0x391   : > { %v3488_v57 = vsub.f32 1.0, %v3487_v8  ;;  %v10857_v17 = vpop.eup %7673  ;;  %vm3492_vm10 = vweird.f32 %v15185_v38  ;;  %v3497_v24 = vand.u32 2147483648, %v9812_v53  ;;  %v3022_v12 = vmul.f32 %v15187_v14, %v15186_v2 }
 0x392   : > { %7309 = vmatmul.msk.f32.gmra.mxu3 %vm1885_vm5, %v3965_v30  ;;  %v3479_v0 = vsel %vm3478_vm8, %v10809_v56, %v3475_v40  ;;  %v3806_v44 = vmul.f32 %v9427_v36, %v3741_v15  ;;  %v3495_v43 = vand.u32 2147483647, %v9812_v53  ;;  %7675 = vpow2.f32 %v7224_v47 }
 0x393   : > { %v3484_v11 = vsel %vm3481_vm9, %v3483_v34, %v3479_v0  ;;  %v3489_v10 = vmul.f32 %v15185_v38, %v3488_v57  ;;  %vm3491_vm11 = vweird.f32 %v9812_v53  ;;  %v3023_v46 = vsub.f32 1.0, %v3022_v12  ;;  %v15190_v12 = vld [vmem:[#allocation45_spill] sm:$0xff] }
 0x394   : > { %v3773_v35 = vsub.f32 1.0, %v3484_v11  ;;  %v3870_v56 = vadd.f32 %v3806_v44, %v3004_v51  ;;  %v3498_v52 = vor.u32 1.1754944e-38, %v3497_v24  ;;  %vm3027_vm12 = vweird.f32 %v15187_v14  ;;  %vm3493_vm13 = vmor %vm3491_vm11, %vm3492_vm10 }
 0x395   : > { %v3490_v4 = vadd.f32 %v15185_v38, %v3489_v10  ;;  %v3024_v60 = vmul.f32 %v15187_v14, %v3023_v46  ;;  %v3030_v18 = vand.u32 2147483647, %v15186_v2  ;;  %v3032_v31 = vand.u32 2147483648, %v15186_v2 }
 0x396   : > { %v3838_v16 = vmul.f32 %v9427_v36, %v3773_v35  ;;  %v3934_v53 = vmul.f32 %v3870_v56, %v15112_v45  ;;  %vm3496_vm14 = vcmp.eq.f32.partialorder %v3495_v43, 8.507059e+37  ;;  %v3517_v50 = vmul.f32 %v10245_v23, %v10099_v37 }
 0x397   : > { %v3494_v29 = vsel %vm3493_vm13, %v15185_v38, %v3490_v4  ;;  %v3025_v49 = vadd.f32 %v15187_v14, %v3024_v60  ;;  %vm3026_vm15 = vweird.f32 %v15186_v2  ;;  %v7222_v47 = vmul.f32 -1.442695, %v15188_v26 }
 0x398   : > { %v3902_v13 = vadd.f32 %v3838_v16, %v3484_v11  ;;  %v3499_v63 = vsel %vm3496_vm14, %v3498_v52, %v3494_v29  ;;  %7278 = vmatmul.msk.f32.gmra.mxu1 %vm1885_vm5, %v3934_v53  ;;  %vm3028_vm0 = vmor %vm3026_vm15, %vm3027_vm12  ;;  %v3033_v45 = vor.u32 1.1754944e-38, %v3032_v31  ;;  %v3518_v38 = vsub.f32 1.0, %v3517_v50  ;;  %v7676_v8 = vpop.eup %7675  ;;  %v15193_v16 = vld [vmem:[#allocation33_spill] sm:$0xff]  ;;  %v15194_v31 = vld [vmem:[#allocation34_spill] sm:$0xff] }
 0x399   : > { %v3774_v9 = vsub.f32 1.0, %v3499_v63  ;;  %v3876_v30 = vadd.f32 %v10822_v6, %v10669_v1  ;;  %v3029_v40 = vsel %vm3028_vm0, %v15187_v14, %v3025_v49  ;;  %vm3031_vm1 = vcmp.eq.f32.partialorder %v3030_v18, 8.507059e+37  ;;  %v15195_v29 = vld [vmem:[#allocation77_spill] sm:$0xff] }
 0x39a   : > { %v3966_v51 = vmul.f32 %v3902_v13, %v15153_v7  ;;  %v3593_v15 = vsub.f32 1.0, %v10833_v32  ;;  %v3034_v57 = vsel %vm3031_vm1, %v3033_v45, %v3029_v40  ;;  %v3519_v0 = vmul.f32 %v10245_v23, %v3518_v38  ;;  %v15196_v50 = vld [vmem:[#allocation37_spill] sm:$0xff]  ;;  %v15223_v40 = vld [vmem:[#allocation14_spill] sm:$0xff] }
 0x39b   : > { %v3839_v34 = vmul.f32 %v9427_v36, %v3774_v9  ;;  %v3099_v24 = vmul.f32 %v10754_v22, %v3098_v39  ;;  %vm3101_vm3 = vweird.f32 %v10660_v48  ;;  %v10900_v1 = vor.u32 1.1754944e-38, %v3107_v55  ;;  %v15189_v39 = vld [vmem:[#allocation51_spill] sm:$0xff]  ;;  %v15199_v9 = vld [vmem:[#allocation70_spill] sm:$0xff] }
 0x39c   : > { %7310 = vmatmul.msk.f32.gmra.mxu3 %vm1885_vm5, %v3966_v51  ;;  %v3743_v7 = vsub.f32 1.0, %v3034_v57  ;;  %vm3522_vm4 = vweird.f32 %v10245_v23  ;;  %7677 = vpow2.f32 %v7222_v47  ;;  %v3520_v6 = vadd.f32 %v10245_v23, %v3519_v0 }
 0x39d   : > { %v3527_v32 = vand.u32 2147483648, %v10099_v37  ;;  %v3532_v27 = vmul.f32 %v10386_v25, %v10240_v19  ;;  %v7257_v2 = vmul.f32 -1.442695, %v15189_v39  ;;  %v3903_v14 = vadd.f32 %v3839_v34, %v3499_v63 }
 0x39e   : > { %vm3521_vm6 = vweird.f32 %v10099_v37  ;;  %v3525_v55 = vand.u32 2147483647, %v10099_v37  ;;  %v10912_v44 = vmul.f32 %v3876_v30, %v15190_v12  ;;  %v3594_v11 = vmul.f32 %v10780_v59, %v3593_v15 }
 0x39f   : > { %v3808_v10 = vmul.f32 %v9427_v36, %v3743_v7  ;;  %vm10916_vm7 = vmor %vm3521_vm6, %vm3522_vm4  ;;  %v3533_v35 = vsub.f32 1.0, %v3532_v27  ;;  %v10921_v46 = vadd.f32 %v10754_v22, %v3099_v24  ;;  %vm3102_vm8 = vweird.f32 %v10754_v22  ;;  %v15204_v7 = vld [vmem:[#allocation35_spill] sm:$0xff] }
 0x3a0   : > { %v3602_v56 = vand.u32 2147483648, %v10733_v54  ;;  %v3524_v37 = vsel %vm10916_vm7, %v10245_v23, %v3520_v6  ;;  %v3127_v4 = vmul.f32 %v10857_v17, %v10826_v3  ;;  %v10930_v52 = vadd.f32 1.0, %v7676_v8  ;;  %7279 = vmatmul.msk.f32.gmra.mxu1 %vm1885_vm5, %v15193_v16  ;;  %vm10954_vm13 = vmor %vm3101_vm3, %vm3102_vm8 }
 0x3a1   : > { %v3528_v60 = vor.u32 1.1754944e-38, %v3527_v32  ;;  %v3534_v18 = vmul.f32 %v10386_v25, %v3533_v35  ;;  %7679 = vpow2.f32 %v7257_v2  ;;  %v3967_v53 = vmul.f32 %v3903_v14, %v15194_v31  ;;  %v15207_v35 = vld [vmem:[#allocation9_spill] sm:$0xff] }
 0x3a2   : > { %vm3526_vm9 = vcmp.eq.f32.partialorder %v3525_v55, 8.507059e+37  ;;  %v3067_v13 = vmul.f32 %v15196_v50, %v15195_v29  ;;  %v7678_v63 = vpop.eup %7677  ;;  %v3595_v23 = vadd.f32 %v10780_v59, %v3594_v11  ;;  %vm3597_vm10 = vweird.f32 %v10780_v59 }
 0x3a3   : > { %v3872_v49 = vadd.f32 %v3808_v10, %v3034_v57  ;;  %v3529_v26 = vsel %vm3526_vm9, %v3528_v60, %v3524_v37  ;;  %vm10942_vm11 = vcmp.eq.f32.partialorder %v3105_v41, 8.507059e+37  ;;  %v7255_v45 = vmul.f32 -1.442695, %v15199_v9 }
 0x3a4   : > { %7311 = vmatmul.msk.f32.gmra.mxu3 %vm1885_vm5, %v3967_v53  ;;  %v3535_v38 = vadd.f32 %v10386_v25, %v3534_v18  ;;  %vm3537_vm12 = vweird.f32 %v10386_v25  ;;  %v3068_v8 = vsub.f32 1.0, %v3067_v13  ;;  %vm3596_vm14 = vweird.f32 %v10733_v54 }
 0x3a5   : > { %v3128_v41 = vsub.f32 1.0, %v3127_v4  ;;  %7681 = vrcp.f32 %v10930_v52  ;;  %v3542_v51 = vand.u32 2147483648, %v10240_v19  ;;  %vm10961_vm15 = vmor %vm3596_vm14, %vm3597_vm10  ;;  %v3776_v15 = vsub.f32 1.0, %v3529_v26 }
 0x3a6   : > { %vm3536_vm0 = vweird.f32 %v10240_v19  ;;  %v3540_v48 = vand.u32 2147483647, %v10240_v19  ;;  %v3069_v34 = vmul.f32 %v15196_v50, %v3068_v8  ;;  %v3104_v57 = vsel %vm10954_vm13, %v10754_v22, %v10921_v46 }
 0x3a7   : > { %v10972_v0 = vadd.f32 1.0, %v7678_v63  ;;  %v3600_v24 = vand.u32 2147483647, %v10733_v54  ;;  %v3936_v6 = vmul.f32 %v3872_v49, %v15204_v7  ;;  %vm10978_vm1 = vmor %vm3536_vm0, %vm3537_vm12  ;;  %v7680_v19 = vpop.eup %7679  ;;  %v3599_v27 = vsel %vm10961_vm15, %v10780_v59, %v3595_v23  ;;  %v15211_v49 = vld [vmem:[#allocation11_spill] sm:$0xff] }
 0x3a8   : > { %v3603_v39 = vor.u32 1.1754944e-38, %v3602_v56  ;;  %7683 = vpow2.f32 %v7255_v45  ;;  %v3539_v22 = vsel %vm10978_vm1, %v10386_v25, %v3535_v38  ;;  %v3543_v54 = vor.u32 1.1754944e-38, %v3542_v51  ;;  %v15208_v56 = vld [vmem:[#allocation36_spill] sm:$0xff]  ;;  %v15212_v38 = vld [vmem:[#allocation58_spill] sm:$0xff] }
 0x3a9   : > { %7280 = vmatmul.msk.f32.gmra.mxu1 %vm1885_vm5, %v3936_v6  ;;  %v3070_v2 = vadd.f32 %v15196_v50, %v3069_v34  ;;  %vm3072_vm3 = vweird.f32 %v15196_v50  ;;  %v3562_v14 = vmul.f32 %v10549_v33, %v10501_v61  ;;  %v3129_v55 = vmul.f32 %v10857_v17, %v3128_v41 }
 0x3aa   : > { %v3841_v59 = vmul.f32 %v9427_v36, %v3776_v15  ;;  %vm3541_vm4 = vcmp.eq.f32.partialorder %v3540_v48, 8.507059e+37  ;;  %v3077_v12 = vand.u32 2147483648, %v15195_v29  ;;  %v10998_v25 = vadd.f32 1.0, %v7680_v19  ;;  %v15215_v15 = vld [vmem:[#allocation38_spill] sm:$0xff] }
 0x3ab   : > { %v10996_v11 = vpop.eup %7681  ;;  %v3544_v10 = vsel %vm3541_vm4, %v3543_v54, %v3539_v22  ;;  %vm3071_vm6 = vweird.f32 %v15195_v29  ;;  %v3075_v43 = vand.u32 2147483647, %v15195_v29  ;;  %7685 = vrcp.f32 %v10972_v0 }
 0x3ac   : > { %vm3601_vm7 = vcmp.eq.f32.partialorder %v3600_v24, 8.507059e+37  ;;  %v7256_v46 = vmul.f32 -1.442695, %v15207_v35  ;;  %7312 = vmatmul.msk.f32.gmra.mxu3 %vm1885_vm5, %v15208_v56  ;;  %vm11008_vm8 = vmor %vm3071_vm6, %vm3072_vm3  ;;  %v3563_v4 = vsub.f32 1.0, %v3562_v14  ;;  %v11015_v16 = vsel %vm10942_vm11, %v10900_v1, %v3104_v57 }
 0x3ad   : > { %v11017_v60 = vsel %vm3601_vm7, %v3603_v39, %v3599_v27  ;;  %v3137_v18 = vand.u32 2147483648, %v10826_v3  ;;  %v3074_v31 = vsel %vm11008_vm8, %v15196_v50, %v3070_v2  ;;  %vm3132_vm9 = vweird.f32 %v10857_v17 }
 0x3ae   : > { %v7684_v53 = vpop.eup %7683  ;;  %v3905_v29 = vadd.f32 %v3841_v59, %v3529_v26  ;;  %v3777_v13 = vsub.f32 1.0, %v3544_v10  ;;  %v3078_v63 = vor.u32 1.1754944e-38, %v3077_v12  ;;  %v3130_v23 = vadd.f32 %v10857_v17, %v3129_v55  ;;  %v15216_v59 = vld [vmem:[#allocation29_spill] sm:$0xff] }
 0x3af   : > { %v3142_v1 = vmul.f32 %v10996_v11, %v10930_v52  ;;  %7687 = vrcp.f32 %v10998_v25  ;;  %vm3076_vm10 = vcmp.eq.f32.partialorder %v3075_v43, 8.507059e+37  ;;  %v7226_v47 = vmul.f32 -1.442695, %v15211_v49 }
 0x3b0   : > { %7689 = vpow2.f32 %v7256_v46  ;;  %v3079_v9 = vsel %vm3076_vm10, %v3078_v63, %v3074_v31  ;;  %v3564_v50 = vmul.f32 %v10549_v33, %v3563_v4  ;;  %v3748_v45 = vsub.f32 1.0, %v11015_v16 }
 0x3b1   : > { %vm3131_vm11 = vweird.f32 %v10826_v3  ;;  %v3135_v26 = vand.u32 2147483647, %v10826_v3  ;;  %7281 = vmatmul.msk.f32.gmra.mxu1 %vm1885_vm5, %v15212_v38  ;;  %v3577_v8 = vmul.f32 %v10839_v28, %v10685_v20  ;;  %v11037_v30 = vpop.eup %7685  ;;  %v3781_v41 = vsub.f32 1.0, %v11017_v60 }
 0x3b2   : > { %v11040_v51 = vadd.f32 1.0, %v7684_v53  ;;  %vm11044_vm12 = vmor %vm3131_vm11, %vm3132_vm9  ;;  %v3969_v3 = vmul.f32 %v3905_v29, %v15215_v15  ;;  %v3842_v48 = vmul.f32 %v9427_v36, %v3777_v13  ;;  %v3138_v57 = vor.u32 1.1754944e-38, %v3137_v18  ;;  %v15219_v18 = vld [vmem:[#allocation46_spill] sm:$0xff] }
 0x3b3   : > { %v3134_v34 = vsel %vm11044_vm12, %v10857_v17, %v3130_v23  ;;  %v3143_v24 = vsub.f32 1.0, %v3142_v1  ;;  %v3746_v7 = vsub.f32 1.0, %v3079_v9  ;;  %7691 = vpow2.f32 %v7226_v47  ;;  %v15220_v23 = vld [vmem:[#allocation40_spill] sm:$0xff] }
 0x3b4   : > { %7313 = vmatmul.msk.f32.gmra.mxu3 %vm1885_vm5, %v3969_v3  ;;  %v3565_v6 = vadd.f32 %v10549_v33, %v3564_v50  ;;  %vm3567_vm13 = vweird.f32 %v10549_v33  ;;  %v3578_v32 = vsub.f32 1.0, %v3577_v8  ;;  %v11059_v27 = vmul.f32 %v9427_v36, %v3748_v45 }
 0x3b5   : > { %v11056_v19 = vpop.eup %7687  ;;  %vm3136_vm14 = vcmp.eq.f32.partialorder %v3135_v26, 8.507059e+37  ;;  %v3572_v39 = vand.u32 2147483648, %v10501_v61  ;;  %v3112_v17 = vmul.f32 %v11037_v30, %v10972_v0  ;;  %v3906_v2 = vadd.f32 %v3842_v48, %v3544_v10 }
 0x3b6   : > { %v7690_v22 = vpop.eup %7689  ;;  %v11064_v54 = vsel %vm3136_vm14, %v3138_v57, %v3134_v34  ;;  %vm3566_vm15 = vweird.f32 %v10501_v61  ;;  %v3570_v14 = vand.u32 2147483647, %v10501_v61  ;;  %v11069_v55 = vmul.f32 %v9427_v36, %v3781_v41  ;;  %v15226_v57 = vld [vmem:[#allocation42_spill] sm:$0xff] }
 0x3b7   : > { %7693 = vrcp.f32 %v11040_v51  ;;  %v7225_v12 = vmul.f32 -1.442695, %v15216_v59  ;;  %v3811_v43 = vmul.f32 %v9427_v36, %v3746_v7  ;;  %vm11076_vm0 = vmor %vm3566_vm15, %vm3567_vm13  ;;  %v3144_v10 = vmul.f32 %v10996_v11, %v3143_v24 }
 0x3b8   : > { %v3637_v61 = vmul.f32 %v11056_v19, %v10998_v25  ;;  %v3569_v46 = vsel %vm11076_vm0, %v10549_v33, %v3565_v6  ;;  %v3579_v56 = vmul.f32 %v10839_v28, %v3578_v32  ;;  %v3750_v37 = vsub.f32 1.0, %v11064_v54  ;;  %v15229_v32 = vld [vmem:[#allocation12_spill] sm:$0xff] }
 0x3b9   : > { %v11088_v4 = vadd.f32 1.0, %v7690_v22  ;;  %7282 = vmatmul.msk.f32.gmra.mxu1 %vm1885_vm5, %v15219_v18  ;;  %v3573_v31 = vor.u32 1.1754944e-38, %v3572_v39  ;;  %v3113_v53 = vsub.f32 1.0, %v3112_v17  ;;  %v7692_v29 = vpop.eup %7691  ;;  %v3150_v13 = vand.u32 2147483647, %v10930_v52 }
 0x3ba   : > { %v3152_v63 = vand.u32 2147483648, %v10930_v52  ;;  %v3970_v1 = vmul.f32 %v3906_v2, %v15220_v23  ;;  %vm3571_vm1 = vcmp.eq.f32.partialorder %v3570_v14, 8.507059e+37  ;;  %vm3147_vm3 = vweird.f32 %v10996_v11  ;;  %v11135_v2 = vpop.f32.mrf.mxu1 }
 0x3bb   : > { %7695 = vpow2.f32 %v7225_v12  ;;  %v3875_v33 = vadd.f32 %v3811_v43, %v3079_v9  ;;  %v3574_v49 = vsel %vm3571_vm1, %v3573_v31, %v3569_v46  ;;  %v3145_v47 = vadd.f32 %v10996_v11, %v3144_v10 }
 0x3bc   : > { %v3638_v50 = vsub.f32 1.0, %v3637_v61  ;;  %7314 = vmatmul.msk.f32.gmra.mxu3 %vm1885_vm5, %v3970_v1  ;;  %v3580_v45 = vadd.f32 %v10839_v28, %v3579_v56  ;;  %vm3582_vm4 = vweird.f32 %v10839_v28  ;;  %vm3146_vm6 = vweird.f32 %v10930_v52 }
 0x3bd   : > { %v11100_v26 = vpop.eup %7693  ;;  %v11103_v38 = vadd.f32 1.0, %v7692_v29  ;;  %v3587_v8 = vand.u32 2147483648, %v10685_v20  ;;  %v3114_v9 = vmul.f32 %v11037_v30, %v3113_v53  ;;  %vm11107_vm7 = vmor %vm3146_vm6, %vm3147_vm3  ;;  %v7227_v15 = vmul.f32 -1.442695, %v15223_v40 }
 0x3be   : > { %v3779_v3 = vsub.f32 1.0, %v3574_v49  ;;  %vm3581_vm8 = vweird.f32 %v10685_v20  ;;  %v3585_v48 = vand.u32 2147483647, %v10685_v20  ;;  %vm11114_vm9 = vcmp.eq.f32.partialorder %v3150_v13, 8.507059e+37 }
 0x3bf   : > { %v3153_v52 = vor.u32 1.1754944e-38, %v3152_v63  ;;  %7697 = vrcp.f32 %v11088_v4  ;;  %v3939_v24 = vmul.f32 %v3875_v33, %v15226_v57  ;;  %vm11122_vm10 = vmor %vm3581_vm8, %vm3582_vm4  ;;  %v3149_v6 = vsel %vm11107_vm7, %v10996_v11, %v3145_v47  ;;  %v15232_v33 = vld [vmem:[#allocation57_spill] sm:$0xff] }
 0x3c0   : > { %v3639_v20 = vmul.f32 %v11056_v19, %v3638_v50  ;;  %v7258_v39 = vmul.f32 -1.442695, %v15229_v32  ;;  %v3584_v17 = vsel %vm11122_vm10, %v10839_v28, %v3580_v45  ;;  %7699 = vrcp.f32 %v11103_v38  ;;  %v11170_v50 = vpop.f32.mrf.mxu3 }
 0x3c1   : > { %v7696_v22 = vpop.eup %7695  ;;  %7283 = vmatmul.msk.f32.gmra.mxu1 %vm1885_vm5, %v3939_v24  ;;  %v3588_v14 = vor.u32 1.1754944e-38, %v3587_v8  ;;  %v3115_v59 = vadd.f32 %v11037_v30, %v3114_v9  ;;  %vm3117_vm11 = vweird.f32 %v11037_v30  ;;  %7701 = vpow2.f32 %v7227_v15  ;;  %v15237_v24 = vld [vmem:[#allocation49_spill] sm:$0xff] }
 0x3c2   : > { %v3844_v11 = vmul.f32 %v9427_v36, %v3779_v3  ;;  %vm3586_vm12 = vcmp.eq.f32.partialorder %v3585_v48, 8.507059e+37  ;;  %v3122_v12 = vand.u32 2147483648, %v10972_v0  ;;  %vm3116_vm13 = vweird.f32 %v10972_v0 }
 0x3c3   : > { %v3589_v43 = vsel %vm3586_vm12, %v3588_v14, %v3584_v17  ;;  %v3120_v28 = vand.u32 2147483647, %v10972_v0  ;;  %v3607_v35 = vmul.f32 %v11100_v26, %v11040_v51  ;;  %v3815_v10 = vmul.f32 %v9427_v36, %v3750_v37  ;;  %vm11153_vm14 = vmor %vm3116_vm13, %vm3117_vm11 }
 0x3c4   : > { %v3154_v61 = vsel %vm11114_vm9, %v3153_v52, %v3149_v6  ;;  %v11149_v46 = vadd.f32 1.0, %v7696_v22  ;;  %7703 = vpow2.f32 %v7258_v39  ;;  %7315 = vmatmul.msk.f32.gmra.mxu3 %vm1885_vm5, %v10655_v21  ;;  %vm3642_vm15 = vweird.f32 %v11056_v19  ;;  %v11197_v52 = vpop.f32.mrf.mxu1 }
 0x3c5   : > { %v11157_v18 = vpop.eup %7697  ;;  %v3647_v0 = vand.u32 2147483648, %v10998_v25  ;;  %v3119_v37 = vsel %vm11153_vm14, %v11037_v30, %v3115_v59  ;;  %v3608_v31 = vsub.f32 1.0, %v3607_v35  ;;  %v3640_v53 = vadd.f32 %v11056_v19, %v3639_v20  ;;  %v15241_v35 = vld [vmem:[#allocation61_spill] sm:$0xff] }
 0x3c6   : > { %v3908_v29 = vadd.f32 %v3844_v11, %v3574_v49  ;;  %v3780_v13 = vsub.f32 1.0, %v3589_v43  ;;  %v3123_v21 = vor.u32 1.1754944e-38, %v3122_v12  ;;  %v11165_v63 = vpop.eup %7699  ;;  %v3877_v23 = vadd.f32 %v11059_v27, %v11015_v16 }
 0x3c7   : > { %v3751_v1 = vsub.f32 1.0, %v3154_v61  ;;  %v7260_v47 = vmul.f32 -1.442695, %v15232_v33  ;;  %vm3121_vm0 = vcmp.eq.f32.partialorder %v3120_v28, 8.507059e+37  ;;  %v7702_v45 = vpop.eup %7701  ;;  %vm3641_vm1 = vweird.f32 %v10998_v25  ;;  %v15240_v28 = vld [vmem:[#allocation55_spill] sm:$0xff] }
 0x3c8   : > { %v3645_v30 = vand.u32 2147483647, %v10998_v25  ;;  %v3124_v8 = vsel %vm3121_vm0, %v3123_v21, %v3119_v37  ;;  %v3609_v49 = vmul.f32 %v11100_v26, %v3608_v31  ;;  %v3910_v9 = vadd.f32 %v11069_v55, %v11017_v60  ;;  %vm11181_vm3 = vmor %vm3641_vm1, %vm3642_vm15  ;;  %v15235_v60 = vld [vmem:[#allocation74_spill] sm:$0xff] }
 0x3c9   : > { %v3879_v41 = vadd.f32 %v3815_v10, %v11064_v54  ;;  %7705 = vrcp.f32 %v11149_v46  ;;  %v3648_v27 = vor.u32 1.1754944e-38, %v3647_v0  ;;  %7284 = vmatmul.msk.f32.gmra.mxu1 %vm1885_vm5, %v10912_v44  ;;  %v3644_v40 = vsel %vm11181_vm3, %v11056_v19, %v3640_v53  ;;  %v15236_v54 = vld [vmem:[#allocation48_spill] sm:$0xff]  ;;  %v11234_v53 = vpop.f32.mrf.mxu3 }
 0x3ca   : > { %v7704_v25 = vpop.eup %7703  ;;  %v7259_v55 = vmul.f32 -1.442695, %v15235_v60  ;;  %v3972_v15 = vmul.f32 %v3908_v29, %v15236_v54  ;;  %v3845_v3 = vmul.f32 %v9427_v36, %v3780_v13  ;;  %v3172_v48 = vmul.f32 %v11165_v63, %v11103_v38 }
 0x3cb   : > { %v11195_v34 = vadd.f32 1.0, %v7702_v45  ;;  %7707 = vpow2.f32 %v7260_v47  ;;  %v3749_v44 = vsub.f32 1.0, %v3124_v8  ;;  %v3816_v57 = vmul.f32 %v9427_v36, %v3751_v1 }
 0x3cc   : > { %vm3646_vm4 = vcmp.eq.f32.partialorder %v3645_v30, 8.507059e+37  ;;  %7316 = vmatmul.msk.f32.gmra.mxu3 %vm1885_vm5, %v3972_v15  ;;  %v3610_v19 = vadd.f32 %v11100_v26, %v3609_v49  ;;  %vm3612_vm6 = vweird.f32 %v11100_v26  ;;  %v3941_v7 = vmul.f32 %v3877_v23, %v15237_v24  ;;  %v11243_v1 = vpop.f32.mrf.mxu1  ;;  %v15243_v30 = vld [vmem:[#allocation15_spill] sm:$0xff] }
 0x3cd   : > { %v11204_v6 = vsel %vm3646_vm4, %v3648_v27, %v3644_v40  ;;  %v11206_v20 = vadd.f32 1.0, %v7704_v25  ;;  %v3617_v32 = vand.u32 2147483648, %v11040_v51  ;;  %7709 = vpow2.f32 %v7259_v55 }
 0x3ce   : > { %v3909_v39 = vadd.f32 %v3845_v3, %v3589_v43  ;;  %vm3611_vm7 = vweird.f32 %v11040_v51  ;;  %v3615_v17 = vand.u32 2147483647, %v11040_v51  ;;  %v3173_v14 = vsub.f32 1.0, %v3172_v48  ;;  %v15244_v3 = vld [vmem:[#allocation54_spill] sm:$0xff] }
 0x3cf   : > { %v11211_v22 = vpop.eup %7705  ;;  %7711 = vrcp.f32 %v11195_v34  ;;  %v3814_v59 = vmul.f32 %v9427_v36, %v3749_v44  ;;  %vm11215_vm8 = vmor %vm3611_vm7, %vm3612_vm6  ;;  %v3622_v12 = vmul.f32 %v11157_v18, %v11088_v4  ;;  %v11222_v43 = vmul.f32 %v3910_v9, %v15240_v28 }
 0x3d0   : > { %v11225_v10 = vmul.f32 %v3879_v41, %v15241_v35  ;;  %v11227_v51 = vadd.f32 %v3816_v57, %v3154_v61  ;;  %v3614_v56 = vsel %vm11215_vm8, %v11100_v26, %v3610_v19  ;;  %v3784_v37 = vsub.f32 1.0, %v11204_v6  ;;  %v15242_v61 = vld [vmem:[#allocation53_spill] sm:$0xff] }
 0x3d1   : > { %v7708_v0 = vpop.eup %7707  ;;  %v7229_v31 = vmul.f32 -1.442695, %v10495_v42  ;;  %7285 = vmatmul.msk.f32.gmra.mxu1 %vm1885_vm5, %v3941_v7  ;;  %v3618_v29 = vor.u32 1.1754944e-38, %v3617_v32  ;;  %v3623_v13 = vsub.f32 1.0, %v3622_v12  ;;  %vm3176_vm9 = vweird.f32 %v11103_v38  ;;  %v11279_v24 = vpop.f32.mrf.mxu3 }
 0x3d2   : > { %7713 = vrcp.f32 %v11206_v20  ;;  %v3973_v21 = vmul.f32 %v3909_v39, %v15242_v61  ;;  %vm3616_vm10 = vcmp.eq.f32.partialorder %v3615_v17, 8.507059e+37  ;;  %v3157_v26 = vmul.f32 %v11211_v22, %v11149_v46 }
 0x3d3   : > { %v3174_v23 = vmul.f32 %v11165_v63, %v3173_v14  ;;  %v3878_v42 = vadd.f32 %v3814_v59, %v3124_v8  ;;  %v3619_v33 = vsel %vm3616_vm10, %v3618_v29, %v3614_v56  ;;  %v3624_v47 = vmul.f32 %v11157_v18, %v3623_v13  ;;  %v7710_v45 = vpop.eup %7709 }
 0x3d4   : > { %v7228_v49 = vmul.f32 -1.442695, %v15243_v30  ;;  %v11247_v9 = vadd.f32 1.0, %v7708_v0  ;;  %7317 = vmatmul.msk.f32.gmra.mxu3 %vm1885_vm5, %v3973_v21  ;;  %vm3627_vm11 = vweird.f32 %v11157_v18  ;;  %v3158_v41 = vsub.f32 1.0, %v3157_v26 }
 0x3d5   : > { %v11251_v16 = vpop.eup %7711  ;;  %7715 = vpow2.f32 %v7229_v31  ;;  %v7261_v27 = vmul.f32 -1.442695, %v10499_v58  ;;  %v3625_v8 = vadd.f32 %v11157_v18, %v3624_v47  ;;  %v3632_v25 = vand.u32 2147483648, %v11088_v4 }
 0x3d6   : > { %v3782_v40 = vsub.f32 1.0, %v3619_v33  ;;  %vm3626_vm12 = vweird.f32 %v11088_v4  ;;  %v3630_v60 = vand.u32 2147483647, %v11088_v4  ;;  %v3159_v55 = vmul.f32 %v11211_v22, %v3158_v41 }
 0x3d7   : > { %v3175_v54 = vadd.f32 %v11165_v63, %v3174_v23  ;;  %vm3177_vm13 = vweird.f32 %v11165_v63  ;;  %v3182_v15 = vand.u32 2147483648, %v11103_v38  ;;  %v3942_v48 = vmul.f32 %v3878_v42, %v15244_v3  ;;  %vm11265_vm14 = vmor %vm3626_vm12, %vm3627_vm11 }
 0x3d8   : > { %v11269_v44 = vpop.eup %7713  ;;  %v11271_v57 = vadd.f32 1.0, %v7710_v45  ;;  %v3187_v4 = vmul.f32 %v11251_v16, %v11195_v34  ;;  %7717 = vpow2.f32 %v7228_v49  ;;  %v3629_v19 = vsel %vm11265_vm14, %v11157_v18, %v3625_v8  ;;  %vm11290_vm1 = vmor %vm3176_vm9, %vm3177_vm13 }
 0x3d9   : > { %7719 = vrcp.f32 %v11247_v9  ;;  %7286 = vmatmul.msk.f32.gmra.mxu1 %vm1885_vm5, %v3942_v48  ;;  %v3633_v7 = vor.u32 1.1754944e-38, %v3632_v25  ;;  %v3160_v32 = vadd.f32 %v11211_v22, %v3159_v55  ;;  %vm3162_vm15 = vweird.f32 %v11211_v22 }
 0x3da   : > { %7721 = vpow2.f32 %v7261_v27  ;;  %v3847_v39 = vmul.f32 %v9427_v36, %v3782_v40  ;;  %vm3631_vm0 = vcmp.eq.f32.partialorder %v3630_v60, 8.507059e+37  ;;  %v3167_v17 = vand.u32 2147483648, %v11149_v46  ;;  %v11339_v60 = vpop.f32.mrf.mxu3 }
 0x3db   : > { %v7716_v14 = vpop.eup %7715  ;;  %v7230_v59 = vmul.f32 -1.442695, %v10587_v62  ;;  %v3634_v11 = vsel %vm3631_vm0, %v3633_v7, %v3629_v19  ;;  %vm3161_vm3 = vweird.f32 %v11149_v46  ;;  %v3165_v12 = vand.u32 2147483647, %v11149_v46  ;;  %v11311_v46 = vpop.f32.mrf.mxu1 }
 0x3dc   : > { %v3849_v28 = vmul.f32 %v9427_v36, %v3784_v37  ;;  %v3179_v35 = vsel %vm11290_vm1, %v11165_v63, %v3175_v54  ;;  %v3180_v56 = vand.u32 2147483647, %v11103_v38  ;;  %v3183_v0 = vor.u32 1.1754944e-38, %v3182_v15  ;;  %7318 = vmatmul.msk.f32.gmra.mxu3 %vm1885_vm5, %v11222_v43  ;;  %vm11306_vm4 = vmor %vm3161_vm3, %vm3162_vm15 }
 0x3dd   : > { %v3188_v31 = vsub.f32 1.0, %v3187_v4  ;;  %7723 = vrcp.f32 %v11271_v57  ;;  %v3164_v63 = vsel %vm11306_vm4, %v11211_v22, %v3160_v32  ;;  %v3652_v38 = vmul.f32 %v11269_v44, %v11206_v20  ;;  %v15251_v22 = vld [vmem:[#allocation65_spill] sm:$0xff] }
 0x3de   : > { %v7718_v37 = vpop.eup %7717  ;;  %v11318_v43 = vadd.f32 1.0, %v7716_v14  ;;  %v3911_v29 = vadd.f32 %v3847_v39, %v3619_v33  ;;  %v3783_v13 = vsub.f32 1.0, %v3634_v11  ;;  %v3168_v61 = vor.u32 1.1754944e-38, %v3167_v17 }
 0x3df   : > { %v11320_v21 = vpop.eup %7719  ;;  %7725 = vpow2.f32 %v7230_v59  ;;  %v7262_v26 = vmul.f32 -1.442695, %v10591_v5  ;;  %vm3166_vm6 = vcmp.eq.f32.partialorder %v3165_v12, 8.507059e+37  ;;  %v3653_v23 = vsub.f32 1.0, %v3652_v38  ;;  %v15252_v5 = vld [vmem:[#allocation62_spill] sm:$0xff] }
 0x3e0   : > { %v7722_v42 = vpop.eup %7721  ;;  %vm3181_vm7 = vcmp.eq.f32.partialorder %v3180_v56, 8.507059e+37  ;;  %v3169_v47 = vsel %vm3166_vm6, %v3168_v61, %v3164_v63  ;;  %v3944_v45 = vmul.f32 %v11227_v51, %v15251_v22  ;;  %v3189_v49 = vmul.f32 %v11251_v16, %v3188_v31  ;;  %v15257_v31 = vld [vmem:[#allocation66_spill] sm:$0xff] }
 0x3e1   : > { %v3184_v30 = vsel %vm3181_vm7, %v3183_v0, %v3179_v35  ;;  %7287 = vmatmul.msk.f32.gmra.mxu1 %vm1885_vm5, %v11225_v10  ;;  %v3654_v33 = vmul.f32 %v11269_v44, %v3653_v23  ;;  %v3913_v41 = vadd.f32 %v3849_v28, %v11204_v6  ;;  %7727 = vrcp.f32 %v11318_v43  ;;  %v15258_v23 = vld [vmem:[#allocation68_spill] sm:$0xff]  ;;  %v15264_v35 = vld [vmem:[#allocation73_spill] sm:$0xff] }
 0x3e2   : > { %v3975_v27 = vmul.f32 %v3911_v29, %v15252_v5  ;;  %v3848_v8 = vmul.f32 %v9427_v36, %v3783_v13  ;;  %v11335_v40 = vadd.f32 1.0, %v7718_v37  ;;  %v3682_v51 = vmul.f32 %v11320_v21, %v11247_v9 }
 0x3e3   : > { %v11333_v25 = vpop.eup %7723  ;;  %7729 = vpow2.f32 %v7262_v26  ;;  %v3752_v10 = vsub.f32 1.0, %v3169_v47  ;;  %v3753_v55 = vsub.f32 1.0, %v3184_v30  ;;  %v11341_v54 = vadd.f32 1.0, %v7722_v42  ;;  %v11356_v39 = vpop.f32.mrf.mxu1 }
 0x3e4   : > { %7319 = vmatmul.msk.f32.gmra.mxu3 %vm1885_vm5, %v3975_v27  ;;  %v3655_v6 = vadd.f32 %v11269_v44, %v3654_v33  ;;  %vm3657_vm8 = vweird.f32 %v11269_v44  ;;  %v3190_v3 = vadd.f32 %v11251_v16, %v3189_v49  ;;  %vm3192_vm9 = vweird.f32 %v11251_v16 }
 0x3e5   : > { %v7726_v15 = vpop.eup %7725  ;;  %v3197_v48 = vand.u32 2147483648, %v11195_v34  ;;  %v3662_v58 = vand.u32 2147483648, %v11206_v20  ;;  %v3912_v4 = vadd.f32 %v3848_v8, %v3634_v11  ;;  %vm3656_vm10 = vweird.f32 %v11206_v20 }
 0x3e6   : > { %v3660_v19 = vand.u32 2147483647, %v11206_v20  ;;  %v3667_v7 = vmul.f32 %v11333_v25, %v11271_v57  ;;  %vm3191_vm11 = vweird.f32 %v11195_v34  ;;  %7731 = vrcp.f32 %v11335_v40  ;;  %vm11361_vm12 = vmor %vm3656_vm10, %vm3657_vm8 }
 0x3e7   : > { %v3683_v32 = vsub.f32 1.0, %v3682_v51  ;;  %v3817_v17 = vmul.f32 %v9427_v36, %v3752_v10  ;;  %v11365_v18 = vpop.eup %7727  ;;  %7733 = vrcp.f32 %v11341_v54  ;;  %v11368_v20 = vadd.f32 1.0, %v7726_v15  ;;  %vm11376_vm13 = vmor %vm3191_vm11, %vm3192_vm9  ;;  %v15259_v51 = vld [vmem:[#allocation67_spill] sm:$0xff] }
 0x3e8   : > { %v3659_v59 = vsel %vm11361_vm12, %v11269_v44, %v3655_v6  ;;  %v3668_v11 = vsub.f32 1.0, %v3667_v7  ;;  %v3818_v28 = vmul.f32 %v9427_v36, %v3753_v55  ;;  %v3195_v56 = vand.u32 2147483647, %v11195_v34 }
 0x3e9   : > { %v7730_v12 = vpop.eup %7729  ;;  %v3198_v0 = vor.u32 1.1754944e-38, %v3197_v48  ;;  %7288 = vmatmul.msk.f32.gmra.mxu1 %vm1885_vm5, %v3944_v45  ;;  %v3663_v62 = vor.u32 1.1754944e-38, %v3662_v58  ;;  %v3194_v44 = vsel %vm11376_vm13, %v11251_v16, %v3190_v3  ;;  %v3976_v63 = vmul.f32 %v3912_v4, %v15257_v31  ;;  %v11399_v45 = vpop.f32.mrf.mxu3 }
 0x3ea   : > { %vm3661_vm14 = vcmp.eq.f32.partialorder %v3660_v19, 8.507059e+37  ;;  %v3669_v38 = vmul.f32 %v11333_v25, %v3668_v11  ;;  %v3684_v37 = vmul.f32 %v11320_v21, %v3683_v32  ;;  %v3217_v29 = vmul.f32 %v11365_v18, %v11318_v43 }
 0x3eb   : > { %v3881_v13 = vadd.f32 %v3817_v17, %v3169_v47  ;;  %v3664_v34 = vsel %vm3661_vm14, %v3663_v62, %v3659_v59  ;;  %v11390_v61 = vadd.f32 1.0, %v7730_v12  ;;  %7735 = vrcp.f32 %v11368_v20 }
 0x3ec   : > { %7320 = vmatmul.msk.f32.gmra.mxu3 %vm1885_vm5, %v3976_v63  ;;  %v3670_v16 = vadd.f32 %v11333_v25, %v3669_v38  ;;  %vm3672_vm15 = vweird.f32 %v11333_v25  ;;  %v11396_v26 = vpop.eup %7731  ;;  %v3977_v42 = vmul.f32 %v3913_v41, %v15258_v23  ;;  %v3882_v22 = vadd.f32 %v3818_v28, %v3184_v30  ;;  %v11410_v30 = vpop.f32.mrf.mxu1 }
 0x3ed   : > { %vm3196_vm0 = vcmp.eq.f32.partialorder %v3195_v56, 8.507059e+37  ;;  %v3677_v47 = vand.u32 2147483648, %v11271_v57  ;;  %v11402_v49 = vpop.eup %7733  ;;  %v3785_v5 = vsub.f32 1.0, %v3664_v34  ;;  %vm3671_vm1 = vweird.f32 %v11271_v57 }
 0x3ee   : > { %v11404_v33 = vsel %vm3196_vm0, %v3198_v0, %v3194_v44  ;;  %v3675_v27 = vand.u32 2147483647, %v11271_v57  ;;  %v3685_v8 = vadd.f32 %v11320_v21, %v3684_v37  ;;  %vm3687_vm3 = vweird.f32 %v11320_v21  ;;  %vm11415_vm4 = vmor %vm3671_vm1, %vm3672_vm15 }
 0x3ef   : > { %v3218_v41 = vsub.f32 1.0, %v3217_v29  ;;  %v3945_v10 = vmul.f32 %v3881_v13, %v15259_v51  ;;  %vm3686_vm6 = vweird.f32 %v11247_v9  ;;  %7737 = vrcp.f32 %v11390_v61 }
 0x3f0   : > { %v3674_v57 = vsel %vm11415_vm4, %v11333_v25, %v3670_v16  ;;  %v3202_v6 = vmul.f32 %v11396_v26, %v11335_v40  ;;  %v3690_v15 = vand.u32 2147483647, %v11247_v9  ;;  %v3692_v3 = vand.u32 2147483648, %v11247_v9  ;;  %vm11436_vm7 = vmor %vm3686_vm6, %vm3687_vm3 }
 0x3f1   : > { %7289 = vmatmul.msk.f32.gmra.mxu1 %vm1885_vm5, %v3945_v10  ;;  %v3678_v48 = vor.u32 1.1754944e-38, %v3677_v47  ;;  %v3697_v58 = vmul.f32 %v11402_v49, %v11341_v54  ;;  %v11431_v4 = vpop.eup %7735  ;;  %v3754_v19 = vsub.f32 1.0, %v11404_v33  ;;  %v3850_v7 = vmul.f32 %v9427_v36, %v3785_v5  ;;  %v11453_v62 = vpop.f32.mrf.mxu3 }
 0x3f2   : > { %vm3676_vm8 = vcmp.eq.f32.partialorder %v3675_v27, 8.507059e+37  ;;  %v3203_v9 = vsub.f32 1.0, %v3202_v6  ;;  %v3689_v32 = vsel %vm11436_vm7, %v11320_v21, %v3685_v8  ;;  %v3219_v17 = vmul.f32 %v11365_v18, %v3218_v41  ;;  %v15265_v8 = vld [vmem:[#allocation26_spill] sm:$0xff] }
 0x3f3   : > { %v3679_v14 = vsel %vm3676_vm8, %v3678_v48, %v3674_v57  ;;  %v3212_v59 = vand.u32 2147483648, %v11335_v40  ;;  %vm3207_vm9 = vweird.f32 %v11396_v26  ;;  %v3210_v12 = vand.u32 2147483647, %v11335_v40 }
 0x3f4   : > { %7321 = vmatmul.msk.f32.gmra.mxu3 %vm1885_vm5, %v3977_v42  ;;  %v3204_v11 = vmul.f32 %v11396_v26, %v3203_v9  ;;  %v3698_v28 = vsub.f32 1.0, %v3697_v58  ;;  %v3946_v56 = vmul.f32 %v3882_v22, %v15264_v35  ;;  %vm3691_vm10 = vcmp.eq.f32.partialorder %v3690_v15, 8.507059e+37 }
 0x3f5   : > { %v3693_v0 = vor.u32 1.1754944e-38, %v3692_v3  ;;  %v3232_v21 = vmul.f32 %v11431_v4, %v11368_v20  ;;  %v11455_v44 = vpop.eup %7737  ;;  %v3914_v31 = vadd.f32 %v3850_v7, %v3664_v34  ;;  %v3786_v63 = vsub.f32 1.0, %v3679_v14 }
 0x3f6   : > { %v3205_v38 = vadd.f32 %v11396_v26, %v3204_v11  ;;  %vm3206_vm11 = vweird.f32 %v11335_v40  ;;  %v3819_v37 = vmul.f32 %v9427_v36, %v3754_v19  ;;  %vm3222_vm12 = vweird.f32 %v11365_v18  ;;  %v11467_v40 = vpop.f32.mrf.mxu1 }
 0x3f7   : > { %v3694_v29 = vsel %vm3691_vm10, %v3693_v0, %v3689_v32  ;;  %vm3208_vm13 = vmor %vm3206_vm11, %vm3207_vm9  ;;  %v3213_v13 = vor.u32 1.1754944e-38, %v3212_v59  ;;  %v3220_v16 = vadd.f32 %v11365_v18, %v3219_v17  ;;  %vm3211_vm14 = vcmp.eq.f32.partialorder %v3210_v12, 8.507059e+37 }
 0x3f8   : > { %v3209_v23 = vsel %vm3208_vm13, %v11396_v26, %v3205_v38  ;;  %v3699_v34 = vmul.f32 %v11402_v49, %v3698_v28  ;;  %v3227_v42 = vand.u32 2147483648, %v11318_v43  ;;  %v3233_v22 = vsub.f32 1.0, %v3232_v21 }
 0x3f9   : > { %7290 = vmatmul.msk.f32.gmra.mxu1 %vm1885_vm5, %v3946_v56  ;;  %v3214_v47 = vsel %vm3211_vm14, %v3213_v13, %v3209_v23  ;;  %v3712_v5 = vmul.f32 %v11455_v44, %v11390_v61  ;;  %vm3221_vm15 = vweird.f32 %v11318_v43  ;;  %v3225_v27 = vand.u32 2147483647, %v11318_v43  ;;  %v11494_v9 = vpop.f32.mrf.mxu3  ;;  %v15271_v56 = vld [vmem:[#allocation50_spill] sm:$0xff] }
 0x3fa   : > { %v3978_v26 = vmul.f32 %v3914_v31, %v15265_v8  ;;  %v3851_v41 = vmul.f32 %v9427_v36, %v3786_v63  ;;  %v3883_v51 = vadd.f32 %v3819_v37, %v11404_v33  ;;  %vm11479_vm0 = vmor %vm3221_vm15, %vm3222_vm12  ;;  %v3755_v55 = vsub.f32 1.0, %v3214_v47 }
 0x3fb   : > { %v3224_v57 = vsel %vm11479_vm0, %v11365_v18, %v3220_v16  ;;  %v3700_v43 = vadd.f32 %v11402_v49, %v3699_v34  ;;  %vm3702_vm1 = vweird.f32 %v11402_v49  ;;  %v3713_v6 = vsub.f32 1.0, %v3712_v5  ;;  %v15268_v18 = vld [vmem:[#allocation10_spill] sm:$0xff] }
 0x3fc   : > { %7322 = vmatmul.msk.f32.gmra.mxu3 %vm1885_vm5, %v3978_v26  ;;  %v3787_v15 = vsub.f32 1.0, %v3694_v29  ;;  %v3228_v33 = vor.u32 1.1754944e-38, %v3227_v42  ;;  %v3234_v3 = vmul.f32 %v11431_v4, %v3233_v22  ;;  %v3707_v48 = vand.u32 2147483648, %v11341_v54  ;;  %v15275_v26 = vld [vmem:[#allocation13_spill] sm:$0xff] }
 0x3fd   : > { %vm3226_vm3 = vcmp.eq.f32.partialorder %v3225_v27, 8.507059e+37  ;;  %v3915_v58 = vadd.f32 %v3851_v41, %v3679_v14  ;;  %vm3701_vm4 = vweird.f32 %v11341_v54  ;;  %v3705_v19 = vand.u32 2147483647, %v11341_v54 }
 0x3fe   : > { %v3947_v25 = vmul.f32 %v3883_v51, %v15268_v18  ;;  %v3229_v7 = vsel %vm3226_vm3, %v3228_v33, %v3224_v57  ;;  %v3820_v32 = vmul.f32 %v9427_v36, %v3755_v55  ;;  %vm11497_vm6 = vmor %vm3701_vm4, %vm3702_vm1  ;;  %v3714_v14 = vmul.f32 %v11455_v44, %v3713_v6  ;;  %v11513_v21 = vpop.f32.mrf.mxu1 }
 0x3ff   : > { %v3704_v59 = vsel %vm11497_vm6, %v11402_v49, %v3700_v43  ;;  %v3852_v11 = vmul.f32 %v9427_v36, %v3787_v15  ;;  %v3235_v54 = vadd.f32 %v11431_v4, %v3234_v3  ;;  %vm3237_vm7 = vweird.f32 %v11431_v4 }
 0x400   : > { %v3708_v12 = vor.u32 1.1754944e-38, %v3707_v48  ;;  %v3756_v28 = vsub.f32 1.0, %v3229_v7  ;;  %v3242_v35 = vand.u32 2147483648, %v11368_v20  ;;  %v3979_v0 = vmul.f32 %v3915_v58, %v15271_v56  ;;  %v15277_v48 = vld [vmem:[#allocation76_spill] sm:$0xff] }
 0x401   : > { %7291 = vmatmul.msk.f32.gmra.mxu1 %vm1885_vm5, %v3947_v25  ;;  %vm3706_vm8 = vcmp.eq.f32.partialorder %v3705_v19, 8.507059e+37  ;;  %vm3236_vm9 = vweird.f32 %v11368_v20  ;;  %v3240_v49 = vand.u32 2147483647, %v11368_v20  ;;  %v3884_v31 = vadd.f32 %v3820_v32, %v3214_v47  ;;  %v15274_v47 = vld [vmem:[#allocation47_spill] sm:$0xff]  ;;  %v11531_v8 = vpop.f32.mrf.mxu3  ;;  %v15278_v32 = vld [vmem:[#allocation56_spill] sm:$0xff] }
 0x402   : > { %v3709_v63 = vsel %vm3706_vm8, %v3708_v12, %v3704_v59  ;;  %vm11515_vm10 = vmor %vm3236_vm9, %vm3237_vm7  ;;  %v3715_v37 = vadd.f32 %v11455_v44, %v3714_v14  ;;  %vm3717_vm11 = vweird.f32 %v11455_v44  ;;  %v3916_v13 = vadd.f32 %v3852_v11, %v3694_v29  ;;  %v15279_v59 = vld [vmem:[#allocation16_spill] sm:$0xff] }
 0x403   : > { %v3239_v16 = vsel %vm11515_vm10, %v11431_v4, %v3235_v54  ;;  %v3722_v20 = vand.u32 2147483648, %v11390_v61  ;;  %v3243_v23 = vor.u32 1.1754944e-38, %v3242_v35  ;;  %v3788_v34 = vsub.f32 1.0, %v3709_v63 }
 0x404   : > { %7323 = vmatmul.msk.f32.gmra.mxu3 %vm1885_vm5, %v3979_v0  ;;  %vm3716_vm12 = vweird.f32 %v11390_v61  ;;  %v3720_v42 = vand.u32 2147483647, %v11390_v61  ;;  %v3821_v22 = vmul.f32 %v9427_v36, %v3756_v28  ;;  %vm3241_vm13 = vcmp.eq.f32.partialorder %v3240_v49, 8.507059e+37 }
 0x405   : > { %v3948_v5 = vmul.f32 %v3884_v31, %v15274_v47  ;;  %vm3718_vm14 = vmor %vm3716_vm12, %vm3717_vm11  ;;  %v3244_v27 = vsel %vm3241_vm13, %v3243_v23, %v3239_v16  ;;  %v3723_v4 = vor.u32 1.1754944e-38, %v3722_v20  ;;  %v3980_v41 = vmul.f32 %v3916_v13, %v15275_v26  ;;  %v11582_v16 = vld [vmem:[%s14743_s5] ss:$0 sm:$0xff] }
 0x406   : > { %v3719_v29 = vsel %vm3718_vm14, %v11455_v44, %v3715_v37  ;;  %v3853_v51 = vmul.f32 %v9427_v36, %v3788_v34  ;;  %vm3721_vm15 = vcmp.eq.f32.partialorder %v3720_v42, 8.507059e+37  ;;  %v3885_v61 = vadd.f32 %v3821_v22, %v3229_v7  ;;  %v11536_v55 = vpop.f32.mrf.mxu1  ;;  %v15276_v44 = vld [vmem:[#allocation75_spill] sm:$0xff] }
 0x407   : > { %v3757_v10 = vsub.f32 1.0, %v3244_v27  ;;  %v3724_v57 = vsel %vm3721_vm15, %v3723_v4, %v3719_v29  ;;  %v11589_v23 = vadd.f32 %v11582_v16, %v11135_v2  ;;  %v11597_v47 = vadd.f32 %v11582_v16, %v11170_v50 }
 0x408   : > { %v3917_v43 = vadd.f32 %v3853_v51, %v3709_v63  ;;  %v3789_v6 = vsub.f32 1.0, %v3724_v57  ;;  %v3949_v15 = vmul.f32 %v3885_v61, %v15276_v44 }
 0x409   : > { %7292 = vmatmul.msk.f32.gmra.mxu1 %vm1885_vm5, %v3948_v5  ;;  %v3822_v33 = vmul.f32 %v9427_v36, %v3757_v10  ;;  %v11541_v3 = vpop.f32.mrf.mxu3  ;;  %15285 = vst [vmem:[#allocation72_spill] sm:$0xff] %v11589_v23  ;;  %v4393_v22 = vsel %vm1344_vm2, %v11589_v23, 0.0  ;;  %v4396_v29 = vsel %vm1344_vm2, %v11597_v47, 0.0 }
 0x40a   : > { %v3981_v58 = vmul.f32 %v3917_v43, %v15277_v48  ;;  %v3854_v19 = vmul.f32 %v9427_v36, %v3789_v6  ;;  %15286 = vst [vmem:[#allocation28_spill] sm:$0xff] %v11597_v47  ;;  %v11617_v43 = vadd.f32 %v11582_v16, %v11197_v52  ;;  %v11632_v52 = vadd.f32 %v11582_v16, %v11234_v53 }
 0x40b   : > { %v3886_v18 = vadd.f32 %v3822_v33, %v3244_v27 }
 0x40c   : > { %7324 = vmatmul.msk.f32.gmra.mxu3 %vm1885_vm5, %v3980_v41  ;;  %v3918_v7 = vadd.f32 %v3854_v19, %v3724_v57  ;;  %15289 = vst [vmem:[#allocation59_spill] sm:$0xff] %v11617_v43  ;;  %v4400_v19 = vsel %vm1344_vm2, %v11617_v43, 0.0 }
 0x40d   : > { %v3950_v17 = vmul.f32 %v3886_v18, %v15278_v32  ;;  %15290 = vst [vmem:[#allocation19_spill] sm:$0xff] %v11632_v52 }
 0x40e   : > { %v11547_v25 = vpop.f32.mrf.mxu1  ;;  %v3982_v14 = vmul.f32 %v3918_v7, %v15279_v59 }
 0x411   : > { %7293 = vmatmul.msk.f32.gmra.mxu1 %vm1885_vm5, %v3949_v15  ;;  %v11552_v11 = vpop.f32.mrf.mxu3 }
 0x414   : > { %7325 = vmatmul.msk.f32.gmra.mxu3 %vm1885_vm5, %v3981_v58 }
 0x416   : > { %v11555_v54 = vpop.f32.mrf.mxu1 }
 0x419   : > { %7294 = vmatmul.msk.f32.gmra.mxu1 %vm1885_vm5, %v3950_v17  ;;  %v11557_v12 = vpop.f32.mrf.mxu3 }
 0x41c   : > { %7326 = vmatmul.msk.f32.gmra.mxu3 %vm1885_vm5, %v3982_v14  ;;  %v11644_v14 = vadd.f32 %v11582_v16, %v11243_v1 }
 0x41e   : > { %v11559_v36 = vpop.f32.mrf.mxu1  ;;  %15293 = vst [vmem:[#allocation21_spill] sm:$0xff] %v11644_v14  ;;  %v4407_v1 = vsel %vm1344_vm2, %v11644_v14, 0.0 }
 0x421   : > { %v11561_v28 = vpop.f32.mrf.mxu3 }
 0x426   : > { %v11563_v35 = vpop.f32.mrf.mxu1 }
 0x429   : > { %v11565_v56 = vpop.f32.mrf.mxu3 }
 0x42e   : > { %v11567_v0 = vpop.f32.mrf.mxu1 }
 0x431   : > { %v11569_v49 = vpop.f32.mrf.mxu3 }
 0x432   : > { %15280 = vst [vmem:[#allocation39_spill] sm:$0xff] %v11569_v49 }
 0x436   : > { %v11571_v31 = vpop.f32.mrf.mxu1 }
 0x439   : > { %v11573_v63 = vpop.f32.mrf.mxu3 }
 0x43a   : > { %15281 = vst [vmem:[#allocation71_spill] sm:$0xff] %v11573_v63 }
 0x43e   : > { %v11575_v38 = vpop.f32.mrf.mxu1 }
 0x43f   : > { %15282 = vst [vmem:[#allocation30_spill] sm:$0xff] %v11575_v38 }
 0x441   : > { %v11577_v37 = vpop.f32.mrf.mxu3 }
 0x442   : > { %15283 = vst [vmem:[#allocation17_spill] sm:$0xff] %v11577_v37 }
 0x446   : > { %v4248_v13 = vpop.f32.mrf.mxu1 }
 0x447   : > { %v11585_v20 = vadd.f32 %v11582_v16, %v4248_v13 }
 0x449   : > { %15284 = vst [vmem:[#allocation32_spill] sm:$0xff] %v11585_v20  ;;  %v4344_v34 = vpop.f32.mrf.mxu3  ;;  %v4394_v42 = vsel %vm1344_vm2, %v11585_v20, 0.0 }
 0x44a   : > { %v11600_v5 = vadd.f32 %v11582_v16, %v4344_v34  ;;  %v4395_v27 = vadd.f32 %v4394_v42, %v4393_v22  ;;  %v4403_v34 = vsel %vm1344_vm2, %v11632_v52, 0.0 }
 0x44c   : > { %15287 = vst [vmem:[#allocation18_spill] sm:$0xff] %v11600_v5  ;;  %v4398_v2 = vsel %vm1344_vm2, %v11600_v5, 0.0  ;;  %v4397_v4 = vadd.f32 %v4396_v29, %v4395_v27 }
 0x44e   : > { %v4399_v26 = vadd.f32 %v4398_v2, %v4397_v4  ;;  %v4251_v41 = vpop.f32.mrf.mxu1  ;;  %v11661_v2 = vadd.f32 %v11582_v16, %v11279_v24 }
 0x44f   : > { %v11613_v57 = vadd.f32 %v11582_v16, %v4251_v41 }
 0x450   : > { %v4505_v51 = vmul.f32 0.25, %v4399_v26  ;;  %15294 = vst [vmem:[#allocation64_spill] sm:$0xff] %v11661_v2 }
 0x451   : > { %v4347_v61 = vpop.f32.mrf.mxu3  ;;  %15288 = vst [vmem:[#allocation27_spill] sm:$0xff] %v11613_v57  ;;  %v4401_v33 = vsel %vm1344_vm2, %v11613_v57, 0.0 }
 0x452   : > { %v11607_v10 = vsub.f32 %v11589_v23, %v4505_v51  ;;  %v11610_v50 = vsub.f32 %v11585_v20, %v4505_v51  ;;  %v11626_v48 = vsub.f32 %v11597_v47, %v4505_v51  ;;  %v11635_v18 = vadd.f32 %v11582_v16, %v4347_v61 }
 0x453   : > { %v4402_v59 = vadd.f32 %v4401_v33, %v4400_v19  ;;  %v11647_v13 = vsub.f32 %v11600_v5, %v4505_v51  ;;  %v4410_v19 = vsel %vm1344_vm2, %v11661_v2, 0.0 }
 0x454   : > { %v4585_v44 = vmul.f32 %v11607_v10, %v11607_v10  ;;  %v4601_v15 = vmul.f32 %v11610_v50, %v11610_v50  ;;  %15291 = vst [vmem:[#allocation60_spill] sm:$0xff] %v11635_v18  ;;  %v4617_v53 = vmul.f32 %v11626_v48, %v11626_v48  ;;  %v4405_v22 = vsel %vm1344_vm2, %v11635_v18, 0.0 }
 0x455   : > { %v4404_v29 = vadd.f32 %v4403_v34, %v4402_v59  ;;  %v4633_v4 = vmul.f32 %v11647_v13, %v11647_v13 }
 0x456   : > { %v4254_v6 = vpop.f32.mrf.mxu1  ;;  %v4649_v32 = vsel %vm1344_vm2, %v4585_v44, 0.0  ;;  %v4650_v17 = vsel %vm1344_vm2, %v4601_v15, 0.0  ;;  %v4652_v51 = vsel %vm1344_vm2, %v4617_v53, 0.0  ;;  %v11674_v15 = vadd.f32 %v11582_v16, %v11311_v46 }
 0x457   : > { %v11638_v7 = vadd.f32 %v11582_v16, %v4254_v6  ;;  %v4651_v42 = vadd.f32 %v4650_v17, %v4649_v32  ;;  %v4406_v61 = vadd.f32 %v4405_v22, %v4404_v29  ;;  %v4654_v17 = vsel %vm1344_vm2, %v4633_v4, 0.0 }
 0x458   : > { %15297 = vst [vmem:[#allocation23_spill] sm:$0xff] %v11674_v15  ;;  %v4414_v34 = vsel %vm1344_vm2, %v11674_v15, 0.0  ;;  %v11687_v46 = vadd.f32 %v11582_v16, %v11339_v60 }
 0x459   : > { %v4350_v58 = vpop.f32.mrf.mxu3  ;;  %15292 = vst [vmem:[#allocation20_spill] sm:$0xff] %v11638_v7  ;;  %v4408_v27 = vsel %vm1344_vm2, %v11638_v7, 0.0  ;;  %v4653_v24 = vadd.f32 %v4652_v51, %v4651_v42  ;;  %v4506_v59 = vmul.f32 0.25, %v4406_v61 }
 0x45a   : > { %v11666_v26 = vadd.f32 %v11582_v16, %v4350_v58  ;;  %v4409_v6 = vadd.f32 %v4408_v27, %v4407_v1  ;;  %15298 = vst [vmem:[#allocation25_spill] sm:$0xff] %v11687_v46 }
 0x45b   : > { %v4655_v42 = vadd.f32 %v4654_v17, %v4653_v24  ;;  %v11693_v1 = vsub.f32 %v11617_v43, %v4506_v59  ;;  %v11696_v4 = vsub.f32 %v11613_v57, %v4506_v59 }
 0x45c   : > { %15295 = vst [vmem:[#allocation44_spill] sm:$0xff] %v11666_v26  ;;  %v4412_v58 = vsel %vm1344_vm2, %v11666_v26, 0.0  ;;  %v4411_v53 = vadd.f32 %v4410_v19, %v4409_v6 }
 0x45d   : > { %v4761_v51 = vmul.f32 0.33333334, %v4655_v42  ;;  %v4586_v24 = vmul.f32 %v11693_v1, %v11693_v1 }
 0x45e   : > { %v4257_v41 = vpop.f32.mrf.mxu1  ;;  %v4413_v27 = vadd.f32 %v4412_v58, %v4411_v53 }
 0x45f   : > { %v11670_v44 = vadd.f32 %v11582_v16, %v4257_v41  ;;  %v4417_v41 = vsel %vm1344_vm2, %v11687_v46, 0.0  ;;  %v11706_v58 = vadd.f32 1e-09, %v4761_v51 }
 0x460   : > { %v4507_v61 = vmul.f32 0.25, %v4413_v27 }
 0x461   : > { %15296 = vst [vmem:[#allocation22_spill] sm:$0xff] %v11670_v44  ;;  %v4353_v33 = vpop.f32.mrf.mxu3  ;;  %v4415_v32 = vsel %vm1344_vm2, %v11670_v44, 0.0  ;;  %7739 = vrsqrt.f32 %v11706_v58  ;;  %vm4799_vm0 = vweird.f32 %v11706_v58 }
 0x462   : > { %v11690_v22 = vadd.f32 %v11582_v16, %v4353_v33  ;;  %v4416_v29 = vadd.f32 %v4415_v32, %v4414_v34  ;;  %v4602_v33 = vmul.f32 %v11696_v4, %v11696_v4  ;;  %v11709_v32 = vsub.f32 %v11632_v52, %v4506_v59 }
 0x463   : > { %v11712_v17 = vsub.f32 %v11644_v14, %v4507_v61  ;;  %v11715_v53 = vsub.f32 %v11638_v7, %v4507_v61  ;;  %v4656_v34 = vsel %vm1344_vm2, %v4586_v24, 0.0  ;;  %v11730_v24 = vsub.f32 %v11661_v2, %v4507_v61 }
 0x464   : > { %15299 = vst [vmem:[#allocation24_spill] sm:$0xff] %v11690_v22  ;;  %v4419_v60 = vsel %vm1344_vm2, %v11690_v22, 0.0  ;;  %v4418_v6 = vadd.f32 %v4417_v41, %v4416_v29  ;;  %v4657_v42 = vsel %vm1344_vm2, %v4602_v33, 0.0  ;;  %v11721_v29 = vsub.f32 %v11635_v18, %v4506_v59 }
 0x465   : > { %v4618_v41 = vmul.f32 %v11709_v32, %v11709_v32  ;;  %v4587_v51 = vmul.f32 %v11712_v17, %v11712_v17 }
 0x466   : > { %v4420_v19 = vadd.f32 %v4419_v60, %v4418_v6  ;;  %v4603_v60 = vmul.f32 %v11715_v53, %v11715_v53  ;;  %v4658_v6 = vadd.f32 %v4657_v42, %v4656_v34  ;;  %v4634_v59 = vmul.f32 %v11721_v29, %v11721_v29 }
 0x467   : > { %v4659_v7 = vsel %vm1344_vm2, %v4618_v41, 0.0  ;;  %v4663_v57 = vsel %vm1344_vm2, %v4587_v51, 0.0  ;;  %v11743_v43 = vpop.eup %7739  ;;  %v11746_v42 = vsub.f32 %v11666_v26, %v4507_v61 }
 0x468   : > { %v4508_v27 = vmul.f32 0.25, %v4420_v19  ;;  %v4664_v14 = vsel %vm1344_vm2, %v4603_v60, 0.0  ;;  %v4660_v34 = vadd.f32 %v4659_v7, %v4658_v6  ;;  %v4661_v51 = vsel %vm1344_vm2, %v4634_v59, 0.0 }
 0x469   : > { %v4665_v41 = vadd.f32 %v4664_v14, %v4663_v57  ;;  %v11760_v7 = vadd.f32 %v11582_v16, %v11356_v39  ;;  %v4794_v61 = vmul.f32 %v11743_v43, %v11706_v58  ;;  %v4635_v26 = vmul.f32 %v11746_v42, %v11746_v42  ;;  %v4260_v39 = vpop.f32.mrf.mxu1  ;;  %v4356_v20 = vpop.f32.mrf.mxu3 }
 0x46a   : > { %v11733_v33 = vsub.f32 %v11674_v15, %v4508_v27  ;;  %v11736_v19 = vsub.f32 %v11670_v44, %v4508_v27  ;;  %v4619_v15 = vmul.f32 %v11730_v24, %v11730_v24  ;;  %v11756_v60 = vsub.f32 %v11687_v46, %v4508_v27 }
 0x46b   : > { %15300 = vst [vmem:[#allocation69_spill] sm:$0xff] %v11760_v7  ;;  %v4662_v6 = vadd.f32 %v4661_v51, %v4660_v34  ;;  %v11771_v59 = vadd.f32 %v11582_v16, %v11399_v45  ;;  %v11774_v5 = vsub.f32 %v11690_v22, %v4508_v27  ;;  %v11779_v51 = vadd.f32 %v11582_v16, %v4260_v39 }
 0x46c   : > { %v4588_v44 = vmul.f32 %v11733_v33, %v11733_v33  ;;  %v4604_v2 = vmul.f32 %v11736_v19, %v11736_v19  ;;  %v4666_v18 = vsel %vm1344_vm2, %v4619_v15, 0.0  ;;  %v4620_v34 = vmul.f32 %v11756_v60, %v11756_v60 }
 0x46d   : > { %15301 = vst [vmem:[#allocation41_spill] sm:$0xff] %v11771_v59  ;;  %v4667_v46 = vadd.f32 %v4666_v18, %v4665_v41  ;;  %v4421_v45 = vsel %vm1344_vm2, %v11760_v7, 0.0  ;;  %v4795_v18 = vmul.f32 %v11743_v43, %v4794_v61  ;;  %v4668_v41 = vsel %vm1344_vm2, %v4635_v26, 0.0 }
 0x46e   : > { %v4670_v57 = vsel %vm1344_vm2, %v4588_v44, 0.0  ;;  %v4671_v14 = vsel %vm1344_vm2, %v4604_v2, 0.0  ;;  %15302 = vst [vmem:[#allocation52_spill] sm:$0xff] %v11779_v51  ;;  %v11782_v44 = vadd.f32 %v11582_v16, %v4356_v20  ;;  %v4762_v2 = vmul.f32 0.33333334, %v4662_v6 }
 0x46f   : > { %v4672_v15 = vadd.f32 %v4671_v14, %v4670_v57  ;;  %v4422_v27 = vsel %vm1344_vm2, %v11779_v51, 0.0  ;;  %v4669_v22 = vadd.f32 %v4668_v41, %v4667_v46  ;;  %v4424_v39 = vsel %vm1344_vm2, %v11771_v59, 0.0 }
 0x470   : > { %15303 = vst [vmem:[#allocation43_spill] sm:$0xff] %v11782_v44  ;;  %v4423_v52 = vadd.f32 %v4422_v27, %v4421_v45  ;;  %v4636_v20 = vmul.f32 %v11774_v5, %v11774_v5  ;;  %v4673_v6 = vsel %vm1344_vm2, %v4620_v34, 0.0  ;;  %v4426_v57 = vsel %vm1344_vm2, %v11782_v44, 0.0 }
 0x471   : > { %v11797_v14 = vadd.f32 1e-09, %v4762_v2  ;;  %v4674_v61 = vadd.f32 %v4673_v6, %v4672_v15  ;;  %v4796_v23 = vmul.f32 0.5, %v4795_v18  ;;  %v4763_v47 = vmul.f32 0.33333334, %v4669_v22 }
 0x472   : > { %v4425_v26 = vadd.f32 %v4424_v39, %v4423_v52  ;;  %v4675_v46 = vsel %vm1344_vm2, %v4636_v20, 0.0  ;;  %vm4800_vm5 = vweird.f32 %v11743_v43 }
 0x473   : > { %7741 = vrsqrt.f32 %v11797_v14  ;;  %v4676_v45 = vadd.f32 %v4675_v46, %v4674_v61  ;;  %v4797_v27 = vsub.f32 1.5, %v4796_v23  ;;  %v11801_v38 = vadd.f32 1e-09, %v4763_v47  ;;  %vm4801_vm1 = vmor %vm4799_vm0, %vm4800_vm5 }
 0x474   : > { %v4427_v37 = vadd.f32 %v4426_v57, %v4425_v26  ;;  %vm4809_vm4 = vweird.f32 %v11797_v14 }
 0x475   : > { %v4764_v15 = vmul.f32 0.33333334, %v4676_v45  ;;  %v4798_v23 = vmul.f32 %v11743_v43, %v4797_v27  ;;  %7743 = vrsqrt.f32 %v11801_v38  ;;  %vm4819_vm8 = vweird.f32 %v11801_v38 }
 0x476   : > { %v4509_v41 = vmul.f32 0.25, %v4427_v37 }
 0x477   : > { %v11831_v61 = vadd.f32 1e-09, %v4764_v15  ;;  %v4802_v46 = vsel %vm4801_vm1, %v11743_v43, %v4798_v23 }
 0x478   : > { %v11804_v34 = vsub.f32 %v11760_v7, %v4509_v41  ;;  %v11807_v2 = vsub.f32 %v11779_v51, %v4509_v41  ;;  %v11810_v52 = vsub.f32 %v11771_v59, %v4509_v41  ;;  %v11813_v22 = vsub.f32 %v11782_v44, %v4509_v41 }
 0x479   : > { %v11823_v39 = vpop.eup %7741  ;;  %7745 = vrsqrt.f32 %v11831_v61  ;;  %vm4829_vm11 = vweird.f32 %v11831_v61 }
 0x47a   : > { %v4589_v18 = vmul.f32 %v11804_v34, %v11804_v34  ;;  %v4605_v37 = vmul.f32 %v11807_v2, %v11807_v2  ;;  %v4621_v47 = vmul.f32 %v11810_v52, %v11810_v52  ;;  %v4637_v20 = vmul.f32 %v11813_v22, %v11813_v22 }
 0x47b   : > { %v4804_v45 = vmul.f32 %v11823_v39, %v11797_v14  ;;  %v11838_v7 = vpop.eup %7743  ;;  %vm4810_vm3 = vweird.f32 %v11823_v39  ;;  %v11903_v14 = vadd.f32 %v11582_v16, %v11513_v21 }
 0x47c   : > { %v4677_v6 = vsel %vm1344_vm2, %v4589_v18, 0.0  ;;  %v4678_v57 = vsel %vm1344_vm2, %v4605_v37, 0.0  ;;  %v4680_v41 = vsel %vm1344_vm2, %v4621_v47, 0.0  ;;  %v4682_v58 = vsel %vm1344_vm2, %v4637_v20, 0.0  ;;  %vm4811_vm6 = vmor %vm4809_vm4, %vm4810_vm3 }
 0x47d   : > { %v4679_v26 = vadd.f32 %v4678_v57, %v4677_v6  ;;  %v4953_v18 = vmul.f32 %v4802_v46, %v11607_v10  ;;  %v4805_v15 = vmul.f32 %v11823_v39, %v4804_v45  ;;  %v4814_v43 = vmul.f32 %v11838_v7, %v11801_v38  ;;  %15310 = vst [vmem:[#allocation77_spill] sm:$0xff] %v11903_v14 }
 0x47e   : > { %v4969_v47 = vmul.f32 %v4802_v46, %v11610_v50  ;;  %v11852_v10 = vadd.f32 %v11582_v16, %v11410_v30  ;;  %v11857_v45 = vadd.f32 %v11582_v16, %v11453_v62  ;;  %v4985_v30 = vmul.f32 %v4802_v46, %v11626_v48 }
 0x47f   : > { %v4681_v27 = vadd.f32 %v4680_v41, %v4679_v26  ;;  %v7327_v23 = vmul.f32 -1.442695, %v4953_v18  ;;  %v4806_v57 = vmul.f32 0.5, %v4805_v15  ;;  %v11845_v51 = vpop.eup %7745  ;;  %v4815_v26 = vmul.f32 %v11838_v7, %v4814_v43  ;;  %v4263_v41 = vpop.f32.mrf.mxu1 }
 0x480   : > { %15304 = vst [vmem:[#allocation31_spill] sm:$0xff] %v11852_v10  ;;  %v4824_v18 = vmul.f32 %v11845_v51, %v11831_v61  ;;  %v11862_v50 = vadd.f32 %v11582_v16, %v4263_v41  ;;  %v7343_v15 = vmul.f32 -1.442695, %v4969_v47  ;;  %v4428_v62 = vsel %vm1344_vm2, %v11852_v10, 0.0 }
 0x481   : > { %v4683_v37 = vadd.f32 %v4682_v58, %v4681_v27  ;;  %15305 = vst [vmem:[#allocation63_spill] sm:$0xff] %v11857_v45  ;;  %7747 = vpow2.f32 %v7327_v23  ;;  %v4359_v27 = vpop.f32.mrf.mxu3  ;;  %v4807_v58 = vsub.f32 1.5, %v4806_v57  ;;  %v4816_v43 = vmul.f32 0.5, %v4815_v26 }
 0x482   : > { %15306 = vst [vmem:[#allocation51_spill] sm:$0xff] %v11862_v50  ;;  %v4429_v23 = vsel %vm1344_vm2, %v11862_v50, 0.0  ;;  %v4431_v57 = vsel %vm1344_vm2, %v11857_v45, 0.0  ;;  %v11881_v48 = vadd.f32 %v11582_v16, %v11494_v9  ;;  %v5001_v47 = vmul.f32 %v4802_v46, %v11647_v13 }
 0x483   : > { %v4765_v6 = vmul.f32 0.33333334, %v4683_v37  ;;  %v11865_v37 = vadd.f32 %v11582_v16, %v4359_v27  ;;  %v4430_v41 = vadd.f32 %v4429_v23, %v4428_v62  ;;  %v4808_v27 = vmul.f32 %v11823_v39, %v4807_v58 }
 0x484   : > { %15309 = vst [vmem:[#allocation34_spill] sm:$0xff] %v11881_v48  ;;  %v7359_v59 = vmul.f32 -1.442695, %v4985_v30  ;;  %v4817_v9 = vsub.f32 1.5, %v4816_v43  ;;  %v11898_v58 = vsel %vm1344_vm2, %v11881_v48, 0.0  ;;  %v11907_v62 = vadd.f32 %v11582_v16, %v11531_v8 }
 0x485   : > { %v11848_v20 = vadd.f32 1e-09, %v4765_v6  ;;  %15307 = vst [vmem:[#allocation45_spill] sm:$0xff] %v11865_v37  ;;  %v11873_v6 = vadd.f32 %v11582_v16, %v11467_v40  ;;  %v4825_v40 = vmul.f32 %v11845_v51, %v4824_v18  ;;  %v4433_v26 = vsel %vm1344_vm2, %v11865_v37, 0.0 }
 0x486   : > { %v4432_v63 = vadd.f32 %v4431_v57, %v4430_v41  ;;  %v7375_v18 = vmul.f32 -1.442695, %v5001_v47  ;;  %15311 = vst [vmem:[#allocation37_spill] sm:$0xff] %v11907_v62  ;;  %vm4820_vm7 = vweird.f32 %v11838_v7  ;;  %vm4830_vm10 = vweird.f32 %v11845_v51 }
 0x487   : > { %7749 = vrsqrt.f32 %v11848_v20  ;;  %15308 = vst [vmem:[#allocation33_spill] sm:$0xff] %v11873_v6  ;;  %v7748_v44 = vpop.eup %7747  ;;  %v11894_v13 = vsel %vm1344_vm2, %v11873_v6, 0.0  ;;  %v4826_v30 = vmul.f32 0.5, %v4825_v40  ;;  %vm4821_vm9 = vmor %vm4819_vm8, %vm4820_vm7  ;;  %vm4839_vm14 = vweird.f32 %v11848_v20 }
 0x488   : > { %7751 = vpow2.f32 %v7343_v15  ;;  %v4434_v46 = vadd.f32 %v4433_v26, %v4432_v63  ;;  %v4812_v15 = vsel %vm4811_vm6, %v11823_v39, %v4808_v27  ;;  %v11909_v23 = vadd.f32 1.0, %v7748_v44  ;;  %vm4831_vm12 = vmor %vm4829_vm11, %vm4830_vm10 }
 0x489   : > { %7753 = vpow2.f32 %v7359_v59  ;;  %v4818_v63 = vmul.f32 %v11838_v7, %v4817_v9  ;;  %v4954_v47 = vmul.f32 %v4812_v15, %v11693_v1  ;;  %v4827_v44 = vsub.f32 1.5, %v4826_v30 }
 0x48a   : > { %v4510_v43 = vmul.f32 0.25, %v4434_v46  ;;  %7755 = vpow2.f32 %v7375_v18  ;;  %v4970_v27 = vmul.f32 %v4812_v15, %v11696_v4  ;;  %v4986_v1 = vmul.f32 %v4812_v15, %v11709_v32 }
 0x48b   : > { %v4822_v46 = vsel %vm4821_vm9, %v11838_v7, %v4818_v63  ;;  %7757 = vrcp.f32 %v11909_v23  ;;  %v5002_v4 = vmul.f32 %v4812_v15, %v11721_v29  ;;  %v7328_v32 = vmul.f32 -1.442695, %v4954_v47 }
 0x48c   : > { %v11917_v21 = vsub.f32 %v11852_v10, %v4510_v43  ;;  %v11920_v8 = vsub.f32 %v11862_v50, %v4510_v43  ;;  %v11923_v59 = vsub.f32 %v11857_v45, %v4510_v43  ;;  %v11927_v41 = vsub.f32 %v11865_v37, %v4510_v43 }
 0x48d   : > { %v11890_v49 = vpop.eup %7749  ;;  %v4828_v43 = vmul.f32 %v11845_v51, %v4827_v44  ;;  %v7360_v45 = vmul.f32 -1.442695, %v4986_v1  ;;  %v4955_v10 = vmul.f32 %v4822_v46, %v11712_v17  ;;  %v4971_v29 = vmul.f32 %v4822_v46, %v11715_v53 }
 0x48e   : > { %v4834_v39 = vmul.f32 %v11890_v49, %v11848_v20  ;;  %v7752_v57 = vpop.eup %7751  ;;  %v4590_v40 = vmul.f32 %v11917_v21, %v11917_v21  ;;  %v4606_v26 = vmul.f32 %v11920_v8, %v11920_v8  ;;  %v4622_v18 = vmul.f32 %v11923_v59, %v11923_v59 }
 0x48f   : > { %v11935_v9 = vadd.f32 1.0, %v7752_v57  ;;  %v7754_v30 = vpop.eup %7753  ;;  %v4638_v57 = vmul.f32 %v11927_v41, %v11927_v41  ;;  %v11955_v44 = vadd.f32 %v11582_v16, %v11536_v55  ;;  %v4832_v53 = vsel %vm4831_vm12, %v11845_v51, %v4828_v43 }
 0x490   : > { %v4835_v38 = vmul.f32 %v11890_v49, %v4834_v39  ;;  %v4684_v7 = vsel %vm1344_vm2, %v4590_v40, 0.0  ;;  %v4685_v63 = vsel %vm1344_vm2, %v4606_v26, 0.0  ;;  %v7344_v39 = vmul.f32 -1.442695, %v4970_v27  ;;  %v7756_v37 = vpop.eup %7755 }
 0x491   : > { %15312 = vst [vmem:[#allocation70_spill] sm:$0xff] %v11935_v9  ;;  %v4686_v50 = vadd.f32 %v4685_v63, %v4684_v7  ;;  %v4687_v47 = vsel %vm1344_vm2, %v4622_v18, 0.0  ;;  %7759 = vrcp.f32 %v11935_v9  ;;  %v7376_v40 = vmul.f32 -1.442695, %v5002_v4  ;;  %v11964_v1 = vpop.eup %7757 }
 0x492   : > { %v4836_v15 = vmul.f32 0.5, %v4835_v38  ;;  %15313 = vst [vmem:[#allocation35_spill] sm:$0xff] %v11955_v44  ;;  %v11960_v27 = vadd.f32 1.0, %v7754_v30  ;;  %7761 = vpow2.f32 %v7328_v32  ;;  %v4689_v61 = vsel %vm1344_vm2, %v4638_v57, 0.0 }
 0x493   : > { %v4688_v17 = vadd.f32 %v4687_v47, %v4686_v50  ;;  %7763 = vpow2.f32 %v7344_v39  ;;  %v4987_v55 = vmul.f32 %v4822_v46, %v11730_v24  ;;  %v7329_v26 = vmul.f32 -1.442695, %v4955_v10 }
 0x494   : > { %7765 = vpow2.f32 %v7360_v45  ;;  %v5003_v18 = vmul.f32 %v4822_v46, %v11746_v42  ;;  %v7345_v4 = vmul.f32 -1.442695, %v4971_v29  ;;  %v4837_v7 = vsub.f32 1.5, %v4836_v15 }
 0x495   : > { %v4690_v38 = vadd.f32 %v4689_v61, %v4688_v17  ;;  %v11970_v50 = vsel %vm1344_vm2, %v11903_v14, 0.0  ;;  %7767 = vpow2.f32 %v7376_v40  ;;  %v4956_v51 = vmul.f32 %v4832_v53, %v11733_v33 }
 0x496   : > { %v11975_v32 = vsel %vm1344_vm2, %v11907_v62, 0.0  ;;  %v11977_v24 = vadd.f32 1.0, %v7756_v37  ;;  %7769 = vrcp.f32 %v11960_v27  ;;  %v4972_v42 = vmul.f32 %v4832_v53, %v11736_v19 }
 0x497   : > { %v4766_v30 = vmul.f32 0.33333334, %v4690_v38  ;;  %v11981_v10 = vpop.eup %7759  ;;  %v11985_v45 = vsel %vm1344_vm2, %v11955_v44, 0.0  ;;  %7771 = vpow2.f32 %v7329_v26  ;;  %v7361_v46 = vmul.f32 -1.442695, %v4987_v55 }
 0x498   : > { %15314 = vst [vmem:[#allocation9_spill] sm:$0xff] %v11977_v24  ;;  %v7762_v43 = vpop.eup %7761  ;;  %7773 = vpow2.f32 %v7345_v4  ;;  %v7377_v57 = vmul.f32 -1.442695, %v5003_v18  ;;  %v4838_v37 = vmul.f32 %v11890_v49, %v4837_v7  ;;  %vm4840_vm13 = vweird.f32 %v11890_v49 }
 0x499   : > { %15315 = vst [vmem:[#allocation36_spill] sm:$0xff] %v11981_v10  ;;  %v11987_v33 = vadd.f32 1e-09, %v4766_v30  ;;  %v7764_v63 = vpop.eup %7763  ;;  %v11993_v19 = vadd.f32 %v11582_v16, %v11541_v3  ;;  %v11997_v39 = vadd.f32 %v11582_v16, %v11547_v25  ;;  %v7330_v29 = vmul.f32 -1.442695, %v4956_v51  ;;  %vm4841_vm15 = vmor %vm4839_vm14, %vm4840_vm13 }
 0x49a   : > { %v7766_v15 = vpop.eup %7765  ;;  %v12002_v47 = vadd.f32 %v11582_v16, %v11552_v11  ;;  %v7346_v40 = vmul.f32 -1.442695, %v4972_v42  ;;  %v12008_v3 = vadd.f32 %v11582_v16, %v11555_v54  ;;  %v12010_v25 = vadd.f32 1.0, %v7762_v43 }
 0x49b   : > { %15316 = vst [vmem:[#allocation11_spill] sm:$0xff] %v11993_v19  ;;  %7775 = vrsqrt.f32 %v11987_v33  ;;  %v7768_v17 = vpop.eup %7767  ;;  %v4988_v61 = vmul.f32 %v4832_v53, %v11756_v60  ;;  %v12017_v55 = vadd.f32 1.0, %v7764_v63  ;;  %v5004_v20 = vmul.f32 %v4832_v53, %v11774_v5 }
 0x49c   : > { %15317 = vst [vmem:[#allocation58_spill] sm:$0xff] %v11997_v39  ;;  %7777 = vrcp.f32 %v11977_v24  ;;  %v12015_v11 = vpop.eup %7769  ;;  %v4842_v26 = vsel %vm4841_vm15, %v11890_v49, %v4838_v37  ;;  %v12023_v54 = vsel %vm1344_vm2, %v11993_v19, 0.0  ;;  %v12027_v60 = vadd.f32 %v11582_v16, %v11557_v12 }
 0x49d   : > { %15318 = vst [vmem:[#allocation38_spill] sm:$0xff] %v12002_v47  ;;  %7779 = vpow2.f32 %v7361_v46  ;;  %v7772_v38 = vpop.eup %7771  ;;  %v12029_v18 = vadd.f32 1.0, %v7766_v15  ;;  %v12033_v7 = vsel %vm1344_vm2, %v11997_v39, 0.0  ;;  %v12037_v49 = vsel %vm1344_vm2, %v12002_v47, 0.0 }
 0x49e   : > { %15319 = vst [vmem:[#allocation29_spill] sm:$0xff] %v12008_v3  ;;  %7781 = vpow2.f32 %v7377_v57  ;;  %v7774_v4 = vpop.eup %7773  ;;  %v12039_v5 = vadd.f32 1.0, %v7768_v17  ;;  %v12043_v12 = vsel %vm1344_vm2, %v12008_v3, 0.0  ;;  %v7362_v51 = vmul.f32 -1.442695, %v4988_v61 }
 0x49f   : > { %15320 = vst [vmem:[#allocation46_spill] sm:$0xff] %v12010_v25  ;;  %7783 = vpow2.f32 %v7330_v29  ;;  %v4957_v30 = vmul.f32 %v4842_v26, %v11804_v34  ;;  %v7378_v46 = vmul.f32 -1.442695, %v5004_v20  ;;  %v4973_v43 = vmul.f32 %v4842_v26, %v11807_v2 }
 0x4a0   : > { %15321 = vst [vmem:[#allocation40_spill] sm:$0xff] %v12017_v55  ;;  %7785 = vpow2.f32 %v7346_v40  ;;  %v12054_v63 = vsel %vm1344_vm2, %v12027_v60, 0.0  ;;  %v12058_v29 = vadd.f32 %v11582_v16, %v11559_v36  ;;  %v12061_v34 = vadd.f32 1.0, %v7772_v38 }
 0x4a1   : > { %15322 = vst [vmem:[#allocation14_spill] sm:$0xff] %v12027_v60  ;;  %v7776_v53 = vpop.eup %7775  ;;  %7787 = vrcp.f32 %v12010_v25  ;;  %v12065_v40 = vadd.f32 %v11582_v16, %v11563_v35  ;;  %v12068_v2 = vadd.f32 1.0, %v7774_v4  ;;  %v12072_v20 = vadd.f32 %v11582_v16, %v11561_v28 }
 0x4a2   : > { %15323 = vst [vmem:[#allocation42_spill] sm:$0xff] %v12039_v5  ;;  %v12047_v42 = vpop.eup %7777  ;;  %7789 = vrcp.f32 %v12017_v55  ;;  %v4844_v57 = vmul.f32 %v7776_v53, %v11987_v33  ;;  %v12076_v36 = vadd.f32 %v11582_v16, %v11565_v56  ;;  %v7331_v38 = vmul.f32 -1.442695, %v4957_v30 }
 0x4a3   : > { %15324 = vst [vmem:[#allocation12_spill] sm:$0xff] %v12047_v42  ;;  %v7780_v37 = vpop.eup %7779  ;;  %7791 = vrcp.f32 %v12029_v18  ;;  %v12080_v35 = vadd.f32 %v11582_v16, %v11567_v0  ;;  %v7347_v4 = vmul.f32 -1.442695, %v4973_v43  ;;  %v4989_v56 = vmul.f32 %v4842_v26, %v11810_v52 }
 0x4a4   : > { %15325 = vst [vmem:[#allocation57_spill] sm:$0xff] %v12058_v29  ;;  %v7782_v15 = vpop.eup %7781  ;;  %7793 = vrcp.f32 %v12039_v5  ;;  %v4845_v17 = vmul.f32 %v7776_v53, %v4844_v57  ;;  %v12084_v5 = vadd.f32 1.0, %v7780_v37  ;;  %vm4850_vm5 = vweird.f32 %v7776_v53 }
 0x4a5   : > { %15326 = vst [vmem:[#allocation74_spill] sm:$0xff] %v12061_v34  ;;  %v7784_v61 = vpop.eup %7783  ;;  %7795 = vpow2.f32 %v7362_v51  ;;  %v12086_v28 = vadd.f32 1.0, %v7782_v15  ;;  %v4266_v51 = vpop.f32.mrf.mxu1  ;;  %vm4849_vm0 = vweird.f32 %v11987_v33  ;;  %v12121_v33 = vsel %vm1344_vm2, %v12065_v40, 0.0 }
 0x4a6   : > { %15327 = vst [vmem:[#allocation48_spill] sm:$0xff] %v12065_v40  ;;  %v7786_v55 = vpop.eup %7785  ;;  %7797 = vpow2.f32 %v7378_v46  ;;  %v4846_v25 = vmul.f32 0.5, %v4845_v17  ;;  %v12094_v46 = vadd.f32 %v11582_v16, %v4266_v51  ;;  %v12098_v37 = vadd.f32 1.0, %v7784_v61  ;;  %vm4851_vm1 = vmor %vm4849_vm0, %vm4850_vm5 }
 0x4a7   : > { %15328 = vst [vmem:[#allocation49_spill] sm:$0xff] %v12068_v2  ;;  %v12082_v57 = vpop.eup %7787  ;;  %7799 = vrcp.f32 %v12061_v34  ;;  %v12100_v15 = vadd.f32 1.0, %v7786_v55  ;;  %v5005_v17 = vmul.f32 %v4842_v26, %v11813_v22  ;;  %v7363_v55 = vmul.f32 -1.442695, %v4989_v56 }
 0x4a8   : > { %15329 = vst [vmem:[#allocation55_spill] sm:$0xff] %v12072_v20  ;;  %v12090_v30 = vpop.eup %7789  ;;  %7801 = vrcp.f32 %v12068_v2  ;;  %v4847_v0 = vsub.f32 1.5, %v4846_v25  ;;  %v4436_v25 = vsel %vm1344_vm2, %v12094_v46, 0.0  ;;  %v12110_v2 = vsel %vm1344_vm2, %v12058_v29, 0.0 }
 0x4a9   : > { %15330 = vst [vmem:[#allocation61_spill] sm:$0xff] %v12076_v36  ;;  %v12096_v43 = vpop.eup %7791  ;;  %7803 = vpow2.f32 %v7331_v38  ;;  %v4437_v22 = vadd.f32 %v4436_v25, %v11894_v13  ;;  %v12117_v61 = vsel %vm1344_vm2, %v12072_v20, 0.0  ;;  %v12128_v56 = vsel %vm1344_vm2, %v12076_v36, 0.0  ;;  %v4362_v25 = vpop.f32.mrf.mxu3 }
 0x4aa   : > { %15331 = vst [vmem:[#allocation53_spill] sm:$0xff] %v12080_v35  ;;  %v12103_v52 = vpop.eup %7793  ;;  %7805 = vpow2.f32 %v7347_v4  ;;  %v7379_v13 = vmul.f32 -1.442695, %v5005_v17  ;;  %v12146_v17 = vadd.f32 %v11582_v16, %v11571_v31  ;;  %v15349_v31 = vld [vmem:[#allocation39_spill] sm:$0xff]  ;;  %vm5758_vm11 = vweird.f32 %v11960_v27 }
 0x4ab   : > { %15332 = vst [vmem:[#allocation15_spill] sm:$0xff] %v12082_v57  ;;  %v7796_v51 = vpop.eup %7795  ;;  %7807 = vrcp.f32 %v12084_v5  ;;  %vm5759_vm12 = vweird.f32 %v12015_v11 }
 0x4ac   : > { %15333 = vst [vmem:[#allocation54_spill] sm:$0xff] %v12084_v5  ;;  %v7798_v26 = vpop.eup %7797  ;;  %7809 = vrcp.f32 %v12086_v28  ;;  %v12136_v5 = vsel %vm1344_vm2, %v12080_v35, 0.0  ;;  %vm12467_vm15 = vmor %vm5758_vm11, %vm5759_vm12 }
 0x4ad   : > { %15334 = vst [vmem:[#allocation65_spill] sm:$0xff] %v12086_v28  ;;  %v12124_v4 = vpop.eup %7799  ;;  %7811 = vrcp.f32 %v12098_v37  ;;  %v12138_v28 = vadd.f32 1.0, %v7796_v51 }
 0x4ae   : > { %15335 = vst [vmem:[#allocation62_spill] sm:$0xff] %v12090_v30  ;;  %v4848_v30 = vmul.f32 %v7776_v53, %v4847_v0  ;;  %v12132_v34 = vpop.eup %7801  ;;  %7813 = vrcp.f32 %v12100_v15 }
 0x4af   : > { %15336 = vst [vmem:[#allocation66_spill] sm:$0xff] %v12094_v46  ;;  %7815 = vpow2.f32 %v7363_v55  ;;  %v15351_v55 = vld [vmem:[#allocation71_spill] sm:$0xff] }
 0x4b0   : > { %15337 = vst [vmem:[#allocation68_spill] sm:$0xff] %v12098_v37  ;;  %v4852_v38 = vsel %vm4851_vm1, %v7776_v53, %v4848_v30  ;;  %v12142_v53 = vadd.f32 %v11582_v16, %v4362_v25  ;;  %v7804_v30 = vpop.eup %7803  ;;  %v4439_v37 = vadd.f32 %v11898_v58, %v4437_v22  ;;  %v12165_v58 = vadd.f32 %v11582_v16, %v15351_v55 }
 0x4b1   : > { %15338 = vst [vmem:[#allocation67_spill] sm:$0xff] %v12100_v15  ;;  %v5006_v0 = vmul.f32 %v4852_v38, %v11927_v41  ;;  %v12148_v41 = vadd.f32 1.0, %v7798_v26  ;;  %v7806_v35 = vpop.eup %7805  ;;  %v4958_v51 = vmul.f32 %v4852_v38, %v11917_v21  ;;  %v12161_v26 = vadd.f32 %v11582_v16, %v15349_v31  ;;  %v15356_v31 = vld [vmem:[#allocation30_spill] sm:$0xff] }
 0x4b2   : > { %15339 = vst [vmem:[#allocation73_spill] sm:$0xff] %v12103_v52  ;;  %v4440_v15 = vsel %vm1344_vm2, %v12142_v53, 0.0  ;;  %7817 = vpow2.f32 %v7379_v13  ;;  %v12179_v40 = vadd.f32 %v11582_v16, %v15356_v31 }
 0x4b3   : > { %15340 = vst [vmem:[#allocation26_spill] sm:$0xff] %v12124_v4  ;;  %v7380_v4 = vmul.f32 -1.442695, %v5006_v0  ;;  %v4441_v22 = vadd.f32 %v4440_v15, %v4439_v37  ;;  %7819 = vrcp.f32 %v12138_v28  ;;  %v12170_v0 = vadd.f32 1.0, %v7804_v30 }
 0x4b4   : > { %15341 = vst [vmem:[#allocation10_spill] sm:$0xff] %v12128_v56  ;;  %7821 = vrcp.f32 %v12148_v41  ;;  %v12182_v37 = vadd.f32 1.0, %v7806_v35  ;;  %v4990_v30 = vmul.f32 %v4852_v38, %v11923_v59  ;;  %v7332_v55 = vmul.f32 -1.442695, %v4958_v51 }
 0x4b5   : > { %15342 = vst [vmem:[#allocation50_spill] sm:$0xff] %v12132_v34  ;;  %v4269_v34 = vpop.f32.mrf.mxu1  ;;  %v4511_v15 = vmul.f32 0.25, %v4441_v22  ;;  %7823 = vpow2.f32 %v7380_v4  ;;  %v4365_v22 = vpop.f32.mrf.mxu3 }
 0x4b6   : > { %15343 = vst [vmem:[#allocation47_spill] sm:$0xff] %v12136_v5  ;;  %v12155_v25 = vadd.f32 %v11582_v16, %v4269_v34  ;;  %v12157_v5 = vpop.eup %7807  ;;  %v4974_v34 = vmul.f32 %v4852_v38, %v11920_v8  ;;  %7825 = vrcp.f32 %v12170_v0 }
 0x4b7   : > { %15344 = vst [vmem:[#allocation13_spill] sm:$0xff] %v12138_v28  ;;  %v12167_v21 = vpop.eup %7809  ;;  %v12192_v31 = vsub.f32 %v12094_v46, %v4511_v15  ;;  %v12198_v35 = vsub.f32 %v12142_v53, %v4511_v15  ;;  %7827 = vrcp.f32 %v12182_v37 }
 0x4b8   : > { %15345 = vst [vmem:[#allocation75_spill] sm:$0xff] %v12146_v17  ;;  %v12175_v36 = vpop.eup %7811  ;;  %7829 = vpow2.f32 %v7332_v55 }
 0x4b9   : > { %15346 = vst [vmem:[#allocation76_spill] sm:$0xff] %v12148_v41  ;;  %v12184_v13 = vpop.eup %7813  ;;  %v12195_v41 = vsub.f32 %v11881_v48, %v4511_v15  ;;  %v4607_v51 = vmul.f32 %v12192_v31, %v12192_v31 }
 0x4ba   : > { %15347 = vst [vmem:[#allocation56_spill] sm:$0xff] %v12155_v25  ;;  %v7816_v28 = vpop.eup %7815 }
 0x4bb   : > { %15348 = vst [vmem:[#allocation16_spill] sm:$0xff] %v12157_v5  ;;  %v4443_v5 = vsel %vm1344_vm2, %v12155_v25, 0.0  ;;  %v7818_v38 = vpop.eup %7817  ;;  %v12229_v55 = vadd.f32 1.0, %v7816_v28  ;;  %v12248_v28 = vsel %vm1344_vm2, %v12146_v17, 0.0 }
 0x4bc   : > { %15350 = vst [vmem:[#allocation39_spill] sm:$0xff] %v12161_v26  ;;  %v4444_v8 = vadd.f32 %v4443_v5, %v11970_v50  ;;  %v7348_v50 = vmul.f32 -1.442695, %v4974_v34  ;;  %v12206_v5 = vadd.f32 %v11582_v16, %v4365_v22  ;;  %v12215_v46 = vpop.eup %7819  ;;  %v7364_v34 = vmul.f32 -1.442695, %v4990_v30 }
 0x4bd   : > { %15352 = vst [vmem:[#allocation71_spill] sm:$0xff] %v12165_v58  ;;  %v12231_v30 = vadd.f32 1.0, %v7818_v38 }
 0x4be   : > { %15353 = vst [vmem:[#allocation78_spill] sm:$0xff] %v12167_v21  ;;  %v4447_v22 = vsel %vm1344_vm2, %v12206_v5, 0.0  ;;  %v4692_v21 = vsel %vm1344_vm2, %v4607_v51, 0.0  ;;  %v4446_v56 = vadd.f32 %v11975_v32, %v4444_v8  ;;  %7831 = vpow2.f32 %v7348_v50  ;;  %v4368_v50 = vpop.f32.mrf.mxu3 }
 0x4bf   : > { %15354 = vst [vmem:[#allocation79_spill] sm:$0xff] %v12170_v0  ;;  %v4639_v0 = vmul.f32 %v12198_v35, %v12198_v35  ;;  %v12244_v32 = vsel %vm1344_vm2, %v12161_v26, 0.0  ;;  %7833 = vpow2.f32 %v7364_v34  ;;  %v12265_v34 = vsel %vm1344_vm2, %v12179_v40, 0.0 }
 0x4c0   : > { %15355 = vst [vmem:[#allocation80_spill] sm:$0xff] %v12175_v36  ;;  %v12189_v36 = vsub.f32 %v11873_v6, %v4511_v15  ;;  %v4623_v15 = vmul.f32 %v12195_v41, %v12195_v41  ;;  %v12222_v6 = vpop.eup %7821  ;;  %v4448_v52 = vadd.f32 %v4447_v22, %v4446_v56  ;;  %v12254_v56 = vsel %vm1344_vm2, %v12165_v58, 0.0 }
 0x4c1   : > { %15357 = vst [vmem:[#allocation30_spill] sm:$0xff] %v12179_v40 }
 0x4c2   : > { %15358 = vst [vmem:[#allocation81_spill] sm:$0xff] %v12182_v37  ;;  %v4591_v4 = vmul.f32 %v12189_v36, %v12189_v36  ;;  %v4512_v22 = vmul.f32 0.25, %v4448_v52 }
 0x4c3   : > { %15359 = vst [vmem:[#allocation82_spill] sm:$0xff] %v12184_v13  ;;  %v15360_v13 = vld [vmem:[#allocation17_spill] sm:$0xff] }
 0x4c4   : > { %v12202_v59 = vadd.f32 %v11582_v16, %v15360_v13  ;;  %v4272_v13 = vpop.f32.mrf.mxu1  ;;  %15362 = vst [vmem:[#allocation83_spill] sm:$0xff] %v12215_v46  ;;  %v4691_v37 = vsel %vm1344_vm2, %v4591_v4, 0.0  ;;  %v7824_v46 = vpop.eup %7823  ;;  %v12274_v52 = vsub.f32 %v11903_v14, %v4512_v22  ;;  %v12292_v14 = vstv %s12233_s6  ;;  %s7133_s6 = sshll.u32 %s8348_s10, 2 }
 0x4c5   : > { %v12220_v48 = vadd.f32 %v11582_v16, %v4272_v13  ;;  %15364 = vst [vmem:[#allocation85_spill] sm:$0xff] %v12222_v6  ;;  %v4693_v13 = vadd.f32 %v4692_v21, %v4691_v37  ;;  %v12235_v57 = vadd.f32 1.0, %v7824_v46  ;;  %v4694_v6 = vsel %vm1344_vm2, %v4623_v15, 0.0  ;;  %v12240_v51 = vpop.eup %7825  ;;  %s621_s28 = scalar_lea.vmem [#allocation6], %s7133_s6 }
 0x4c6   : > { %15361 = vst [vmem:[#allocation17_spill] sm:$0xff] %v12202_v59  ;;  %v12250_v46 = vpop.eup %7827  ;;  %v4696_v37 = vsel %vm1344_vm2, %v4639_v0, 0.0  ;;  %v5764_v0 = vand.u32 2147483648, %v11960_v27  ;;  %s7057_s29 = sshll.u32 %s621_s28, 4  ;;  %s7058_s29 = int_to_ptr.vmem [resolvable:$true] %s7057_s29 }
 0x4c7   : > { %15363 = vst [vmem:[#allocation84_spill] sm:$0xff] %v12220_v48  ;;  %v4450_v4 = vsel %vm1344_vm2, %v12220_v48, 0.0  ;;  %v4695_v21 = vadd.f32 %v4694_v6, %v4693_v13  ;;  %7835 = vrcp.f32 %v12235_v57  ;;  %v7830_v38 = vpop.eup %7829  ;;  %v12261_v6 = vadd.f32 %v11582_v16, %v4368_v50 }
 0x4c8   : > { %15365 = vst [vmem:[#allocation86_spill] sm:$0xff] %v12229_v55  ;;  %v4451_v8 = vadd.f32 %v4450_v4, %v11985_v45  ;;  %7837 = vrcp.f32 %v12229_v55  ;;  %v12269_v13 = vsel %vm1344_vm2, %v12202_v59, 0.0  ;;  %v7832_v4 = vpop.eup %7831  ;;  %v12280_v50 = vsub.f32 %v11907_v62, %v4512_v22 }
 0x4c9   : > { %15366 = vst [vmem:[#allocation87_spill] sm:$0xff] %v12231_v30  ;;  %v4697_v15 = vadd.f32 %v4696_v37, %v4695_v21  ;;  %7839 = vrcp.f32 %v12231_v30  ;;  %v12277_v37 = vsub.f32 %v12155_v25, %v4512_v22  ;;  %v4454_v30 = vsel %vm1344_vm2, %v12261_v6, 0.0 }
 0x4ca   : > { %15367 = vst [vmem:[#allocation88_spill] sm:$0xff] %v12240_v51  ;;  %v12283_v51 = vsub.f32 %v12206_v5, %v4512_v22  ;;  %v4592_v25 = vmul.f32 %v12274_v52, %v12274_v52  ;;  %vm6073_vm3 = vweird.f32 %v12235_v57  ;;  %v6079_v10 = vand.u32 2147483648, %v12235_v57 }
 0x4cb   : > { %15368 = vst [vmem:[#allocation89_spill] sm:$0xff] %v12244_v32  ;;  %v4767_v21 = vmul.f32 0.33333334, %v4697_v15  ;;  %v7834_v15 = vpop.eup %7833  ;;  %v4608_v22 = vmul.f32 %v12277_v37, %v12277_v37  ;;  %v6077_v32 = vand.u32 2147483647, %v12235_v57 }
 0x4cc   : > { %15369 = vst [vmem:[#allocation90_spill] sm:$0xff] %v12248_v28  ;;  %v4275_v45 = vpop.f32.mrf.mxu1  ;;  %v4640_v58 = vmul.f32 %v12283_v51, %v12283_v51 }
 0x4cd   : > { %15370 = vst [vmem:[#allocation91_spill] sm:$0xff] %v12250_v46  ;;  %v4453_v46 = vadd.f32 %v12023_v54, %v4451_v8  ;;  %v12289_v59 = vadd.f32 %v11582_v16, %v4275_v45  ;;  %v12294_v40 = vadd.f32 1e-09, %v4767_v21  ;;  %v12300_v62 = vpop.eup %7835  ;;  %v12302_v54 = vadd.f32 1.0, %v7830_v38  ;;  %v4371_v45 = vpop.f32.mrf.mxu3 }
 0x4ce   : > { %15371 = vst [vmem:[#allocation92_spill] sm:$0xff] %v12254_v56  ;;  %v4624_v8 = vmul.f32 %v12280_v50, %v12280_v50  ;;  %v12309_v21 = vadd.f32 1.0, %v7832_v4  ;;  %v12322_v4 = vor.u32 1.1754944e-38, %v5764_v0  ;;  %vm6074_vm4 = vweird.f32 %v12300_v62 }
 0x4cf   : > { %15372 = vst [vmem:[#allocation93_spill] sm:$0xff] %v12261_v6  ;;  %v4455_v16 = vadd.f32 %v4454_v30, %v4453_v46  ;;  %7841 = vrsqrt.f32 %v12294_v40  ;;  %v4457_v55 = vsel %vm1344_vm2, %v12289_v59, 0.0  ;;  %v4698_v30 = vsel %vm1344_vm2, %v4592_v25, 0.0  ;;  %v12332_v25 = vld [vmem:[%s14743_s5] ss:$0 sm:$0xff]  ;;  %vm12401_vm8 = vmor %vm6073_vm3, %vm6074_vm4 }
 0x4d0   : > { %15373 = vst [vmem:[#allocation94_spill] sm:$0xff] %v12265_v34  ;;  %v6069_v34 = vmul.f32 %v12300_v62, %v12235_v57  ;;  %v4699_v46 = vsel %vm1344_vm2, %v4608_v22, 0.0  ;;  %7843 = vrcp.f32 %v12302_v54  ;;  %v4701_v26 = vsel %vm1344_vm2, %v4624_v8, 0.0 }
 0x4d1   : > { %15374 = vst [vmem:[#allocation95_spill] sm:$0xff] %v12269_v13  ;;  %v12307_v13 = vpop.eup %7837  ;;  %v4700_v56 = vadd.f32 %v4699_v46, %v4698_v30  ;;  %v4513_v28 = vmul.f32 0.25, %v4455_v16  ;;  %v12335_v22 = vadd.f32 %v12332_v25, %v4371_v45  ;;  %7845 = vrcp.f32 %v12309_v21 }
 0x4d2   : > { %15375 = vst [vmem:[#allocation96_spill] sm:$0xff] %v12289_v59  ;;  %v12316_v38 = vpop.eup %7839  ;;  %v6070_v17 = vsub.f32 1.0, %v6069_v34  ;;  %v4703_v8 = vsel %vm1344_vm2, %v4640_v58, 0.0  ;;  %v5754_v16 = vmul.f32 %v12015_v11, %v11960_v27  ;;  %vm4859_vm7 = vweird.f32 %v12294_v40 }
 0x4d3   : > { %15376 = vst [vmem:[#allocation97_spill] sm:$0xff] %v12302_v54  ;;  %v4702_v0 = vadd.f32 %v4701_v26, %v4700_v56  ;;  %v12339_v34 = vsub.f32 %v11955_v44, %v4513_v28  ;;  %v4461_v44 = vsel %vm1344_vm2, %v12335_v22, 0.0  ;;  %vm12412_vm9 = vcmp.eq.f32.partialorder %v6077_v32, 8.507059e+37 }
 0x4d4   : > { %15377 = vst [vmem:[#allocation98_spill] sm:$0xff] %v12307_v13  ;;  %v12324_v13 = vadd.f32 1.0, %v7834_v15  ;;  %v12342_v15 = vsub.f32 %v12220_v48, %v4513_v28  ;;  %v6071_v26 = vmul.f32 %v12300_v62, %v6070_v17  ;;  %v4278_v54 = vpop.f32.mrf.mxu1  ;;  %v6080_v57 = vor.u32 1.1754944e-38, %v6079_v10 }
 0x4d5   : > { %15378 = vst [vmem:[#allocation99_spill] sm:$0xff] %v12309_v21  ;;  %v7842_v45 = vpop.eup %7841  ;;  %v4704_v56 = vadd.f32 %v4703_v8, %v4702_v0  ;;  %v4593_v30 = vmul.f32 %v12339_v34, %v12339_v34  ;;  %v12381_v20 = vadd.f32 %v12332_v25, %v4278_v54  ;;  %v5755_v54 = vsub.f32 1.0, %v5754_v16 }
 0x4d6   : > { %15379 = vst [vmem:[#allocation100_spill] sm:$0xff] %v12316_v38  ;;  %v4458_v38 = vadd.f32 %v4457_v55, %v12033_v7  ;;  %v12346_v7 = vsub.f32 %v11993_v19, %v4513_v28  ;;  %v12349_v55 = vsub.f32 %v12261_v6, %v4513_v28  ;;  %v4609_v58 = vmul.f32 %v12342_v15, %v12342_v15  ;;  %v12369_v21 = vpop.eup %7843 }
 0x4d7   : > { %v4854_v46 = vmul.f32 %v7842_v45, %v12294_v40  ;;  %v4768_v17 = vmul.f32 0.33333334, %v4704_v56  ;;  %v4705_v8 = vsel %vm1344_vm2, %v4593_v30, 0.0  ;;  %15380 = vst [vmem:[#allocation101_spill] sm:$0xff] %v12369_v21  ;;  %v12373_v6 = vpop.eup %7845  ;;  %vm4860_vm6 = vweird.f32 %v7842_v45 }
 0x4d8   : > { %v4625_v28 = vmul.f32 %v12346_v7, %v12346_v7  ;;  %v4460_v19 = vadd.f32 %v12037_v49, %v4458_v38  ;;  %v4641_v0 = vmul.f32 %v12349_v55, %v12349_v55  ;;  %v4706_v48 = vsel %vm1344_vm2, %v4609_v58, 0.0  ;;  %v4374_v38 = vpop.f32.mrf.mxu3  ;;  %15381 = vst [vmem:[#allocation102_spill] sm:$0xff] %v12373_v6  ;;  %vm4861_vm10 = vmor %vm4859_vm7, %vm4860_vm6 }
 0x4d9   : > { %v4855_v9 = vmul.f32 %v7842_v45, %v4854_v46  ;;  %v4707_v49 = vadd.f32 %v4706_v48, %v4705_v8  ;;  %v12376_v56 = vadd.f32 1e-09, %v4768_v17  ;;  %v6072_v58 = vadd.f32 %v12300_v62, %v6071_v26  ;;  %15382 = vst [vmem:[#allocation103_spill] sm:$0xff] %v12381_v20 }
 0x4da   : > { %v4708_v30 = vsel %vm1344_vm2, %v4625_v28, 0.0  ;;  %v4462_v42 = vadd.f32 %v4461_v44, %v4460_v19  ;;  %v4710_v48 = vsel %vm1344_vm2, %v4641_v0, 0.0  ;;  %v12386_v8 = vadd.f32 %v12332_v25, %v4374_v38 }
 0x4db   : > { %v4856_v24 = vmul.f32 0.5, %v4855_v9  ;;  %v4709_v21 = vadd.f32 %v4708_v30, %v4707_v49  ;;  %7847 = vrsqrt.f32 %v12376_v56  ;;  %v4464_v44 = vsel %vm1344_vm2, %v12381_v20, 0.0 }
 0x4dc   : > { %v4514_v46 = vmul.f32 0.25, %v4462_v42  ;;  %v4465_v40 = vadd.f32 %v4464_v44, %v12043_v12  ;;  %v6076_v28 = vsel %vm12401_vm8, %v12300_v62, %v6072_v58  ;;  %v4468_v0 = vsel %vm1344_vm2, %v12386_v8, 0.0 }
 0x4dd   : > { %v4857_v17 = vsub.f32 1.5, %v4856_v24  ;;  %v4711_v6 = vadd.f32 %v4710_v48, %v4709_v21  ;;  %v5756_v58 = vmul.f32 %v12015_v11, %v5755_v54  ;;  %vm4869_vm14 = vweird.f32 %v12376_v56 }
 0x4de   : > { %v12392_v9 = vsub.f32 %v11997_v39, %v4514_v46  ;;  %v12395_v19 = vsub.f32 %v12289_v59, %v4514_v46  ;;  %v12406_v26 = vsub.f32 %v12002_v47, %v4514_v46  ;;  %v12427_v30 = vsub.f32 %v12335_v22, %v4514_v46 }
 0x4df   : > { %v4858_v42 = vmul.f32 %v7842_v45, %v4857_v17  ;;  %v4769_v21 = vmul.f32 0.33333334, %v4711_v6  ;;  %v4467_v10 = vadd.f32 %v12054_v63, %v4465_v40  ;;  %v12448_v59 = vadd.f32 %v12015_v11, %v5756_v58 }
 0x4e0   : > { %v4594_v12 = vmul.f32 %v12392_v9, %v12392_v9  ;;  %v4610_v38 = vmul.f32 %v12395_v19, %v12395_v19  ;;  %v4626_v17 = vmul.f32 %v12406_v26, %v12406_v26 }
 0x4e1   : > { %v4862_v6 = vsel %vm4861_vm10, %v7842_v45, %v4858_v42  ;;  %v12419_v49 = vadd.f32 1e-09, %v4769_v21  ;;  %v7848_v62 = vpop.eup %7847  ;;  %v4469_v44 = vadd.f32 %v4468_v0, %v4467_v10  ;;  %v4642_v21 = vmul.f32 %v12427_v30, %v12427_v30 }
 0x4e2   : > { %v5007_v32 = vmul.f32 %v4862_v6, %v12198_v35  ;;  %v4959_v45 = vmul.f32 %v4862_v6, %v12189_v36  ;;  %v4864_v48 = vmul.f32 %v7848_v62, %v12376_v56  ;;  %v12439_v35 = vsel %vm12412_vm9, %v6080_v57, %v6076_v28 }
 0x4e3   : > { %7849 = vrsqrt.f32 %v12419_v49  ;;  %v4975_v46 = vmul.f32 %v4862_v6, %v12192_v31  ;;  %v4991_v63 = vmul.f32 %v4862_v6, %v12195_v41  ;;  %v4712_v36 = vsel %vm1344_vm2, %v4594_v12, 0.0 }
 0x4e4   : > { %v7381_v54 = vmul.f32 -1.442695, %v5007_v32  ;;  %v4865_v24 = vmul.f32 %v7848_v62, %v4864_v48  ;;  %v4713_v42 = vsel %vm1344_vm2, %v4610_v38, 0.0  ;;  %v7333_v28 = vmul.f32 -1.442695, %v4959_v45 }
 0x4e5   : > { %v4714_v40 = vadd.f32 %v4713_v42, %v4712_v36  ;;  %v4715_v41 = vsel %vm1344_vm2, %v4626_v17, 0.0  ;;  %v4515_v16 = vmul.f32 0.25, %v4469_v44  ;;  %v6286_v57 = vsub.f32 1.0, %v12439_v35 }
 0x4e6   : > { %v4866_v31 = vmul.f32 0.5, %v4865_v24  ;;  %v7349_v0 = vmul.f32 -1.442695, %v4975_v46  ;;  %vm4870_vm13 = vweird.f32 %v7848_v62  ;;  %v7365_v38 = vmul.f32 -1.442695, %v4991_v63 }
 0x4e7   : > { %v4716_v6 = vadd.f32 %v4715_v41, %v4714_v40  ;;  %7851 = vpow2.f32 %v7381_v54  ;;  %v12454_v10 = vsub.f32 %v12008_v3, %v4515_v16  ;;  %v4717_v45 = vsel %vm1344_vm2, %v4642_v21, 0.0  ;;  %vm4871_vm5 = vmor %vm4869_vm14, %vm4870_vm13 }
 0x4e8   : > { %v4867_v32 = vsub.f32 1.5, %v4866_v31  ;;  %7853 = vrcp.f32 %v12324_v13  ;;  %v12461_v46 = vsub.f32 %v12381_v20, %v4515_v16  ;;  %v5761_v44 = vsel %vm12467_vm15, %v12015_v11, %v12448_v59 }
 0x4e9   : > { %v7850_v12 = vpop.eup %7849  ;;  %7855 = vpow2.f32 %v7333_v28  ;;  %v4718_v17 = vadd.f32 %v4717_v45, %v4716_v6  ;;  %v12478_v54 = vmul.f32 %v11964_v1, %v11909_v23  ;;  %v6351_v24 = vmul.f32 %v12292_v14, %v6286_v57 }
 0x4ea   : > { %v4874_v58 = vmul.f32 %v7850_v12, %v12419_v49  ;;  %v4868_v48 = vmul.f32 %v7848_v62, %v4867_v32  ;;  %7857 = vpow2.f32 %v7349_v0  ;;  %v4595_v42 = vmul.f32 %v12454_v10, %v12454_v10 }
 0x4eb   : > { %7859 = vpow2.f32 %v7365_v38  ;;  %v12487_v31 = vsub.f32 %v12027_v60, %v4515_v16  ;;  %v15389_v11 = vand.u32 2147483647, %v11960_v27  ;;  %v4770_v0 = vmul.f32 0.33333334, %v4718_v17 }
 0x4ec   : > { %v4875_v56 = vmul.f32 %v7850_v12, %v4874_v58  ;;  %v4872_v36 = vsel %vm4871_vm5, %v7848_v62, %v4868_v48  ;;  %v12503_v27 = vsub.f32 %v12386_v8, %v4515_v16  ;;  %vm4880_vm1 = vweird.f32 %v7850_v12 }
 0x4ed   : > { %v4960_v21 = vmul.f32 %v4872_v36, %v12274_v52  ;;  %v4976_v40 = vmul.f32 %v4872_v36, %v12277_v37  ;;  %v4992_v28 = vmul.f32 %v4872_v36, %v12280_v50  ;;  %vm12491_vm0 = vcmp.eq.f32.partialorder %v15389_v11, 8.507059e+37  ;;  %v7852_v41 = vpop.eup %7851 }
 0x4ee   : > { %v5008_v62 = vmul.f32 %v4872_v36, %v12283_v51  ;;  %v4876_v57 = vmul.f32 0.5, %v4875_v56  ;;  %v4611_v52 = vmul.f32 %v12461_v46, %v12461_v46  ;;  %v12498_v37 = vpop.eup %7853  ;;  %v12500_v50 = vadd.f32 1.0, %v7852_v41  ;;  %v4281_v56 = vpop.f32.mrf.mxu1 }
 0x4ef   : > { %v7334_v6 = vmul.f32 -1.442695, %v4960_v21  ;;  %v7350_v38 = vmul.f32 -1.442695, %v4976_v40  ;;  %v7856_v32 = vpop.eup %7855  ;;  %v7366_v58 = vmul.f32 -1.442695, %v4992_v28  ;;  %vm4879_vm3 = vweird.f32 %v12419_v49 }
 0x4f0   : > { %v4877_v45 = vsub.f32 1.5, %v4876_v57  ;;  %v4719_v51 = vsel %vm1344_vm2, %v4595_v42, 0.0  ;;  %v7858_v48 = vpop.eup %7857  ;;  %7861 = vrcp.f32 %v12500_v50  ;;  %v7382_v17 = vmul.f32 -1.442695, %v5008_v62  ;;  %vm4881_vm4 = vmor %vm4879_vm3, %vm4880_vm1 }
 0x4f1   : > { %v4627_v63 = vmul.f32 %v12487_v31, %v12487_v31  ;;  %v7860_v36 = vpop.eup %7859  ;;  %7863 = vpow2.f32 %v7334_v6  ;;  %v12510_v21 = vadd.f32 1e-09, %v4770_v0  ;;  %v4720_v40 = vsel %vm1344_vm2, %v4611_v52, 0.0 }
 0x4f2   : > { %v4878_v16 = vmul.f32 %v7850_v12, %v4877_v45  ;;  %v6415_v28 = vadd.f32 %v6351_v24, %v12439_v35  ;;  %7865 = vpow2.f32 %v7350_v38  ;;  %v4643_v42 = vmul.f32 %v12503_v27, %v12503_v27  ;;  %v15393_v38 = vld [vmem:[#allocation45_spill] sm:$0xff] }
 0x4f3   : > { %v4721_v49 = vadd.f32 %v4720_v40, %v4719_v51  ;;  %v12517_v11 = vadd.f32 1.0, %v7856_v32  ;;  %7867 = vpow2.f32 %v7366_v58  ;;  %v12520_v62 = vadd.f32 %v12332_v25, %v4281_v56 }
 0x4f4   : > { %v4882_v41 = vsel %vm4881_vm4, %v7850_v12, %v4878_v16  ;;  %v12522_v57 = vadd.f32 1.0, %v7858_v48  ;;  %7869 = vpow2.f32 %v7382_v17  ;;  %v4722_v35 = vsel %vm1344_vm2, %v4627_v63, 0.0 }
 0x4f5   : > { %15392 = vst [vmem:[#allocation104_spill] sm:$0xff] %v12520_v62  ;;  %v4961_v0 = vmul.f32 %v4882_v41, %v12339_v34  ;;  %v12526_v24 = vadd.f32 1.0, %v7860_v36  ;;  %7871 = vrsqrt.f32 %v12510_v21  ;;  %v4723_v52 = vadd.f32 %v4722_v35, %v4721_v49 }
 0x4f6   : > { %v5766_v6 = vsel %vm12491_vm0, %v12322_v4, %v5761_v44  ;;  %v12532_v12 = vpop.eup %7861  ;;  %v12535_v32 = vmul.f32 %v6415_v28, %v15393_v38  ;;  %v6094_v58 = vand.u32 2147483648, %v12500_v50  ;;  %v4977_v34 = vmul.f32 %v4882_v41, %v12342_v15 }
 0x4f7   : > { %v4724_v45 = vsel %vm1344_vm2, %v4643_v42, 0.0  ;;  %v7864_v51 = vpop.eup %7863  ;;  %7873 = vrcp.f32 %v12517_v11  ;;  %v6084_v48 = vmul.f32 %v12532_v12, %v12500_v50  ;;  %v5009_v59 = vmul.f32 %v4882_v41, %v12349_v55 }
 0x4f8   : > { %v4725_v4 = vadd.f32 %v4724_v45, %v4723_v52  ;;  %v7866_v44 = vpop.eup %7865  ;;  %7875 = vrcp.f32 %v12522_v57  ;;  %v6092_v17 = vand.u32 2147483647, %v12500_v50  ;;  %v7335_v63 = vmul.f32 -1.442695, %v4961_v0 }
 0x4f9   : > { %v6265_v56 = vsub.f32 1.0, %v5766_v6  ;;  %v7868_v36 = vpop.eup %7867  ;;  %7877 = vrcp.f32 %v12526_v24  ;;  %v6085_v15 = vsub.f32 1.0, %v6084_v48  ;;  %v4471_v16 = vsel %vm1344_vm2, %v12520_v62, 0.0 }
 0x4fa   : > { %v5275_v40 = vsub.f32 1.0, %v12478_v54  ;;  %v7870_v28 = vpop.eup %7869  ;;  %vm6088_vm6 = vweird.f32 %v12500_v50  ;;  %v6095_v55 = vor.u32 1.1754944e-38, %v6094_v58  ;;  %v7351_v42 = vmul.f32 -1.442695, %v4977_v34 }
 0x4fb   : > { %v6330_v49 = vmul.f32 %v12292_v14, %v6265_v56  ;;  %v7872_v35 = vpop.eup %7871  ;;  %v6086_v0 = vmul.f32 %v12532_v12, %v6085_v15  ;;  %v12553_v52 = vadd.f32 1.0, %v7870_v28  ;;  %v7383_v38 = vmul.f32 -1.442695, %v5009_v59 }
 0x4fc   : > { %v4771_v45 = vmul.f32 0.33333334, %v4725_v4  ;;  %vm12555_vm7 = vcmp.eq.f32.partialorder %v6092_v17, 8.507059e+37  ;;  %v12559_v3 = vadd.f32 1.0, %v7864_v51  ;;  %v4993_v54 = vmul.f32 %v4882_v41, %v12346_v7 }
 0x4fd   : > { %7879 = vpow2.f32 %v7335_v63  ;;  %v4884_v58 = vmul.f32 %v7872_v35, %v12510_v21  ;;  %v12563_v34 = vpop.eup %7873  ;;  %vm6089_vm8 = vweird.f32 %v12532_v12  ;;  %v12566_v56 = vadd.f32 1.0, %v7866_v44  ;;  %v12582_v44 = vld [vmem:[%s14745_s7] ss:$0 sm:$0xff] }
 0x4fe   : > { %15396 = vst [vmem:[#allocation45_spill] sm:$0xff] %v12559_v3  ;;  %7881 = vrcp.f32 %v12553_v52  ;;  %v6394_v59 = vadd.f32 %v6330_v49, %v5766_v6  ;;  %v12569_v4 = vpop.eup %7875  ;;  %v6087_v17 = vadd.f32 %v12532_v12, %v6086_v0  ;;  %v12572_v51 = vadd.f32 1.0, %v7868_v36  ;;  %vm12592_vm11 = vmor %vm6088_vm6, %vm6089_vm8  ;;  %v15399_v0 = vld [vmem:[#allocation28_spill] sm:$0xff] }
 0x4ff   : > { %7883 = vpow2.f32 %v7351_v42  ;;  %v4885_v7 = vmul.f32 %v7872_v35, %v4884_v58  ;;  %v12574_v41 = vpop.eup %7877  ;;  %vm4889_vm9 = vweird.f32 %v12510_v21  ;;  %v12577_v63 = vadd.f32 1e-09, %v4771_v45 }
 0x500   : > { %7885 = vpow2.f32 %v7383_v38  ;;  %v5276_v6 = vmul.f32 %v11964_v1, %v5275_v40  ;;  %v6107_v36 = vand.u32 2147483647, %v12553_v52  ;;  %v7367_v15 = vmul.f32 -1.442695, %v4993_v54 }
 0x501   : > { %7887 = vrcp.f32 %v12559_v3  ;;  %v4886_v28 = vmul.f32 0.5, %v4885_v7  ;;  %vm5278_vm10 = vweird.f32 %v11909_v23  ;;  %v6109_v40 = vand.u32 2147483648, %v12553_v52 }
 0x502   : > { %7889 = vrcp.f32 %v12566_v56  ;;  %v12599_v49 = vadd.f32 %v4471_v16, %v12110_v2  ;;  %v6458_v38 = vmul.f32 %v6394_v59, %v15399_v0  ;;  %v6091_v54 = vsel %vm12592_vm11, %v12532_v12, %v6087_v17 }
 0x503   : > { %v7880_v45 = vpop.eup %7879  ;;  %7891 = vrcp.f32 %v12572_v51  ;;  %v4887_v50 = vsub.f32 1.5, %v4886_v28  ;;  %vm4890_vm12 = vweird.f32 %v7872_v35  ;;  %vm6103_vm13 = vweird.f32 %v12553_v52 }
 0x504   : > { %v7882_v58 = vpop.eup %7881  ;;  %7893 = vrsqrt.f32 %v12577_v63  ;;  %v6526_v7 = vmul.f32 %v12582_v44, %v6458_v38  ;;  %v5277_v2 = vadd.f32 %v11964_v1, %v5276_v6  ;;  %vm12611_vm14 = vcmp.eq.f32.partialorder %v6107_v36, 8.507059e+37  ;;  %vm4891_vm15 = vmor %vm4889_vm9, %vm4890_vm12 }
 0x505   : > { %v7884_v16 = vpop.eup %7883  ;;  %v6099_v59 = vmul.f32 %v7882_v58, %v12553_v52  ;;  %7895 = vpow2.f32 %v7367_v15  ;;  %v4888_v12 = vmul.f32 %v7872_v35, %v4887_v50  ;;  %v6096_v28 = vsel %vm12555_vm7, %v6095_v55, %v6091_v54  ;;  %v4284_v52 = vpop.f32.mrf.mxu1 }
 0x506   : > { %v7886_v17 = vpop.eup %7885  ;;  %v6110_v42 = vor.u32 1.1754944e-38, %v6109_v40  ;;  %v12617_v20 = vadd.f32 1.0, %v7880_v45  ;;  %v6654_v6 = vsel %vm1344_vm2, %v6526_v7, 0.0  ;;  %vm5279_vm5 = vweird.f32 %v11964_v1  ;;  %v4377_v7 = vpop.f32.mrf.mxu3 }
 0x507   : > { %v12623_v38 = vpop.eup %7887  ;;  %v6100_v36 = vsub.f32 1.0, %v6099_v59  ;;  %v12625_v60 = vadd.f32 1.0, %v7886_v17  ;;  %v4892_v15 = vsel %vm4891_vm15, %v7872_v35, %v4888_v12  ;;  %6655 = vadd.xlane.f32.xlu0 %v6654_v6  ;;  %v12630_v55 = vadd.f32 1.0, %v7884_v16  ;;  %vm12645_vm1 = vmor %vm5278_vm10, %vm5279_vm5 }
 0x508   : > { %15402 = vst [vmem:[#allocation28_spill] sm:$0xff] %v12617_v20  ;;  %v12628_v48 = vpop.eup %7889  ;;  %v4962_v40 = vmul.f32 %v4892_v15, %v12392_v9  ;;  %v4978_v21 = vmul.f32 %v4892_v15, %v12395_v19  ;;  %v5284_v45 = vand.u32 2147483648, %v11909_v23  ;;  %vm6104_vm0 = vweird.f32 %v7882_v58 }
 0x509   : > { %15403 = vst [vmem:[#allocation105_spill] sm:$0xff] %v12623_v38  ;;  %v12635_v54 = vpop.eup %7891  ;;  %v6101_v50 = vmul.f32 %v7882_v58, %v6100_v36  ;;  %7897 = vrcp.f32 %v12625_v60  ;;  %v5282_v35 = vand.u32 2147483647, %v11909_v23  ;;  %v6287_v12 = vsub.f32 1.0, %v6096_v28  ;;  %vm6105_vm4 = vmor %vm6103_vm13, %vm6104_vm0 }
 0x50a   : > { %v7894_v59 = vpop.eup %7893  ;;  %7899 = vrcp.f32 %v12617_v20  ;;  %v5010_v16 = vmul.f32 %v4892_v15, %v12427_v30  ;;  %v7336_v9 = vmul.f32 -1.442695, %v4962_v40  ;;  %v7352_v36 = vmul.f32 -1.442695, %v4978_v21 }
 0x50b   : > { %v7896_v17 = vpop.eup %7895  ;;  %v6102_v6 = vadd.f32 %v7882_v58, %v6101_v50  ;;  %v4894_v47 = vmul.f32 %v7894_v59, %v12577_v63  ;;  %vm4899_vm3 = vweird.f32 %v12577_v63  ;;  %v5281_v30 = vsel %vm12645_vm1, %v11964_v1, %v5277_v2 }
 0x50c   : > { %v4994_v23 = vmul.f32 %v4892_v15, %v12406_v26  ;;  %v7384_v40 = vmul.f32 -1.442695, %v5010_v16  ;;  %v5285_v39 = vor.u32 1.1754944e-38, %v5284_v45  ;;  %v12659_v20 = vadd.f32 %v12332_v25, %v4377_v7 }
 0x50d   : > { %v6106_v21 = vsel %vm6105_vm4, %v7882_v58, %v6102_v6  ;;  %7901 = vpow2.f32 %v7336_v9  ;;  %v4895_v50 = vmul.f32 %v7894_v59, %v4894_v47  ;;  %vm5283_vm6 = vcmp.eq.f32.partialorder %v5282_v35, 8.507059e+37 }
 0x50e   : > { %v6352_v38 = vmul.f32 %v12292_v14, %v6287_v12  ;;  %v6111_v1 = vsel %vm12611_vm14, %v6110_v42, %v6106_v21  ;;  %7903 = vpow2.f32 %v7352_v36  ;;  %v5286_v2 = vsel %vm5283_vm6, %v5285_v39, %v5281_v30 }
 0x50f   : > { %v7898_v19 = vpop.eup %7897  ;;  %v6288_v3 = vsub.f32 1.0, %v6111_v1  ;;  %7905 = vpow2.f32 %v7384_v40  ;;  %v4896_v26 = vmul.f32 0.5, %v4895_v50  ;;  %v6233_v15 = vsub.f32 1.0, %v5286_v2 }
 0x510   : > { %v12664_v45 = vpop.eup %7899  ;;  %v6114_v58 = vmul.f32 %v7898_v19, %v12625_v60  ;;  %v6124_v47 = vand.u32 2147483648, %v12625_v60  ;;  %v7368_v35 = vmul.f32 -1.442695, %v4994_v23  ;;  %v4475_v7 = vsel %vm1344_vm2, %v12659_v20, 0.0 }
 0x511   : > { %v4897_v0 = vsub.f32 1.5, %v4896_v26  ;;  %vm4900_vm7 = vweird.f32 %v7894_v59  ;;  %v4474_v39 = vadd.f32 %v12117_v61, %v12599_v49  ;;  %v12673_v42 = vadd.f32 %v12332_v25, %v4284_v52 }
 0x512   : > { %v6416_v12 = vadd.f32 %v6352_v38, %v6096_v28  ;;  %v6353_v16 = vmul.f32 %v12292_v14, %v6288_v3  ;;  %7907 = vrcp.f32 %v12630_v55  ;;  %v6115_v9 = vsub.f32 1.0, %v6114_v58  ;;  %vm4901_vm10 = vmor %vm4899_vm3, %vm4900_vm7 }
 0x513   : > { %15406 = vst [vmem:[#allocation106_spill] sm:$0xff] %v12673_v42  ;;  %v7902_v6 = vpop.eup %7901  ;;  %v12677_v36 = vadd.f32 1.0, %v7896_v17  ;;  %v4898_v30 = vmul.f32 %v7894_v59, %v4897_v0  ;;  %v6298_v23 = vmul.f32 %v12292_v14, %v6233_v15  ;;  %v4476_v40 = vadd.f32 %v4475_v7, %v4474_v39 }
 0x514   : > { %v7904_v21 = vpop.eup %7903  ;;  %v6116_v50 = vmul.f32 %v7898_v19, %v6115_v9  ;;  %vm6118_vm8 = vweird.f32 %v12625_v60  ;;  %vm6119_vm9 = vweird.f32 %v7898_v19  ;;  %v6122_v61 = vand.u32 2147483647, %v12625_v60 }
 0x515   : > { %15407 = vst [vmem:[#allocation107_spill] sm:$0xff] %v12677_v36  ;;  %v7906_v3 = vpop.eup %7905  ;;  %v6125_v49 = vor.u32 1.1754944e-38, %v6124_v47  ;;  %7909 = vpow2.f32 %v7368_v35  ;;  %v4902_v28 = vsel %vm4901_vm10, %v7894_v59, %v4898_v30  ;;  %v4478_v38 = vsel %vm1344_vm2, %v12673_v42, 0.0  ;;  %vm6120_vm11 = vmor %vm6118_vm8, %vm6119_vm9 }
 0x516   : > { %v6417_v17 = vadd.f32 %v6353_v16, %v6111_v1  ;;  %v6117_v52 = vadd.f32 %v7898_v19, %v6116_v50  ;;  %v12687_v26 = vadd.f32 1.0, %v7902_v6  ;;  %v12689_v15 = vadd.f32 1.0, %v7906_v3 }
 0x517   : > { %v4963_v60 = vmul.f32 %v4902_v28, %v12454_v10  ;;  %v5011_v58 = vmul.f32 %v4902_v28, %v12503_v27  ;;  %v6362_v63 = vadd.f32 %v6298_v23, %v5286_v2  ;;  %v4516_v7 = vmul.f32 0.25, %v4476_v40 }
 0x518   : > { %15408 = vst [vmem:[#allocation108_spill] sm:$0xff] %v12687_v26  ;;  %v12693_v0 = vpop.eup %7907  ;;  %v6121_v47 = vsel %vm6120_vm11, %v7898_v19, %v6117_v52  ;;  %vm6123_vm12 = vcmp.eq.f32.partialorder %v6122_v61, 8.507059e+37  ;;  %v12695_v59 = vadd.f32 1.0, %v7904_v21  ;;  %7911 = vrcp.f32 %v12689_v15 }
 0x519   : > { %v12699_v1 = vmul.f32 %v6416_v12, %v12142_v53  ;;  %7913 = vrcp.f32 %v12677_v36  ;;  %v6126_v35 = vsel %vm6123_vm12, %v6125_v49, %v6121_v47  ;;  %v4979_v10 = vmul.f32 %v4902_v28, %v12461_v46  ;;  %v15410_v12 = vld [vmem:[#allocation72_spill] sm:$0xff] }
 0x51a   : > { %15409 = vst [vmem:[#allocation109_spill] sm:$0xff] %v12695_v59  ;;  %v12704_v27 = vmul.f32 %v6417_v17, %v12206_v5  ;;  %v7385_v2 = vmul.f32 -1.442695, %v5011_v58  ;;  %v12707_v39 = vadd.f32 %v4478_v38, %v12121_v33  ;;  %v5769_v19 = vmul.f32 %v12096_v43, %v12029_v18  ;;  %v15411_v33 = vld [vmem:[#allocation55_spill] sm:$0xff] }
 0x51b   : > { %v7910_v16 = vpop.eup %7909  ;;  %7915 = vrcp.f32 %v12687_v26  ;;  %v7337_v53 = vmul.f32 -1.442695, %v4963_v60  ;;  %v6426_v9 = vmul.f32 %v6362_v63, %v15410_v12  ;;  %v12714_v6 = vsub.f32 %v12058_v29, %v4516_v7 }
 0x51c   : > { %v6289_v46 = vsub.f32 1.0, %v6126_v35  ;;  %7917 = vrcp.f32 %v12695_v59  ;;  %v12718_v5 = vsub.f32 %v12520_v62, %v4516_v7  ;;  %v12721_v30 = vsub.f32 %v15411_v33, %v4516_v7 }
 0x51d   : > { %v7353_v23 = vmul.f32 -1.442695, %v4979_v10  ;;  %v6494_v40 = vmul.f32 %v12582_v44, %v6426_v9  ;;  %v12725_v21 = vsub.f32 %v12659_v20, %v4516_v7  ;;  %v4596_v50 = vmul.f32 %v12714_v6, %v12714_v6 }
 0x51e   : > { %v12729_v61 = vpop.eup %7911  ;;  %v12731_v3 = vadd.f32 1.0, %v7910_v16  ;;  %7919 = vpow2.f32 %v7385_v2  ;;  %v4612_v49 = vmul.f32 %v12718_v5, %v12718_v5  ;;  %v4628_v38 = vmul.f32 %v12721_v30, %v12721_v30 }
 0x51f   : > { %vm5773_vm13 = vweird.f32 %v12029_v18  ;;  %v12738_v17 = vpop.eup %7913  ;;  %v6129_v52 = vmul.f32 %v12729_v61, %v12689_v15  ;;  %v4995_v60 = vmul.f32 %v4902_v28, %v12487_v31  ;;  %7921 = vpow2.f32 %v7337_v53 }
 0x520   : > { %15412 = vst [vmem:[#allocation72_spill] sm:$0xff] %v12731_v3  ;;  %v6558_v58 = vsel %vm1344_vm2, %v6494_v40, 0.0  ;;  %v6354_v63 = vmul.f32 %v12292_v14, %v6289_v46  ;;  %v4644_v7 = vmul.f32 %v12725_v21, %v12725_v21  ;;  %v4726_v47 = vsel %vm1344_vm2, %v4596_v50, 0.0 }
 0x521   : > { %15413 = vst [vmem:[#allocation110_spill] sm:$0xff] %v12738_v17  ;;  %6559 = vadd.xlane.f32.xlu2 %v6558_v58  ;;  %v4727_v10 = vsel %vm1344_vm2, %v4612_v49, 0.0  ;;  %v12749_v2 = vpop.eup %7915  ;;  %v6130_v16 = vsub.f32 1.0, %v6129_v52  ;;  %7923 = vpow2.f32 %v7353_v23  ;;  %v5770_v9 = vsub.f32 1.0, %v5769_v19 }
 0x522   : > { %15414 = vst [vmem:[#allocation111_spill] sm:$0xff] %v12749_v2  ;;  %v4728_v12 = vadd.f32 %v4727_v10, %v4726_v47  ;;  %v12751_v31 = vpop.eup %7917  ;;  %7925 = vrcp.f32 %v12731_v3  ;;  %v6137_v28 = vand.u32 2147483647, %v12689_v15  ;;  %v6139_v53 = vand.u32 2147483648, %v12689_v15  ;;  %v15430_v3 = vld [vmem:[#allocation42_spill] sm:$0xff] }
 0x523   : > { %15415 = vst [vmem:[#allocation112_spill] sm:$0xff] %v12751_v31  ;;  %v4729_v46 = vsel %vm1344_vm2, %v4628_v38, 0.0  ;;  %v6131_v40 = vmul.f32 %v12729_v61, %v6130_v16  ;;  %v5771_v49 = vmul.f32 %v12096_v43, %v5770_v9  ;;  %v5779_v52 = vand.u32 2147483648, %v12029_v18 }
 0x524   : > { %v4730_v50 = vadd.f32 %v4729_v46, %v4728_v12  ;;  %v7920_v23 = vpop.eup %7919  ;;  %v7369_v58 = vmul.f32 -1.442695, %v4995_v60  ;;  %v4731_v19 = vsel %vm1344_vm2, %v4644_v7, 0.0  ;;  %vm5774_vm14 = vweird.f32 %v12096_v43  ;;  %v15416_v60 = vld [vmem:[#allocation9_spill] sm:$0xff]  ;;  %v15417_v46 = vld [vmem:[#allocation12_spill] sm:$0xff] }
 0x525   : > { %v5777_v47 = vand.u32 2147483647, %v12029_v18  ;;  %v7922_v10 = vpop.eup %7921  ;;  %v6418_v33 = vadd.f32 %v6354_v63, %v6126_v35  ;;  %vm6133_vm15 = vweird.f32 %v12689_v15  ;;  %v12764_v38 = vadd.f32 1.0, %v7920_v23  ;;  %vm5775_vm1 = vmor %vm5773_vm13, %vm5774_vm14 }
 0x526   : > { %v4732_v16 = vadd.f32 %v4731_v19, %v4730_v50  ;;  %v6132_v12 = vadd.f32 %v12729_v61, %v6131_v40  ;;  %vm6134_vm5 = vweird.f32 %v12729_v61  ;;  %v5772_v9 = vadd.f32 %v12096_v43, %v5771_v49 }
 0x527   : > { %v5994_v7 = vmul.f32 %v15417_v46, %v15416_v60  ;;  %v7924_v29 = vpop.eup %7923  ;;  %vm12771_vm0 = vcmp.eq.f32.partialorder %v6137_v28, 8.507059e+37  ;;  %v6140_v35 = vor.u32 1.1754944e-38, %v6139_v53  ;;  %7927 = vrcp.f32 %v12764_v38  ;;  %v15421_v28 = vld [vmem:[#allocation93_spill] sm:$0xff]  ;;  %vm12790_vm4 = vmor %vm6133_vm15, %vm6134_vm5 }
 0x528   : > { %v5780_v63 = vor.u32 1.1754944e-38, %v5779_v52  ;;  %v12780_v40 = vpop.eup %7925  ;;  %7929 = vpow2.f32 %v7369_v58  ;;  %v4772_v50 = vmul.f32 0.33333334, %v4732_v16  ;;  %v5776_v49 = vsel %vm5775_vm1, %v12096_v43, %v5772_v9 }
 0x529   : > { %15420 = vst [vmem:[#allocation9_spill] sm:$0xff] %v12780_v40  ;;  %vm5778_vm3 = vcmp.eq.f32.partialorder %v5777_v47, 8.507059e+37  ;;  %v12784_v23 = vmul.f32 %v6418_v33, %v15421_v28  ;;  %v12794_v18 = vadd.f32 1.0, %v7922_v10  ;;  %v5995_v19 = vsub.f32 1.0, %v5994_v7 }
 0x52a   : > { %v5781_v52 = vsel %vm5778_vm3, %v5780_v63, %v5776_v49  ;;  %v6136_v43 = vsel %vm12790_vm4, %v12729_v61, %v6132_v12  ;;  %v12799_v58 = vadd.f32 1.0, %v7924_v29  ;;  %v12801_v33 = vadd.f32 1e-09, %v4772_v50  ;;  %v15427_v61 = vld [vmem:[#allocation70_spill] sm:$0xff]  ;;  %v15428_v29 = vld [vmem:[#allocation36_spill] sm:$0xff] }
 0x52b   : > { %15422 = vst [vmem:[#allocation12_spill] sm:$0xff] %v12784_v23  ;;  %v6266_v47 = vsub.f32 1.0, %v5781_v52  ;;  %v5996_v16 = vmul.f32 %v15417_v46, %v5995_v19  ;;  %vm5999_vm6 = vweird.f32 %v15417_v46  ;;  %v6002_v15 = vand.u32 2147483647, %v15416_v60 }
 0x52c   : > { %15425 = vst [vmem:[#allocation93_spill] sm:$0xff] %v12794_v18  ;;  %v6004_v10 = vand.u32 2147483648, %v15416_v60  ;;  %7931 = vrsqrt.f32 %v12801_v33  ;;  %vm5998_vm7 = vweird.f32 %v15416_v60  ;;  %v5514_v12 = vmul.f32 %v15428_v29, %v15427_v61 }
 0x52d   : > { %15426 = vst [vmem:[#allocation113_spill] sm:$0xff] %v12799_v58  ;;  %v6331_v9 = vmul.f32 %v12292_v14, %v6266_v47  ;;  %v7928_v7 = vpop.eup %7927  ;;  %v12814_v63 = vsel %vm12771_vm0, %v6140_v35, %v6136_v43  ;;  %v6152_v50 = vand.u32 2147483647, %v12764_v38  ;;  %v6154_v49 = vand.u32 2147483648, %v12764_v38  ;;  %vm6000_vm8 = vmor %vm5998_vm7, %vm5999_vm6  ;;  %v15429_v43 = vld [vmem:[#allocation19_spill] sm:$0xff] }
 0x52e   : > { %v5997_v28 = vadd.f32 %v15417_v46, %v5996_v16  ;;  %v7930_v53 = vpop.eup %7929  ;;  %v6144_v19 = vmul.f32 %v7928_v7, %v12764_v38  ;;  %v6005_v60 = vor.u32 1.1754944e-38, %v6004_v10  ;;  %v5515_v31 = vsub.f32 1.0, %v5514_v12  ;;  %v15431_v10 = vld [vmem:[#allocation73_spill] sm:$0xff] }
 0x52f   : > { %v6395_v47 = vadd.f32 %v6331_v9, %v5781_v52  ;;  %vm6149_vm9 = vweird.f32 %v7928_v7  ;;  %vm6003_vm10 = vcmp.eq.f32.partialorder %v6002_v15, 8.507059e+37  ;;  %vm5519_vm11 = vweird.f32 %v15428_v29 }
 0x530   : > { %v6001_v62 = vsel %vm6000_vm8, %v15417_v46, %v5997_v28  ;;  %v6145_v35 = vsub.f32 1.0, %v6144_v19  ;;  %v5516_v16 = vmul.f32 %v15428_v29, %v5515_v31  ;;  %v5522_v52 = vand.u32 2147483647, %v15427_v61 }
 0x531   : > { %v6459_v59 = vmul.f32 %v6395_v47, %v15429_v43  ;;  %v6006_v23 = vsel %vm6003_vm10, %v6005_v60, %v6001_v62  ;;  %v5524_v9 = vand.u32 2147483648, %v15427_v61  ;;  %v6009_v12 = vmul.f32 %v15431_v10, %v15430_v3 }
 0x532   : > { %v6281_v40 = vsub.f32 1.0, %v6006_v23  ;;  %v7932_v2 = vpop.eup %7931  ;;  %v6146_v26 = vmul.f32 %v7928_v7, %v6145_v35  ;;  %v5517_v15 = vadd.f32 %v15428_v29, %v5516_v16  ;;  %vm5518_vm12 = vweird.f32 %v15427_v61 }
 0x533   : > { %v6527_v46 = vmul.f32 %v12582_v44, %v6459_v59  ;;  %v6290_v28 = vsub.f32 1.0, %v12814_v63  ;;  %vm6148_vm13 = vweird.f32 %v12764_v38  ;;  %v4904_v31 = vmul.f32 %v7932_v2, %v12801_v33  ;;  %vm5520_vm14 = vmor %vm5518_vm12, %vm5519_vm11 }
 0x534   : > { %v6346_v19 = vmul.f32 %v12292_v14, %v6281_v40  ;;  %v6147_v47 = vadd.f32 %v7928_v7, %v6146_v26  ;;  %v5521_v59 = vsel %vm5520_vm14, %v15428_v29, %v5517_v15  ;;  %v5525_v62 = vor.u32 1.1754944e-38, %v5524_v9  ;;  %vm12842_vm15 = vmor %vm6148_vm13, %vm6149_vm9  ;;  %v15434_v29 = vld [vmem:[#allocation18_spill] sm:$0xff] }
 0x535   : > { %v6657_v60 = vsel %vm1344_vm2, %v6527_v46, 0.0  ;;  %v4905_v35 = vmul.f32 %v7932_v2, %v4904_v31  ;;  %vm5523_vm5 = vcmp.eq.f32.partialorder %v5522_v52, 8.507059e+37  ;;  %v6010_v43 = vsub.f32 1.0, %v6009_v12 }
 0x536   : > { %6658 = vadd.xlane.f32.xlu1 %v6657_v60  ;;  %v6410_v38 = vadd.f32 %v6346_v19, %v6006_v23  ;;  %v6151_v40 = vsel %vm12842_vm15, %v7928_v7, %v6147_v47  ;;  %vm6153_vm0 = vcmp.eq.f32.partialorder %v6152_v50, 8.507059e+37  ;;  %v6155_v26 = vor.u32 1.1754944e-38, %v6154_v49  ;;  %v15436_v47 = vld [vmem:[#allocation46_spill] sm:$0xff]  ;;  %v15437_v60 = vld [vmem:[#allocation15_spill] sm:$0xff] }
 0x537   : > { %v5526_v16 = vsel %vm5523_vm5, %v5525_v62, %v5521_v59  ;;  %v4906_v46 = vmul.f32 0.5, %v4905_v35  ;;  %vm4910_vm1 = vweird.f32 %v7932_v2  ;;  %v6011_v17 = vmul.f32 %v15431_v10, %v6010_v43 }
 0x538   : > { %v6474_v9 = vmul.f32 %v6410_v38, %v15434_v29  ;;  %v6249_v15 = vsub.f32 1.0, %v5526_v16  ;;  %vm6014_vm3 = vweird.f32 %v15431_v10  ;;  %v6017_v31 = vand.u32 2147483647, %v15430_v3 }
 0x539   : > { %v6019_v23 = vand.u32 2147483648, %v15430_v3  ;;  %v12853_v52 = vsel %vm6153_vm0, %v6155_v26, %v6151_v40  ;;  %v4907_v12 = vsub.f32 1.5, %v4906_v46  ;;  %v12857_v49 = vadd.f32 1.0, %v7930_v53  ;;  %v15438_v26 = vld [vmem:[#allocation32_spill] sm:$0xff] }
 0x53a   : > { %v6542_v7 = vmul.f32 %v12582_v44, %v6474_v9  ;;  %v6314_v50 = vmul.f32 %v12292_v14, %v6249_v15  ;;  %v6012_v19 = vadd.f32 %v15431_v10, %v6011_v17  ;;  %vm6013_vm4 = vweird.f32 %v15430_v3  ;;  %v4380_v3 = vpop.f32.mrf.mxu3 }
 0x53b   : > { %15435 = vst [vmem:[#allocation70_spill] sm:$0xff] %v12857_v49  ;;  %v5289_v59 = vmul.f32 %v15437_v60, %v15436_v47  ;;  %v4908_v62 = vmul.f32 %v7932_v2, %v4907_v12  ;;  %vm4909_vm6 = vweird.f32 %v12801_v33  ;;  %vm6015_vm7 = vmor %vm6013_vm4, %vm6014_vm3  ;;  %v6355_v38 = vmul.f32 %v12292_v14, %v6290_v28  ;;  %v15439_v28 = vld [vmem:[#allocation10_spill] sm:$0xff] }
 0x53c   : > { %v6702_v61 = vsel %vm1344_vm2, %v6542_v7, 0.0  ;;  %v6378_v35 = vadd.f32 %v6314_v50, %v5526_v16  ;;  %v6291_v53 = vsub.f32 1.0, %v12853_v52  ;;  %vm4911_vm8 = vmor %vm4909_vm6, %vm4910_vm1  ;;  %v6016_v17 = vsel %vm6015_vm7, %v15431_v10, %v6012_v19 }
 0x53d   : > { %6703 = vadd.xlane.f32.xlu0 %v6702_v61  ;;  %v6020_v43 = vor.u32 1.1754944e-38, %v6019_v23  ;;  %v4912_v40 = vsel %vm4911_vm8, %v7932_v2, %v4908_v62  ;;  %v12873_v46 = vadd.f32 %v12332_v25, %v4380_v3  ;;  %vm6018_vm9 = vcmp.eq.f32.partialorder %v6017_v31, 8.507059e+37 }
 0x53e   : > { %v6442_v33 = vmul.f32 %v6378_v35, %v15438_v26  ;;  %7933 = vrcp.f32 %v12794_v18  ;;  %v4481_v16 = vadd.f32 %v15439_v28, %v12707_v39  ;;  %v5290_v9 = vsub.f32 1.0, %v5289_v59  ;;  %v4287_v39 = vpop.f32.mrf.mxu1  ;;  %v15443_v26 = vld [vmem:[#allocation61_spill] sm:$0xff] }
 0x53f   : > { %v6021_v29 = vsel %vm6018_vm9, %v6020_v43, %v6016_v17  ;;  %7935 = vrcp.f32 %v12799_v58  ;;  %v5012_v15 = vmul.f32 %v4912_v40, %v12725_v21  ;;  %v4482_v2 = vsel %vm1344_vm2, %v12873_v46, 0.0  ;;  %v15442_v17 = vld [vmem:[#allocation48_spill] sm:$0xff] }
 0x540   : > { %v6510_v10 = vmul.f32 %v12582_v44, %v6442_v33  ;;  %v12884_v25 = vadd.f32 %v6355_v38, %v12814_v63  ;;  %v6356_v31 = vmul.f32 %v12292_v14, %v6291_v53  ;;  %v4964_v23 = vmul.f32 %v4912_v40, %v12714_v6  ;;  %v12897_v6 = vld [vmem:[%s14743_s5] ss:$0 sm:$0xff] }
 0x541   : > { %v4483_v12 = vadd.f32 %v4482_v2, %v4481_v16  ;;  %v7386_v7 = vmul.f32 -1.442695, %v5012_v15  ;;  %v6282_v19 = vsub.f32 1.0, %v6021_v29  ;;  %vm5293_vm10 = vweird.f32 %v15436_v47 }
 0x542   : > { %v6606_v50 = vsel %vm1344_vm2, %v6510_v10, 0.0  ;;  %v5291_v59 = vmul.f32 %v15437_v60, %v5290_v9  ;;  %vm5294_vm11 = vweird.f32 %v15437_v60  ;;  %v5297_v63 = vand.u32 2147483647, %v15436_v47 }
 0x543   : > { %6607 = vadd.xlane.f32.xlu2 %v6606_v50  ;;  %v4517_v21 = vmul.f32 0.25, %v4483_v12  ;;  %v4980_v62 = vmul.f32 %v4912_v40, %v12718_v5  ;;  %v12900_v61 = vadd.f32 %v12897_v6, %v4287_v39  ;;  %v6347_v35 = vmul.f32 %v12292_v14, %v6282_v19  ;;  %vm5295_vm12 = vmor %vm5293_vm10, %vm5294_vm11  ;;  %v15445_v39 = vld [vmem:[#allocation60_spill] sm:$0xff]  ;;  %v15446_v50 = vld [vmem:[#allocation54_spill] sm:$0xff] }
 0x544   : > { %v5299_v38 = vand.u32 2147483648, %v15436_v47  ;;  %v12904_v53 = vpop.eup %7933  ;;  %v7338_v3 = vmul.f32 -1.442695, %v4964_v23  ;;  %7937 = vpow2.f32 %v7386_v7  ;;  %v5292_v15 = vadd.f32 %v15437_v60, %v5291_v59  ;;  %v15447_v19 = vld [vmem:[#allocation16_spill] sm:$0xff] }
 0x545   : > { %15440 = vst [vmem:[#allocation36_spill] sm:$0xff] %v12900_v61  ;;  %v12907_v43 = vsub.f32 %v15442_v17, %v4517_v21  ;;  %v12910_v5 = vsub.f32 %v12673_v42, %v4517_v21  ;;  %v12913_v33 = vsub.f32 %v15443_v26, %v4517_v21  ;;  %v12915_v28 = vpop.eup %7935  ;;  %v12918_v16 = vsub.f32 %v12873_v46, %v4517_v21 }
 0x546   : > { %15441 = vst [vmem:[#allocation19_spill] sm:$0xff] %v12904_v53  ;;  %v6411_v9 = vadd.f32 %v6347_v35, %v6021_v29  ;;  %v5300_v12 = vor.u32 1.1754944e-38, %v5299_v38  ;;  %v5296_v29 = vsel %vm5295_vm12, %v15437_v60, %v5292_v15  ;;  %vm5298_vm13 = vcmp.eq.f32.partialorder %v5297_v63, 8.507059e+37 }
 0x547   : > { %15444 = vst [vmem:[#allocation42_spill] sm:$0xff] %v12915_v28  ;;  %v4597_v10 = vmul.f32 %v12907_v43, %v12907_v43  ;;  %v4613_v2 = vmul.f32 %v12910_v5, %v12910_v5  ;;  %v4629_v23 = vmul.f32 %v12913_v33, %v12913_v33  ;;  %v5784_v21 = vmul.f32 %v15447_v19, %v15446_v50  ;;  %v15471_v28 = vld [vmem:[#allocation21_spill] sm:$0xff] }
 0x548   : > { %v6475_v7 = vmul.f32 %v6411_v9, %v15445_v39  ;;  %v4645_v59 = vmul.f32 %v12918_v16, %v12918_v16  ;;  %v5301_v42 = vsel %vm5298_vm13, %v5300_v12, %v5296_v29  ;;  %v4996_v47 = vmul.f32 %v4912_v40, %v12721_v30 }
 0x549   : > { %v4733_v35 = vsel %vm1344_vm2, %v4597_v10, 0.0  ;;  %v4734_v26 = vsel %vm1344_vm2, %v4613_v2, 0.0  ;;  %7939 = vpow2.f32 %v7338_v3  ;;  %v6420_v60 = vadd.f32 %v6356_v31, %v12853_v52 }
 0x54a   : > { %v4735_v38 = vadd.f32 %v4734_v26, %v4733_v35  ;;  %v6543_v9 = vmul.f32 %v12582_v44, %v6475_v7  ;;  %v4736_v63 = vsel %vm1344_vm2, %v4629_v23, 0.0  ;;  %v6234_v15 = vsub.f32 1.0, %v5301_v42  ;;  %v7938_v17 = vpop.eup %7937  ;;  %v15453_v35 = vld [vmem:[#allocation74_spill] sm:$0xff] }
 0x54b   : > { %v5785_v39 = vsub.f32 1.0, %v5784_v21  ;;  %v7354_v53 = vmul.f32 -1.442695, %v4980_v62  ;;  %v4485_v10 = vsel %vm1344_vm2, %v12900_v61, 0.0  ;;  %v12946_v12 = vadd.f32 1.0, %v7938_v17  ;;  %v15449_v17 = vld [vmem:[#allocation47_spill] sm:$0xff] }
 0x54c   : > { %v4737_v18 = vadd.f32 %v4736_v63, %v4735_v38  ;;  %v6705_v2 = vsel %vm1344_vm2, %v6543_v9, 0.0  ;;  %v4738_v30 = vsel %vm1344_vm2, %v4645_v59, 0.0  ;;  %v6299_v40 = vmul.f32 %v12292_v14, %v6234_v15  ;;  %v4383_v15 = vpop.f32.mrf.mxu3 }
 0x54d   : > { %6706 = vadd.xlane.f32.xlu1 %v6705_v2  ;;  %v5786_v52 = vmul.f32 %v15447_v19, %v5785_v39  ;;  %7941 = vrcp.f32 %v12857_v49  ;;  %v7370_v31 = vmul.f32 -1.442695, %v4996_v47  ;;  %vm5789_vm14 = vweird.f32 %v15447_v19  ;;  %v15454_v47 = vld [vmem:[#allocation26_spill] sm:$0xff] }
 0x54e   : > { %v4739_v3 = vadd.f32 %v4738_v30, %v4737_v18  ;;  %v12955_v62 = vmul.f32 %v12884_v25, %v12335_v22  ;;  %7943 = vrcp.f32 %v12946_v12  ;;  %v4486_v26 = vadd.f32 %v4485_v10, %v15449_v17  ;;  %v15458_v30 = vld [vmem:[#allocation89_spill] sm:$0xff] }
 0x54f   : > { %v5792_v23 = vand.u32 2147483647, %v15446_v50  ;;  %v7940_v7 = vpop.eup %7939  ;;  %v6363_v21 = vadd.f32 %v6299_v40, %v5301_v42  ;;  %v5787_v59 = vadd.f32 %v15447_v19, %v5786_v52  ;;  %vm5788_vm15 = vweird.f32 %v15446_v50  ;;  %v15455_v42 = vld [vmem:[#allocation59_spill] sm:$0xff] }
 0x550   : > { %15448 = vst [vmem:[#allocation73_spill] sm:$0xff] %v12955_v62  ;;  %v4773_v29 = vmul.f32 0.33333334, %v4739_v3  ;;  %v12963_v18 = vmul.f32 %v6420_v60, %v12386_v8  ;;  %7945 = vpow2.f32 %v7354_v53  ;;  %vm12965_vm5 = vmor %vm5788_vm15, %vm5789_vm14  ;;  %v5794_v25 = vand.u32 2147483648, %v15446_v50 }
 0x551   : > { %v5304_v38 = vmul.f32 %v15454_v47, %v15453_v35  ;;  %7947 = vpow2.f32 %v7370_v31  ;;  %v6427_v63 = vmul.f32 %v6363_v21, %v15455_v42  ;;  %v5791_v8 = vsel %vm12965_vm5, %v15447_v19, %v5787_v59 }
 0x552   : > { %15450 = vst [vmem:[#allocation18_spill] sm:$0xff] %v12963_v18  ;;  %v12972_v9 = vadd.f32 1e-09, %v4773_v29  ;;  %v12978_v60 = vadd.f32 1.0, %v7940_v7  ;;  %vm5793_vm0 = vcmp.eq.f32.partialorder %v5792_v23, 8.507059e+37  ;;  %v5795_v53 = vor.u32 1.1754944e-38, %v5794_v25 }
 0x553   : > { %v5305_v39 = vsub.f32 1.0, %v5304_v38  ;;  %v12980_v10 = vpop.eup %7941  ;;  %v6495_v50 = vmul.f32 %v12582_v44, %v6427_v63  ;;  %v12985_v2 = vadd.f32 %v12897_v6, %v4383_v15  ;;  %v4488_v40 = vadd.f32 %v15458_v30, %v4486_v26 }
 0x554   : > { %15456 = vst [vmem:[#allocation46_spill] sm:$0xff] %v12978_v60  ;;  %7949 = vrsqrt.f32 %v12972_v9  ;;  %v12988_v52 = vpop.eup %7943  ;;  %v5796_v19 = vsel %vm5793_vm0, %v5795_v53, %v5791_v8  ;;  %vm5309_vm1 = vweird.f32 %v15454_v47  ;;  %v5314_v3 = vand.u32 2147483648, %v15453_v35 }
 0x555   : > { %15457 = vst [vmem:[#allocation15_spill] sm:$0xff] %v12980_v10  ;;  %v5306_v31 = vmul.f32 %v15454_v47, %v5305_v39  ;;  %v6159_v17 = vmul.f32 %v12988_v52, %v12946_v12  ;;  %v6561_v23 = vsel %vm1344_vm2, %v6495_v50, 0.0  ;;  %v6267_v7 = vsub.f32 1.0, %v5796_v19  ;;  %v15459_v39 = vld [vmem:[#allocation40_spill] sm:$0xff]  ;;  %v15460_v50 = vld [vmem:[#allocation62_spill] sm:$0xff] }
 0x556   : > { %v5312_v29 = vand.u32 2147483647, %v15453_v35  ;;  %v12997_v21 = vpop.eup %7945  ;;  %v6169_v26 = vand.u32 2147483648, %v12946_v12  ;;  %6562 = vadd.xlane.f32.xlu0 %v6561_v23  ;;  %v4489_v59 = vsel %vm1344_vm2, %v12985_v2, 0.0  ;;  %vm5308_vm3 = vweird.f32 %v15453_v35 }
 0x557   : > { %v5307_v22 = vadd.f32 %v15454_v47, %v5306_v31  ;;  %v13004_v25 = vpop.eup %7947  ;;  %v6160_v38 = vsub.f32 1.0, %v6159_v17  ;;  %v6167_v42 = vand.u32 2147483647, %v12946_v12  ;;  %v6332_v63 = vmul.f32 %v12292_v14, %v6267_v7  ;;  %vm5310_vm4 = vmor %vm5308_vm3, %vm5309_vm1 }
 0x558   : > { %v4490_v8 = vadd.f32 %v4489_v59, %v4488_v40  ;;  %vm6163_vm6 = vweird.f32 %v12946_v12  ;;  %v5315_v15 = vor.u32 1.1754944e-38, %v5314_v3  ;;  %v5529_v30 = vmul.f32 %v15460_v50, %v15459_v39 }
 0x559   : > { %v5311_v53 = vsel %vm5310_vm4, %v15454_v47, %v5307_v22  ;;  %v6161_v31 = vmul.f32 %v12988_v52, %v6160_v38  ;;  %v6396_v17 = vadd.f32 %v6332_v63, %v5796_v19  ;;  %vm5313_vm7 = vcmp.eq.f32.partialorder %v5312_v29, 8.507059e+37  ;;  %v15463_v47 = vld [vmem:[#allocation64_spill] sm:$0xff]  ;;  %v15464_v22 = vld [vmem:[#allocation53_spill] sm:$0xff]  ;;  %v4290_v19 = vpop.f32.mrf.mxu1 }
 0x55a   : > { %v7950_v35 = vpop.eup %7949  ;;  %v4518_v23 = vmul.f32 0.25, %v4490_v8  ;;  %vm6164_vm8 = vweird.f32 %v12988_v52  ;;  %v6170_v40 = vor.u32 1.1754944e-38, %v6169_v26  ;;  %v5316_v59 = vsel %vm5313_vm7, %v5315_v15, %v5311_v53  ;;  %v15465_v8 = vld [vmem:[#allocation39_spill] sm:$0xff] }
 0x55b   : > { %v4914_v7 = vmul.f32 %v7950_v35, %v12972_v9  ;;  %vm13017_vm9 = vcmp.eq.f32.partialorder %v6167_v42, 8.507059e+37  ;;  %v6460_v3 = vmul.f32 %v6396_v17, %v15463_v47  ;;  %v5530_v29 = vsub.f32 1.0, %v5529_v30  ;;  %vm13050_vm11 = vmor %vm6163_vm6, %vm6164_vm8 }
 0x55c   : > { %v13023_v58 = vsub.f32 %v15464_v22, %v4518_v23  ;;  %v13026_v38 = vsub.f32 %v12900_v61, %v4518_v23  ;;  %v6162_v63 = vadd.f32 %v12988_v52, %v6161_v31  ;;  %v13030_v18 = vsub.f32 %v15465_v8, %v4518_v23 }
 0x55d   : > { %v4915_v26 = vmul.f32 %v7950_v35, %v4914_v7  ;;  %v13033_v42 = vsub.f32 %v12985_v2, %v4518_v23  ;;  %v6528_v53 = vmul.f32 %v12582_v44, %v6460_v3  ;;  %v6235_v47 = vsub.f32 1.0, %v5316_v59 }
 0x55e   : > { %v4598_v15 = vmul.f32 %v13023_v58, %v13023_v58  ;;  %v4614_v17 = vmul.f32 %v13026_v38, %v13026_v38  ;;  %vm4919_vm10 = vweird.f32 %v12972_v9  ;;  %v4630_v30 = vmul.f32 %v13030_v18, %v13030_v18 }
 0x55f   : > { %v4916_v22 = vmul.f32 0.5, %v4915_v26  ;;  %v13044_v31 = vadd.f32 %v12897_v6, %v4290_v19  ;;  %v6660_v7 = vsel %vm1344_vm2, %v6528_v53, 0.0  ;;  %v4646_v3 = vmul.f32 %v13033_v42, %v13033_v42 }
 0x560   : > { %v4740_v26 = vsel %vm1344_vm2, %v4598_v15, 0.0  ;;  %v4741_v61 = vsel %vm1344_vm2, %v4614_v17, 0.0  ;;  %v6166_v19 = vsel %vm13050_vm11, %v12988_v52, %v6162_v63  ;;  %vm4920_vm12 = vweird.f32 %v7950_v35  ;;  %6661 = vadd.xlane.f32.xlu2 %v6660_v7 }
 0x561   : > { %15466 = vst [vmem:[#allocation32_spill] sm:$0xff] %v13044_v31  ;;  %v4917_v8 = vsub.f32 1.5, %v4916_v22  ;;  %v4742_v12 = vadd.f32 %v4741_v61, %v4740_v26  ;;  %v4743_v62 = vsel %vm1344_vm2, %v4630_v30, 0.0  ;;  %v6300_v10 = vmul.f32 %v12292_v14, %v6235_v47  ;;  %vm4921_vm14 = vmor %vm4919_vm10, %vm4920_vm12  ;;  %v15470_v47 = vld [vmem:[#allocation78_spill] sm:$0xff] }
 0x562   : > { %v5531_v53 = vmul.f32 %v15460_v50, %v5530_v29  ;;  %vm5534_vm13 = vweird.f32 %v15460_v50  ;;  %v5537_v17 = vand.u32 2147483647, %v15459_v39  ;;  %v5539_v36 = vand.u32 2147483648, %v15459_v39 }
 0x563   : > { %v4918_v49 = vmul.f32 %v7950_v35, %v4917_v8  ;;  %v4744_v15 = vadd.f32 %v4743_v62, %v4742_v12  ;;  %v4745_v52 = vsel %vm1344_vm2, %v4646_v3, 0.0  ;;  %v6364_v61 = vadd.f32 %v6300_v10, %v5316_v59  ;;  %v15469_v8 = vld [vmem:[#allocation65_spill] sm:$0xff] }
 0x564   : > { %v5532_v22 = vadd.f32 %v15460_v50, %v5531_v53  ;;  %vm5533_vm15 = vweird.f32 %v15459_v39  ;;  %v13075_v29 = vsel %vm13017_vm9, %v6170_v40, %v6166_v19  ;;  %v6024_v30 = vmul.f32 %v15470_v47, %v15469_v8 }
 0x565   : > { %v4922_v63 = vsel %vm4921_vm14, %v7950_v35, %v4918_v49  ;;  %v4746_v62 = vadd.f32 %v4745_v52, %v4744_v15  ;;  %vm5535_vm5 = vmor %vm5533_vm15, %vm5534_vm13  ;;  %vm5538_vm0 = vcmp.eq.f32.partialorder %v5537_v17, 8.507059e+37  ;;  %v5540_v10 = vor.u32 1.1754944e-38, %v5539_v36 }
 0x566   : > { %v4965_v23 = vmul.f32 %v4922_v63, %v12907_v43  ;;  %v4981_v9 = vmul.f32 %v4922_v63, %v12910_v5  ;;  %v5013_v39 = vmul.f32 %v4922_v63, %v12918_v16  ;;  %v6428_v40 = vmul.f32 %v6364_v61, %v15471_v28 }
 0x567   : > { %v4774_v59 = vmul.f32 0.33333334, %v4746_v62  ;;  %v5536_v49 = vsel %vm5535_vm5, %v15460_v50, %v5532_v22  ;;  %v13087_v35 = vadd.f32 1.0, %v12997_v21  ;;  %v13090_v7 = vadd.f32 1.0, %v13004_v25  ;;  %v15474_v22 = vld [vmem:[#allocation49_spill] sm:$0xff] }
 0x568   : > { %7951 = vrcp.f32 %v12978_v60  ;;  %v5541_v43 = vsel %vm5538_vm0, %v5540_v10, %v5536_v49  ;;  %v6292_v5 = vsub.f32 1.0, %v13075_v29  ;;  %v7387_v3 = vmul.f32 -1.442695, %v5013_v39  ;;  %v15477_v10 = vld [vmem:[#allocation27_spill] sm:$0xff]  ;;  %v15478_v49 = vld [vmem:[#allocation13_spill] sm:$0xff] }
 0x569   : > { %15472 = vst [vmem:[#allocation10_spill] sm:$0xff] %v13087_v35  ;;  %v6496_v36 = vmul.f32 %v12582_v44, %v6428_v40  ;;  %v6250_v16 = vsub.f32 1.0, %v5541_v43  ;;  %v4997_v26 = vmul.f32 %v4922_v63, %v12913_v33  ;;  %v13096_v19 = vadd.f32 1e-09, %v4774_v59  ;;  %v15475_v63 = vld [vmem:[#allocation50_spill] sm:$0xff] }
 0x56a   : > { %15473 = vst [vmem:[#allocation60_spill] sm:$0xff] %v13090_v7  ;;  %v4492_v21 = vsel %vm1344_vm2, %v13044_v31, 0.0  ;;  %v6025_v50 = vsub.f32 1.0, %v6024_v30  ;;  %v7339_v12 = vmul.f32 -1.442695, %v4965_v23  ;;  %vm6029_vm1 = vweird.f32 %v15470_v47 }
 0x56b   : > { %v7355_v25 = vmul.f32 -1.442695, %v4981_v9  ;;  %v6564_v53 = vsel %vm1344_vm2, %v6496_v36, 0.0  ;;  %v6315_v15 = vmul.f32 %v12292_v14, %v6250_v16  ;;  %v6032_v44 = vand.u32 2147483647, %v15469_v8 }
 0x56c   : > { %6565 = vadd.xlane.f32.xlu1 %v6564_v53  ;;  %v6026_v17 = vmul.f32 %v15470_v47, %v6025_v50  ;;  %v6034_v33 = vand.u32 2147483648, %v15469_v8  ;;  %v6357_v52 = vmul.f32 %v12292_v14, %v6292_v5  ;;  %7953 = vpow2.f32 %v7387_v3  ;;  %v13121_v3 = vld [vmem:[%s14745_s7] ss:$0 sm:$0xff] }
 0x56d   : > { %v6379_v61 = vadd.f32 %v6315_v15, %v5541_v43  ;;  %v5544_v62 = vmul.f32 %v15475_v63, %v15474_v22  ;;  %v7371_v23 = vmul.f32 -1.442695, %v4997_v26  ;;  %7955 = vrsqrt.f32 %v13096_v19  ;;  %v15479_v43 = vld [vmem:[#allocation83_spill] sm:$0xff] }
 0x56e   : > { %v13109_v30 = vpop.eup %7951  ;;  %v6027_v9 = vadd.f32 %v15470_v47, %v6026_v17  ;;  %vm6028_vm3 = vweird.f32 %v15469_v8  ;;  %7957 = vpow2.f32 %v7339_v12  ;;  %v6035_v59 = vor.u32 1.1754944e-38, %v6034_v33 }
 0x56f   : > { %15476 = vst [vmem:[#allocation54_spill] sm:$0xff] %v13109_v30  ;;  %v6443_v39 = vmul.f32 %v6379_v61, %v15477_v10  ;;  %vm6030_vm4 = vmor %vm6028_vm3, %vm6029_vm1  ;;  %v5545_v28 = vsub.f32 1.0, %v5544_v62  ;;  %7959 = vpow2.f32 %v7355_v25  ;;  %vm6033_vm6 = vcmp.eq.f32.partialorder %v6032_v44, 8.507059e+37  ;;  %v15480_v44 = vld [vmem:[#allocation90_spill] sm:$0xff] }
 0x570   : > { %v6031_v40 = vsel %vm6030_vm4, %v15470_v47, %v6027_v9  ;;  %v5799_v5 = vmul.f32 %v15479_v43, %v15478_v49  ;;  %vm5549_vm7 = vweird.f32 %v15475_v63  ;;  %7961 = vrcp.f32 %v13087_v35  ;;  %v15496_v35 = vld [vmem:[#allocation80_spill] sm:$0xff] }
 0x571   : > { %v6511_v8 = vmul.f32 %v13121_v3, %v6443_v39  ;;  %v6036_v36 = vsel %vm6033_vm6, %v6035_v59, %v6031_v40  ;;  %v5546_v16 = vmul.f32 %v15475_v63, %v5545_v28  ;;  %v5552_v47 = vand.u32 2147483647, %v15474_v22  ;;  %v4386_v28 = vpop.f32.mrf.mxu3 }
 0x572   : > { %v6283_v26 = vsub.f32 1.0, %v6036_v36  ;;  %v5554_v50 = vand.u32 2147483648, %v15474_v22  ;;  %v7954_v12 = vpop.eup %7953  ;;  %7963 = vrcp.f32 %v13090_v7  ;;  %vm5548_vm8 = vweird.f32 %v15474_v22 }
 0x573   : > { %v6609_v25 = vsel %vm1344_vm2, %v6511_v8, 0.0  ;;  %v5547_v53 = vadd.f32 %v15475_v63, %v5546_v16  ;;  %v7956_v15 = vpop.eup %7955  ;;  %v13133_v17 = vadd.f32 1.0, %v7954_v12  ;;  %v4493_v33 = vadd.f32 %v4492_v21, %v15480_v44  ;;  %vm13139_vm9 = vmor %vm5548_vm8, %vm5549_vm7  ;;  %v15486_v44 = vld [vmem:[#allocation44_spill] sm:$0xff] }
 0x574   : > { %6610 = vadd.xlane.f32.xlu0 %v6609_v25  ;;  %v6348_v61 = vmul.f32 %v12292_v14, %v6283_v26  ;;  %v5800_v9 = vsub.f32 1.0, %v5799_v5  ;;  %v7958_v10 = vpop.eup %7957  ;;  %v13144_v39 = vadd.f32 %v6357_v52, %v13075_v29  ;;  %7965 = vpow2.f32 %v7371_v23 }
 0x575   : > { %v4924_v22 = vmul.f32 %v7956_v15, %v13096_v19  ;;  %v5551_v21 = vsel %vm13139_vm9, %v15475_v63, %v5547_v53  ;;  %v7960_v59 = vpop.eup %7959  ;;  %7967 = vrcp.f32 %v13133_v17  ;;  %vm4929_vm10 = vweird.f32 %v13096_v19  ;;  %v15484_v63 = vld [vmem:[#allocation92_spill] sm:$0xff] }
 0x576   : > { %vm5553_vm11 = vcmp.eq.f32.partialorder %v5552_v47, 8.507059e+37  ;;  %v5555_v40 = vor.u32 1.1754944e-38, %v5554_v50  ;;  %v6184_v5 = vand.u32 2147483648, %v13133_v17  ;;  %v6412_v29 = vadd.f32 %v6348_v61, %v6036_v36  ;;  %v13156_v23 = vpop.eup %7961  ;;  %v4293_v61 = vpop.f32.mrf.mxu1 }
 0x577   : > { %v4925_v8 = vmul.f32 %v7956_v15, %v4924_v22  ;;  %v13154_v52 = vadd.f32 %v12897_v6, %v4386_v28  ;;  %15483 = vst [vmem:[#allocation16_spill] sm:$0xff] %v13156_v23  ;;  %v13158_v16 = vadd.f32 1.0, %v7958_v10  ;;  %v4495_v26 = vadd.f32 %v15484_v63, %v4493_v33 }
 0x578   : > { %v5556_v12 = vsel %vm5553_vm11, %v5555_v40, %v5551_v21  ;;  %v5801_v25 = vmul.f32 %v15479_v43, %v5800_v9  ;;  %v13162_v53 = vpop.eup %7963  ;;  %v13164_v47 = vadd.f32 1.0, %v7960_v59  ;;  %v6476_v62 = vmul.f32 %v6412_v29, %v15486_v44 }
 0x579   : > { %15485 = vst [vmem:[#allocation47_spill] sm:$0xff] %v13162_v53  ;;  %v4926_v50 = vmul.f32 0.5, %v4925_v8  ;;  %v4496_v36 = vsel %vm1344_vm2, %v13154_v52, 0.0  ;;  %v6182_v22 = vand.u32 2147483647, %v13133_v17  ;;  %vm4930_vm12 = vweird.f32 %v7956_v15 }
 0x57a   : > { %v4497_v10 = vadd.f32 %v4496_v36, %v4495_v26  ;;  %v6251_v28 = vsub.f32 1.0, %v5556_v12  ;;  %vm5803_vm13 = vweird.f32 %v15478_v49  ;;  %v7966_v33 = vpop.eup %7965  ;;  %vm6178_vm14 = vweird.f32 %v13133_v17  ;;  %vm4931_vm0 = vmor %vm4929_vm10, %vm4930_vm12 }
 0x57b   : > { %v6185_v9 = vor.u32 1.1754944e-38, %v6184_v5  ;;  %v4927_v21 = vsub.f32 1.5, %v4926_v50  ;;  %v6544_v59 = vmul.f32 %v13121_v3, %v6476_v62  ;;  %v7968_v40 = vpop.eup %7967  ;;  %v13174_v29 = vadd.f32 %v12897_v6, %v4293_v61  ;;  %v15490_v50 = vld [vmem:[#allocation75_spill] sm:$0xff] }
 0x57c   : > { %v4519_v8 = vmul.f32 0.25, %v4497_v10  ;;  %v6316_v63 = vmul.f32 %v12292_v14, %v6251_v28  ;;  %v5802_v44 = vadd.f32 %v15479_v43, %v5801_v25  ;;  %v6174_v26 = vmul.f32 %v7968_v40, %v13133_v17  ;;  %v15491_v61 = vld [vmem:[#allocation71_spill] sm:$0xff]  ;;  %v15495_v17 = vld [vmem:[#allocation68_spill] sm:$0xff] }
 0x57d   : > { %15487 = vst [vmem:[#allocation74_spill] sm:$0xff] %v13174_v29  ;;  %v4928_v36 = vmul.f32 %v7956_v15, %v4927_v21  ;;  %v6708_v53 = vsel %vm1344_vm2, %v6544_v59, 0.0  ;;  %vm5804_vm15 = vweird.f32 %v15479_v43  ;;  %vm13181_vm5 = vcmp.eq.f32.partialorder %v6182_v22, 8.507059e+37 }
 0x57e   : > { %6709 = vadd.xlane.f32.xlu2 %v6708_v53  ;;  %v13189_v62 = vsub.f32 %v15490_v50, %v4519_v8  ;;  %v13192_v25 = vsub.f32 %v13044_v31, %v4519_v8  ;;  %v13195_v10 = vsub.f32 %v15491_v61, %v4519_v8  ;;  %v13198_v28 = vsub.f32 %v13154_v52, %v4519_v8  ;;  %vm13219_vm3 = vmor %vm5803_vm13, %vm5804_vm15 }
 0x57f   : > { %v6175_v22 = vsub.f32 1.0, %v6174_v26  ;;  %vm6179_vm1 = vweird.f32 %v7968_v40  ;;  %v4932_v21 = vsel %vm4931_vm0, %v7956_v15, %v4928_v36  ;;  %v6380_v59 = vadd.f32 %v6316_v63, %v5556_v12 }
 0x580   : > { %v4966_v19 = vmul.f32 %v4932_v21, %v13023_v58  ;;  %v4982_v53 = vmul.f32 %v4932_v21, %v13026_v38  ;;  %v4998_v50 = vmul.f32 %v4932_v21, %v13030_v18  ;;  %v5014_v7 = vmul.f32 %v4932_v21, %v13033_v42  ;;  %vm6180_vm4 = vmor %vm6178_vm14, %vm6179_vm1 }
 0x581   : > { %v6176_v31 = vmul.f32 %v7968_v40, %v6175_v22  ;;  %v4599_v61 = vmul.f32 %v13189_v62, %v13189_v62  ;;  %v4615_v8 = vmul.f32 %v13192_v25, %v13192_v25  ;;  %v4631_v26 = vmul.f32 %v13195_v10, %v13195_v10 }
 0x582   : > { %v7340_v15 = vmul.f32 -1.442695, %v4966_v19  ;;  %v7356_v12 = vmul.f32 -1.442695, %v4982_v53  ;;  %v4647_v58 = vmul.f32 %v13198_v28, %v13198_v28  ;;  %v5807_v38 = vand.u32 2147483647, %v15478_v49 }
 0x583   : > { %v6177_v18 = vadd.f32 %v7968_v40, %v6176_v31  ;;  %v7388_v63 = vmul.f32 -1.442695, %v5014_v7  ;;  %v4747_v42 = vsel %vm1344_vm2, %v4599_v61, 0.0  ;;  %v4748_v36 = vsel %vm1344_vm2, %v4615_v8, 0.0  ;;  %v15494_v53 = vld [vmem:[#allocation20_spill] sm:$0xff] }
 0x584   : > { %7969 = vpow2.f32 %v7340_v15  ;;  %v7372_v21 = vmul.f32 -1.442695, %v4998_v50  ;;  %v4749_v31 = vadd.f32 %v4748_v36, %v4747_v42  ;;  %v5806_v7 = vsel %vm13219_vm3, %v15479_v43, %v5802_v44 }
 0x585   : > { %v6181_v61 = vsel %vm6180_vm4, %v7968_v40, %v6177_v18  ;;  %v4750_v19 = vsel %vm1344_vm2, %v4631_v26, 0.0  ;;  %v6444_v8 = vmul.f32 %v6380_v59, %v15494_v53  ;;  %v5809_v30 = vand.u32 2147483648, %v15478_v49 }
 0x586   : > { %7971 = vpow2.f32 %v7356_v12  ;;  %v4751_v60 = vadd.f32 %v4750_v19, %v4749_v31  ;;  %v4752_v23 = vsel %vm1344_vm2, %v4647_v58, 0.0  ;;  %v5319_v15 = vmul.f32 %v15496_v35, %v15495_v17 }
 0x587   : > { %v6186_v50 = vsel %vm13181_vm5, %v6185_v9, %v6181_v61  ;;  %7973 = vpow2.f32 %v7388_v63  ;;  %v6512_v43 = vmul.f32 %v13121_v3, %v6444_v8  ;;  %v5810_v40 = vor.u32 1.1754944e-38, %v5809_v30 }
 0x588   : > { %7975 = vrcp.f32 %v13158_v16  ;;  %v4753_v44 = vadd.f32 %v4752_v23, %v4751_v60  ;;  %vm5808_vm6 = vcmp.eq.f32.partialorder %v5807_v38, 8.507059e+37  ;;  %v5320_v59 = vsub.f32 1.0, %v5319_v15  ;;  %v15498_v23 = vld [vmem:[#allocation86_spill] sm:$0xff] }
 0x589   : > { %v13239_v49 = vadd.f32 1.0, %v7966_v33  ;;  %7977 = vpow2.f32 %v7372_v21  ;;  %v6612_v26 = vsel %vm1344_vm2, %v6512_v43, 0.0  ;;  %v5811_v12 = vsel %vm5808_vm6, %v5810_v40, %v5806_v7  ;;  %v15499_v33 = vld [vmem:[#allocation98_spill] sm:$0xff] }
 0x58a   : > { %v7970_v58 = vpop.eup %7969  ;;  %v6293_v18 = vsub.f32 1.0, %v6186_v50  ;;  %v4775_v42 = vmul.f32 0.33333334, %v4753_v44  ;;  %6613 = vadd.xlane.f32.xlu1 %v6612_v26  ;;  %v6268_v9 = vsub.f32 1.0, %v5811_v12  ;;  %v5321_v5 = vmul.f32 %v15496_v35, %v5320_v59  ;;  %v15500_v15 = vld [vmem:[#allocation94_spill] sm:$0xff] }
 0x58b   : > { %15497 = vst [vmem:[#allocation26_spill] sm:$0xff] %v13239_v49  ;;  %v4499_v30 = vsel %vm1344_vm2, %v13174_v29, 0.0  ;;  %vm5324_vm7 = vweird.f32 %v15496_v35  ;;  %v5329_v60 = vand.u32 2147483648, %v15495_v17  ;;  %v5814_v38 = vmul.f32 %v15499_v33, %v15498_v23 }
 0x58c   : > { %v7972_v63 = vpop.eup %7971  ;;  %7979 = vrcp.f32 %v13164_v47  ;;  %v6333_v36 = vmul.f32 %v12292_v14, %v6268_v9  ;;  %v5322_v22 = vadd.f32 %v15496_v35, %v5321_v5  ;;  %v5327_v21 = vand.u32 2147483647, %v15495_v17 }
 0x58d   : > { %v7974_v31 = vpop.eup %7973  ;;  %v13255_v7 = vmul.f32 %v13144_v39, %v12659_v20  ;;  %7981 = vrcp.f32 %v13239_v49  ;;  %v13258_v61 = vadd.f32 1e-09, %v4775_v42  ;;  %vm5323_vm8 = vweird.f32 %v15495_v17 }
 0x58e   : > { %v13261_v19 = vpop.eup %7975  ;;  %v6358_v53 = vmul.f32 %v12292_v14, %v6293_v18  ;;  %v13264_v8 = vadd.f32 1.0, %v7974_v31  ;;  %v4500_v43 = vadd.f32 %v4499_v30, %v15500_v15  ;;  %v6397_v40 = vadd.f32 %v6333_v36, %v5811_v12  ;;  %vm5325_vm9 = vmor %vm5323_vm8, %vm5324_vm7  ;;  %v15503_v12 = vld [vmem:[#allocation25_spill] sm:$0xff]  ;;  %v15505_v31 = vld [vmem:[#allocation76_spill] sm:$0xff] }
 0x58f   : > { %v7978_v20 = vpop.eup %7977  ;;  %v13269_v39 = vadd.f32 1.0, %v7970_v58  ;;  %v5326_v44 = vsel %vm5325_vm9, %v15496_v35, %v5322_v22  ;;  %v5330_v59 = vor.u32 1.1754944e-38, %v5329_v60  ;;  %v5815_v26 = vsub.f32 1.0, %v5814_v38 }
 0x590   : > { %v13272_v17 = vadd.f32 1.0, %v7972_v63  ;;  %7983 = vrcp.f32 %v13264_v8  ;;  %v6199_v18 = vand.u32 2147483648, %v13264_v8  ;;  %vm5328_vm10 = vcmp.eq.f32.partialorder %v5327_v21, 8.507059e+37 }
 0x591   : > { %15501 = vst [vmem:[#allocation59_spill] sm:$0xff] %v13269_v39  ;;  %7985 = vrsqrt.f32 %v13258_v61  ;;  %v6461_v42 = vmul.f32 %v6397_v40, %v15503_v12  ;;  %v5331_v9 = vsel %vm5328_vm10, %v5330_v59, %v5326_v44  ;;  %v5816_v5 = vmul.f32 %v15499_v33, %v5815_v26  ;;  %v4389_v59 = vpop.f32.mrf.mxu3 }
 0x592   : > { %15502 = vst [vmem:[#allocation89_spill] sm:$0xff] %v13272_v17  ;;  %v13279_v58 = vpop.eup %7979  ;;  %v13281_v30 = vadd.f32 %v6358_v53, %v6186_v50  ;;  %v13283_v35 = vadd.f32 1.0, %v7978_v20  ;;  %v6236_v60 = vsub.f32 1.0, %v5331_v9  ;;  %vm5819_vm11 = vweird.f32 %v15499_v33  ;;  %v15506_v53 = vld [vmem:[#allocation85_spill] sm:$0xff] }
 0x593   : > { %v13286_v38 = vpop.eup %7981  ;;  %7987 = vrcp.f32 %v13269_v39  ;;  %v6529_v63 = vmul.f32 %v13121_v3, %v6461_v42  ;;  %v5817_v36 = vadd.f32 %v15499_v33, %v5816_v5  ;;  %v5824_v22 = vand.u32 2147483648, %v15498_v23  ;;  %v15510_v39 = vld [vmem:[#allocation95_spill] sm:$0xff] }
 0x594   : > { %15504 = vst [vmem:[#allocation40_spill] sm:$0xff] %v13286_v38  ;;  %v6301_v21 = vmul.f32 %v12292_v14, %v6236_v60  ;;  %vm5818_vm12 = vweird.f32 %v15498_v23  ;;  %v5822_v50 = vand.u32 2147483647, %v15498_v23  ;;  %v6039_v15 = vmul.f32 %v15506_v53, %v15505_v31 }
 0x595   : > { %7989 = vrcp.f32 %v13272_v17  ;;  %v6197_v40 = vand.u32 2147483647, %v13264_v8  ;;  %v13299_v20 = vor.u32 1.1754944e-38, %v6199_v18  ;;  %v6663_v44 = vsel %vm1344_vm2, %v6529_v63, 0.0  ;;  %vm13304_vm13 = vmor %vm5818_vm12, %vm5819_vm11 }
 0x596   : > { %v13308_v12 = vpop.eup %7983  ;;  %vm6193_vm14 = vweird.f32 %v13264_v8  ;;  %6664 = vadd.xlane.f32.xlu0 %v6663_v44  ;;  %v6365_v23 = vadd.f32 %v6301_v21, %v5331_v9  ;;  %v13312_v42 = vadd.f32 %v12897_v6, %v4389_v59  ;;  %v5821_v18 = vsel %vm13304_vm13, %v15499_v33, %v5817_v36  ;;  %v15511_v6 = vld [vmem:[#allocation23_spill] sm:$0xff] }
 0x597   : > { %v6040_v5 = vsub.f32 1.0, %v6039_v15  ;;  %v7986_v60 = vpop.eup %7985  ;;  %v6189_v63 = vmul.f32 %v13308_v12, %v13264_v8  ;;  %v4502_v38 = vadd.f32 %v15510_v39, %v4500_v43  ;;  %v5825_v49 = vor.u32 1.1754944e-38, %v5824_v22 }
 0x598   : > { %15509 = vst [vmem:[#allocation62_spill] sm:$0xff] %v13312_v42  ;;  %vm6043_vm15 = vweird.f32 %v15505_v31  ;;  %vm6044_vm5 = vweird.f32 %v15506_v53  ;;  %v4934_v9 = vmul.f32 %v7986_v60, %v13258_v61  ;;  %vm4939_vm0 = vweird.f32 %v13258_v61 }
 0x599   : > { %v6429_v21 = vmul.f32 %v6365_v23, %v15511_v6  ;;  %v4503_v33 = vsel %vm1344_vm2, %v13312_v42, 0.0  ;;  %vm5823_vm1 = vcmp.eq.f32.partialorder %v5822_v50, 8.507059e+37  ;;  %v13327_v36 = vpop.eup %7987  ;;  %v6190_v15 = vsub.f32 1.0, %v6189_v63  ;;  %vm13383_vm9 = vmor %vm6043_vm15, %vm6044_vm5 }
 0x59a   : > { %15512 = vst [vmem:[#allocation64_spill] sm:$0xff] %v13327_v36  ;;  %v4504_v44 = vadd.f32 %v4503_v33, %v4502_v38  ;;  %v5826_v43 = vsel %vm5823_vm1, %v5825_v49, %v5821_v18  ;;  %v6041_v39 = vmul.f32 %v15506_v53, %v6040_v5  ;;  %vm6194_vm3 = vweird.f32 %v13308_v12 }
 0x59b   : > { %vm13331_vm4 = vcmp.eq.f32.partialorder %v6197_v40, 8.507059e+37  ;;  %v4935_v59 = vmul.f32 %v7986_v60, %v4934_v9  ;;  %v6497_v26 = vmul.f32 %v13121_v3, %v6429_v21  ;;  %v6269_v23 = vsub.f32 1.0, %v5826_v43  ;;  %v13336_v6 = vpop.eup %7989  ;;  %v15516_v21 = vld [vmem:[#allocation30_spill] sm:$0xff]  ;;  %vm13361_vm7 = vmor %vm6193_vm14, %vm6194_vm3 }
 0x59c   : > { %15515 = vst [vmem:[#allocation65_spill] sm:$0xff] %v13336_v6  ;;  %v6191_v50 = vmul.f32 %v13308_v12, %v6190_v15  ;;  %v4520_v36 = vmul.f32 0.25, %v4504_v44  ;;  %v6047_v38 = vand.u32 2147483647, %v15505_v31  ;;  %v6049_v49 = vand.u32 2147483648, %v15505_v31  ;;  %v15517_v44 = vld [vmem:[#allocation17_spill] sm:$0xff] }
 0x59d   : > { %v4936_v18 = vmul.f32 0.5, %v4935_v59  ;;  %v6567_v5 = vsel %vm1344_vm2, %v6497_v26, 0.0  ;;  %v6334_v40 = vmul.f32 %v12292_v14, %v6269_v23  ;;  %v6042_v63 = vadd.f32 %v15506_v53, %v6041_v39 }
 0x59e   : > { %v6192_v9 = vadd.f32 %v13308_v12, %v6191_v50  ;;  %6568 = vadd.xlane.f32.xlu2 %v6567_v5  ;;  %v13346_v33 = vsub.f32 %v15516_v21, %v4520_v36  ;;  %v13349_v15 = vsub.f32 %v13174_v29, %v4520_v36  ;;  %v13352_v6 = vsub.f32 %v15517_v44, %v4520_v36  ;;  %v15522_v5 = vld [vmem:[#allocation41_spill] sm:$0xff] }
 0x59f   : > { %v4937_v17 = vsub.f32 1.5, %v4936_v18  ;;  %vm4940_vm6 = vweird.f32 %v7986_v60  ;;  %v13355_v59 = vsub.f32 %v13312_v42, %v4520_v36  ;;  %v6398_v26 = vadd.f32 %v6334_v40, %v5826_v43 }
 0x5a0   : > { %v4600_v23 = vmul.f32 %v13346_v33, %v13346_v33  ;;  %v4616_v50 = vmul.f32 %v13349_v15, %v13349_v15  ;;  %v4632_v18 = vmul.f32 %v13352_v6, %v13352_v6  ;;  %vm13371_vm8 = vcmp.eq.f32.partialorder %v6047_v38, 8.507059e+37  ;;  %vm4941_vm10 = vmor %vm4939_vm0, %vm4940_vm6 }
 0x5a1   : > { %v6196_v8 = vsel %vm13361_vm7, %v13308_v12, %v6192_v9  ;;  %v4938_v43 = vmul.f32 %v7986_v60, %v4937_v17  ;;  %v6462_v40 = vmul.f32 %v6398_v26, %v15522_v5  ;;  %v6050_v21 = vor.u32 1.1754944e-38, %v6049_v49  ;;  %v15525_v5 = vld [vmem:[#allocation67_spill] sm:$0xff]  ;;  %v15526_v49 = vld [vmem:[#allocation82_spill] sm:$0xff] }
 0x5a2   : > { %v4648_v38 = vmul.f32 %v13355_v59, %v13355_v59  ;;  %v4754_v12 = vsel %vm1344_vm2, %v4600_v23, 0.0  ;;  %v4755_v17 = vsel %vm1344_vm2, %v4616_v50, 0.0  ;;  %v6046_v9 = vsel %vm13383_vm9, %v15506_v53, %v6042_v63 }
 0x5a3   : > { %v4942_v31 = vsel %vm4941_vm10, %v7986_v60, %v4938_v43  ;;  %v4756_v26 = vadd.f32 %v4755_v17, %v4754_v12  ;;  %v6530_v39 = vmul.f32 %v13121_v3, %v6462_v40  ;;  %v5559_v29 = vmul.f32 %v15526_v49, %v15525_v5  ;;  %v15528_v17 = vld [vmem:[#allocation100_spill] sm:$0xff] }
 0x5a4   : > { %v13402_v61 = vsel %vm13331_vm4, %v13299_v20, %v6196_v8  ;;  %v4967_v23 = vmul.f32 %v4942_v31, %v13189_v62  ;;  %v4983_v50 = vmul.f32 %v4942_v31, %v13192_v25  ;;  %v4757_v42 = vsel %vm1344_vm2, %v4632_v18, 0.0 }
 0x5a5   : > { %v5015_v53 = vmul.f32 %v4942_v31, %v13198_v28  ;;  %v4758_v60 = vadd.f32 %v4757_v42, %v4756_v26  ;;  %v6666_v63 = vsel %vm1344_vm2, %v6530_v39, 0.0  ;;  %v6051_v44 = vsel %vm13371_vm8, %v6050_v21, %v6046_v9 }
 0x5a6   : > { %7991 = vrcp.f32 %v13283_v35  ;;  %v7341_v43 = vmul.f32 -1.442695, %v4967_v23  ;;  %v7357_v22 = vmul.f32 -1.442695, %v4983_v50  ;;  %v4759_v20 = vsel %vm1344_vm2, %v4648_v38, 0.0  ;;  %6667 = vadd.xlane.f32.xlu1 %v6666_v63 }
 0x5a7   : > { %v7389_v62 = vmul.f32 -1.442695, %v5015_v53  ;;  %v4760_v8 = vadd.f32 %v4759_v20, %v4758_v60  ;;  %v6284_v25 = vsub.f32 1.0, %v6051_v44  ;;  %v5560_v40 = vsub.f32 1.0, %v5559_v29  ;;  %v15527_v29 = vld [vmem:[#allocation87_spill] sm:$0xff] }
 0x5a8   : > { %v6294_v18 = vsub.f32 1.0, %v13402_v61  ;;  %v4999_v28 = vmul.f32 %v4942_v31, %v13195_v10  ;;  %7993 = vpow2.f32 %v7341_v43  ;;  %vm5564_vm11 = vweird.f32 %v15526_v49 }
 0x5a9   : > { %7995 = vpow2.f32 %v7357_v22  ;;  %v4776_v42 = vmul.f32 0.33333334, %v4760_v8  ;;  %v6349_v21 = vmul.f32 %v12292_v14, %v6284_v25  ;;  %v5561_v36 = vmul.f32 %v15526_v49, %v5560_v40 }
 0x5aa   : > { %vm5563_vm12 = vweird.f32 %v15525_v5  ;;  %v5567_v38 = vand.u32 2147483647, %v15525_v5  ;;  %v5569_v12 = vand.u32 2147483648, %v15525_v5  ;;  %v6054_v9 = vmul.f32 %v15528_v17, %v15527_v29  ;;  %v15529_v5 = vld [vmem:[#allocation24_spill] sm:$0xff] }
 0x5ab   : > { %7997 = vpow2.f32 %v7389_v62  ;;  %v13423_v10 = vadd.f32 1e-09, %v4776_v42  ;;  %v6413_v31 = vadd.f32 %v6349_v21, %v6051_v44  ;;  %v5562_v26 = vadd.f32 %v15526_v49, %v5561_v36  ;;  %vm5565_vm13 = vmor %vm5563_vm12, %vm5564_vm11  ;;  %v15531_v21 = vld [vmem:[#allocation81_spill] sm:$0xff]  ;;  %v15532_v36 = vld [vmem:[#allocation91_spill] sm:$0xff] }
 0x5ac   : > { %v13426_v39 = vpop.eup %7991  ;;  %v6359_v23 = vmul.f32 %v12292_v14, %v6294_v18  ;;  %v7373_v50 = vmul.f32 -1.442695, %v4999_v28  ;;  %v5570_v53 = vor.u32 1.1754944e-38, %v5569_v12  ;;  %v6055_v60 = vsub.f32 1.0, %v6054_v9 }
 0x5ad   : > { %7999 = vrsqrt.f32 %v13423_v10  ;;  %v6477_v63 = vmul.f32 %v6413_v31, %v15529_v5  ;;  %v5566_v43 = vsel %vm5565_vm13, %v15526_v49, %v5562_v26  ;;  %vm5568_vm14 = vcmp.eq.f32.partialorder %v5567_v38, 8.507059e+37 }
 0x5ae   : > { %v7994_v44 = vpop.eup %7993  ;;  %v5571_v22 = vsel %vm5568_vm14, %v5570_v53, %v5566_v43  ;;  %v6056_v20 = vmul.f32 %v15528_v17, %v6055_v60  ;;  %vm6058_vm15 = vweird.f32 %v15527_v29  ;;  %vm6059_vm5 = vweird.f32 %v15528_v17  ;;  %v15537_v53 = vld [vmem:[#allocation79_spill] sm:$0xff] }
 0x5af   : > { %v7996_v62 = vpop.eup %7995  ;;  %v13437_v8 = vadd.f32 1.0, %v7994_v44  ;;  %v6545_v25 = vmul.f32 %v13121_v3, %v6477_v63  ;;  %v6252_v40 = vsub.f32 1.0, %v5571_v22  ;;  %v6064_v18 = vand.u32 2147483648, %v15527_v29  ;;  %vm13457_vm0 = vmor %vm6058_vm15, %vm6059_vm5 }
 0x5b0   : > { %v13441_v28 = vadd.f32 1.0, %v7996_v62  ;;  %v6057_v49 = vadd.f32 %v15528_v17, %v6056_v20  ;;  %v6062_v42 = vand.u32 2147483647, %v15527_v29  ;;  %v5574_v38 = vmul.f32 %v15532_v36, %v15531_v21 }
 0x5b1   : > { %v7998_v12 = vpop.eup %7997  ;;  %v13449_v9 = vmul.f32 %v13281_v30, %v12873_v46  ;;  %8001 = vpow2.f32 %v7373_v50  ;;  %v6711_v31 = vsel %vm1344_vm2, %v6545_v25, 0.0  ;;  %v6317_v26 = vmul.f32 %v12292_v14, %v6252_v40 }
 0x5b2   : > { %15530 = vst [vmem:[#allocation78_spill] sm:$0xff] %v13441_v28  ;;  %v13462_v60 = vadd.f32 %v6359_v23, %v13402_v61  ;;  %v13464_v5 = vadd.f32 1.0, %v7998_v12  ;;  %8003 = vrcp.f32 %v13437_v8  ;;  %6712 = vadd.xlane.f32.xlu0 %v6711_v31  ;;  %v6061_v46 = vsel %vm13457_vm0, %v15528_v17, %v6057_v49  ;;  %v15536_v17 = vld [vmem:[#allocation22_spill] sm:$0xff] }
 0x5b3   : > { %15533 = vst [vmem:[#allocation21_spill] sm:$0xff] %v13449_v9  ;;  %v8000_v30 = vpop.eup %7999  ;;  %8005 = vrcp.f32 %v13441_v28  ;;  %v6381_v29 = vadd.f32 %v6317_v26, %v5571_v22  ;;  %v6065_v50 = vor.u32 1.1754944e-38, %v6064_v18  ;;  %v5575_v63 = vsub.f32 1.0, %v5574_v38 }
 0x5b4   : > { %8007 = vrcp.f32 %v13464_v5  ;;  %v6214_v61 = vand.u32 2147483648, %v13464_v5  ;;  %vm6063_vm1 = vcmp.eq.f32.partialorder %v6062_v42, 8.507059e+37  ;;  %vm5578_vm3 = vweird.f32 %v15531_v21 }
 0x5b5   : > { %v6212_v23 = vand.u32 2147483647, %v13464_v5  ;;  %v4944_v43 = vmul.f32 %v8000_v30, %v13423_v10  ;;  %vm4949_vm4 = vweird.f32 %v13423_v10  ;;  %v6445_v44 = vmul.f32 %v6381_v29, %v15536_v17 }
 0x5b6   : > { %v6066_v20 = vsel %vm6063_vm1, %v6065_v50, %v6061_v46  ;;  %v13478_v62 = vor.u32 1.1754944e-38, %v6214_v61  ;;  %vm4950_vm6 = vweird.f32 %v8000_v30  ;;  %v5576_v25 = vmul.f32 %v15532_v36, %v5575_v63  ;;  %v15538_v46 = vld [vmem:[#allocation88_spill] sm:$0xff] }
 0x5b7   : > { %v6285_v22 = vsub.f32 1.0, %v6066_v20  ;;  %v13481_v40 = vpop.eup %8001  ;;  %v4945_v18 = vmul.f32 %v8000_v30, %v4944_v43  ;;  %v6513_v49 = vmul.f32 %v13121_v3, %v6445_v44  ;;  %vm5579_vm7 = vweird.f32 %v15532_v36  ;;  %vm4951_vm15 = vmor %vm4949_vm4, %vm4950_vm6 }
 0x5b8   : > { %v5582_v42 = vand.u32 2147483647, %v15531_v21  ;;  %v13486_v38 = vpop.eup %8003  ;;  %v5577_v31 = vadd.f32 %v15532_v36, %v5576_v25  ;;  %v5584_v26 = vand.u32 2147483648, %v15531_v21  ;;  %v5334_v29 = vmul.f32 %v15538_v46, %v15537_v53  ;;  %vm13499_vm9 = vmor %vm5578_vm3, %vm5579_vm7 }
 0x5b9   : > { %v6350_v12 = vmul.f32 %v12292_v14, %v6285_v22  ;;  %v13493_v50 = vpop.eup %8005  ;;  %vm6208_vm8 = vweird.f32 %v13464_v5  ;;  %v4946_v63 = vmul.f32 0.5, %v4945_v18  ;;  %v6615_v61 = vsel %vm1344_vm2, %v6513_v49, 0.0 }
 0x5ba   : > { %15539 = vst [vmem:[#allocation49_spill] sm:$0xff] %v13493_v50  ;;  %vm5583_vm10 = vcmp.eq.f32.partialorder %v5582_v42, 8.507059e+37  ;;  %vm5338_vm11 = vweird.f32 %v15537_v53  ;;  %v8008_v17 = vpop.eup %8007  ;;  %6616 = vadd.xlane.f32.xlu2 %v6615_v61  ;;  %v5581_v22 = vsel %vm13499_vm9, %v15532_v36, %v5577_v31  ;;  %v5585_v25 = vor.u32 1.1754944e-38, %v5584_v26  ;;  %v15544_v42 = vld [vmem:[#allocation43_spill] sm:$0xff] }
 0x5bb   : > { %v6414_v44 = vadd.f32 %v6350_v12, %v6066_v20  ;;  %v5335_v18 = vsub.f32 1.0, %v5334_v29  ;;  %v6204_v49 = vmul.f32 %v8008_v17, %v13464_v5  ;;  %vm6209_vm12 = vweird.f32 %v8008_v17 }
 0x5bc   : > { %vm13508_vm13 = vcmp.eq.f32.partialorder %v6212_v23, 8.507059e+37  ;;  %v4947_v50 = vsub.f32 1.5, %v4946_v63  ;;  %vm5339_vm14 = vweird.f32 %v15538_v46  ;;  %v5586_v61 = vsel %vm5583_vm10, %v5585_v25, %v5581_v22  ;;  %v15548_v22 = vld [vmem:[#allocation102_spill] sm:$0xff]  ;;  %vm6210_vm1 = vmor %vm6208_vm8, %vm6209_vm12 }
 0x5bd   : > { %v6478_v28 = vmul.f32 %v6414_v44, %v15544_v42  ;;  %v5336_v20 = vmul.f32 %v15538_v46, %v5335_v18  ;;  %v5342_v12 = vand.u32 2147483647, %v15537_v53  ;;  %v6205_v36 = vsub.f32 1.0, %v6204_v49  ;;  %v15547_v44 = vld [vmem:[#allocation99_spill] sm:$0xff]  ;;  %vm5340_vm0 = vmor %vm5338_vm11, %vm5339_vm14 }
 0x5be   : > { %v4948_v31 = vmul.f32 %v8000_v30, %v4947_v50  ;;  %v6253_v26 = vsub.f32 1.0, %v5586_v61  ;;  %v5344_v29 = vand.u32 2147483648, %v15537_v53  ;;  %v5589_v25 = vmul.f32 %v15548_v22, %v15547_v44 }
 0x5bf   : > { %v6546_v23 = vmul.f32 %v13121_v3, %v6478_v28  ;;  %v5337_v63 = vadd.f32 %v15538_v46, %v5336_v20  ;;  %vm13522_vm5 = vcmp.eq.f32.partialorder %v5342_v12, 8.507059e+37  ;;  %v6206_v18 = vmul.f32 %v8008_v17, %v6205_v36 }
 0x5c0   : > { %v4952_v50 = vsel %vm4951_vm15, %v8000_v30, %v4948_v31  ;;  %v6318_v49 = vmul.f32 %v12292_v14, %v6253_v26  ;;  %v5345_v42 = vor.u32 1.1754944e-38, %v5344_v29  ;;  %v15549_v29 = vld [vmem:[#allocation52_spill] sm:$0xff]  ;;  %vm5594_vm3 = vweird.f32 %v15548_v22 }
 0x5c1   : > { %v4968_v9 = vmul.f32 %v4952_v50, %v13346_v33  ;;  %v4984_v10 = vmul.f32 %v4952_v50, %v13349_v15  ;;  %v5000_v28 = vmul.f32 %v4952_v50, %v13352_v6  ;;  %v5016_v20 = vmul.f32 %v4952_v50, %v13355_v59 }
 0x5c2   : > { %v6207_v12 = vadd.f32 %v8008_v17, %v6206_v18  ;;  %v6714_v36 = vsel %vm1344_vm2, %v6546_v23, 0.0  ;;  %v6382_v30 = vadd.f32 %v6318_v49, %v5586_v61  ;;  %v5341_v31 = vsel %vm5340_vm0, %v15538_v46, %v5337_v63 }
 0x5c3   : > { %v7342_v33 = vmul.f32 -1.442695, %v4968_v9  ;;  %v7358_v15 = vmul.f32 -1.442695, %v4984_v10  ;;  %v7374_v6 = vmul.f32 -1.442695, %v5000_v28  ;;  %6715 = vadd.xlane.f32.xlu1 %v6714_v36  ;;  %v5346_v59 = vsel %vm13522_vm5, %v5345_v42, %v5341_v31 }
 0x5c4   : > { %v6211_v26 = vsel %vm6210_vm1, %v8008_v17, %v6207_v12  ;;  %v7390_v53 = vmul.f32 -1.442695, %v5016_v20  ;;  %v6446_v18 = vmul.f32 %v6382_v30, %v15549_v29  ;;  %v6237_v50 = vsub.f32 1.0, %v5346_v59  ;;  %v15550_v42 = vld [vmem:[#allocation97_spill] sm:$0xff] }
 0x5c5   : > { %v13546_v61 = vadd.f32 1.0, %v13481_v40  ;;  %v6216_v5 = vsel %vm13508_vm13, %v13478_v62, %v6211_v26  ;;  %8009 = vpow2.f32 %v7342_v33  ;;  %v5590_v9 = vsub.f32 1.0, %v5589_v25  ;;  %v15551_v10 = vld [vmem:[#allocation101_spill] sm:$0xff] }
 0x5c6   : > { %v6295_v46 = vsub.f32 1.0, %v6216_v5  ;;  %8011 = vpow2.f32 %v7358_v15  ;;  %v6514_v23 = vmul.f32 %v13121_v3, %v6446_v18  ;;  %v6302_v63 = vmul.f32 %v12292_v14, %v6237_v50  ;;  %v15552_v12 = vld [vmem:[#allocation69_spill] sm:$0xff] }
 0x5c7   : > { %8013 = vpow2.f32 %v7374_v6  ;;  %v5591_v17 = vmul.f32 %v15548_v22, %v5590_v9  ;;  %v5597_v40 = vand.u32 2147483647, %v15547_v44  ;;  %vm5593_vm4 = vweird.f32 %v15547_v44 }
 0x5c8   : > { %v6360_v43 = vmul.f32 %v12292_v14, %v6295_v46  ;;  %8015 = vpow2.f32 %v7390_v53  ;;  %v6618_v62 = vsel %vm1344_vm2, %v6514_v23, 0.0  ;;  %v6366_v21 = vadd.f32 %v6302_v63, %v5346_v59  ;;  %vm5595_vm6 = vmor %vm5593_vm4, %vm5594_vm3 }
 0x5c9   : > { %6619 = vadd.xlane.f32.xlu0 %v6618_v62  ;;  %v5592_v25 = vadd.f32 %v15548_v22, %v5591_v17  ;;  %v5599_v49 = vand.u32 2147483648, %v15547_v44  ;;  %v5349_v28 = vmul.f32 %v15551_v10, %v15550_v42  ;;  %v13565_v20 = vmul.f32 %v13462_v60, %v12985_v2 }
 0x5ca   : > { %8017 = vrcp.f32 %v13546_v61  ;;  %v6430_v36 = vmul.f32 %v6366_v21, %v15552_v12  ;;  %vm5598_vm7 = vcmp.eq.f32.partialorder %v5597_v40, 8.507059e+37  ;;  %v6424_v31 = vadd.f32 %v6360_v43, %v6216_v5 }
 0x5cb   : > { %v8010_v30 = vpop.eup %8009  ;;  %v5596_v33 = vsel %vm5595_vm6, %v15548_v22, %v5592_v25  ;;  %v5600_v15 = vor.u32 1.1754944e-38, %v5599_v49  ;;  %v5350_v6 = vsub.f32 1.0, %v5349_v28  ;;  %vm5354_vm8 = vweird.f32 %v15551_v10 }
 0x5cc   : > { %v8012_v44 = vpop.eup %8011  ;;  %v13570_v59 = vadd.f32 1.0, %v8010_v30  ;;  %v6498_v26 = vmul.f32 %v13121_v3, %v6430_v36  ;;  %v5357_v2 = vand.u32 2147483647, %v15550_v42  ;;  %v5359_v50 = vand.u32 2147483648, %v15550_v42 }
 0x5cd   : > { %v8014_v60 = vpop.eup %8013  ;;  %v13575_v53 = vadd.f32 1.0, %v8012_v44  ;;  %v5601_v29 = vsel %vm5598_vm7, %v5600_v15, %v5596_v33  ;;  %v5351_v18 = vmul.f32 %v15551_v10, %v5350_v6  ;;  %vm5353_vm9 = vweird.f32 %v15550_v42 }
 0x5ce   : > { %v8016_v22 = vpop.eup %8015  ;;  %v13579_v5 = vadd.f32 1.0, %v8014_v60  ;;  %8019 = vrcp.f32 %v13570_v59  ;;  %v6570_v9 = vsel %vm1344_vm2, %v6498_v26, 0.0  ;;  %v6254_v46 = vsub.f32 1.0, %v5601_v29  ;;  %vm5355_vm10 = vmor %vm5353_vm9, %vm5354_vm8 }
 0x5cf   : > { %v13583_v23 = vadd.f32 1.0, %v8016_v22  ;;  %8021 = vrcp.f32 %v13575_v53  ;;  %6571 = vadd.xlane.f32.xlu2 %v6570_v9  ;;  %v5352_v63 = vadd.f32 %v15551_v10, %v5351_v18  ;;  %v13591_v40 = vmul.f32 %v6424_v31, %v13154_v52  ;;  %v15553_v31 = vld [vmem:[#allocation51_spill] sm:$0xff] }
 0x5d0   : > { %v13588_v17 = vpop.eup %8017  ;;  %8023 = vrcp.f32 %v13579_v5  ;;  %v6319_v43 = vmul.f32 %v12292_v14, %v6254_v46  ;;  %v5829_v62 = vmul.f32 %v12498_v37, %v12324_v13  ;;  %vm5358_vm11 = vcmp.eq.f32.partialorder %v5357_v2, 8.507059e+37 }
 0x5d1   : > { %8025 = vrcp.f32 %v13583_v23  ;;  %v5360_v21 = vor.u32 1.1754944e-38, %v5359_v50  ;;  %vm5833_vm12 = vweird.f32 %v12324_v13  ;;  %v6227_v25 = vand.u32 2147483647, %v13583_v23 }
 0x5d2   : > { %v6383_v52 = vadd.f32 %v6319_v43, %v5601_v29  ;;  %v5356_v49 = vsel %vm5355_vm10, %v15551_v10, %v5352_v63  ;;  %v5830_v42 = vsub.f32 1.0, %v5829_v62  ;;  %v6229_v28 = vand.u32 2147483648, %v13583_v23 }
 0x5d3   : > { %v5361_v12 = vsel %vm5358_vm11, %v5360_v21, %v5356_v49  ;;  %vm5834_vm13 = vweird.f32 %v12498_v37  ;;  %v5837_v36 = vand.u32 2147483647, %v12324_v13  ;;  %v5839_v44 = vand.u32 2147483648, %v12324_v13 }
 0x5d4   : > { %v13606_v30 = vpop.eup %8019  ;;  %v6447_v33 = vmul.f32 %v6383_v52, %v15553_v31  ;;  %v6238_v15 = vsub.f32 1.0, %v5361_v12  ;;  %v5831_v6 = vmul.f32 %v12498_v37, %v5830_v42  ;;  %vm6223_vm14 = vweird.f32 %v13583_v23  ;;  %vm5835_vm4 = vmor %vm5833_vm12, %vm5834_vm13 }
 0x5d5   : > { %v13611_v26 = vpop.eup %8021  ;;  %vm13614_vm15 = vcmp.eq.f32.partialorder %v5837_v36, 8.507059e+37  ;;  %v5364_v2 = vmul.f32 %v12563_v34, %v12517_v11  ;;  %vm5368_vm5 = vweird.f32 %v12517_v11  ;;  %vm5369_vm0 = vweird.f32 %v12563_v34 }
 0x5d6   : > { %v13622_v60 = vpop.eup %8023  ;;  %v6515_v29 = vmul.f32 %v13121_v3, %v6447_v33  ;;  %v6303_v18 = vmul.f32 %v12292_v14, %v6238_v15  ;;  %v5832_v50 = vadd.f32 %v12498_v37, %v5831_v6  ;;  %v5840_v22 = vor.u32 1.1754944e-38, %v5839_v44  ;;  %v15560_v6 = vld [vmem:[#allocation31_spill] sm:$0xff]  ;;  %vm5370_vm9 = vmor %vm5368_vm5, %vm5369_vm0 }
 0x5d7   : > { %v8026_v9 = vpop.eup %8025  ;;  %v5365_v46 = vsub.f32 1.0, %v5364_v2  ;;  %v5372_v63 = vand.u32 2147483647, %v12517_v11  ;;  %v5374_v43 = vand.u32 2147483648, %v12517_v11  ;;  %v5844_v62 = vmul.f32 %v12574_v41, %v12526_v24 }
 0x5d8   : > { %v6219_v21 = vmul.f32 %v8026_v9, %v13583_v23  ;;  %vm6224_vm1 = vweird.f32 %v8026_v9  ;;  %vm13632_vm3 = vcmp.eq.f32.partialorder %v6227_v25, 8.507059e+37  ;;  %v6621_v49 = vsel %vm1344_vm2, %v6515_v29, 0.0 }
 0x5d9   : > { %v6367_v42 = vadd.f32 %v6303_v18, %v5361_v12  ;;  %6622 = vadd.xlane.f32.xlu1 %v6621_v49  ;;  %v5836_v36 = vsel %vm5835_vm4, %v12498_v37, %v5832_v50  ;;  %v5366_v31 = vmul.f32 %v12563_v34, %v5365_v46  ;;  %vm13643_vm6 = vcmp.eq.f32.partialorder %v5372_v63, 8.507059e+37  ;;  %vm6225_vm10 = vmor %vm6223_vm14, %vm6224_vm1 }
 0x5da   : > { %v5375_v25 = vor.u32 1.1754944e-38, %v5374_v43  ;;  %v6220_v15 = vsub.f32 1.0, %v6219_v21  ;;  %v5841_v12 = vsel %vm13614_vm15, %v5840_v22, %v5836_v36  ;;  %v5845_v2 = vsub.f32 1.0, %v5844_v62 }
 0x5db   : > { %v6431_v44 = vmul.f32 %v6367_v42, %v15560_v6  ;;  %v6270_v29 = vsub.f32 1.0, %v5841_v12  ;;  %v5367_v13 = vadd.f32 %v12563_v34, %v5366_v31  ;;  %vm5848_vm7 = vweird.f32 %v12526_v24 }
 0x5dc   : > { %vm5849_vm8 = vweird.f32 %v12574_v41  ;;  %v6221_v37 = vmul.f32 %v8026_v9, %v6220_v15  ;;  %v5846_v50 = vmul.f32 %v12574_v41, %v5845_v2  ;;  %v5852_v10 = vand.u32 2147483647, %v12526_v24 }
 0x5dd   : > { %v6499_v18 = vmul.f32 %v13121_v3, %v6431_v44  ;;  %v6335_v22 = vmul.f32 %v12292_v14, %v6270_v29  ;;  %v5371_v46 = vsel %vm5370_vm9, %v12563_v34, %v5367_v13  ;;  %v5854_v63 = vand.u32 2147483648, %v12526_v24  ;;  %vm5850_vm11 = vmor %vm5848_vm7, %vm5849_vm8 }
 0x5de   : > { %v6547_v43 = vmul.f32 %v13121_v3, %v12535_v32  ;;  %v6222_v62 = vadd.f32 %v8026_v9, %v6221_v37  ;;  %v5376_v21 = vsel %vm13643_vm6, %v5375_v25, %v5371_v46  ;;  %v5847_v49 = vadd.f32 %v12574_v41, %v5846_v50 }
 0x5df   : > { %v6573_v11 = vsel %vm1344_vm2, %v6499_v18, 0.0  ;;  %v6230_v42 = vor.u32 1.1754944e-38, %v6229_v28  ;;  %v6399_v34 = vadd.f32 %v6335_v22, %v5841_v12  ;;  %v6239_v36 = vsub.f32 1.0, %v5376_v21  ;;  %v15561_v28 = vld [vmem:[#allocation63_spill] sm:$0xff]  ;;  %v15562_v22 = vld [vmem:[#allocation33_spill] sm:$0xff] }
 0x5e0   : > { %6574 = vadd.xlane.f32.xlu0 %v6573_v11  ;;  %v5855_v32 = vor.u32 1.1754944e-38, %v5854_v63  ;;  %v6226_v3 = vsel %vm6225_vm10, %v8026_v9, %v6222_v62  ;;  %v5851_v23 = vsel %vm5850_vm11, %v12574_v41, %v5847_v49  ;;  %vm5853_vm12 = vcmp.eq.f32.partialorder %v5852_v10, 8.507059e+37  ;;  %v13687_v41 = vld [vmem:[%s14745_s7] ss:$0 sm:$0xff] }
 0x5e1   : > { %v5859_v31 = vmul.f32 %v12635_v54, %v12572_v51  ;;  %v6231_v33 = vsel %vm13632_vm3, %v6230_v42, %v6226_v3  ;;  %v6463_v25 = vmul.f32 %v6399_v34, %v15561_v28  ;;  %v6304_v15 = vmul.f32 %v12292_v14, %v6239_v36  ;;  %v15563_v34 = vld [vmem:[#allocation34_spill] sm:$0xff] }
 0x5e2   : > { %v5856_v6 = vsel %vm5853_vm12, %v5855_v32, %v5851_v23  ;;  %v6296_v44 = vsub.f32 1.0, %v6231_v33  ;;  %v6717_v24 = vsel %vm1344_vm2, %v6547_v43, 0.0  ;;  %vm5864_vm13 = vweird.f32 %v12635_v54 }
 0x5e3   : > { %v6271_v12 = vsub.f32 1.0, %v5856_v6  ;;  %v5860_v2 = vsub.f32 1.0, %v5859_v31  ;;  %v6531_v9 = vmul.f32 %v13687_v41, %v6463_v25  ;;  %v6368_v29 = vadd.f32 %v6304_v15, %v5376_v21 }
 0x5e4   : > { %v5867_v52 = vand.u32 2147483647, %v12572_v51  ;;  %v6361_v13 = vmul.f32 %v12292_v14, %v6296_v44  ;;  %v5869_v50 = vand.u32 2147483648, %v12572_v51  ;;  %vm5863_vm14 = vweird.f32 %v12572_v51 }
 0x5e5   : > { %v6336_v37 = vmul.f32 %v12292_v14, %v6271_v12  ;;  %v5861_v18 = vmul.f32 %v12635_v54, %v5860_v2  ;;  %v6669_v10 = vsel %vm1344_vm2, %v6531_v9, 0.0  ;;  %v6432_v46 = vmul.f32 %v6368_v29, %v15562_v22  ;;  %vm5865_vm5 = vmor %vm5863_vm14, %vm5864_vm13 }
 0x5e6   : > { %v6548_v63 = vmul.f32 %v13687_v41, %v12699_v1  ;;  %v13701_v43 = vadd.f32 %v6361_v13, %v6231_v33  ;;  %6670 = vadd.xlane.f32.xlu2 %v6669_v10  ;;  %vm5868_vm15 = vcmp.eq.f32.partialorder %v5867_v52, 8.507059e+37  ;;  %v5870_v49 = vor.u32 1.1754944e-38, %v5869_v50  ;;  %v15566_v50 = vld [vmem:[#allocation45_spill] sm:$0xff] }
 0x5e7   : > { %v6400_v62 = vadd.f32 %v6336_v37, %v5856_v6  ;;  %v5862_v11 = vadd.f32 %v12635_v54, %v5861_v18  ;;  %v6500_v21 = vmul.f32 %v13687_v41, %v6432_v46  ;;  %v5604_v51 = vmul.f32 %v12569_v4, %v12522_v57  ;;  %v15567_v10 = vld [vmem:[#allocation105_spill] sm:$0xff] }
 0x5e8   : > { %v6720_v42 = vsel %vm1344_vm2, %v6548_v63, 0.0  ;;  %vm5608_vm0 = vweird.f32 %v12522_v57  ;;  %vm5609_vm1 = vweird.f32 %v12569_v4  ;;  %v5612_v31 = vand.u32 2147483647, %v12522_v57 }
 0x5e9   : > { %v6464_v1 = vmul.f32 %v6400_v62, %v15563_v34  ;;  %v5866_v36 = vsel %vm5865_vm5, %v12635_v54, %v5862_v11  ;;  %v6576_v32 = vsel %vm1344_vm2, %v6500_v21, 0.0  ;;  %v5605_v23 = vsub.f32 1.0, %v5604_v51  ;;  %vm5610_vm7 = vmor %vm5608_vm0, %vm5609_vm1 }
 0x5ea   : > { %v5871_v3 = vsel %vm5868_vm15, %v5870_v49, %v5866_v36  ;;  %6577 = vadd.xlane.f32.xlu1 %v6576_v32  ;;  %v5614_v25 = vand.u32 2147483648, %v12522_v57  ;;  %v6549_v15 = vmul.f32 %v13687_v41, %v12704_v27  ;;  %vm13721_vm3 = vcmp.eq.f32.partialorder %v5612_v31, 8.507059e+37 }
 0x5eb   : > { %v6532_v33 = vmul.f32 %v13687_v41, %v6464_v1  ;;  %v6272_v28 = vsub.f32 1.0, %v5871_v3  ;;  %v5606_v54 = vmul.f32 %v12569_v4, %v5605_v23  ;;  %v5619_v44 = vmul.f32 %v12628_v48, %v12566_v56 }
 0x5ec   : > { %vm5623_vm4 = vweird.f32 %v12566_v56  ;;  %v5615_v9 = vor.u32 1.1754944e-38, %v5614_v25  ;;  %v13731_v29 = vsel %vm1344_vm2, %v6549_v15, 0.0  ;;  %vm5624_vm6 = vweird.f32 %v12628_v48 }
 0x5ed   : > { %v6672_v12 = vsel %vm1344_vm2, %v6532_v33, 0.0  ;;  %v6337_v2 = vmul.f32 %v12292_v14, %v6272_v28  ;;  %v5607_v27 = vadd.f32 %v12569_v4, %v5606_v54  ;;  %v5620_v52 = vsub.f32 1.0, %v5619_v44  ;;  %vm5625_vm11 = vmor %vm5623_vm4, %vm5624_vm6  ;;  %v15579_v33 = vld [vmem:[#allocation110_spill] sm:$0xff] }
 0x5ee   : > { %6673 = vadd.xlane.f32.xlu0 %v6672_v12  ;;  %v5627_v13 = vand.u32 2147483647, %v12566_v56  ;;  %6718 = vadd.xlane.f32.xlu2 %v6717_v24  ;;  %v5629_v18 = vand.u32 2147483648, %v12566_v56  ;;  %v5379_v22 = vmul.f32 %v15567_v10, %v15566_v50  ;;  %vm5383_vm8 = vweird.f32 %v15566_v50  ;;  %v15570_v24 = vld [vmem:[#allocation37_spill] sm:$0xff] }
 0x5ef   : > { %v6401_v37 = vadd.f32 %v6337_v2, %v5871_v3  ;;  %v5611_v46 = vsel %vm5610_vm7, %v12569_v4, %v5607_v27  ;;  %v5621_v63 = vmul.f32 %v12628_v48, %v5620_v52  ;;  %vm5384_vm10 = vweird.f32 %v15567_v10  ;;  %v15573_v27 = vld [vmem:[#allocation28_spill] sm:$0xff]  ;;  %v15574_v52 = vld [vmem:[#allocation66_spill] sm:$0xff] }
 0x5f0   : > { %vm13746_vm9 = vcmp.eq.f32.partialorder %v5627_v13, 8.507059e+37  ;;  %v5616_v11 = vsel %vm13721_vm3, %v5615_v9, %v5611_v46  ;;  %v5630_v21 = vor.u32 1.1754944e-38, %v5629_v18  ;;  %v5380_v49 = vsub.f32 1.0, %v5379_v22  ;;  %vm5385_vm14 = vmor %vm5383_vm8, %vm5384_vm10 }
 0x5f1   : > { %v6465_v57 = vmul.f32 %v6401_v37, %v15570_v24  ;;  %v6255_v51 = vsub.f32 1.0, %v5616_v11  ;;  %v5622_v34 = vadd.f32 %v12628_v48, %v5621_v63  ;;  %v5387_v4 = vand.u32 2147483647, %v15566_v50 }
 0x5f2   : > { %v5389_v1 = vand.u32 2147483648, %v15566_v50  ;;  %v5381_v32 = vmul.f32 %v15567_v10, %v5380_v49  ;;  %v5634_v3 = vmul.f32 %v12693_v0, %v12630_v55  ;;  %vm5638_vm12 = vweird.f32 %v12630_v55  ;;  %v15585_v50 = vld [vmem:[#allocation84_spill] sm:$0xff] }
 0x5f3   : > { %v6533_v36 = vmul.f32 %v13687_v41, %v6465_v57  ;;  %v6320_v23 = vmul.f32 %v12292_v14, %v6255_v51  ;;  %v5626_v31 = vsel %vm5625_vm11, %v12628_v48, %v5622_v34  ;;  %vm13768_vm13 = vcmp.eq.f32.partialorder %v5387_v4, 8.507059e+37  ;;  %v15577_v34 = vld [vmem:[#allocation56_spill] sm:$0xff] }
 0x5f4   : > { %v5390_v28 = vor.u32 1.1754944e-38, %v5389_v1  ;;  %v5631_v56 = vsel %vm13746_vm9, %v5630_v21, %v5626_v31  ;;  %v5382_v15 = vadd.f32 %v15567_v10, %v5381_v32  ;;  %v5635_v54 = vsub.f32 1.0, %v5634_v3  ;;  %v15578_v31 = vld [vmem:[#allocation107_spill] sm:$0xff] }
 0x5f5   : > { %v6675_v25 = vsel %vm1344_vm2, %v6533_v36, 0.0  ;;  %v6384_v6 = vadd.f32 %v6320_v23, %v5616_v11  ;;  %v6256_v44 = vsub.f32 1.0, %v5631_v56  ;;  %vm5639_vm15 = vweird.f32 %v12693_v0 }
 0x5f6   : > { %6676 = vadd.xlane.f32.xlu1 %v6675_v25  ;;  %6721 = vadd.xlane.f32.xlu0 %v6720_v42  ;;  %v5642_v48 = vand.u32 2147483647, %v12630_v55  ;;  %v5386_v12 = vsel %vm5385_vm14, %v15567_v10, %v5382_v15  ;;  %v5636_v2 = vmul.f32 %v12693_v0, %v5635_v54  ;;  %v5644_v9 = vand.u32 2147483648, %v12630_v55  ;;  %vm5640_vm0 = vmor %vm5638_vm12, %vm5639_vm15  ;;  %v15580_v25 = vld [vmem:[#allocation77_spill] sm:$0xff] }
 0x5f7   : > { %v5394_v42 = vmul.f32 %v12664_v45, %v15573_v27  ;;  %v6448_v13 = vmul.f32 %v6384_v6, %v15574_v52  ;;  %v6321_v37 = vmul.f32 %v12292_v14, %v6256_v44  ;;  %v5391_v18 = vsel %vm13768_vm13, %v5390_v28, %v5386_v12 }
 0x5f8   : > { %vm13791_vm5 = vcmp.eq.f32.partialorder %v5642_v48, 8.507059e+37  ;;  %v6240_v22 = vsub.f32 1.0, %v5391_v18  ;;  %v5637_v10 = vadd.f32 %v12693_v0, %v5636_v2  ;;  %v5645_v46 = vor.u32 1.1754944e-38, %v5644_v9 }
 0x5f9   : > { %v5395_v63 = vsub.f32 1.0, %v5394_v42  ;;  %v6516_v62 = vmul.f32 %v13687_v41, %v6448_v13  ;;  %v6385_v24 = vadd.f32 %v6321_v37, %v5631_v56  ;;  %vm5398_vm1 = vweird.f32 %v15573_v27  ;;  %v15584_v13 = vld [vmem:[#allocation111_spill] sm:$0xff] }
 0x5fa   : > { %vm5399_vm3 = vweird.f32 %v12664_v45  ;;  %v6305_v57 = vmul.f32 %v12292_v14, %v6240_v22  ;;  %v5641_v11 = vsel %vm5640_vm0, %v12693_v0, %v5637_v10  ;;  %v5402_v49 = vand.u32 2147483647, %v15573_v27 }
 0x5fb   : > { %v5396_v21 = vmul.f32 %v12664_v45, %v5395_v63  ;;  %v6624_v51 = vsel %vm1344_vm2, %v6516_v62, 0.0  ;;  %v6449_v4 = vmul.f32 %v6385_v24, %v15577_v34  ;;  %v5646_v55 = vsel %vm13791_vm5, %v5645_v46, %v5641_v11  ;;  %vm5400_vm6 = vmor %vm5398_vm1, %vm5399_vm3 }
 0x5fc   : > { %v5404_v1 = vand.u32 2147483648, %v15573_v27  ;;  %6625 = vadd.xlane.f32.xlu2 %v6624_v51  ;;  %v6369_v36 = vadd.f32 %v6305_v57, %v5391_v18  ;;  %v6257_v32 = vsub.f32 1.0, %v5646_v55  ;;  %vm5403_vm4 = vcmp.eq.f32.partialorder %v5402_v49, 8.507059e+37  ;;  %v15586_v49 = vld [vmem:[#allocation72_spill] sm:$0xff]  ;;  %v15587_v51 = vld [vmem:[#allocation9_spill] sm:$0xff] }
 0x5fd   : > { %v5397_v3 = vadd.f32 %v12664_v45, %v5396_v21  ;;  %v6517_v0 = vmul.f32 %v13687_v41, %v6449_v4  ;;  %v5874_v28 = vmul.f32 %v15579_v33, %v15578_v31  ;;  %vm5878_vm7 = vweird.f32 %v15578_v31 }
 0x5fe   : > { %6724 = vadd.xlane.f32.xlu1 %v13731_v29  ;;  %v5405_v23 = vor.u32 1.1754944e-38, %v5404_v1  ;;  %v6433_v56 = vmul.f32 %v6369_v36, %v15580_v25  ;;  %v6322_v15 = vmul.f32 %v12292_v14, %v6257_v32  ;;  %vm5879_vm8 = vweird.f32 %v15579_v33  ;;  %v15590_v32 = vld [vmem:[#allocation35_spill] sm:$0xff] }
 0x5ff   : > { %v5401_v54 = vsel %vm5400_vm6, %v12664_v45, %v5397_v3  ;;  %v6627_v29 = vsel %vm1344_vm2, %v6517_v0, 0.0  ;;  %v5875_v44 = vsub.f32 1.0, %v5874_v28  ;;  %v5882_v48 = vand.u32 2147483647, %v15578_v31  ;;  %v15583_v45 = vld [vmem:[#allocation108_spill] sm:$0xff]  ;;  %vm5880_vm12 = vmor %vm5878_vm7, %vm5879_vm8 }
 0x600   : > { %v5406_v6 = vsel %vm5403_vm4, %v5405_v23, %v5401_v54  ;;  %6628 = vadd.xlane.f32.xlu0 %v6627_v29  ;;  %v6501_v12 = vmul.f32 %v13687_v41, %v6433_v56  ;;  %v6386_v2 = vadd.f32 %v6322_v15, %v5646_v55  ;;  %v5884_v27 = vand.u32 2147483648, %v15578_v31  ;;  %v15591_v54 = vld [vmem:[#allocation12_spill] sm:$0xff] }
 0x601   : > { %v6241_v9 = vsub.f32 1.0, %v5406_v6  ;;  %v5876_v42 = vmul.f32 %v15579_v33, %v5875_v44  ;;  %vm13831_vm9 = vcmp.eq.f32.partialorder %v5882_v48, 8.507059e+37  ;;  %v5409_v37 = vmul.f32 %v15584_v13, %v15583_v45 }
 0x602   : > { %vm5413_vm10 = vweird.f32 %v15583_v45  ;;  %v6579_v18 = vsel %vm1344_vm2, %v6501_v12, 0.0  ;;  %v6450_v22 = vmul.f32 %v6386_v2, %v15585_v50  ;;  %v5885_v46 = vor.u32 1.1754944e-38, %v5884_v27  ;;  %v15592_v12 = vld [vmem:[#allocation70_spill] sm:$0xff]  ;;  %v15593_v2 = vld [vmem:[#allocation15_spill] sm:$0xff] }
 0x603   : > { %v6306_v10 = vmul.f32 %v12292_v14, %v6241_v9  ;;  %v5877_v63 = vadd.f32 %v15579_v33, %v5876_v42  ;;  %v5410_v62 = vsub.f32 1.0, %v5409_v37  ;;  %vm5414_vm11 = vweird.f32 %v15584_v13 }
 0x604   : > { %v5417_v24 = vand.u32 2147483647, %v15583_v45  ;;  %6580 = vadd.xlane.f32.xlu2 %v6579_v18  ;;  %v6518_v57 = vmul.f32 %v13687_v41, %v6450_v22  ;;  %v5419_v21 = vand.u32 2147483648, %v15583_v45  ;;  %v5889_v34 = vmul.f32 %v15587_v51, %v15586_v49  ;;  %vm5415_vm5 = vmor %vm5413_vm10, %vm5414_vm11 }
 0x605   : > { %v6370_v11 = vadd.f32 %v6306_v10, %v5406_v6  ;;  %v5881_v4 = vsel %vm5880_vm12, %v15579_v33, %v5877_v63  ;;  %v5411_v55 = vmul.f32 %v15584_v13, %v5410_v62  ;;  %vm5893_vm14 = vweird.f32 %v15586_v49 }
 0x606   : > { %vm13854_vm13 = vcmp.eq.f32.partialorder %v5417_v24, 8.507059e+37  ;;  %v6630_v36 = vsel %vm1344_vm2, %v6518_v57, 0.0  ;;  %v5886_v0 = vsel %vm13831_vm9, %v5885_v46, %v5881_v4  ;;  %v5420_v23 = vor.u32 1.1754944e-38, %v5419_v21  ;;  %v15596_v46 = vld [vmem:[#allocation11_spill] sm:$0xff] }
 0x607   : > { %v6434_v3 = vmul.f32 %v6370_v11, %v15590_v32  ;;  %6631 = vadd.xlane.f32.xlu1 %v6630_v36  ;;  %v6273_v31 = vsub.f32 1.0, %v5886_v0  ;;  %v5412_v33 = vadd.f32 %v15584_v13, %v5411_v55  ;;  %v5890_v28 = vsub.f32 1.0, %v5889_v34  ;;  %v15599_v34 = vld [vmem:[#allocation73_spill] sm:$0xff] }
 0x608   : > { %vm5894_vm15 = vweird.f32 %v15587_v51  ;;  %v5897_v56 = vand.u32 2147483647, %v15586_v49  ;;  %v5899_v15 = vand.u32 2147483648, %v15586_v49  ;;  %v6550_v29 = vmul.f32 %v13687_v41, %v15591_v54 }
 0x609   : > { %v6502_v25 = vmul.f32 %v13687_v41, %v6434_v3  ;;  %v6338_v6 = vmul.f32 %v12292_v14, %v6273_v31  ;;  %v5416_v44 = vsel %vm5415_vm5, %v15584_v13, %v5412_v33  ;;  %v5891_v48 = vmul.f32 %v15587_v51, %v5890_v28  ;;  %vm5895_vm1 = vmor %vm5893_vm14, %vm5894_vm15  ;;  %v15602_v28 = vld [vmem:[#allocation58_spill] sm:$0xff] }
 0x60a   : > { %v5904_v9 = vmul.f32 %v15593_v2, %v15592_v12  ;;  %v5421_v42 = vsel %vm13854_vm13, %v5420_v23, %v5416_v44  ;;  %vm13882_vm0 = vcmp.eq.f32.partialorder %v5897_v56, 8.507059e+37  ;;  %v5900_v45 = vor.u32 1.1754944e-38, %v5899_v15  ;;  %v15601_v23 = vld [vmem:[#allocation112_spill] sm:$0xff] }
 0x60b   : > { %v6582_v27 = vsel %vm1344_vm2, %v6502_v25, 0.0  ;;  %v6402_v37 = vadd.f32 %v6338_v6, %v5886_v0  ;;  %v6242_v18 = vsub.f32 1.0, %v5421_v42  ;;  %v5892_v13 = vadd.f32 %v15587_v51, %v5891_v48  ;;  %v15600_v0 = vld [vmem:[#allocation109_spill] sm:$0xff] }
 0x60c   : > { %6583 = vadd.xlane.f32.xlu0 %v6582_v27  ;;  %v13888_v50 = vsel %vm1344_vm2, %v6550_v29, 0.0  ;;  %v5905_v22 = vsub.f32 1.0, %v5904_v9  ;;  %vm5908_vm3 = vweird.f32 %v15592_v12  ;;  %vm5909_vm4 = vweird.f32 %v15593_v2  ;;  %v15603_v27 = vld [vmem:[#allocation18_spill] sm:$0xff] }
 0x60d   : > { %v5912_v10 = vand.u32 2147483647, %v15592_v12  ;;  %v6466_v63 = vmul.f32 %v6402_v37, %v15596_v46  ;;  %v6307_v62 = vmul.f32 %v12292_v14, %v6242_v18  ;;  %v5896_v24 = vsel %vm5895_vm1, %v15587_v51, %v5892_v13  ;;  %vm5910_vm8 = vmor %vm5908_vm3, %vm5909_vm4  ;;  %v15606_v18 = vld [vmem:[#allocation38_spill] sm:$0xff] }
 0x60e   : > { %v5914_v57 = vand.u32 2147483648, %v15592_v12  ;;  %v5901_v11 = vsel %vm13882_vm0, %v5900_v45, %v5896_v24  ;;  %v5906_v21 = vmul.f32 %v15593_v2, %v5905_v22  ;;  %v6551_v4 = vmul.f32 %v13687_v41, %v15599_v34  ;;  %v15608_v46 = vld [vmem:[#allocation42_spill] sm:$0xff] }
 0x60f   : > { %vm13904_vm6 = vcmp.eq.f32.partialorder %v5912_v10, 8.507059e+37  ;;  %v6534_v55 = vmul.f32 %v13687_v41, %v6466_v63  ;;  %v6371_v1 = vadd.f32 %v6307_v62, %v5421_v42  ;;  %v6274_v36 = vsub.f32 1.0, %v5901_v11  ;;  %v15607_v10 = vld [vmem:[#allocation113_spill] sm:$0xff] }
 0x610   : > { %v5915_v32 = vor.u32 1.1754944e-38, %v5914_v57  ;;  %v5907_v51 = vadd.f32 %v15593_v2, %v5906_v21  ;;  %v13913_v3 = vsel %vm1344_vm2, %v6551_v4, 0.0  ;;  %v5649_v31 = vmul.f32 %v15601_v23, %v15600_v0 }
 0x611   : > { %vm5653_vm7 = vweird.f32 %v15600_v0  ;;  %v6678_v33 = vsel %vm1344_vm2, %v6534_v55, 0.0  ;;  %v6435_v25 = vmul.f32 %v6371_v1, %v15602_v28  ;;  %v6339_v56 = vmul.f32 %v12292_v14, %v6274_v36  ;;  %v15609_v55 = vld [vmem:[#allocation93_spill] sm:$0xff]  ;;  %v15610_v1 = vld [vmem:[#allocation19_spill] sm:$0xff] }
 0x612   : > { %vm5654_vm9 = vweird.f32 %v15601_v23  ;;  %6679 = vadd.xlane.f32.xlu2 %v6678_v33  ;;  %v5911_v15 = vsel %vm5910_vm8, %v15593_v2, %v5907_v51  ;;  %v5650_v54 = vsub.f32 1.0, %v5649_v31  ;;  %v5657_v29 = vand.u32 2147483647, %v15600_v0 }
 0x613   : > { %v5659_v6 = vand.u32 2147483648, %v15600_v0  ;;  %v6503_v44 = vmul.f32 %v13687_v41, %v6435_v25  ;;  %v6403_v48 = vadd.f32 %v6339_v56, %v5901_v11  ;;  %v5916_v9 = vsel %vm13904_vm6, %v5915_v32, %v5911_v15  ;;  %vm5655_vm13 = vmor %vm5653_vm7, %vm5654_vm9 }
 0x614   : > { %v6552_v12 = vmul.f32 %v13687_v41, %v15603_v27  ;;  %v6275_v42 = vsub.f32 1.0, %v5916_v9  ;;  %v5651_v52 = vmul.f32 %v15601_v23, %v5650_v54  ;;  %vm13935_vm10 = vcmp.eq.f32.partialorder %v5657_v29, 8.507059e+37  ;;  %v6560_v27 = vpop.xlane.xlu2 %6559 }
 0x615   : > { %v5660_v2 = vor.u32 1.1754944e-38, %v5659_v6  ;;  %v6585_v37 = vsel %vm1344_vm2, %v6503_v44, 0.0  ;;  %v6467_v13 = vmul.f32 %v6403_v48, %v15606_v18  ;;  %v5664_v63 = vmul.f32 %v15608_v46, %v15607_v10 }
 0x616   : > { %v13944_v22 = vsel %vm1344_vm2, %v6552_v12, 0.0  ;;  %6586 = vadd.xlane.f32.xlu1 %v6585_v37  ;;  %v6340_v62 = vmul.f32 %v12292_v14, %v6275_v42  ;;  %v5652_v24 = vadd.f32 %v15601_v23, %v5651_v52  ;;  %vm5668_vm11 = vweird.f32 %v15607_v10 }
 0x617   : > { %vm5669_vm12 = vweird.f32 %v15608_v46  ;;  %v6535_v57 = vmul.f32 %v13687_v41, %v6467_v13  ;;  %v5665_v11 = vsub.f32 1.0, %v5664_v63  ;;  %v5672_v21 = vand.u32 2147483647, %v15607_v10 }
 0x618   : > { %v5674_v49 = vand.u32 2147483648, %v15607_v10  ;;  %v6404_v34 = vadd.f32 %v6340_v62, %v5916_v9  ;;  %v5656_v4 = vsel %vm5655_vm13, %v15601_v23, %v5652_v24  ;;  %v5424_v36 = vmul.f32 %v15610_v1, %v15609_v55  ;;  %v15613_v23 = vld [vmem:[#allocation14_spill] sm:$0xff]  ;;  %vm5670_vm0 = vmor %vm5668_vm11, %vm5669_vm12  ;;  %v6656_v9 = vpop.xlane.xlu0 %6655  ;;  %v15616_v24 = vld [vmem:[#allocation96_spill] sm:$0xff] }
 0x619   : > { %vm5428_vm14 = vweird.f32 %v15609_v55  ;;  %v6681_v32 = vsel %vm1344_vm2, %v6535_v57, 0.0  ;;  %v5661_v51 = vsel %vm13935_vm10, %v5660_v2, %v5656_v4  ;;  %v5666_v0 = vmul.f32 %v15608_v46, %v5665_v11 }
 0x61a   : > { %vm13967_vm15 = vcmp.eq.f32.partialorder %v5672_v21, 8.507059e+37  ;;  %6682 = vadd.xlane.f32.xlu0 %v6681_v32  ;;  %6727 = vadd.xlane.f32.xlu2 %v13888_v50  ;;  %v6468_v33 = vmul.f32 %v6404_v34, %v15613_v23  ;;  %v6258_v28 = vsub.f32 1.0, %v5661_v51  ;;  %v5675_v25 = vor.u32 1.1754944e-38, %v5674_v49  ;;  %v15617_v21 = vld [vmem:[#allocation10_spill] sm:$0xff]  ;;  %v15618_v49 = vld [vmem:[#allocation16_spill] sm:$0xff] }
 0x61b   : > { %v5425_v56 = vsub.f32 1.0, %v5424_v36  ;;  %v5667_v15 = vadd.f32 %v15608_v46, %v5666_v0  ;;  %vm5429_vm5 = vweird.f32 %v15610_v1  ;;  %v5432_v54 = vand.u32 2147483647, %v15609_v55 }
 0x61c   : > { %v5434_v29 = vand.u32 2147483648, %v15609_v55  ;;  %v6536_v6 = vmul.f32 %v13687_v41, %v6468_v33  ;;  %v6323_v44 = vmul.f32 %v12292_v14, %v6258_v28  ;;  %v13985_v48 = vstv %s13939_s20  ;;  %vm5430_vm3 = vmor %vm5428_vm14, %vm5429_vm5  ;;  %v15619_v28 = vld [vmem:[#allocation46_spill] sm:$0xff] }
 0x61d   : > { %v5426_v50 = vmul.f32 %v15610_v1, %v5425_v56  ;;  %v5671_v12 = vsel %vm5670_vm0, %v15608_v46, %v5667_v15  ;;  %vm13988_vm1 = vcmp.eq.f32.partialorder %v5432_v54, 8.507059e+37  ;;  %v6880_v45 = vlaneseq }
 0x61e   : > { %v5435_v52 = vor.u32 1.1754944e-38, %v5434_v29  ;;  %v6684_v2 = vsel %vm1344_vm2, %v6536_v6, 0.0  ;;  %v6387_v37 = vadd.f32 %v6323_v44, %v5661_v51  ;;  %v5676_v18 = vsel %vm13967_vm15, %v5675_v25, %v5671_v12  ;;  %v15620_v25 = vld [vmem:[#allocation54_spill] sm:$0xff]  ;;  %v15621_v29 = vld [vmem:[#allocation103_spill] sm:$0xff] }
 0x61f   : > { %v5427_v13 = vadd.f32 %v15610_v1, %v5426_v50  ;;  %6685 = vadd.xlane.f32.xlu1 %v6684_v2  ;;  %v6259_v10 = vsub.f32 1.0, %v5676_v18  ;;  %v14000_v46 = vand.u32 127, %v6880_v45  ;;  %v14003_v63 = vadd.f32 %v13985_v48, %v6656_v9 }
 0x620   : > { %v14006_v62 = vadd.f32 %v13985_v48, %v6560_v27  ;;  %v6451_v57 = vmul.f32 %v6387_v37, %v15616_v24  ;;  %v5679_v34 = vmul.f32 %v15618_v49, %v15617_v21  ;;  %vm5683_vm4 = vweird.f32 %v15617_v21  ;;  %v15624_v37 = vld [vmem:[#allocation60_spill] sm:$0xff] }
 0x621   : > { %v5431_v11 = vsel %vm5430_vm3, %v15610_v1, %v5427_v13  ;;  %v6324_v4 = vmul.f32 %v12292_v14, %v6259_v10  ;;  %v6974_v36 = vperm.slane %v14003_v63, %v14000_v46  ;;  %vm5684_vm6 = vweird.f32 %v15618_v49  ;;  %v15626_v10 = vld [vmem:[#allocation29_spill] sm:$0xff] }
 0x622   : > { %v5436_v55 = vsel %vm13988_vm1, %v5435_v52, %v5431_v11  ;;  %v6882_v32 = vperm.slane %v14006_v62, %v14000_v46  ;;  %6730 = vadd.xlane.f32.xlu0 %v13913_v3  ;;  %v6519_v1 = vmul.f32 %v13687_v41, %v6451_v57  ;;  %v5680_v0 = vsub.f32 1.0, %v5679_v34  ;;  %vm5685_vm10 = vmor %vm5683_vm4, %vm5684_vm6 }
 0x623   : > { %v6243_v51 = vsub.f32 1.0, %v5436_v55  ;;  %v6388_v31 = vadd.f32 %v6324_v4, %v5676_v18  ;;  %v5687_v23 = vand.u32 2147483647, %v15617_v21  ;;  %v5689_v33 = vand.u32 2147483648, %v15617_v21  ;;  %v15625_v18 = vld [vmem:[#allocation47_spill] sm:$0xff] }
 0x624   : > { %v5439_v56 = vmul.f32 %v15620_v25, %v15619_v28  ;;  %v6633_v15 = vsel %vm1344_vm2, %v6519_v1, 0.0  ;;  %v5681_v3 = vmul.f32 %v15618_v49, %v5680_v0  ;;  %vm5443_vm7 = vweird.f32 %v15619_v28 }
 0x625   : > { %v6308_v54 = vmul.f32 %v12292_v14, %v6243_v51  ;;  %6634 = vadd.xlane.f32.xlu2 %v6633_v15  ;;  %v6452_v6 = vmul.f32 %v6388_v31, %v15621_v29  ;;  %vm14032_vm8 = vcmp.eq.f32.partialorder %v5687_v23, 8.507059e+37  ;;  %v5690_v50 = vor.u32 1.1754944e-38, %v5689_v33  ;;  %v6659_v33 = vpop.xlane.xlu1 %6658  ;;  %v6608_v29 = vpop.xlane.xlu2 %6607 }
 0x626   : > { %v5440_v9 = vsub.f32 1.0, %v5439_v56  ;;  %v5682_v12 = vadd.f32 %v15618_v49, %v5681_v3  ;;  %vm5444_vm9 = vweird.f32 %v15620_v25  ;;  %v5447_v42 = vand.u32 2147483647, %v15619_v28  ;;  %v6704_v56 = vpop.xlane.xlu0 %6703 }
 0x627   : > { %v6372_v27 = vadd.f32 %v6308_v54, %v5436_v55  ;;  %6733 = vadd.xlane.f32.xlu1 %v13944_v22  ;;  %v6520_v52 = vmul.f32 %v13687_v41, %v6452_v6  ;;  %v5449_v2 = vand.u32 2147483648, %v15619_v28  ;;  %v5919_v13 = vmul.f32 %v15625_v18, %v15624_v37  ;;  %vm5445_vm13 = vmor %vm5443_vm7, %vm5444_vm9 }
 0x628   : > { %v5441_v45 = vmul.f32 %v15620_v25, %v5440_v9  ;;  %v5686_v57 = vsel %vm5685_vm10, %v15618_v49, %v5682_v12  ;;  %vm14051_vm11 = vcmp.eq.f32.partialorder %v5447_v42, 8.507059e+37  ;;  %vm5923_vm12 = vweird.f32 %v15624_v37 }
 0x629   : > { %v6436_v24 = vmul.f32 %v6372_v27, %v15626_v10  ;;  %v6636_v11 = vsel %vm1344_vm2, %v6520_v52, 0.0  ;;  %v5691_v21 = vsel %vm14032_vm8, %v5690_v50, %v5686_v57  ;;  %v5450_v4 = vor.u32 1.1754944e-38, %v5449_v2  ;;  %v15631_v2 = vld [vmem:[#allocation104_spill] sm:$0xff] }
 0x62a   : > { %v5442_v34 = vadd.f32 %v15620_v25, %v5441_v45  ;;  %6637 = vadd.xlane.f32.xlu0 %v6636_v11  ;;  %v6260_v1 = vsub.f32 1.0, %v5691_v21  ;;  %v5920_v49 = vsub.f32 1.0, %v5919_v13  ;;  %vm5924_vm14 = vweird.f32 %v15625_v18 }
 0x62b   : > { %v6504_v55 = vmul.f32 %v13687_v41, %v6436_v24  ;;  %v5927_v0 = vand.u32 2147483647, %v15624_v37  ;;  %v5929_v31 = vand.u32 2147483648, %v15624_v37  ;;  %v14070_v23 = vadd.s32 4294967288, %v14000_v46  ;;  %vm5925_vm0 = vmor %vm5923_vm12, %vm5924_vm14 }
 0x62c   : > { %v5446_v51 = vsel %vm5445_vm13, %v15620_v25, %v5442_v34  ;;  %v6325_v54 = vmul.f32 %v12292_v14, %v6260_v1  ;;  %v5921_v3 = vmul.f32 %v15625_v18, %v5920_v49  ;;  %vm6885_vm5 = vcmask 130112  }
 0x62d   : > { %v6588_v15 = vsel %vm1344_vm2, %v6504_v55, 0.0  ;;  %v5451_v28 = vsel %vm14051_vm11, %v5450_v4, %v5446_v51  ;;  %vm14077_vm15 = vcmp.eq.f32.partialorder %v5927_v0, 8.507059e+37  ;;  %v5930_v44 = vor.u32 1.1754944e-38, %v5929_v31  ;;  %v15632_v55 = vld [vmem:[#allocation57_spill] sm:$0xff] }
 0x62e   : > { %6589 = vadd.xlane.f32.xlu2 %v6588_v15  ;;  %v6244_v25 = vsub.f32 1.0, %v5451_v28  ;;  %v6389_v50 = vadd.f32 %v6325_v54, %v5691_v21  ;;  %v5922_v9 = vadd.f32 %v15625_v18, %v5921_v3  ;;  %v6785_v27 = vadd.f32 %v13985_v48, %v6659_v33  ;;  %v6707_v3 = vpop.xlane.xlu1 %6706  ;;  %v15638_v54 = vld [vmem:[#allocation48_spill] sm:$0xff] }
 0x62f   : > { %v14084_v12 = vadd.f32 %v13985_v48, %v6704_v56  ;;  %v14092_v52 = vadd.f32 %v13985_v48, %v6608_v29  ;;  %v5454_v45 = vmul.f32 %v13261_v19, %v13158_v16  ;;  %vm5458_vm1 = vweird.f32 %v13158_v16  ;;  %v6563_v29 = vpop.xlane.xlu0 %6562 }
 0x630   : > { %v6309_v42 = vmul.f32 %v12292_v14, %v6244_v25  ;;  %v6453_v13 = vmul.f32 %v6389_v50, %v15631_v2  ;;  %v5926_v10 = vsel %vm5925_vm0, %v15625_v18, %v5922_v9  ;;  %v6975_v24 = vperm.slane %v6785_v27, %v14070_v23 }
 0x631   : > { %v7005_v57 = vperm.slane %v14084_v12, %v14000_v46  ;;  %v5931_v37 = vsel %vm14077_vm15, %v5930_v44, %v5926_v10  ;;  %v6943_v11 = vperm.slane %v14092_v52, %v14000_v46  ;;  %v5455_v21 = vsub.f32 1.0, %v5454_v45  ;;  %v6662_v44 = vpop.xlane.xlu2 %6661  ;;  %v15635_v12 = vld [vmem:[#allocation55_spill] sm:$0xff] }
 0x632   : > { %v6373_v22 = vadd.f32 %v6309_v42, %v5451_v28  ;;  %v6521_v34 = vmul.f32 %v13687_v41, %v6453_v13  ;;  %v6276_v4 = vsub.f32 1.0, %v5931_v37  ;;  %v14111_v18 = vsel %vm6885_vm5, %v6975_v24, %v6974_v36 }
 0x633   : > { %vm5459_vm3 = vweird.f32 %v13261_v19  ;;  %v5456_v49 = vmul.f32 %v13261_v19, %v5455_v21  ;;  %v5462_v51 = vand.u32 2147483647, %v13158_v16  ;;  %v5464_v0 = vand.u32 2147483648, %v13158_v16 }
 0x634   : > { %v6437_v1 = vmul.f32 %v6373_v22, %v15632_v55  ;;  %v6639_v31 = vsel %vm1344_vm2, %v6521_v34, 0.0  ;;  %v6341_v33 = vmul.f32 %v12292_v14, %v6276_v4  ;;  %v6553_v63 = vmul.f32 %v13687_v41, %v13255_v7  ;;  %vm5460_vm6 = vmor %vm5458_vm1, %vm5459_vm3 }
 0x635   : > { %v5694_v36 = vmul.f32 %v13279_v58, %v13164_v47  ;;  %6640 = vadd.xlane.f32.xlu1 %v6639_v31  ;;  %v5457_v15 = vadd.f32 %v13261_v19, %v5456_v49  ;;  %vm14126_vm4 = vcmp.eq.f32.partialorder %v5462_v51, 8.507059e+37  ;;  %v5465_v28 = vor.u32 1.1754944e-38, %v5464_v0 }
 0x636   : > { %v6505_v56 = vmul.f32 %v13687_v41, %v6437_v1  ;;  %v6405_v25 = vadd.f32 %v6341_v33, %v5931_v37  ;;  %v6735_v7 = vsel %vm1344_vm2, %v6553_v63, 0.0  ;;  %vm5698_vm7 = vweird.f32 %v13164_v47 }
 0x637   : > { %v5695_v6 = vsub.f32 1.0, %v5694_v36  ;;  %v5461_v9 = vsel %vm5460_vm6, %v13261_v19, %v5457_v15  ;;  %vm5699_vm8 = vweird.f32 %v13279_v58  ;;  %v5702_v27 = vand.u32 2147483647, %v13164_v47 }
 0x638   : > { %v6591_v50 = vsel %vm1344_vm2, %v6505_v56, 0.0  ;;  %v6469_v42 = vmul.f32 %v6405_v25, %v15635_v12  ;;  %v5466_v16 = vsel %vm14126_vm4, %v5465_v28, %v5461_v9  ;;  %v5704_v2 = vand.u32 2147483648, %v13164_v47  ;;  %vm5700_vm10 = vmor %vm5698_vm7, %vm5699_vm8  ;;  %v6611_v25 = vpop.xlane.xlu0 %6610 }
 0x639   : > { %6592 = vadd.xlane.f32.xlu0 %v6591_v50  ;;  %v5696_v45 = vmul.f32 %v13279_v58, %v5695_v6  ;;  %v6245_v13 = vsub.f32 1.0, %v5466_v16  ;;  %vm14145_vm9 = vcmp.eq.f32.partialorder %v5702_v27, 8.507059e+37  ;;  %v6801_v19 = vadd.f32 %v13985_v48, %v6707_v3  ;;  %v15640_v50 = vld [vmem:[#allocation65_spill] sm:$0xff]  ;;  %v6710_v27 = vpop.xlane.xlu2 %6709 }
 0x63a   : > { %v6753_v24 = vadd.f32 %v13985_v48, %v6563_v29  ;;  %v6537_v22 = vmul.f32 %v13687_v41, %v6469_v42  ;;  %v5705_v21 = vor.u32 1.1754944e-38, %v5704_v2  ;;  %v14154_v34 = vadd.s32 4294967280, %v14000_v46  ;;  %v6566_v29 = vpop.xlane.xlu1 %6565 }
 0x63b   : > { %v5697_v37 = vadd.f32 %v13279_v58, %v5696_v45  ;;  %v6310_v4 = vmul.f32 %v12292_v14, %v6245_v13  ;;  %v7006_v55 = vperm.slane %v6801_v19, %v14070_v23  ;;  %vm6889_vm11 = vcmask 195712   ;;  %v15643_v19 = vld [vmem:[#allocation26_spill] sm:$0xff] }
 0x63c   : > { %v6884_v1 = vperm.slane %v6753_v24, %v14070_v23  ;;  %v6687_v49 = vsel %vm1344_vm2, %v6537_v22, 0.0  ;;  %v6786_v0 = vadd.f32 %v13985_v48, %v6662_v44  ;;  %v5949_v31 = vmul.f32 %v13426_v39, %v13283_v35  ;;  %v15639_v44 = vld [vmem:[#allocation89_spill] sm:$0xff]  ;;  %v15644_v24 = vld [vmem:[#allocation40_spill] sm:$0xff] }
 0x63d   : > { %v5701_v51 = vsel %vm5700_vm10, %v13279_v58, %v5697_v37  ;;  %6688 = vadd.xlane.f32.xlu2 %v6687_v49  ;;  %v6374_v33 = vadd.f32 %v6310_v4, %v5466_v16  ;;  %v14171_v63 = vsel %vm6885_vm5, %v7006_v55, %v7005_v57  ;;  %vm5953_vm12 = vweird.f32 %v13283_v35  ;;  %v15645_v37 = vld [vmem:[#allocation106_spill] sm:$0xff] }
 0x63e   : > { %v5706_v47 = vsel %vm14145_vm9, %v5705_v21, %v5701_v51  ;;  %v14177_v36 = vsel %vm6885_vm5, %v6884_v1, %v6882_v32  ;;  %v6977_v56 = vperm.slane %v6786_v0, %v14154_v34  ;;  %v5950_v15 = vsub.f32 1.0, %v5949_v31 }
 0x63f   : > { %v6261_v58 = vsub.f32 1.0, %v5706_v47  ;;  %v6438_v28 = vmul.f32 %v6374_v33, %v15638_v54  ;;  %vm5954_vm13 = vweird.f32 %v13426_v39  ;;  %v5957_v3 = vand.u32 2147483647, %v13283_v35 }
 0x640   : > { %v5959_v57 = vand.u32 2147483648, %v13283_v35  ;;  %v14188_v32 = vsel %vm6889_vm11, %v6977_v56, %v14111_v18  ;;  %v5951_v6 = vmul.f32 %v13426_v39, %v5950_v15  ;;  %v5709_v9 = vmul.f32 %v15640_v50, %v15639_v44  ;;  %vm5955_vm1 = vmor %vm5953_vm12, %vm5954_vm13 }
 0x641   : > { %6736 = vadd.xlane.f32.xlu0 %v6735_v7  ;;  %v6326_v62 = vmul.f32 %v12292_v14, %v6261_v58  ;;  %v6506_v12 = vmul.f32 %v13687_v41, %v6438_v28  ;;  %vm14194_vm14 = vcmp.eq.f32.partialorder %v5957_v3, 8.507059e+37  ;;  %vm5713_vm15 = vweird.f32 %v15639_v44 }
 0x642   : > { %v5960_v16 = vor.u32 1.1754944e-38, %v5959_v57  ;;  %v5952_v45 = vadd.f32 %v13426_v39, %v5951_v6  ;;  %v5710_v18 = vsub.f32 1.0, %v5709_v9  ;;  %vm5714_vm0 = vweird.f32 %v15640_v50  ;;  %v6665_v9 = vpop.xlane.xlu0 %6664 }
 0x643   : > { %v6390_v7 = vadd.f32 %v6326_v62, %v5706_v47  ;;  %v6594_v2 = vsel %vm1344_vm2, %v6506_v12, 0.0  ;;  %v5717_v13 = vand.u32 2147483647, %v15639_v44  ;;  %v5719_v10 = vand.u32 2147483648, %v15639_v44  ;;  %vm5715_vm7 = vmor %vm5713_vm15, %vm5714_vm0 }
 0x644   : > { %v5934_v22 = vmul.f32 %v15644_v24, %v15643_v19  ;;  %6595 = vadd.xlane.f32.xlu1 %v6594_v2  ;;  %v5956_v4 = vsel %vm5955_vm1, %v13426_v39, %v5952_v45  ;;  %v5711_v55 = vmul.f32 %v15640_v50, %v5710_v18  ;;  %vm5938_vm3 = vweird.f32 %v15643_v19 }
 0x645   : > { %v6454_v21 = vmul.f32 %v6390_v7, %v15645_v37  ;;  %v5961_v35 = vsel %vm14194_vm14, %v5960_v16, %v5956_v4  ;;  %vm14216_vm4 = vcmp.eq.f32.partialorder %v5717_v13, 8.507059e+37  ;;  %v5720_v49 = vor.u32 1.1754944e-38, %v5719_v10  ;;  %v6569_v16 = vpop.xlane.xlu2 %6568  ;;  %v15650_v13 = vld [vmem:[#allocation39_spill] sm:$0xff]  ;;  %v15651_v37 = vld [vmem:[#allocation62_spill] sm:$0xff] }
 0x646   : > { %v5935_v51 = vsub.f32 1.0, %v5934_v22  ;;  %v6278_v31 = vsub.f32 1.0, %v5961_v35  ;;  %v5712_v33 = vadd.f32 %v15640_v50, %v5711_v55  ;;  %vm5939_vm6 = vweird.f32 %v15644_v24 }
 0x647   : > { %v6522_v0 = vmul.f32 %v13687_v41, %v6454_v21  ;;  %v5942_v47 = vand.u32 2147483647, %v15643_v19  ;;  %v5944_v58 = vand.u32 2147483648, %v15643_v19  ;;  %v6754_v56 = vadd.f32 %v13985_v48, %v6566_v29  ;;  %v6614_v29 = vpop.xlane.xlu1 %6613  ;;  %vm5940_vm9 = vmor %vm5938_vm3, %vm5939_vm6 }
 0x648   : > { %v5936_v39 = vmul.f32 %v15644_v24, %v5935_v51  ;;  %v6343_v54 = vmul.f32 %v12292_v14, %v6278_v31  ;;  %v5716_v28 = vsel %vm5715_vm7, %v15640_v50, %v5712_v33  ;;  %v6769_v3 = vadd.f32 %v13985_v48, %v6611_v25 }
 0x649   : > { %v6642_v15 = vsel %vm1344_vm2, %v6522_v0, 0.0  ;;  %v5721_v57 = vsel %vm14216_vm4, %v5720_v49, %v5716_v28  ;;  %vm14238_vm8 = vcmp.eq.f32.partialorder %v5942_v47, 8.507059e+37  ;;  %v5945_v44 = vor.u32 1.1754944e-38, %v5944_v58  ;;  %v15652_v49 = vld [vmem:[#allocation36_spill] sm:$0xff]  ;;  %v15656_v28 = vld [vmem:[#allocation61_spill] sm:$0xff] }
 0x64a   : > { %6643 = vadd.xlane.f32.xlu2 %v6642_v15  ;;  %v5937_v62 = vadd.f32 %v15644_v24, %v5936_v39  ;;  %v6407_v12 = vadd.f32 %v6343_v54, %v5961_v35  ;;  %v6262_v42 = vsub.f32 1.0, %v5721_v57  ;;  %v6888_v25 = vperm.slane %v6754_v56, %v14154_v34  ;;  %v15655_v56 = vld [vmem:[#allocation21_spill] sm:$0xff]  ;;  %v14301_v6 = vpop.xlane.xlu0 %6712 }
 0x64b   : > { %v6944_v50 = vperm.slane %v6769_v3, %v14070_v23  ;;  %v6802_v45 = vadd.f32 %v13985_v48, %v6710_v27  ;;  %v6555_v18 = vmul.f32 %v13687_v41, %v13565_v20  ;;  %v5484_v2 = vmul.f32 %v13486_v38, %v13437_v8 }
 0x64c   : > { %v5941_v7 = vsel %vm5940_vm9, %v15644_v24, %v5937_v62  ;;  %v6471_v10 = vmul.f32 %v6407_v12, %v15650_v13  ;;  %v6327_v19 = vmul.f32 %v12292_v14, %v6262_v42  ;;  %v6890_v23 = vsel %vm6889_vm11, %v6888_v25, %v14177_v36 }
 0x64d   : > { %v5946_v22 = vsel %vm14238_vm8, %v5945_v44, %v5941_v7  ;;  %v14262_v24 = vmul.f32 %v13701_v43, %v15651_v37  ;;  %v6945_v20 = vsel %vm6885_vm5, %v6944_v50, %v6943_v11  ;;  %v7008_v21 = vperm.slane %v6802_v45, %v14154_v34  ;;  %v14307_v42 = vpop.xlane.xlu2 %6616 }
 0x64e   : > { %v6277_v27 = vsub.f32 1.0, %v5946_v22  ;;  %v6539_v4 = vmul.f32 %v13687_v41, %v6471_v10  ;;  %v6391_v55 = vadd.f32 %v6327_v19, %v5721_v57  ;;  %v6741_v35 = vsel %vm1344_vm2, %v6555_v18, 0.0 }
 0x64f   : > { %v5485_v1 = vsub.f32 1.0, %v5484_v2  ;;  %v14274_v43 = vsel %vm6889_vm11, %v7008_v21, %v14171_v63  ;;  %vm5489_vm10 = vweird.f32 %v13486_v38  ;;  %v5492_v52 = vand.u32 2147483647, %v13437_v8  ;;  %v14299_v62 = vpop.xlane.xlu1 %6667 }
 0x650   : > { %v6342_v36 = vmul.f32 %v12292_v14, %v6277_v27  ;;  %v6693_v11 = vsel %vm1344_vm2, %v6539_v4, 0.0  ;;  %v6455_v51 = vmul.f32 %v6391_v55, %v15652_v49  ;;  %v5494_v31 = vand.u32 2147483648, %v13437_v8  ;;  %v15662_v49 = vld [vmem:[#allocation64_spill] sm:$0xff] }
 0x651   : > { %v5486_v0 = vmul.f32 %v13486_v38, %v5485_v1  ;;  %6694 = vadd.xlane.f32.xlu1 %v6693_v11  ;;  %vm5488_vm5 = vweird.f32 %v13437_v8  ;;  %vm14283_vm12 = vcmp.eq.f32.partialorder %v5492_v52, 8.507059e+37  ;;  %v6770_v63 = vadd.f32 %v13985_v48, %v6614_v29  ;;  %v15661_v11 = vld [vmem:[#allocation59_spill] sm:$0xff] }
 0x652   : > { %v6406_v33 = vadd.f32 %v6342_v36, %v5946_v22  ;;  %v6523_v47 = vmul.f32 %v13687_v41, %v6455_v51  ;;  %v6554_v15 = vmul.f32 %v13687_v41, %v15655_v56  ;;  %v14293_v54 = vadd.s32 4294967272, %v14000_v46  ;;  %vm5490_vm13 = vmor %vm5488_vm5, %vm5489_vm10 }
 0x653   : > { %v5487_v58 = vadd.f32 %v13486_v38, %v5486_v0  ;;  %v5495_v8 = vor.u32 1.1754944e-38, %v5494_v31  ;;  %v6946_v57 = vperm.slane %v6770_v63, %v14154_v34  ;;  %vm6893_vm14 = vcmask 261312   ;;  %v14312_v34 = vld [vmem:[%s14745_s7] ss:$0 sm:$0xff]  ;;  %v15663_v0 = vld [vmem:[#allocation75_spill] sm:$0xff] }
 0x654   : > { %v6470_v3 = vmul.f32 %v6406_v33, %v15656_v28  ;;  %v6645_v44 = vsel %vm1344_vm2, %v6523_v47, 0.0  ;;  %v6787_v29 = vadd.f32 %v13985_v48, %v6665_v9  ;;  %v6755_v12 = vadd.f32 %v13985_v48, %v6569_v16  ;;  %v15658_v9 = vld [vmem:[#allocation49_spill] sm:$0xff] }
 0x655   : > { %v5491_v41 = vsel %vm5490_vm13, %v13486_v38, %v5487_v58  ;;  %6646 = vadd.xlane.f32.xlu0 %v6645_v44  ;;  %v14318_v7 = vsel %vm6889_vm11, %v6946_v57, %v6945_v20  ;;  %v15657_v38 = vld [vmem:[#allocation78_spill] sm:$0xff]  ;;  %v6738_v18 = vsel %vm1344_vm2, %v6554_v15, 0.0  ;;  %vm5729_vm11 = vweird.f32 %v15658_v9  ;;  %v14365_v15 = vpop.xlane.xlu0 %6619  ;;  %v14372_v44 = vpop.xlane.xlu2 %6571 }
 0x656   : > { %v6538_v25 = vmul.f32 %v14312_v34, %v6470_v3  ;;  %v5496_v50 = vsel %vm14283_vm12, %v5495_v8, %v5491_v41  ;;  %v5724_v45 = vmul.f32 %v15658_v9, %v15657_v38  ;;  %v6979_v2 = vperm.slane %v6787_v29, %v14293_v54 }
 0x657   : > { %v6247_v16 = vsub.f32 1.0, %v5496_v50  ;;  %v6892_v13 = vperm.slane %v6755_v12, %v14293_v54  ;;  %vm5728_vm15 = vweird.f32 %v15657_v38  ;;  %v5732_v22 = vand.u32 2147483647, %v15657_v38  ;;  %v14363_v56 = vpop.xlane.xlu1 %6715 }
 0x658   : > { %v6690_v10 = vsel %vm1344_vm2, %v6538_v25, 0.0  ;;  %v5725_v19 = vsub.f32 1.0, %v5724_v45  ;;  %v14331_v27 = vsel %vm6893_vm14, %v6979_v2, %v14188_v32  ;;  %v5734_v21 = vand.u32 2147483648, %v15657_v38  ;;  %vm5730_vm4 = vmor %vm5728_vm15, %vm5729_vm11 }
 0x659   : > { %6691 = vadd.xlane.f32.xlu2 %v6690_v10  ;;  %v6312_v37 = vmul.f32 %v12292_v14, %v6247_v16  ;;  %v14334_v20 = vsel %vm6893_vm14, %v6892_v13, %v6890_v23  ;;  %6742 = vadd.xlane.f32.xlu1 %v6741_v35  ;;  %vm14339_vm0 = vcmp.eq.f32.partialorder %v5732_v22, 8.507059e+37  ;;  %v5964_v1 = vmul.f32 %v13588_v17, %v13546_v61 }
 0x65a   : > { %v5726_v4 = vmul.f32 %v15658_v9, %v5725_v19  ;;  %v5735_v32 = vor.u32 1.1754944e-38, %v5734_v21  ;;  %vm5968_vm1 = vweird.f32 %v13546_v61  ;;  %v5972_v23 = vand.u32 2147483647, %v13546_v61 }
 0x65b   : > { %v6376_v36 = vadd.f32 %v6312_v37, %v5496_v50  ;;  %v5965_v35 = vsub.f32 1.0, %v5964_v1  ;;  %vm5969_vm3 = vweird.f32 %v13588_v17  ;;  %v5469_v51 = vmul.f32 %v15662_v49, %v15661_v11 }
 0x65c   : > { %v5727_v52 = vadd.f32 %v15658_v9, %v5726_v4  ;;  %vm14354_vm6 = vcmp.eq.f32.partialorder %v5972_v23, 8.507059e+37  ;;  %v5974_v39 = vand.u32 2147483648, %v13546_v61  ;;  %vm5473_vm7 = vweird.f32 %v15661_v11  ;;  %vm5970_vm9 = vmor %vm5968_vm1, %vm5969_vm3 }
 0x65d   : > { %v6440_v31 = vmul.f32 %v6376_v36, %v15663_v0  ;;  %v5966_v47 = vmul.f32 %v13588_v17, %v5965_v35  ;;  %v5470_v58 = vsub.f32 1.0, %v5469_v51  ;;  %vm5474_vm8 = vweird.f32 %v15662_v49  ;;  %v14419_v35 = vpop.xlane.xlu0 %6574 }
 0x65e   : > { %v5731_v63 = vsel %vm5730_vm4, %v15658_v9, %v5727_v52  ;;  %v5477_v8 = vand.u32 2147483647, %v15661_v11  ;;  %v5479_v57 = vand.u32 2147483648, %v15661_v11  ;;  %v14377_v25 = vadd.s32 4294967264, %v14000_v46  ;;  %vm5475_vm5 = vmor %vm5473_vm7, %vm5474_vm8 }
 0x65f   : > { %v6508_v28 = vmul.f32 %v14312_v34, %v6440_v31  ;;  %v5736_v3 = vsel %vm14339_vm0, %v5735_v32, %v5731_v63  ;;  %v5967_v29 = vadd.f32 %v13588_v17, %v5966_v47  ;;  %v5471_v12 = vmul.f32 %v15662_v49, %v5470_v58  ;;  %v14417_v52 = vpop.xlane.xlu1 %6622  ;;  %v15669_v63 = vld [vmem:[#allocation71_spill] sm:$0xff] }
 0x660   : > { %v6263_v41 = vsub.f32 1.0, %v5736_v3  ;;  %v5975_v38 = vor.u32 1.1754944e-38, %v5974_v39  ;;  %vm14384_vm10 = vcmp.eq.f32.partialorder %v5477_v8, 8.507059e+37  ;;  %v5480_v45 = vor.u32 1.1754944e-38, %v5479_v57 }
 0x661   : > { %v6600_v50 = vsel %vm1344_vm2, %v6508_v28, 0.0  ;;  %6739 = vadd.xlane.f32.xlu2 %v6738_v18  ;;  %v5971_v2 = vsel %vm5970_vm9, %v13588_v17, %v5967_v29  ;;  %v5472_v13 = vadd.f32 %v15662_v49, %v5471_v12  ;;  %v6788_v18 = vadd.f32 %v13985_v48, %v14299_v62  ;;  %v15672_v29 = vld [vmem:[#allocation53_spill] sm:$0xff] }
 0x662   : > { %6601 = vadd.xlane.f32.xlu0 %v6600_v50  ;;  %v6328_v16 = vmul.f32 %v12292_v14, %v6263_v41  ;;  %v5976_v61 = vsel %vm14354_vm6, %v5975_v38, %v5971_v2  ;;  %vm6897_vm12 = vcmask 326912   ;;  %v6803_v10 = vadd.f32 %v13985_v48, %v14301_v6  ;;  %v15668_v6 = vld [vmem:[#allocation32_spill] sm:$0xff] }
 0x663   : > { %v6771_v17 = vadd.f32 %v13985_v48, %v14307_v42  ;;  %v6279_v22 = vsub.f32 1.0, %v5976_v61  ;;  %v5476_v37 = vsel %vm5475_vm5, %v15662_v49, %v5472_v13  ;;  %v6981_v62 = vperm.slane %v6788_v18, %v14377_v25  ;;  %v14428_v49 = vpop.xlane.xlu2 %6670 }
 0x664   : > { %v6392_v19 = vadd.f32 %v6328_v16, %v5736_v3  ;;  %v5481_v21 = vsel %vm14384_vm10, %v5480_v45, %v5476_v37  ;;  %v7010_v4 = vperm.slane %v6803_v10, %v14293_v54  ;;  %v6556_v1 = vmul.f32 %v14312_v34, %v13591_v40 }
 0x665   : > { %v6948_v55 = vperm.slane %v6771_v17, %v14293_v54  ;;  %v6344_v42 = vmul.f32 %v12292_v14, %v6279_v22  ;;  %v6246_v32 = vsub.f32 1.0, %v5481_v21  ;;  %v14415_v23 = vsel %vm6897_vm12, %v6981_v62, %v14331_v27  ;;  %v14466_v17 = vpop.xlane.xlu0 %6673 }
 0x666   : > { %v6456_v36 = vmul.f32 %v6392_v19, %v15668_v6  ;;  %v7011_v11 = vsel %vm6893_vm14, %v7010_v4, %v14274_v43  ;;  %v5739_v40 = vmul.f32 %v13611_v26, %v13575_v53  ;;  %vm5743_vm13 = vweird.f32 %v13575_v53 }
 0x667   : > { %v6949_v54 = vsel %vm6893_vm14, %v6948_v55, %v14318_v7  ;;  %v6408_v51 = vadd.f32 %v6344_v42, %v5976_v61  ;;  %v6311_v0 = vmul.f32 %v12292_v14, %v6246_v32  ;;  %vm5744_vm15 = vweird.f32 %v13611_v26  ;;  %v6578_v10 = vpop.xlane.xlu1 %6577 }
 0x668   : > { %v6524_v27 = vmul.f32 %v14312_v34, %v6456_v36  ;;  %v5740_v31 = vsub.f32 1.0, %v5739_v40  ;;  %v5747_v43 = vand.u32 2147483647, %v13575_v53  ;;  %v5749_v33 = vand.u32 2147483648, %v13575_v53  ;;  %vm5745_vm1 = vmor %vm5743_vm13, %vm5744_vm15 }
 0x669   : > { %v5499_v7 = vmul.f32 %v13606_v30, %v13570_v59  ;;  %v6472_v47 = vmul.f32 %v6408_v51, %v15669_v63  ;;  %v6375_v58 = vadd.f32 %v6311_v0, %v5481_v21  ;;  %vm5503_vm14 = vweird.f32 %v13570_v59  ;;  %v15677_v63 = vld [vmem:[#allocation74_spill] sm:$0xff] }
 0x66a   : > { %v6648_v39 = vsel %vm1344_vm2, %v6524_v27, 0.0  ;;  %v5741_v28 = vmul.f32 %v13611_v26, %v5740_v31  ;;  %vm14441_vm11 = vcmp.eq.f32.partialorder %v5747_v43, 8.507059e+37  ;;  %v5750_v8 = vor.u32 1.1754944e-38, %v5749_v33 }
 0x66b   : > { %6649 = vadd.xlane.f32.xlu1 %v6648_v39  ;;  %v5500_v57 = vsub.f32 1.0, %v5499_v7  ;;  %v6540_v41 = vmul.f32 %v14312_v34, %v6472_v47  ;;  %v6439_v12 = vmul.f32 %v6375_v58, %v15672_v29  ;;  %vm5504_vm0 = vweird.f32 %v13606_v30  ;;  %v14471_v53 = vpop.xlane.xlu2 %6718 }
 0x66c   : > { %v5507_v50 = vand.u32 2147483647, %v13570_v59  ;;  %v5742_v38 = vadd.f32 %v13611_v26, %v5741_v28  ;;  %v5509_v45 = vand.u32 2147483648, %v13570_v59  ;;  %v6804_v16 = vadd.f32 %v13985_v48, %v14363_v56  ;;  %vm5505_vm4 = vmor %vm5503_vm14, %vm5504_vm0 }
 0x66d   : > { %v5501_v9 = vmul.f32 %v13606_v30, %v5500_v57  ;;  %v6696_v2 = vsel %vm1344_vm2, %v6540_v41, 0.0  ;;  %v6507_v13 = vmul.f32 %v14312_v34, %v6439_v12  ;;  %v6772_v61 = vadd.f32 %v13985_v48, %v14365_v15  ;;  %v6722_v39 = vpop.xlane.xlu0 %6721  ;;  %v15678_v12 = vld [vmem:[#allocation30_spill] sm:$0xff] }
 0x66e   : > { %vm14460_vm3 = vcmp.eq.f32.partialorder %v5507_v50, 8.507059e+37  ;;  %6697 = vadd.xlane.f32.xlu0 %v6696_v2  ;;  %v5746_v56 = vsel %vm5745_vm1, %v13611_v26, %v5742_v38  ;;  %v5510_v22 = vor.u32 1.1754944e-38, %v5509_v45  ;;  %v7012_v37 = vperm.slane %v6804_v16, %v14377_v25 }
 0x66f   : > { %v5502_v19 = vadd.f32 %v13606_v30, %v5501_v9  ;;  %v6597_v62 = vsel %vm1344_vm2, %v6507_v13, 0.0  ;;  %v5751_v21 = vsel %vm14441_vm11, %v5750_v8, %v5746_v56  ;;  %v6950_v15 = vperm.slane %v6772_v61, %v14377_v25  ;;  %v6677_v7 = vpop.xlane.xlu1 %6676 }
 0x670   : > { %v6756_v26 = vadd.f32 %v13985_v48, %v14372_v44  ;;  %6598 = vadd.xlane.f32.xlu2 %v6597_v62  ;;  %v6264_v4 = vsub.f32 1.0, %v5751_v21  ;;  %v14485_v6 = vsel %vm6897_vm12, %v7012_v37, %v7011_v11  ;;  %v5979_v36 = vmul.f32 %v13622_v60, %v13579_v5 }
 0x671   : > { %v5506_v55 = vsel %vm5505_vm4, %v13606_v30, %v5502_v19  ;;  %v6744_v42 = vsel %vm1344_vm2, %v6556_v1, 0.0  ;;  %v6951_v32 = vsel %vm6897_vm12, %v6950_v15, %v6949_v54  ;;  %vm5983_vm6 = vweird.f32 %v13579_v5 }
 0x672   : > { %v5511_v59 = vsel %vm14460_vm3, %v5510_v22, %v5506_v55  ;;  %v6896_v40 = vperm.slane %v6756_v26, %v14377_v25  ;;  %v6329_v44 = vmul.f32 %v12292_v14, %v6264_v4  ;;  %v5980_v51 = vsub.f32 1.0, %v5979_v36 }
 0x673   : > { %v6248_v27 = vsub.f32 1.0, %v5511_v59  ;;  %vm5984_vm7 = vweird.f32 %v13622_v60  ;;  %v5987_v1 = vand.u32 2147483647, %v13579_v5  ;;  %v5989_v11 = vand.u32 2147483648, %v13579_v5  ;;  %v6626_v8 = vpop.xlane.xlu2 %6625 }
 0x674   : > { %v6898_v30 = vsel %vm6897_vm12, %v6896_v40, %v14334_v20  ;;  %v6393_v0 = vadd.f32 %v6329_v44, %v5751_v21  ;;  %v5981_v25 = vmul.f32 %v13622_v60, %v5980_v51  ;;  %v6899_v31 = vadd.s32 4294967256, %v14000_v46  ;;  %vm5985_vm10 = vmor %vm5983_vm6, %vm5984_vm7  ;;  %v15679_v40 = vld [vmem:[#allocation17_spill] sm:$0xff] }
 0x675   : > { %v6313_v54 = vmul.f32 %v12292_v14, %v6248_v27  ;;  %vm14504_vm8 = vcmp.eq.f32.partialorder %v5987_v1, 8.507059e+37  ;;  %v5990_v33 = vor.u32 1.1754944e-38, %v5989_v11  ;;  %v14510_v20 = vmul.f32 %v14312_v34, %v14262_v24  ;;  %v6629_v26 = vpop.xlane.xlu0 %6628 }
 0x676   : > { %vm6901_vm9 = vcmask 392512   ;;  %6745 = vadd.xlane.f32.xlu0 %v6744_v42  ;;  %v6457_v47 = vmul.f32 %v6393_v0, %v15677_v63  ;;  %v5982_v28 = vadd.f32 %v13622_v60, %v5981_v25  ;;  %v6773_v3 = vadd.f32 %v13985_v48, %v14417_v52 }
 0x677   : > { %v6377_v58 = vadd.f32 %v6313_v54, %v5511_v59  ;;  %v6757_v24 = vadd.f32 %v13985_v48, %v14419_v35  ;;  %v6789_v57 = vadd.f32 %v13985_v48, %v14428_v49  ;;  %v6903_v41 = vadd.s32 4294967248, %v14000_v46  ;;  %v6725_v15 = vpop.xlane.xlu1 %6724 }
 0x678   : > { %vm6905_vm5 = vcmask 458112   ;;  %v6525_v29 = vmul.f32 %v14312_v34, %v6457_v47  ;;  %v5986_v52 = vsel %vm5985_vm10, %v13622_v60, %v5982_v28  ;;  %v6952_v38 = vperm.slane %v6773_v3, %v6899_v31 }
 0x679   : > { %v6441_v50 = vmul.f32 %v6377_v58, %v15678_v12  ;;  %v5991_v5 = vsel %vm14504_vm8, %v5990_v33, %v5986_v52  ;;  %v6900_v9 = vperm.slane %v6757_v24, %v6899_v31  ;;  %v6983_v45 = vperm.slane %v6789_v57, %v6899_v31 }
 0x67a   : > { %v6758_v35 = vadd.f32 %v13985_v48, %v6578_v10  ;;  %v6651_v16 = vsel %vm1344_vm2, %v6525_v29, 0.0  ;;  %v6280_v2 = vsub.f32 1.0, %v5991_v5  ;;  %v6953_v13 = vsel %vm6901_vm9, %v6952_v38, %v6951_v32 }
 0x67b   : > { %v6509_v49 = vmul.f32 %v14312_v34, %v6441_v50  ;;  %6652 = vadd.xlane.f32.xlu2 %v6651_v16  ;;  %v6902_v18 = vsel %vm6901_vm9, %v6900_v9, %v6898_v30  ;;  %v6984_v60 = vsel %vm6901_vm9, %v6983_v45, %v14415_v23  ;;  %v6790_v56 = vadd.f32 %v13985_v48, %v14466_v17  ;;  %v6581_v36 = vpop.xlane.xlu2 %6580 }
 0x67c   : > { %v6904_v61 = vperm.slane %v6758_v35, %v6903_v41  ;;  %v6345_v10 = vmul.f32 %v12292_v14, %v6280_v2  ;;  %v6805_v22 = vadd.f32 %v13985_v48, %v14471_v53  ;;  %v6907_v37 = vadd.s32 4294967240, %v14000_v46 }
 0x67d   : > { %v6603_v19 = vsel %vm1344_vm2, %v6509_v49, 0.0  ;;  %v6985_v21 = vperm.slane %v6790_v56, %v6903_v41  ;;  %vm6909_vm12 = vcmask 523712   ;;  %v6791_v23 = vadd.f32 %v13985_v48, %v6677_v7 }
 0x67e   : > { %6604 = vadd.xlane.f32.xlu1 %v6603_v19  ;;  %v6906_v62 = vsel %vm6905_vm5, %v6904_v61, %v6902_v18  ;;  %v6409_v4 = vadd.f32 %v6345_v10, %v5991_v5  ;;  %v7014_v17 = vperm.slane %v6805_v22, %v6899_v31  ;;  %v6806_v55 = vadd.f32 %v13985_v48, %v6722_v39 }
 0x67f   : > { %v6774_v14 = vadd.f32 %v13985_v48, %v6626_v8  ;;  %v6986_v53 = vsel %vm6905_vm5, %v6985_v21, %v6984_v60  ;;  %v6987_v42 = vperm.slane %v6791_v23, %v6907_v37  ;;  %v6807_v59 = vadd.f32 %v13985_v48, %v6725_v15  ;;  %v6632_v58 = vpop.xlane.xlu1 %6631  ;;  %v6584_v28 = vpop.xlane.xlu0 %6583 }
 0x680   : > { %v6775_v32 = vadd.f32 %v13985_v48, %v6629_v26  ;;  %v6473_v44 = vmul.f32 %v6409_v4, %v15679_v40  ;;  %v7015_v27 = vsel %vm6901_vm9, %v7014_v17, %v14485_v6  ;;  %v7016_v51 = vperm.slane %v6806_v55, %v6903_v41 }
 0x681   : > { %v6954_v30 = vperm.slane %v6774_v14, %v6903_v41  ;;  %v6988_v1 = vsel %vm6909_vm12, %v6987_v42, %v6986_v53  ;;  %v7018_v11 = vperm.slane %v6807_v59, %v6907_v37  ;;  %v6759_v54 = vadd.f32 %v13985_v48, %v6581_v36 }
 0x682   : > { %v6956_v0 = vperm.slane %v6775_v32, %v6907_v37  ;;  %v6541_v25 = vmul.f32 %v14312_v34, %v6473_v44  ;;  %v7017_v31 = vsel %vm6905_vm5, %v7016_v51, %v7015_v27  ;;  %v6747_v63 = vsel %vm1344_vm2, %v14510_v20, 0.0 }
 0x683   : > { %v6955_v43 = vsel %vm6905_vm5, %v6954_v30, %v6953_v13  ;;  %v7019_v33 = vsel %vm6909_vm12, %v7018_v11, %v7017_v31  ;;  %v6908_v39 = vperm.slane %v6759_v54, %v6907_v37  ;;  %v6911_v47 = vadd.s32 4294967232, %v14000_v46 }
 0x684   : > { %v6957_v7 = vsel %vm6909_vm12, %v6956_v0, %v6955_v43  ;;  %v6699_v6 = vsel %vm1344_vm2, %v6541_v25, 0.0  ;;  %v6776_v3 = vadd.f32 %v13985_v48, %v6632_v58  ;;  %v6760_v8 = vadd.f32 %v13985_v48, %v6584_v28 }
 0x685   : > { %6700 = vadd.xlane.f32.xlu2 %v6699_v6  ;;  %v6910_v34 = vsel %vm6909_vm12, %v6908_v39, %v6906_v62  ;;  %v6680_v24 = vpop.xlane.xlu2 %6679  ;;  %vm6913_vm13 = vcmask 589312   ;;  %v14575_v38 = vadd.s32 4294967224, %v14000_v46  ;;  %vm6917_vm2 = vcmask 654912  }
 0x686   : > { %6748 = vadd.xlane.f32.xlu1 %v6747_v63  ;;  %v6792_v57 = vadd.f32 %v13985_v48, %v6680_v24  ;;  %v6958_v41 = vperm.slane %v6776_v3, %v6911_v47  ;;  %v6912_v29 = vperm.slane %v6760_v8, %v6911_v47  ;;  %v14594_v27 = vadd.s32 4294967216, %v14000_v46 }
 0x687   : > { %vm6921_vm15 = vcmask 720512   ;;  %v14603_v11 = vadd.s32 4294967208, %v14000_v46  ;;  %vm6925_vm14 = vcmask 786112   ;;  %v14612_v43 = vadd.s32 4294967200, %v14000_v46 }
 0x688   : > { %v6989_v12 = vperm.slane %v6792_v57, %v6911_v47  ;;  %v14570_v20 = vsel %vm6913_vm13, %v6958_v41, %v6957_v7  ;;  %v6914_v50 = vsel %vm6913_vm13, %v6912_v29, %v6910_v34  ;;  %vm6929_vm11 = vcmask 851712  }
 0x689   : > { %v6587_v5 = vpop.xlane.xlu1 %6586  ;;  %v14627_v8 = vadd.s32 4294967192, %v14000_v46  ;;  %vm6933_vm0 = vcmask 917312   ;;  %vm6937_vm1 = vcmask 982912   ;;  %vm6941_vm3 = vcmask 1048512  }
 0x68a   : > { %v6990_v52 = vsel %vm6913_vm13, %v6989_v12, %v6988_v1  ;;  %v6761_v9 = vadd.f32 %v13985_v48, %v6587_v5  ;;  %vm7036_vm4 = vcmask 1041409   ;;  %vm7038_vm6 = vcmask 1042434  }
 0x68b   : > { %vm7040_vm7 = vcmask 1043459  }
 0x68c   : > { %v6916_v16 = vperm.slane %v6761_v9, %v14575_v38 }
 0x68d   : > { %v6728_v45 = vpop.xlane.xlu2 %6727  ;;  %v6683_v18 = vpop.xlane.xlu0 %6682 }
 0x68e   : > { %v6808_v35 = vadd.f32 %v13985_v48, %v6728_v45  ;;  %v6918_v2 = vsel %vm6917_vm2, %v6916_v16, %v6914_v50  ;;  %v6793_v42 = vadd.f32 %v13985_v48, %v6683_v18 }
 0x690   : > { %v7020_v49 = vperm.slane %v6808_v35, %v6911_v47  ;;  %v6991_v59 = vperm.slane %v6793_v42, %v14575_v38 }
 0x692   : > { %v14582_v13 = vsel %vm6913_vm13, %v7020_v49, %v7019_v33  ;;  %v6686_v61 = vpop.xlane.xlu1 %6685  ;;  %v14607_v54 = vsel %vm6917_vm2, %v6991_v59, %v6990_v52 }
 0x693   : > { %v14597_v51 = vadd.f32 %v13985_v48, %v6686_v61 }
 0x695   : > { %v6731_v56 = vpop.xlane.xlu0 %6730  ;;  %v6993_v47 = vperm.slane %v14597_v51, %v14594_v27 }
 0x696   : > { %v14600_v30 = vadd.f32 %v13985_v48, %v6731_v56 }
 0x698   : > { %v6635_v60 = vpop.xlane.xlu2 %6634  ;;  %v7022_v34 = vperm.slane %v14600_v30, %v14575_v38 }
 0x699   : > { %v6777_v32 = vadd.f32 %v13985_v48, %v6635_v60  ;;  %v14650_v60 = vadd.s32 4294967176, %v14000_v46 }
 0x69a   : > { %v6734_v10 = vpop.xlane.xlu1 %6733 }
 0x69b   : > { %v6960_v25 = vperm.slane %v6777_v32, %v14575_v38  ;;  %v14615_v7 = vadd.f32 %v13985_v48, %v6734_v10 }
 0x69d   : > { %v6638_v22 = vpop.xlane.xlu0 %6637  ;;  %v6961_v41 = vsel %vm6917_vm2, %v6960_v25, %v14570_v20  ;;  %v7024_v52 = vperm.slane %v14615_v7, %v14594_v27  ;;  %v14644_v20 = vadd.s32 4294967184, %v14000_v46 }
 0x69e   : > { %v6778_v40 = vadd.f32 %v13985_v48, %v6638_v22 }
 0x6a0   : > { %v6962_v39 = vperm.slane %v6778_v40, %v14594_v27 }
 0x6a1   : > { %v6590_v19 = vpop.xlane.xlu2 %6589 }
 0x6a2   : > { %v6762_v44 = vadd.f32 %v13985_v48, %v6590_v19  ;;  %v6963_v38 = vsel %vm6921_vm15, %v6962_v39, %v6961_v41 }
 0x6a4   : > { %v6920_v6 = vperm.slane %v6762_v44, %v14594_v27 }
 0x6a6   : > { %v6922_v5 = vsel %vm6921_vm15, %v6920_v6, %v6918_v2 }
 0x6a8   : > { %v6641_v62 = vpop.xlane.xlu1 %6640 }
 0x6a9   : > { %v6779_v0 = vadd.f32 %v13985_v48, %v6641_v62 }
 0x6ab   : > { %v6964_v3 = vperm.slane %v6779_v0, %v14603_v11  ;;  %v7023_v0 = vsel %vm6917_vm2, %v7022_v34, %v14582_v13 }
 0x6ac   : > { %v6593_v21 = vpop.xlane.xlu0 %6592 }
 0x6ad   : > { %v6763_v31 = vadd.f32 %v13985_v48, %v6593_v21  ;;  %v6965_v16 = vsel %vm6925_vm14, %v6964_v3, %v6963_v38 }
 0x6af   : > { %v6924_v29 = vperm.slane %v6763_v31, %v14603_v11  ;;  %v7025_v31 = vsel %vm6921_vm15, %v7024_v52, %v7023_v0 }
 0x6b0   : > { %v6689_v37 = vpop.xlane.xlu2 %6688 }
 0x6b1   : > { %v6795_v12 = vadd.f32 %v13985_v48, %v6689_v37  ;;  %v6926_v2 = vsel %vm6925_vm14, %v6924_v29, %v6922_v5 }
 0x6b3   : > { %v6995_v61 = vperm.slane %v6795_v12, %v14603_v11 }
 0x6b4   : > { %v6737_v26 = vpop.xlane.xlu0 %6736 }
 0x6b5   : > { %v6811_v9 = vadd.f32 %v13985_v48, %v6737_v26 }
 0x6b7   : > { %v6596_v15 = vpop.xlane.xlu1 %6595  ;;  %v7026_v22 = vperm.slane %v6811_v9, %v14603_v11 }
 0x6b8   : > { %v6764_v58 = vadd.f32 %v13985_v48, %v6596_v15 }
 0x6b9   : > { %v7027_v39 = vsel %vm6925_vm14, %v7026_v22, %v7025_v31 }
 0x6ba   : > { %v6928_v45 = vperm.slane %v6764_v58, %v14612_v43 }
 0x6bc   : > { %v6930_v21 = vsel %vm6929_vm11, %v6928_v45, %v6926_v2 }
 0x6bd   : > { %v6644_v23 = vpop.xlane.xlu2 %6643 }
 0x6be   : > { %v6780_v28 = vadd.f32 %v13985_v48, %v6644_v23 }
 0x6c0   : > { %v6966_v35 = vperm.slane %v6780_v28, %v14612_v43 }
 0x6c2   : > { %v6967_v46 = vsel %vm6929_vm11, %v6966_v35, %v6965_v16 }
 0x6c4   : > { %v14584_v17 = vpop.xlane.xlu1 %6694 }
 0x6c5   : > { %v6797_v59 = vadd.f32 %v13985_v48, %v14584_v17 }
 0x6c8   : > { %v6647_v55 = vpop.xlane.xlu0 %6646 }
 0x6c9   : > { %v6781_v24 = vadd.f32 %v13985_v48, %v6647_v55 }
 0x6cb   : > { %v6968_v49 = vperm.slane %v6781_v24, %v14627_v8 }
 0x6cc   : > { %v6692_v4 = vpop.xlane.xlu2 %6691  ;;  %v14586_v36 = vpop.xlane.xlu1 %6742 }
 0x6cd   : > { %v6796_v37 = vadd.f32 %v13985_v48, %v6692_v4  ;;  %v6969_v26 = vsel %vm6933_vm0, %v6968_v49, %v6967_v46  ;;  %v6813_v32 = vadd.f32 %v13985_v48, %v14586_v36  ;;  %v6994_v36 = vsel %vm6921_vm15, %v6993_v47, %v14607_v54 }
 0x6cf   : > { %v6997_v44 = vperm.slane %v6796_v37, %v14612_v43  ;;  %v7030_v54 = vperm.slane %v6813_v32, %v14627_v8 }
 0x6d4   : > { %v6740_v14 = vpop.xlane.xlu2 %6739 }
 0x6d5   : > { %v6602_v53 = vpop.xlane.xlu0 %6601  ;;  %v6812_v23 = vadd.f32 %v13985_v48, %v6740_v14 }
 0x6d6   : > { %v6766_v56 = vadd.f32 %v13985_v48, %v6602_v53 }
 0x6d7   : > { %v7028_v30 = vperm.slane %v6812_v23, %v14612_v43  ;;  %v6996_v43 = vsel %vm6925_vm14, %v6995_v61, %v6994_v36 }
 0x6d8   : > { %v6936_v14 = vperm.slane %v6766_v56, %v14644_v20  ;;  %v6998_v6 = vsel %vm6929_vm11, %v6997_v44, %v6996_v43 }
 0x6d9   : > { %v7029_v13 = vsel %vm6929_vm11, %v7028_v30, %v7027_v39 }
 0x6de   : > { %v6650_v33 = vpop.xlane.xlu1 %6649 }
 0x6df   : > { %v6782_v50 = vadd.f32 %v13985_v48, %v6650_v33  ;;  %v6999_v33 = vperm.slane %v6797_v59, %v14627_v8 }
 0x6e1   : > { %v6698_v63 = vpop.xlane.xlu0 %6697  ;;  %v6970_v19 = vperm.slane %v6782_v50, %v14644_v20  ;;  %v7000_v24 = vsel %vm6933_vm0, %v6999_v33, %v6998_v6 }
 0x6e3   : > { %v6599_v1 = vpop.xlane.xlu2 %6598  ;;  %v6971_v40 = vsel %vm6937_vm1, %v6970_v19, %v6969_v26 }
 0x6e4   : > { %v6765_v57 = vadd.f32 %v13985_v48, %v6599_v1  ;;  %v6798_v1 = vadd.f32 %v13985_v48, %v6698_v63 }
 0x6e6   : > { %v6932_v18 = vperm.slane %v6765_v57, %v14627_v8  ;;  %v7001_v63 = vperm.slane %v6798_v1, %v14644_v20  ;;  %v7031_v8 = vsel %vm6933_vm0, %v7030_v54, %v7029_v13 }
 0x6e8   : > { %v6934_v55 = vsel %vm6933_vm0, %v6932_v18, %v6930_v21  ;;  %v7002_v29 = vsel %vm6937_vm1, %v7001_v63, %v7000_v24 }
 0x6e9   : > { %v6746_v53 = vpop.xlane.xlu0 %6745  ;;  %v6938_v11 = vsel %vm6937_vm1, %v6936_v14, %v6934_v55 }
 0x6ea   : > { %v6814_v17 = vadd.f32 %v13985_v48, %v6746_v53 }
 0x6ec   : > { %v7032_v47 = vperm.slane %v6814_v17, %v14644_v20 }
 0x6ee   : > { %v6653_v10 = vpop.xlane.xlu2 %6652  ;;  %v7033_v12 = vsel %vm6937_vm1, %v7032_v47, %v7031_v8 }
 0x6ef   : > { %v6783_v62 = vadd.f32 %v13985_v48, %v6653_v10 }
 0x6f1   : > { %v6605_v15 = vpop.xlane.xlu1 %6604  ;;  %v6972_v42 = vperm.slane %v6783_v62, %v14650_v60 }
 0x6f2   : > { %v6767_v4 = vadd.f32 %v13985_v48, %v6605_v15 }
 0x6f3   : > { %v6973_v27 = vsel %vm6941_vm3, %v6972_v42, %v6971_v40 }
 0x6f4   : > { %v6940_v51 = vperm.slane %v6767_v4, %v14650_v60 }
 0x6f6   : > { %v6942_v25 = vsel %vm6941_vm3, %v6940_v51, %v6938_v11 }
 0x6f7   : > { %v7037_v7 = vsel %vm7036_vm4, %v6973_v27, %v6942_v25 }
 0x6f8   : > { %v6701_v34 = vpop.xlane.xlu2 %6700 }
 0x6f9   : > { %v6749_v58 = vpop.xlane.xlu1 %6748  ;;  %v6799_v28 = vadd.f32 %v13985_v48, %v6701_v34 }
 0x6fa   : > { %v6815_v3 = vadd.f32 %v13985_v48, %v6749_v58 }
 0x6fb   : > { %v7003_v57 = vperm.slane %v6799_v28, %v14650_v60 }
 0x6fc   : > { %v7034_v41 = vperm.slane %v6815_v3, %v14650_v60 }
 0x6fd   : > { %v7004_v48 = vsel %vm6941_vm3, %v7003_v57, %v7002_v29 }
 0x6fe   : > { %v7035_v50 = vsel %vm6941_vm3, %v7034_v41, %v7033_v12  ;;  %v7039_v52 = vsel %vm7038_vm6, %v7004_v48, %v7037_v7 }
 0x6ff   : > { %v7041_v38 = vsel %vm7040_vm7, %v7035_v50, %v7039_v52 }
 0x700   : > { %7043 = vst [vmem:[%s621_s28] sm:$0xf] %v7041_v38 }
 0x701   : > { %8061 = shalt.err (!%p8058_p5)
}
 0x702   : > { %7404 = dma.vmem_to_hbm [thread:$0]  (%p8197_p6), %s7058_s29, 64, %s7060_s30, %s7045_s11  }
 0x703 PF: > { %s7071_s10 = sand.u32 1, %s8084_s15   ;;  %p7407_p7 = pnand %p7127_p9, %p8201_p8 }
 0x704   : > { %s7072_s24 = scalar_lea.sflag [#allocation7], %s7071_s10 }
 0x705   : > { %p7408_p10 = pneg %p7407_p7 }
 0x707   : > { %8079 = dma.done.wait (%p7408_p10), %s7072_s24, 64  }
 0x708   : > { %8081 = vsyncadd (%p7408_p10), %s7072_s24, 4294967232  ;;  %p22_p11 = scmp.ge.s32.totalorder %s8182_s8, 4   ;;  %s15680_s15 = smov %s8088_s16 }
 0x709   : > { %s15681_s16 = smov %s8092_s17  ;;  %s15682_s17 = smov %s8195_s21 }
 0x70a   : > { %s15683_s18 = smov %s8182_s8  ;;  %24 = sbr.rel (!%p22_p11) target bundleno = 7 (0x7), region = 134 }
 0x70f   :  { %7078 = vsyncpa [#allocation7], 1 }
 0x710   :  { %7080 = vsyncpa [#allocation7 + $0x1], 1 }

</bundles_post_ra>
